<compile_context>
chip_gen: v7x
topology: tpu7x:2x2x1
jax: 0.10.0
libtpu: 0.0.40
codegen_flags: <defaults>
</compile_context>

<pallas_src>
import jax
import jax.numpy as jnp
from jax.experimental import pallas as pl
from jax.experimental.pallas import tpu as pltpu

NUM_VERTICES_COARSE = 431
NUM_VERTICES_MID = 1723
NUM_VERTICES_FINE = 6890
HIDDEN = 64          # model_dim[1]
IN_CH = 3
EPS = 1e-5

TILE_COLS_MID = 256    # 1723 -> pad 1792, 7 blocks
TILE_COLS_FINE = 512   # 6890 -> pad 7168, 14 blocks


# ----------------------------------------------------------------------------
# Kernel 1: GraphResBlock (per batch element)
# ----------------------------------------------------------------------------
def _graph_res_block_kernel(
    x_ref, a_ref,
    g_pre_ref, b_pre_ref,          # pre-norm affine   (1, 3)
    w1_ref, b1_ref,                # lin1: 3 -> H
    g1_ref, bt1_ref,               # norm1 affine      (1, H)
    wg_ref, bg_ref,                # graph conv weight H -> H
    g2_ref, bt2_ref,               # norm2 affine      (1, H)
    w2_ref, b2_ref,                # lin2: H -> 3
    o_ref,
):
    x = x_ref[0]                                                # (V, 3) f32

    # pre_norm: GroupNorm(1, 3) over channels and vertices jointly, + ReLU
    # single-pass statistics: var = E[x^2] - E[x]^2
    mu = jnp.mean(x)
    var = jnp.mean(x * x) - mu * mu
    y = (x - mu) * jax.lax.rsqrt(var + EPS)
    y = y * g_pre_ref[...] + b_pre_ref[...]
    y = jnp.maximum(y, 0.0)

    # lin1 (per-vertex linear): (V,3) @ (3,H)
    y = jnp.dot(y, w1_ref[...], preferred_element_type=jnp.float32) + b1_ref[...]

    # norm1: per-channel GroupNorm over vertices, + ReLU (single-pass stats)
    mu1 = jnp.mean(y, axis=0, keepdims=True)
    var1 = jnp.mean(y * y, axis=0, keepdims=True) - mu1 * mu1
    y = (y - mu1) * jax.lax.rsqrt(var1 + EPS) * g1_ref[...] + bt1_ref[...]
    y = jnp.maximum(y, 0.0)

    # GraphConvolution: A @ Y @ Wg + bg
    y = jnp.dot(a_ref[...], y, preferred_element_type=jnp.float32)   # (V,H)
    y = jnp.dot(y, wg_ref[...], preferred_element_type=jnp.float32) + bg_ref[...]

    # norm2 + ReLU (single-pass stats)
    mu2 = jnp.mean(y, axis=0, keepdims=True)
    var2 = jnp.mean(y * y, axis=0, keepdims=True) - mu2 * mu2
    y = (y - mu2) * jax.lax.rsqrt(var2 + EPS) * g2_ref[...] + bt2_ref[...]
    y = jnp.maximum(y, 0.0)

    # lin2: (V,H) @ (H,3)
    y = jnp.dot(y, w2_ref[...], preferred_element_type=jnp.float32) + b2_ref[...]

    # identity residual (in_channels == out_channels == 3)
    o_ref[0] = x + y


def graph_res_block(x, adjacency, params):
    B, V, C = x.shape
    H = params["w1"].shape[1]

    def full2d(shape):
        return pl.BlockSpec(shape, lambda b: (0, 0))

    param_order = [
        ("g_pre", (1, C)), ("b_pre", (1, C)),
        ("w1", (C, H)), ("b1", (1, H)),
        ("g1", (1, H)), ("bt1", (1, H)),
        ("wg", (H, H)), ("bg", (1, H)),
        ("g2", (1, H)), ("bt2", (1, H)),
        ("w2", (H, C)), ("b2", (1, C)),
    ]

    in_specs = [
        pl.BlockSpec((1, V, C), lambda b: (b, 0, 0)),   # x per batch element
        pl.BlockSpec((V, V), lambda b: (0, 0)),         # adjacency (shared, resident)
    ] + [full2d(shape) for _, shape in param_order]

    args = [x, adjacency] + [params[name] for name, _ in param_order]

    return pl.pallas_call(
        _graph_res_block_kernel,
        out_shape=jax.ShapeDtypeStruct((B, V, C), jnp.float32),
        grid=(B,),
        in_specs=in_specs,
        out_specs=pl.BlockSpec((1, V, C), lambda b: (b, 0, 0)),
        compiler_params=pltpu.CompilerParams(dimension_semantics=("parallel",)),
    )(*args)


# ----------------------------------------------------------------------------
# Kernel 2: mesh upsampling, batch-folded + transposed (lane-dense output)
#
#   outT[:, j*T:(j+1)*T] = xT @ UT[:, j*T:(j+1)*T]
#   xT  : (B*C, Vin)        f32 (resident across all grid steps)
#   UT  : (Vin, Vout_pad)   bf16, column-tiled  ->  read from HBM exactly once
#   outT: (B*C, Vout_pad)   f32, vertex dim on lanes -> unmasked stores
# ----------------------------------------------------------------------------
def _upsample_t_kernel(x_ref, u_ref, o_ref):
    x = x_ref[...].astype(jnp.bfloat16)
    o_ref[...] = jnp.dot(x, u_ref[...], preferred_element_type=jnp.float32)


def prepare_upsample_operator(U, tile_cols):
    """(Vout, Vin) f32 -> transposed, zero-padded, bf16 operator (Vin, Vout_pad).

    Call once outside the jitted forward so the transpose/pad/cast is not
    re-executed (and U is not re-streamed) per call.
    """
    vout, vin = U.shape
    vout_pad = tile_cols * (-(-vout // tile_cols))
    UT = jnp.transpose(U)
    UT = jnp.pad(UT, ((0, 0), (0, vout_pad - vout)))
    return UT.astype(jnp.bfloat16)


def mesh_upsample_t(UT_pad, x, vout, tile_cols):
    """x: (B, Vin, C) f32, UT_pad: (Vin, Vout_pad) bf16 -> (B, vout, C) f32."""
    B, Vin, C = x.shape
    Vout_pad = UT_pad.shape[1]
    n_blocks = Vout_pad // tile_cols

    # fold batch & channels into the matmul M dimension: (B*C, Vin)
    xT = jnp.transpose(x, (0, 2, 1)).reshape(B * C, Vin)

    outT = pl.pallas_call(
        _upsample_t_kernel,
        out_shape=jax.ShapeDtypeStruct((B * C, Vout_pad), jnp.float32),
        grid=(n_blocks,),
        in_specs=[
            pl.BlockSpec((B * C, Vin), lambda j: (0, 0)),      # xT, resident
            pl.BlockSpec((Vin, tile_cols), lambda j: (0, j)),  # UT column tile
        ],
        out_specs=pl.BlockSpec((B * C, tile_cols), lambda j: (0, j)),
        compiler_params=pltpu.CompilerParams(dimension_semantics=("parallel",)),
    )(xT, UT_pad)

    out = outT[:, :vout].reshape(B, C, vout)
    return jnp.transpose(out, (0, 2, 1))


# ----------------------------------------------------------------------------
# Full regressor forward
# ----------------------------------------------------------------------------
@jax.jit
def gcn_mesh_regressor(vertices_coord, adjacency, UT_mid_pad, UT_fused_pad, params):
    pred_coarse = graph_res_block(vertices_coord, adjacency, params)
    pred_mid = mesh_upsample_t(UT_mid_pad, pred_coarse,
                               NUM_VERTICES_MID, TILE_COLS_MID)
    # pred_fine = U_fine @ (U_mid @ pred_coarse) == (U_fine @ U_mid) @ pred_coarse
    pred_fine = mesh_upsample_t(UT_fused_pad, pred_coarse,
                                NUM_VERTICES_FINE, TILE_COLS_FINE)
    return pred_coarse, pred_mid, pred_fine


# ----------------------------------------------------------------------------
# Deterministic synthetic parameters / matrices
# ----------------------------------------------------------------------------
def init_params(key, hidden=HIDDEN, in_ch=IN_CH):
    ks = jax.random.split(key, 4)
    scale = 0.1
    return {
        "g_pre": jnp.ones((1, in_ch), jnp.float32),
        "b_pre": jnp.zeros((1, in_ch), jnp.float32),
        "w1": scale * jax.random.normal(ks[0], (in_ch, hidden), jnp.float32),
        "b1": jnp.zeros((1, hidden), jnp.float32),
        "g1": jnp.ones((1, hidden), jnp.float32),
        "bt1": jnp.zeros((1, hidden), jnp.float32),
        "wg": scale * jax.random.normal(ks[1], (hidden, hidden), jnp.float32),
        "bg": jnp.zeros((1, hidden), jnp.float32),
        "g2": jnp.ones((1, hidden), jnp.float32),
        "bt2": jnp.zeros((1, hidden), jnp.float32),
        "w2": scale * jax.random.normal(ks[2], (hidden, in_ch), jnp.float32),
        "b2": jnp.zeros((1, in_ch), jnp.float32),
    }


def make_row_stochastic(key, rows, cols):
    m = jax.random.uniform(key, (rows, cols), jnp.float32)
    return m / jnp.sum(m, axis=1, keepdims=True)


if __name__ == "__main__":
    B = 2
    key = jax.random.PRNGKey(0)
    k_x, k_p, k_adj, k_u1, k_u0 = jax.random.split(key, 5)

    vertices_coord = jax.random.normal(
        k_x, (B, NUM_VERTICES_COARSE, IN_CH), jnp.float32)
    params = init_params(k_p)
    # synthetic (row-normalized) adjacency / upsample operators in place of the
    # .pt tensors and the mesh_sampler's sparse upsampling matrices
    adjacency = make_row_stochastic(k_adj, NUM_VERTICES_COARSE, NUM_VERTICES_COARSE)
    U_mid = make_row_stochastic(k_u1, NUM_VERTICES_MID, NUM_VERTICES_COARSE)
    U_fine = make_row_stochastic(k_u0, NUM_VERTICES_FINE, NUM_VERTICES_MID)

    # One-time operator preparation (outside the jitted forward):
    #   fuse the two upsample stages and store transposed / padded / bf16.
    U_fused = jnp.dot(U_fine, U_mid)                     # (6890, 431)
    UT_mid_pad = prepare_upsample_operator(U_mid, TILE_COLS_MID)
    UT_fused_pad = prepare_upsample_operator(U_fused, TILE_COLS_FINE)
    jax.block_until_ready((UT_mid_pad, UT_fused_pad))

    coarse, mid, fine = gcn_mesh_regressor(
        vertices_coord, adjacency, UT_mid_pad, UT_fused_pad, params)
    jax.block_until_ready((coarse, mid, fine))

    assert coarse.shape == (B, NUM_VERTICES_COARSE, 3)
    assert mid.shape == (B, NUM_VERTICES_MID, 3)
    assert fine.shape == (B, NUM_VERTICES_FINE, 3)
    assert jnp.all(jnp.isfinite(coarse))
    assert jnp.all(jnp.isfinite(mid))
    assert jnp.all(jnp.isfinite(fine))
    print("KERNEL_OK")
</pallas_src>

<mosaic_0001>
module attributes {stable_mosaic.version = 11 : i64} {
  func.func @_graph_res_block_kernel(%arg0: i32, %arg1: memref<1x431x3xf32, #tpu.memory_space<vmem>>, %arg2: memref<431x431xf32, #tpu.memory_space<vmem>>, %arg3: memref<1x3xf32, #tpu.memory_space<vmem>>, %arg4: memref<1x3xf32, #tpu.memory_space<vmem>>, %arg5: memref<3x64xf32, #tpu.memory_space<vmem>>, %arg6: memref<1x64xf32, #tpu.memory_space<vmem>>, %arg7: memref<1x64xf32, #tpu.memory_space<vmem>>, %arg8: memref<1x64xf32, #tpu.memory_space<vmem>>, %arg9: memref<64x64xf32, #tpu.memory_space<vmem>>, %arg10: memref<1x64xf32, #tpu.memory_space<vmem>>, %arg11: memref<1x64xf32, #tpu.memory_space<vmem>>, %arg12: memref<1x64xf32, #tpu.memory_space<vmem>>, %arg13: memref<64x3xf32, #tpu.memory_space<vmem>>, %arg14: memref<1x3xf32, #tpu.memory_space<vmem>>, %arg15: memref<1x431x3xf32, #tpu.memory_space<vmem>>) attributes {dimension_semantics = [#tpu.dimension_semantics<parallel>], iteration_bounds = array<i64: 2>, scalar_prefetch = 0 : i64, scratch_operands = 0 : i64, tpu.core_type = #tpu.core_type<tc>, window_params = [{transform_indices = @transform_0, window_bounds = array<i64: 1, 431, 3>}, {pipeline_mode = #tpu.pipeline_mode<synchronous>, transform_indices = @transform_1, window_bounds = array<i64: 431, 431>}, {pipeline_mode = #tpu.pipeline_mode<synchronous>, transform_indices = @transform_2, window_bounds = array<i64: 1, 3>}, {pipeline_mode = #tpu.pipeline_mode<synchronous>, transform_indices = @transform_3, window_bounds = array<i64: 1, 3>}, {pipeline_mode = #tpu.pipeline_mode<synchronous>, transform_indices = @transform_4, window_bounds = array<i64: 3, 64>}, {pipeline_mode = #tpu.pipeline_mode<synchronous>, transform_indices = @transform_5, window_bounds = array<i64: 1, 64>}, {pipeline_mode = #tpu.pipeline_mode<synchronous>, transform_indices = @transform_6, window_bounds = array<i64: 1, 64>}, {pipeline_mode = #tpu.pipeline_mode<synchronous>, transform_indices = @transform_7, window_bounds = array<i64: 1, 64>}, {pipeline_mode = #tpu.pipeline_mode<synchronous>, transform_indices = @transform_8, window_bounds = array<i64: 64, 64>}, {pipeline_mode = #tpu.pipeline_mode<synchronous>, transform_indices = @transform_9, window_bounds = array<i64: 1, 64>}, {pipeline_mode = #tpu.pipeline_mode<synchronous>, transform_indices = @transform_10, window_bounds = array<i64: 1, 64>}, {pipeline_mode = #tpu.pipeline_mode<synchronous>, transform_indices = @transform_11, window_bounds = array<i64: 1, 64>}, {pipeline_mode = #tpu.pipeline_mode<synchronous>, transform_indices = @transform_12, window_bounds = array<i64: 64, 3>}, {pipeline_mode = #tpu.pipeline_mode<synchronous>, transform_indices = @transform_13, window_bounds = array<i64: 1, 3>}, {transform_indices = @transform_14, window_bounds = array<i64: 1, 431, 3>}]} {
    %c0 = arith.constant 0 : index
    %c0_0 = arith.constant 0 : index
    %c0_1 = arith.constant 0 : index
    %0 = vector.load %arg1[%c0, %c0_0, %c0_1] : memref<1x431x3xf32, #tpu.memory_space<vmem>>, vector<1x431x3xf32>
    %1 = vector.shape_cast %0 : vector<1x431x3xf32> to vector<431x3xf32>
    %2 = vector.shape_cast %1 : vector<431x3xf32> to vector<1x431x3xf32>
    %cst = arith.constant dense<0.000000e+00> : vector<1xf32>
    %3 = vector.multi_reduction <add>, %2, %cst [1, 2] : vector<1x431x3xf32> to vector<1xf32>
    %4 = vector.shape_cast %3 : vector<1xf32> to vector<1x1x1xf32>
    %5 = vector.extract %4[0, 0, 0] : f32 from vector<1x1x1xf32>
    %cst_2 = arith.constant 1.293000e+03 : f32
    %6 = arith.divf %5, %cst_2 : f32
    %7 = arith.mulf %1, %1 : vector<431x3xf32>
    %8 = vector.shape_cast %7 : vector<431x3xf32> to vector<1x431x3xf32>
    %cst_3 = arith.constant dense<0.000000e+00> : vector<1xf32>
    %9 = vector.multi_reduction <add>, %8, %cst_3 [1, 2] : vector<1x431x3xf32> to vector<1xf32>
    %10 = vector.shape_cast %9 : vector<1xf32> to vector<1x1x1xf32>
    %11 = vector.extract %10[0, 0, 0] : f32 from vector<1x1x1xf32>
    %cst_4 = arith.constant 1.293000e+03 : f32
    %12 = arith.divf %11, %cst_4 : f32
    %13 = arith.mulf %6, %6 : f32
    %14 = arith.subf %12, %13 : f32
    %15 = vector.broadcast %6 : f32 to vector<431x3xf32>
    %16 = arith.subf %1, %15 : vector<431x3xf32>
    %cst_5 = arith.constant 9.99999974E-6 : f32
    %17 = arith.addf %14, %cst_5 : f32
    %18 = math.rsqrt %17 : f32
    %19 = vector.broadcast %18 : f32 to vector<431x3xf32>
    %20 = arith.mulf %16, %19 : vector<431x3xf32>
    %c0_6 = arith.constant 0 : index
    %c0_7 = arith.constant 0 : index
    %21 = vector.load %arg3[%c0_6, %c0_7] : memref<1x3xf32, #tpu.memory_space<vmem>>, vector<1x3xf32>
    %22 = vector.broadcast %21 : vector<1x3xf32> to vector<431x3xf32>
    %23 = arith.mulf %20, %22 : vector<431x3xf32>
    %c0_8 = arith.constant 0 : index
    %c0_9 = arith.constant 0 : index
    %24 = vector.load %arg4[%c0_8, %c0_9] : memref<1x3xf32, #tpu.memory_space<vmem>>, vector<1x3xf32>
    %25 = vector.broadcast %24 : vector<1x3xf32> to vector<431x3xf32>
    %26 = arith.addf %23, %25 : vector<431x3xf32>
    %cst_10 = arith.constant 0.000000e+00 : f32
    %27 = vector.broadcast %cst_10 : f32 to vector<431x3xf32>
    %28 = arith.maximumf %26, %27 : vector<431x3xf32>
    %c0_11 = arith.constant 0 : index
    %c0_12 = arith.constant 0 : index
    %29 = vector.load %arg5[%c0_11, %c0_12] : memref<3x64xf32, #tpu.memory_space<vmem>>, vector<3x64xf32>
    %cst_13 = arith.constant dense<0.000000e+00> : vector<431x64xf32>
    %30 = tpu.matmul %28, %29, %cst_13 {dimension_numbers = #tpu.dot_dimension_numbers<[1], [0], [0], [1], [0, 0, 1, 1], [], []>} : vector<431x3xf32>, vector<3x64xf32>, vector<431x64xf32> -> vector<431x64xf32>
    %c0_14 = arith.constant 0 : index
    %c0_15 = arith.constant 0 : index
    %31 = vector.load %arg6[%c0_14, %c0_15] : memref<1x64xf32, #tpu.memory_space<vmem>>, vector<1x64xf32>
    %32 = vector.broadcast %31 : vector<1x64xf32> to vector<431x64xf32>
    %33 = arith.addf %30, %32 : vector<431x64xf32>
    %cst_16 = arith.constant dense<0.000000e+00> : vector<64xf32>
    %34 = vector.multi_reduction <add>, %33, %cst_16 [0] : vector<431x64xf32> to vector<64xf32>
    %35 = vector.shape_cast %34 : vector<64xf32> to vector<1x64xf32>
    %cst_17 = arith.constant 4.310000e+02 : f32
    %36 = vector.broadcast %cst_17 : f32 to vector<1x64xf32>
    %37 = arith.divf %35, %36 : vector<1x64xf32>
    %38 = arith.mulf %33, %33 : vector<431x64xf32>
    %cst_18 = arith.constant dense<0.000000e+00> : vector<64xf32>
    %39 = vector.multi_reduction <add>, %38, %cst_18 [0] : vector<431x64xf32> to vector<64xf32>
    %40 = vector.shape_cast %39 : vector<64xf32> to vector<1x64xf32>
    %cst_19 = arith.constant 4.310000e+02 : f32
    %41 = vector.broadcast %cst_19 : f32 to vector<1x64xf32>
    %42 = arith.divf %40, %41 : vector<1x64xf32>
    %43 = arith.mulf %37, %37 : vector<1x64xf32>
    %44 = arith.subf %42, %43 : vector<1x64xf32>
    %45 = vector.broadcast %37 : vector<1x64xf32> to vector<431x64xf32>
    %46 = arith.subf %33, %45 : vector<431x64xf32>
    %cst_20 = arith.constant 9.99999974E-6 : f32
    %47 = vector.broadcast %cst_20 : f32 to vector<1x64xf32>
    %48 = arith.addf %44, %47 : vector<1x64xf32>
    %49 = math.rsqrt %48 : vector<1x64xf32>
    %50 = vector.broadcast %49 : vector<1x64xf32> to vector<431x64xf32>
    %51 = arith.mulf %46, %50 : vector<431x64xf32>
    %c0_21 = arith.constant 0 : index
    %c0_22 = arith.constant 0 : index
    %52 = vector.load %arg7[%c0_21, %c0_22] : memref<1x64xf32, #tpu.memory_space<vmem>>, vector<1x64xf32>
    %53 = vector.broadcast %52 : vector<1x64xf32> to vector<431x64xf32>
    %54 = arith.mulf %51, %53 : vector<431x64xf32>
    %c0_23 = arith.constant 0 : index
    %c0_24 = arith.constant 0 : index
    %55 = vector.load %arg8[%c0_23, %c0_24] : memref<1x64xf32, #tpu.memory_space<vmem>>, vector<1x64xf32>
    %56 = vector.broadcast %55 : vector<1x64xf32> to vector<431x64xf32>
    %57 = arith.addf %54, %56 : vector<431x64xf32>
    %cst_25 = arith.constant 0.000000e+00 : f32
    %58 = vector.broadcast %cst_25 : f32 to vector<431x64xf32>
    %59 = arith.maximumf %57, %58 : vector<431x64xf32>
    %c0_26 = arith.constant 0 : index
    %c0_27 = arith.constant 0 : index
    %60 = vector.load %arg2[%c0_26, %c0_27] : memref<431x431xf32, #tpu.memory_space<vmem>>, vector<431x431xf32>
    %cst_28 = arith.constant dense<0.000000e+00> : vector<431x64xf32>
    %61 = tpu.matmul %60, %59, %cst_28 {dimension_numbers = #tpu.dot_dimension_numbers<[1], [0], [0], [1], [0, 0, 1, 1], [], []>} : vector<431x431xf32>, vector<431x64xf32>, vector<431x64xf32> -> vector<431x64xf32>
    %c0_29 = arith.constant 0 : index
    %c0_30 = arith.constant 0 : index
    %62 = vector.load %arg9[%c0_29, %c0_30] : memref<64x64xf32, #tpu.memory_space<vmem>>, vector<64x64xf32>
    %cst_31 = arith.constant dense<0.000000e+00> : vector<431x64xf32>
    %63 = tpu.matmul %61, %62, %cst_31 {dimension_numbers = #tpu.dot_dimension_numbers<[1], [0], [0], [1], [0, 0, 1, 1], [], []>} : vector<431x64xf32>, vector<64x64xf32>, vector<431x64xf32> -> vector<431x64xf32>
    %c0_32 = arith.constant 0 : index
    %c0_33 = arith.constant 0 : index
    %64 = vector.load %arg10[%c0_32, %c0_33] : memref<1x64xf32, #tpu.memory_space<vmem>>, vector<1x64xf32>
    %65 = vector.broadcast %64 : vector<1x64xf32> to vector<431x64xf32>
    %66 = arith.addf %63, %65 : vector<431x64xf32>
    %cst_34 = arith.constant dense<0.000000e+00> : vector<64xf32>
    %67 = vector.multi_reduction <add>, %66, %cst_34 [0] : vector<431x64xf32> to vector<64xf32>
    %68 = vector.shape_cast %67 : vector<64xf32> to vector<1x64xf32>
    %cst_35 = arith.constant 4.310000e+02 : f32
    %69 = vector.broadcast %cst_35 : f32 to vector<1x64xf32>
    %70 = arith.divf %68, %69 : vector<1x64xf32>
    %71 = arith.mulf %66, %66 : vector<431x64xf32>
    %cst_36 = arith.constant dense<0.000000e+00> : vector<64xf32>
    %72 = vector.multi_reduction <add>, %71, %cst_36 [0] : vector<431x64xf32> to vector<64xf32>
    %73 = vector.shape_cast %72 : vector<64xf32> to vector<1x64xf32>
    %cst_37 = arith.constant 4.310000e+02 : f32
    %74 = vector.broadcast %cst_37 : f32 to vector<1x64xf32>
    %75 = arith.divf %73, %74 : vector<1x64xf32>
    %76 = arith.mulf %70, %70 : vector<1x64xf32>
    %77 = arith.subf %75, %76 : vector<1x64xf32>
    %78 = vector.broadcast %70 : vector<1x64xf32> to vector<431x64xf32>
    %79 = arith.subf %66, %78 : vector<431x64xf32>
    %cst_38 = arith.constant 9.99999974E-6 : f32
    %80 = vector.broadcast %cst_38 : f32 to vector<1x64xf32>
    %81 = arith.addf %77, %80 : vector<1x64xf32>
    %82 = math.rsqrt %81 : vector<1x64xf32>
    %83 = vector.broadcast %82 : vector<1x64xf32> to vector<431x64xf32>
    %84 = arith.mulf %79, %83 : vector<431x64xf32>
    %c0_39 = arith.constant 0 : index
    %c0_40 = arith.constant 0 : index
    %85 = vector.load %arg11[%c0_39, %c0_40] : memref<1x64xf32, #tpu.memory_space<vmem>>, vector<1x64xf32>
    %86 = vector.broadcast %85 : vector<1x64xf32> to vector<431x64xf32>
    %87 = arith.mulf %84, %86 : vector<431x64xf32>
    %c0_41 = arith.constant 0 : index
    %c0_42 = arith.constant 0 : index
    %88 = vector.load %arg12[%c0_41, %c0_42] : memref<1x64xf32, #tpu.memory_space<vmem>>, vector<1x64xf32>
    %89 = vector.broadcast %88 : vector<1x64xf32> to vector<431x64xf32>
    %90 = arith.addf %87, %89 : vector<431x64xf32>
    %cst_43 = arith.constant 0.000000e+00 : f32
    %91 = vector.broadcast %cst_43 : f32 to vector<431x64xf32>
    %92 = arith.maximumf %90, %91 : vector<431x64xf32>
    %c0_44 = arith.constant 0 : index
    %c0_45 = arith.constant 0 : index
    %93 = vector.load %arg13[%c0_44, %c0_45] : memref<64x3xf32, #tpu.memory_space<vmem>>, vector<64x3xf32>
    %cst_46 = arith.constant dense<0.000000e+00> : vector<431x3xf32>
    %94 = tpu.matmul %92, %93, %cst_46 {dimension_numbers = #tpu.dot_dimension_numbers<[1], [0], [0], [1], [0, 0, 1, 1], [], []>} : vector<431x64xf32>, vector<64x3xf32>, vector<431x3xf32> -> vector<431x3xf32>
    %c0_47 = arith.constant 0 : index
    %c0_48 = arith.constant 0 : index
    %95 = vector.load %arg14[%c0_47, %c0_48] : memref<1x3xf32, #tpu.memory_space<vmem>>, vector<1x3xf32>
    %96 = vector.broadcast %95 : vector<1x3xf32> to vector<431x3xf32>
    %97 = arith.addf %94, %96 : vector<431x3xf32>
    %98 = arith.addf %1, %97 : vector<431x3xf32>
    %c0_49 = arith.constant 0 : index
    %c0_50 = arith.constant 0 : index
    %c0_51 = arith.constant 0 : index
    %99 = vector.load %arg15[%c0_49, %c0_50, %c0_51] : memref<1x431x3xf32, #tpu.memory_space<vmem>>, vector<1x431x3xf32>
    %100 = vector.shape_cast %99 : vector<1x431x3xf32> to vector<431x3xf32>
    %101 = vector.shape_cast %98 : vector<431x3xf32> to vector<1x431x3xf32>
    tpu.vector_store %arg15[%c0_49, %c0_50, %c0_51], %101 {strides = array<i32>} : memref<1x431x3xf32, #tpu.memory_space<vmem>>, vector<1x431x3xf32>,
    return
  }
  func.func @transform_0(%arg0: i32) -> (i32, i32, i32) {
    %c0_i32 = arith.constant 0 : i32
    %c0_i32_0 = arith.constant 0 : i32
    %c0_i32_1 = arith.constant 0 : i32
    return %arg0, %c0_i32, %c0_i32_0 : i32, i32, i32
  }
  func.func @transform_1(%arg0: i32) -> (i32, i32) {
    %c0_i32 = arith.constant 0 : i32
    %c0_i32_0 = arith.constant 0 : i32
    %c0_i32_1 = arith.constant 0 : i32
    return %c0_i32, %c0_i32_0 : i32, i32
  }
  func.func @transform_2(%arg0: i32) -> (i32, i32) {
    %c0_i32 = arith.constant 0 : i32
    %c0_i32_0 = arith.constant 0 : i32
    %c0_i32_1 = arith.constant 0 : i32
    return %c0_i32, %c0_i32_0 : i32, i32
  }
  func.func @transform_3(%arg0: i32) -> (i32, i32) {
    %c0_i32 = arith.constant 0 : i32
    %c0_i32_0 = arith.constant 0 : i32
    %c0_i32_1 = arith.constant 0 : i32
    return %c0_i32, %c0_i32_0 : i32, i32
  }
  func.func @transform_4(%arg0: i32) -> (i32, i32) {
    %c0_i32 = arith.constant 0 : i32
    %c0_i32_0 = arith.constant 0 : i32
    %c0_i32_1 = arith.constant 0 : i32
    return %c0_i32, %c0_i32_0 : i32, i32
  }
  func.func @transform_5(%arg0: i32) -> (i32, i32) {
    %c0_i32 = arith.constant 0 : i32
    %c0_i32_0 = arith.constant 0 : i32
    %c0_i32_1 = arith.constant 0 : i32
    return %c0_i32, %c0_i32_0 : i32, i32
  }
  func.func @transform_6(%arg0: i32) -> (i32, i32) {
    %c0_i32 = arith.constant 0 : i32
    %c0_i32_0 = arith.constant 0 : i32
    %c0_i32_1 = arith.constant 0 : i32
    return %c0_i32, %c0_i32_0 : i32, i32
  }
  func.func @transform_7(%arg0: i32) -> (i32, i32) {
    %c0_i32 = arith.constant 0 : i32
    %c0_i32_0 = arith.constant 0 : i32
    %c0_i32_1 = arith.constant 0 : i32
    return %c0_i32, %c0_i32_0 : i32, i32
  }
  func.func @transform_8(%arg0: i32) -> (i32, i32) {
    %c0_i32 = arith.constant 0 : i32
    %c0_i32_0 = arith.constant 0 : i32
    %c0_i32_1 = arith.constant 0 : i32
    return %c0_i32, %c0_i32_0 : i32, i32
  }
  func.func @transform_9(%arg0: i32) -> (i32, i32) {
    %c0_i32 = arith.constant 0 : i32
    %c0_i32_0 = arith.constant 0 : i32
    %c0_i32_1 = arith.constant 0 : i32
    return %c0_i32, %c0_i32_0 : i32, i32
  }
  func.func @transform_10(%arg0: i32) -> (i32, i32) {
    %c0_i32 = arith.constant 0 : i32
    %c0_i32_0 = arith.constant 0 : i32
    %c0_i32_1 = arith.constant 0 : i32
    return %c0_i32, %c0_i32_0 : i32, i32
  }
  func.func @transform_11(%arg0: i32) -> (i32, i32) {
    %c0_i32 = arith.constant 0 : i32
    %c0_i32_0 = arith.constant 0 : i32
    %c0_i32_1 = arith.constant 0 : i32
    return %c0_i32, %c0_i32_0 : i32, i32
  }
  func.func @transform_12(%arg0: i32) -> (i32, i32) {
    %c0_i32 = arith.constant 0 : i32
    %c0_i32_0 = arith.constant 0 : i32
    %c0_i32_1 = arith.constant 0 : i32
    return %c0_i32, %c0_i32_0 : i32, i32
  }
  func.func @transform_13(%arg0: i32) -> (i32, i32) {
    %c0_i32 = arith.constant 0 : i32
    %c0_i32_0 = arith.constant 0 : i32
    %c0_i32_1 = arith.constant 0 : i32
    return %c0_i32, %c0_i32_0 : i32, i32
  }
  func.func @transform_14(%arg0: i32) -> (i32, i32, i32) {
    %c0_i32 = arith.constant 0 : i32
    %c0_i32_0 = arith.constant 0 : i32
    %c0_i32_1 = arith.constant 0 : i32
    return %arg0, %c0_i32, %c0_i32_0 : i32, i32, i32
  }
}

module attributes {stable_mosaic.version = 11 : i64} {
  func.func @_upsample_t_kernel(%arg0: i32, %arg1: memref<6x431xf32, #tpu.memory_space<vmem>>, %arg2: memref<431x256xbf16, #tpu.memory_space<vmem>>, %arg3: memref<6x256xf32, #tpu.memory_space<vmem>>) attributes {dimension_semantics = [#tpu.dimension_semantics<parallel>], iteration_bounds = array<i64: 7>, scalar_prefetch = 0 : i64, scratch_operands = 0 : i64, tpu.core_type = #tpu.core_type<tc>, window_params = [{pipeline_mode = #tpu.pipeline_mode<synchronous>, transform_indices = @transform_0, window_bounds = array<i64: 6, 431>}, {transform_indices = @transform_1, window_bounds = array<i64: 431, 256>}, {transform_indices = @transform_2, window_bounds = array<i64: 6, 256>}]} {
    %c0 = arith.constant 0 : index
    %c0_0 = arith.constant 0 : index
    %0 = vector.load %arg1[%c0, %c0_0] : memref<6x431xf32, #tpu.memory_space<vmem>>, vector<6x431xf32>
    %1 = arith.truncf %0 : vector<6x431xf32> to vector<6x431xbf16>
    %c0_1 = arith.constant 0 : index
    %c0_2 = arith.constant 0 : index
    %2 = vector.load %arg2[%c0_1, %c0_2] : memref<431x256xbf16, #tpu.memory_space<vmem>>, vector<431x256xbf16>
    %cst = arith.constant dense<0.000000e+00> : vector<6x256xf32>
    %3 = tpu.matmul %1, %2, %cst {dimension_numbers = #tpu.dot_dimension_numbers<[1], [0], [0], [1], [0, 0, 1, 1], [], []>} : vector<6x431xbf16>, vector<431x256xbf16>, vector<6x256xf32> -> vector<6x256xf32>
    %c0_3 = arith.constant 0 : index
    %c0_4 = arith.constant 0 : index
    %4 = vector.load %arg3[%c0_3, %c0_4] : memref<6x256xf32, #tpu.memory_space<vmem>>, vector<6x256xf32>
    tpu.vector_store %arg3[%c0_3, %c0_4], %3 {strides = array<i32>} : memref<6x256xf32, #tpu.memory_space<vmem>>, vector<6x256xf32>,
    return
  }
  func.func @transform_0(%arg0: i32) -> (i32, i32) {
    %c0_i32 = arith.constant 0 : i32
    %c0_i32_0 = arith.constant 0 : i32
    %c0_i32_1 = arith.constant 0 : i32
    return %c0_i32, %c0_i32_0 : i32, i32
  }
  func.func @transform_1(%arg0: i32) -> (i32, i32) {
    %c0_i32 = arith.constant 0 : i32
    %c0_i32_0 = arith.constant 0 : i32
    return %c0_i32, %arg0 : i32, i32
  }
  func.func @transform_2(%arg0: i32) -> (i32, i32) {
    %c0_i32 = arith.constant 0 : i32
    %c0_i32_0 = arith.constant 0 : i32
    return %c0_i32, %arg0 : i32, i32
  }
}

module attributes {stable_mosaic.version = 11 : i64} {
  func.func @_upsample_t_kernel(%arg0: i32, %arg1: memref<6x431xf32, #tpu.memory_space<vmem>>, %arg2: memref<431x512xbf16, #tpu.memory_space<vmem>>, %arg3: memref<6x512xf32, #tpu.memory_space<vmem>>) attributes {dimension_semantics = [#tpu.dimension_semantics<parallel>], iteration_bounds = array<i64: 14>, scalar_prefetch = 0 : i64, scratch_operands = 0 : i64, tpu.core_type = #tpu.core_type<tc>, window_params = [{pipeline_mode = #tpu.pipeline_mode<synchronous>, transform_indices = @transform_0, window_bounds = array<i64: 6, 431>}, {transform_indices = @transform_1, window_bounds = array<i64: 431, 512>}, {transform_indices = @transform_2, window_bounds = array<i64: 6, 512>}]} {
    %c0 = arith.constant 0 : index
    %c0_0 = arith.constant 0 : index
    %0 = vector.load %arg1[%c0, %c0_0] : memref<6x431xf32, #tpu.memory_space<vmem>>, vector<6x431xf32>
    %1 = arith.truncf %0 : vector<6x431xf32> to vector<6x431xbf16>
    %c0_1 = arith.constant 0 : index
    %c0_2 = arith.constant 0 : index
    %2 = vector.load %arg2[%c0_1, %c0_2] : memref<431x512xbf16, #tpu.memory_space<vmem>>, vector<431x512xbf16>
    %cst = arith.constant dense<0.000000e+00> : vector<6x512xf32>
    %3 = tpu.matmul %1, %2, %cst {dimension_numbers = #tpu.dot_dimension_numbers<[1], [0], [0], [1], [0, 0, 1, 1], [], []>} : vector<6x431xbf16>, vector<431x512xbf16>, vector<6x512xf32> -> vector<6x512xf32>
    %c0_3 = arith.constant 0 : index
    %c0_4 = arith.constant 0 : index
    %4 = vector.load %arg3[%c0_3, %c0_4] : memref<6x512xf32, #tpu.memory_space<vmem>>, vector<6x512xf32>
    tpu.vector_store %arg3[%c0_3, %c0_4], %3 {strides = array<i32>} : memref<6x512xf32, #tpu.memory_space<vmem>>, vector<6x512xf32>,
    return
  }
  func.func @transform_0(%arg0: i32) -> (i32, i32) {
    %c0_i32 = arith.constant 0 : i32
    %c0_i32_0 = arith.constant 0 : i32
    %c0_i32_1 = arith.constant 0 : i32
    return %c0_i32, %c0_i32_0 : i32, i32
  }
  func.func @transform_1(%arg0: i32) -> (i32, i32) {
    %c0_i32 = arith.constant 0 : i32
    %c0_i32_0 = arith.constant 0 : i32
    return %c0_i32, %arg0 : i32, i32
  }
  func.func @transform_2(%arg0: i32) -> (i32, i32) {
    %c0_i32 = arith.constant 0 : i32
    %c0_i32_0 = arith.constant 0 : i32
    return %c0_i32, %arg0 : i32, i32
  }
}

</mosaic_0001>

<bundles_post_ra>
// kernel: gcn_mesh_regressor.4
= control target key start
LH: loop header
LB: loop body
LE: loop exit
PB: predicated region body
PF: predicated region fallthrough
CT: control target
= control target key end

     0   :  { %7 = vsyncpa [#allocation3], 0  ;;  %s1116_s0 = inlined_call_operand.vmem [shape: f32[6,431], index: 0, kind: input, shape index: {}]   ;;  %s1117_s1 = inlined_call_operand.hbm [shape: bf16[431,1792], index: 1, kind: input, shape index: {}]   ;;  %s1118_s2 = inlined_call_operand.vmem [shape: f32[6,1792], index: 2, kind: output, shape index: {}]  }
   0x1   :  { %9 = vsyncpa [#allocation3 + $0x1], 0  ;;  %s943_s9 = smov 0   ;;  %s945_s10 = smov 0  }
   0x2   :  { %s947_s11 = smov 0   ;;  %s949_s12 = smov 0  }
   0x3 LB: > { %s662_s13 = sadd.s32 4294967295, %s921_s12   ;;  %s963_s14 = sadd.s32 1, %s921_s12   ;;  %s921_s12 = sphi %s949_s12, %s1124_s12   ;;  %s917_s11 = sphi %s947_s11, %s1123_s11   ;;  %s913_s10 = sphi %s945_s10, %s1122_s10   ;;  %s909_s9 = sphi %s943_s9, %s1121_s9  }
   0x4   : > { %s40_s15 = ssub.s32 %s921_s12, %s963_s14  ;;  %s43_s16 = sadd.s32 1, %s917_s11 }
   0x5   : > { %p41_p0 = scmp.eq.s32.totalorder %s40_s15, 0  ;;  %p50_p1 = scmp.ne.s32.totalorder %s917_s11, %s913_s10 }
   0x6   : > { %p51_p2 = scmp.eq.s32.totalorder %s921_s12, 0  ;;  %p56_p3 = scmp.ne.s32.totalorder %s913_s10, %s909_s9 }
   0x7   : > { %s973_s17 = scalar_select %p41_p0, %s917_s11, %s43_s16  }
   0x8   : > { %p52_p4 = por %p51_p2, %p50_p1  ;;  %p57_p5 = scmp.eq.s32.totalorder %s662_s13, 0 }
   0x9   : > { %p739_p6 = scmp.lt.s32.totalorder %s921_s12, 7  ;;  %s109_s19 = sand.u32 1, %s917_s11  }
   0xa   : > { %p978_p7 = por %p57_p5, %p56_p3  ;;  %s731_s20 = smul.u32 432, %s109_s19 }
   0xb   : > { %s728_s21 = sshll.u32 %s921_s12, 7  ;;  %p984_p8 = pnand %p739_p6, %p52_p4 }
   0xc   : > { %s991_s25 = scalar_lea.hbm %s1117_s1, %s728_s21  ;;  %s113_s26 = scalar_lea.vmem [#allocation2], %s731_s20 }
   0xd   : > { %s120_s27 = sshll.u32 %s113_s26, 4  ;;  %s995_s28 = scalar_lea.sflag [#allocation3], %s109_s19  ;;  %s993_s27 = int_to_ptr.vmem [resolvable:$true] %s120_s27 }
   0xe   : > { %s857_s29 = scalar_lea.hbm %s991_s25, 6912  ;;  %p859_p10 = pneg %p984_p8 }
   0xf   : > { %p858_p9 = scmp.ne.s32.totalorder %s991_s25, %s857_s29  ;;  %s862_s4 = scalar_lea.hbm %s1117_s1, 48384 }
  0x10   : > { %p863_p13 = scmp.lt.u32.totalorder %s991_s25, %s1117_s1  ;;  %p864_p0 = scmp.lt.u32.totalorder %s862_s4, %s857_s29 }
  0x11   : > { %p860_p11 = pnand %p859_p10, %p858_p9  ;;  %p866_p2 = scmp.lt.u32.totalorder %s857_s29, %s991_s25 }
  0x12   : > { %p865_p1 = por %p864_p0, %p863_p13 }
  0x13   : > { %p861_p12 = pneg %p860_p11 }
  0x14   : > { %p867_p3 = por %p866_p2, %p865_p1 }
  0x16   : > { %p868_p4 = pnand %p867_p3, %p861_p12 }
  0x18   : > { %871 = shalt.err (!%p868_p4)
}
  0x19   : > { %s872_s7 = scalar_lea.vmem %s993_s27, 6912  ;;  %s923_s8 = smov [#allocation2]  }
  0x1a   : > { %p873_p5 = scmp.ne.s32.totalorder %s993_s27, %s872_s7  ;;  %s877_s9 = sshll.u32 %s923_s8, 4  ;;  %s878_s9 = int_to_ptr.vmem [resolvable:$false] %s877_s9 }
  0x1b   : > { %s879_s15 = scalar_lea.vmem %s878_s9, 13824  ;;  %p880_p11 = scmp.lt.s32.totalorder %s993_s27, %s878_s9 }
  0x1c   : > { %p875_p6 = pnand %p873_p5, %p859_p10  ;;  %p881_p13 = scmp.lt.s32.totalorder %s879_s15, %s872_s7 }
  0x1e   : > { %p876_p9 = pneg %p875_p6  ;;  %p882_p0 = por %p881_p13, %p880_p11 }
  0x20   : > { %p883_p1 = pnand %p882_p0, %p876_p9 }
  0x22   : > { %886 = shalt.err (!%p883_p1)
}
  0x23   : > { %s924_s16 = smov 896   ;;  %s925_s19 = smov 128  }
  0x24   : > { %s926_s20 = smov 8   ;;  %p668_p10 = scmp.ge.s32.totalorder %s921_s12, 1 }
  0x25   : > { %738 = dma.hbm_to_vmem [thread:$0]  (!%p984_p8), %s991_s25, 6912, %s993_s27, %s995_s28, %s924_s16, %s925_s19, %s926_s20  }
  0x26   : > { %p128_p12 = scmp.lt.s32.totalorder %s921_s12, 8 }
  0x28   : > { %p129_p2 = pnand %p668_p10, %p128_p12 }
  0x29   : > { %s134_s21 = sand.u32 (!%p129_p2), 1, %s913_s10  }
  0x2a   : > { %132 = sbr.rel (%p129_p2) target bundleno = 331 (0x14b), region = 28  ;;  %s135_s24 = scalar_lea.sflag (!%p129_p2), [#allocation3], %s134_s21 }
  0x2b   : > { %s732_s23 = smul.u32 (!%p129_p2), 432, %s134_s21 }
  0x2d   : > { %s1026_s26 = scalar_lea.vmem (!%p129_p2), [#allocation2], %s732_s23 }
  0x31   : > { %904 = dma.done.wait (%p978_p7), %s135_s24, 6912  }
  0x32   : > { %906 = vsyncadd (%p978_p7), %s135_s24, 4294960384  ;;  %v776_v0 = vld [vmem:[%s1026_s26 + $0x4] ss:$8 sps:$4 sm:$0xff]   ;;  %v778_v1 = vld [vmem:[%s1026_s26] ss:$8 sps:$4 sm:$0xff]   ;;  %vm501_vm0 = vcmask 1046528  }
  0x33   : > { %511 = vmatprep.subr.bf16.mxu1 %v776_v0  ;;  %v779_v2 = vld [vmem:[%s1026_s26 + $0x14] ss:$8 sps:$4 sm:$0xff]   ;;  %v781_v3 = vld [vmem:[%s1026_s26 + $0x10] ss:$8 sps:$4 sm:$0xff]   ;;  %v782_v4 = vld [vmem:[%s1026_s26 + $0x24] ss:$8 sps:$4 sm:$0xff]  }
  0x34   : > { %512 = vmatpush1.bf16.msra.mxu1 %v778_v1  ;;  %v784_v5 = vld [vmem:[%s1026_s26 + $0x20] ss:$8 sps:$4 sm:$0xff]   ;;  %v791_v6 = vld [vmem:[%s1026_s26 + $0x104] ss:$8 sps:$4 sm:$0xff]   ;;  %v785_v8 = vld [vmem:[%s1026_s26 + $0x34] ss:$8 sps:$4 sm:$0xff]  }
  0x35   : > { %513 = vmatprep.subr.bf16.mxu1 %v779_v2  ;;  %v793_v7 = vld [vmem:[%s1026_s26 + $0x100] ss:$8 sps:$4 sm:$0xff]   ;;  %552 = vmatprep.subr.bf16.mxu0 %v791_v6  ;;  %v797_v9 = vld [vmem:[%s1026_s26 + $0x114] ss:$8 sps:$4 sm:$0xff]   ;;  %v799_v10 = vld [vmem:[%s1026_s26 + $0x110] ss:$8 sps:$4 sm:$0xff]  }
  0x36   : > { %553 = vmatpush1.bf16.msra.mxu0 %v793_v7  ;;  %v787_v11 = vld [vmem:[%s1026_s26 + $0x30] ss:$8 sps:$4 sm:$0xff]   ;;  %v788_v12 = vld [vmem:[%s1026_s26 + $0x44] ss:$8 sps:$4 sm:$0xff]   ;;  %v805_v14 = vld [vmem:[%s1026_s26 + $0x120] ss:$8 sps:$4 sm:$0xff]  }
  0x37   : > { %554 = vmatprep.subr.bf16.mxu0 %v797_v9  ;;  %v803_v13 = vld [vmem:[%s1026_s26 + $0x124] ss:$8 sps:$4 sm:$0xff]   ;;  %v790_v15 = vld [vmem:[%s1026_s26 + $0x40] ss:$8 sps:$4 sm:$0xff]   ;;  %v809_v16 = vld [vmem:[%s1026_s26 + $0x134] ss:$8 sps:$4 sm:$0xff]  }
  0x38   : > { %514 = vmatpush1.bf16.msra.mxu1 %v781_v3  ;;  %v794_v17 = vld [vmem:[%s1026_s26 + $0x54] ss:$8 sps:$4 sm:$0xff]   ;;  %v811_v18 = vld [vmem:[%s1026_s26 + $0x130] ss:$8 sps:$4 sm:$0xff]   ;;  %v815_v20 = vld [vmem:[%s1026_s26 + $0x144] ss:$8 sps:$4 sm:$0xff]  }
  0x39   : > { %515 = vmatprep.subr.bf16.mxu1 %v782_v4  ;;  %v796_v19 = vld [vmem:[%s1026_s26 + $0x50] ss:$8 sps:$4 sm:$0xff]   ;;  %v800_v21 = vld [vmem:[%s1026_s26 + $0x64] ss:$8 sps:$4 sm:$0xff]   ;;  %v817_v22 = vld [vmem:[%s1026_s26 + $0x140] ss:$8 sps:$4 sm:$0xff]  }
  0x3a   : > { %555 = vmatpush1.bf16.msra.mxu0 %v799_v10  ;;  %v802_v23 = vld [vmem:[%s1026_s26 + $0x60] ss:$8 sps:$4 sm:$0xff]   ;;  %v821_v24 = vld [vmem:[%s1026_s26 + $0x154] ss:$8 sps:$4 sm:$0xff]   ;;  %v823_v26 = vld [vmem:[%s1026_s26 + $0x150] ss:$8 sps:$4 sm:$0xff]  }
  0x3b   : > { %556 = vmatprep.subr.bf16.mxu0 %v803_v13  ;;  %v806_v25 = vld [vmem:[%s1026_s26 + $0x74] ss:$8 sps:$4 sm:$0xff]   ;;  %v808_v27 = vld [vmem:[%s1026_s26 + $0x70] ss:$8 sps:$4 sm:$0xff]   ;;  %v827_v28 = vld [vmem:[%s1026_s26 + $0x164] ss:$8 sps:$4 sm:$0xff]  }
  0x3c   : > { %516 = vmatpush1.bf16.msra.mxu1 %v784_v5  ;;  %v812_v29 = vld [vmem:[%s1026_s26 + $0x84] ss:$8 sps:$4 sm:$0xff]   ;;  %v829_v30 = vld [vmem:[%s1026_s26 + $0x160] ss:$8 sps:$4 sm:$0xff]   ;;  %v833_v32 = vld [vmem:[%s1026_s26 + $0x174] ss:$8 sps:$4 sm:$0xff]  }
  0x3d   : > { %517 = vmatprep.subr.bf16.mxu1 %v785_v8  ;;  %v814_v31 = vld [vmem:[%s1026_s26 + $0x80] ss:$8 sps:$4 sm:$0xff]   ;;  %v818_v33 = vld [vmem:[%s1026_s26 + $0x94] ss:$8 sps:$4 sm:$0xff]   ;;  %v820_v34 = vld [vmem:[%s1026_s26 + $0x90] ss:$8 sps:$4 sm:$0xff]  }
  0x3e   : > { %557 = vmatpush1.bf16.msra.mxu0 %v805_v14  ;;  %v835_v35 = vld [vmem:[%s1026_s26 + $0x170] ss:$8 sps:$4 sm:$0xff]   ;;  %v839_v36 = vld [vmem:[%s1026_s26 + $0x184] ss:$8 sps:$4 sm:$0xff]   ;;  %vm497_vm1 = vcmask 384000   ;;  %vm502_vm2 = vcmask 1047552  }
  0x3f   : > { %558 = vmatprep.subr.bf16.mxu0 %v809_v16  ;;  %v170_v37 = vld [vmem:[%s1116_s0 + $0x18] sm:$0x3f]  ;;  %v168_v40 = vld [vmem:[%s1116_s0 + $0x8] sm:$0x3f]  ;;  %v927_v41 = vmov 65535   ;;  %s669_s4 = sshll.u32 %s662_s13, 1 }
  0x40   : > { %518 = vmatpush1.bf16.msra.mxu1 %v787_v11  ;;  %v824_v38 = vld [vmem:[%s1026_s26 + $0xa4] ss:$8 sps:$4 sm:$0xff]   ;;  %v174_v39 = vpack.c.bf16 %v170_v37, %v170_v37  ;;  %v503_v42 = vsel %vm501_vm0, 4294967295, %v927_v41  ;;  %v172_v43 = vpack.c.bf16 %v168_v40, %v168_v40  ;;  %v841_v44 = vld [vmem:[%s1026_s26 + $0x180] ss:$8 sps:$4 sm:$0xff]   ;;  %p161_p7 = scmp.lt.s32.totalorder %s669_s4, 13 }
  0x41   : > { %519 = vmatprep.subr.bf16.mxu1 %v788_v12  ;;  %v826_v45 = vld [vmem:[%s1026_s26 + $0xa0] ss:$8 sps:$4 sm:$0xff]   ;;  %v845_v46 = vld [vmem:[%s1026_s26 + $0x194] ss:$8 sps:$4 sm:$0xff]   ;;  %v851_v47 = vld [vmem:[%s1026_s26 + $0x1a4] ss:$8 sps:$4 sm:$0xff]  }
  0x42   : > { %559 = vmatpush1.bf16.msra.mxu0 %v811_v18  ;;  %725 = vmatprep.mubr.msk.bf16.mxu0 %vm497_vm1, %v174_v39  ;;  %v830_v48 = vld [vmem:[%s1026_s26 + $0xb4] ss:$8 sps:$4 sm:$0xff]   ;;  %v504_v49 = vsel %vm502_vm2, %v503_v42, 0  ;;  %v847_v50 = vld [vmem:[%s1026_s26 + $0x190] ss:$8 sps:$4 sm:$0xff]   ;;  %s1126_s4 = smov (!%p161_p7, %s669_s4), 13 }
  0x43   : > { %560 = vmatprep.subr.bf16.mxu0 %v815_v20  ;;  %543 = vmatprep.mubr.bf16.mxu1 %v172_v43  ;;  %v853_v51 = vld [vmem:[%s1026_s26 + $0x1a0] ss:$8 sps:$4 sm:$0xff]   ;;  %v832_v52 = vld [vmem:[%s1026_s26 + $0xb0] ss:$8 sps:$4 sm:$0xff]   ;;  %v509_v53 = vand.u32 %v851_v47, %v504_v49  ;;  %v836_v54 = vld [vmem:[%s1026_s26 + $0xc4] ss:$8 sps:$4 sm:$0xff]  }
  0x44   : > { %520 = vmatpush1.bf16.msra.mxu1 %v790_v15  ;;  %v506_v55 = vand.u32 %v853_v51, %v504_v49  ;;  %v169_v56 = vld [vmem:[%s1116_s0 + $0x10] sm:$0x3f]  ;;  %v167_v1 = vld [vmem:[%s1116_s0] sm:$0x3f]  ;;  %s670_s5 = sshll.u32 %s1126_s4, 3 }
  0x45   : > { %521 = vmatprep.subr.bf16.mxu1 %v794_v17  ;;  %v838_v57 = vld [vmem:[%s1026_s26 + $0xc0] ss:$8 sps:$4 sm:$0xff]   ;;  %v842_v58 = vld [vmem:[%s1026_s26 + $0xd4] ss:$8 sps:$4 sm:$0xff]   ;;  %v173_v59 = vpack.c.bf16 %v169_v56, %v169_v56  ;;  %v844_v60 = vld [vmem:[%s1026_s26 + $0xd0] ss:$8 sps:$4 sm:$0xff]   ;;  %v171_v2 = vpack.c.bf16 %v167_v1, %v167_v1  ;;  %s164_s8 = scalar_lea.vmem %s1118_s2, %s670_s5 }
  0x46   : > { %561 = vmatpush1.bf16.msra.mxu0 %v817_v22  ;;  %v848_v61 = vld [vmem:[%s1026_s26 + $0xe4] ss:$8 sps:$4 sm:$0xff]   ;;  %v850_v62 = vld [vmem:[%s1026_s26 + $0xe0] ss:$8 sps:$4 sm:$0xff]   ;;  %v854_v63 = vld [vmem:[%s1026_s26 + $0xf4] ss:$8 sps:$4 sm:$0xff]  }
  0x47   : > { %562 = vmatprep.subr.bf16.mxu0 %v821_v24  ;;  %v856_v0 = vld [vmem:[%s1026_s26 + $0xf0] ss:$8 sps:$4 sm:$0xff]  }
  0x48   : > { %522 = vmatpush1.bf16.msra.mxu1 %v796_v19 }
  0x49   : > { %523 = vmatprep.subr.bf16.mxu1 %v800_v21 }
  0x4a   : > { %563 = vmatpush1.bf16.msra.mxu0 %v823_v26 }
  0x4b   : > { %564 = vmatprep.subr.bf16.mxu0 %v827_v28 }
  0x4c   : > { %524 = vmatpush1.bf16.msra.mxu1 %v802_v23 }
  0x4d   : > { %525 = vmatprep.subr.bf16.mxu1 %v806_v25 }
  0x4e   : > { %565 = vmatpush1.bf16.msra.mxu0 %v829_v30 }
  0x4f   : > { %566 = vmatprep.subr.bf16.mxu0 %v833_v32 }
  0x50   : > { %526 = vmatpush1.bf16.msra.mxu1 %v808_v27 }
  0x51   : > { %527 = vmatprep.subr.bf16.mxu1 %v812_v29 }
  0x52   : > { %567 = vmatpush1.bf16.msra.mxu0 %v835_v35 }
  0x53   : > { %568 = vmatprep.subr.bf16.mxu0 %v839_v36 }
  0x54   : > { %528 = vmatpush1.bf16.msra.mxu1 %v814_v31 }
  0x55   : > { %529 = vmatprep.subr.bf16.mxu1 %v818_v33 }
  0x56   : > { %569 = vmatpush1.bf16.msra.mxu0 %v841_v44 }
  0x57   : > { %570 = vmatprep.subr.bf16.mxu0 %v845_v46 }
  0x58   : > { %530 = vmatpush1.bf16.msra.mxu1 %v820_v34 }
  0x59   : > { %531 = vmatprep.subr.bf16.mxu1 %v824_v38 }
  0x5a   : > { %571 = vmatpush1.bf16.msra.mxu0 %v847_v50 }
  0x5b   : > { %572 = vmatprep.subr.bf16.mxu0 %v509_v53 }
  0x5c   : > { %532 = vmatpush1.bf16.msra.mxu1 %v826_v45 }
  0x5d   : > { %533 = vmatprep.subr.bf16.mxu1 %v830_v48 }
  0x5e   : > { %573 = vmatpush1.bf16.msra.mxu0 %v506_v55 }
  0x60   : > { %534 = vmatpush1.bf16.msra.mxu1 %v832_v52 }
  0x61   : > { %535 = vmatprep.subr.bf16.mxu1 %v836_v54  ;;  %585 = vmatmul.mubr.bf16.vlgmr.msra.gmra.mrb[0].mxu0 %v173_v59 }
  0x64   : > { %536 = vmatpush1.bf16.msra.mxu1 %v838_v57 }
  0x65   : > { %537 = vmatprep.subr.bf16.mxu1 %v842_v58 }
  0x68   : > { %538 = vmatpush1.bf16.msra.mxu1 %v844_v60 }
  0x69   : > { %539 = vmatprep.subr.bf16.mxu1 %v848_v61 }
  0x6c   : > { %540 = vmatpush1.bf16.msra.mxu1 %v850_v62 }
  0x6d   : > { %541 = vmatprep.subr.bf16.mxu1 %v854_v63 }
  0x70   : > { %542 = vmatpush1.bf16.msra.mxu1 %v856_v0 }
  0x73   : > { %544 = vmatmul.mubr.bf16.vlgmr.msra.gmra.mrb[0].mxu1 %v171_v2 }
 0x134   : > { %v586_v3 = vpop.f32.mrb[0].mxu0 }
 0x135   : > { %v588_v4 = vpop.f32.mrb[1].mxu0 }
 0x136   : > { %v590_v5 = vpop.f32.mrb[2].mxu0 }
 0x137   : > { %v591_v6 = vpop.f32.mrb[3].mxu0 }
 0x146   : > { %v545_v7 = vpop.f32.mrb[0].mxu1 }
 0x147   : > { %v587_v8 = vadd.f32 %v586_v3, %v545_v7  ;;  %v547_v9 = vpop.f32.mrb[1].mxu1 }
 0x148   : > { %v589_v10 = vadd.f32 %v588_v4, %v547_v9  ;;  %v549_v11 = vpop.f32.mrb[2].mxu1 }
 0x149   : > { %593 = vst [vmem:[%s164_s8] sm:$0x3f] %v587_v8  ;;  %v550_v12 = vpop.f32.mrb[3].mxu1 }
 0x14a   : > { %594 = vst [vmem:[%s164_s8 + $0x8] sm:$0x3f] %v589_v10 }
 0x14b PF: > { %p12_p8 = scmp.ge.s32.totalorder %s963_s14, 9   ;;  %s1121_s9 = smov %s913_s10 }
 0x14c   : > { %s1122_s10 = smov %s917_s11  ;;  %s1123_s11 = smov %s973_s17 }
 0x14d   : > { %s1124_s12 = smov %s963_s14  ;;  %14 = sbr.rel (!%p12_p8) target bundleno = 3 (0x3), region = 68 }
 0x154   :  { %617 = vsyncpa [#allocation3], 1 }
 0x155   :  { %619 = vsyncpa [#allocation3 + $0x1], 1 }

// kernel: gcn_mesh_regressor.5
= control target key start
LH: loop header
LB: loop body
LE: loop exit
PB: predicated region body
PF: predicated region fallthrough
CT: control target
= control target key end

     0   :  { %7 = vsyncpa [#allocation3], 0  ;;  %s1724_s0 = inlined_call_operand.vmem [shape: f32[6,431], index: 0, kind: input, shape index: {}]   ;;  %s1725_s1 = inlined_call_operand.hbm [shape: bf16[431,7168], index: 1, kind: input, shape index: {}]   ;;  %s1726_s2 = inlined_call_operand.vmem [shape: f32[6,7168], index: 2, kind: output, shape index: {}]  }
   0x1   :  { %9 = vsyncpa [#allocation3 + $0x1], 0  ;;  %s1497_s9 = smov 0   ;;  %s1499_s10 = smov 0  }
   0x2   :  { %s1501_s11 = smov 0   ;;  %s1503_s12 = smov 0  }
   0x3 LB: > { %s1074_s13 = sadd.s32 4294967295, %s1475_s12   ;;  %s1517_s14 = sadd.s32 1, %s1475_s12   ;;  %s1475_s12 = sphi %s1503_s12, %s1732_s12   ;;  %s1471_s11 = sphi %s1501_s11, %s1731_s11   ;;  %s1467_s10 = sphi %s1499_s10, %s1730_s10   ;;  %s1463_s9 = sphi %s1497_s9, %s1729_s9  }
   0x4   : > { %s40_s15 = ssub.s32 %s1475_s12, %s1517_s14  ;;  %s43_s16 = sadd.s32 1, %s1471_s11 }
   0x5   : > { %p41_p0 = scmp.eq.s32.totalorder %s40_s15, 0  ;;  %p50_p1 = scmp.ne.s32.totalorder %s1471_s11, %s1467_s10 }
   0x6   : > { %p51_p2 = scmp.eq.s32.totalorder %s1475_s12, 0  ;;  %p56_p3 = scmp.ne.s32.totalorder %s1467_s10, %s1463_s9 }
   0x7   : > { %s1527_s17 = scalar_select %p41_p0, %s1471_s11, %s43_s16  }
   0x8   : > { %p52_p4 = por %p51_p2, %p50_p1  ;;  %p57_p5 = scmp.eq.s32.totalorder %s1074_s13, 0 }
   0x9   : > { %p1212_p6 = scmp.lt.s32.totalorder %s1475_s12, 14  ;;  %s109_s19 = sand.u32 1, %s1471_s11  }
   0xa   : > { %p1532_p7 = por %p57_p5, %p56_p3  ;;  %s1204_s20 = smul.u32 864, %s109_s19 }
   0xb   : > { %s1195_s21 = sshll.u32 %s1475_s12, 8  ;;  %p1538_p8 = pnand %p1212_p6, %p52_p4 }
   0xc   : > { %s1545_s25 = scalar_lea.hbm %s1725_s1, %s1195_s21  ;;  %s113_s26 = scalar_lea.vmem [#allocation2], %s1204_s20 }
   0xd   : > { %s120_s27 = sshll.u32 %s113_s26, 4  ;;  %s1549_s28 = scalar_lea.sflag [#allocation3], %s109_s19  ;;  %s1547_s27 = int_to_ptr.vmem [resolvable:$true] %s120_s27 }
   0xe   : > { %s1411_s29 = scalar_lea.hbm %s1545_s25, 13824  ;;  %p1413_p10 = pneg %p1538_p8 }
   0xf   : > { %p1412_p9 = scmp.ne.s32.totalorder %s1545_s25, %s1411_s29  ;;  %s1416_s4 = scalar_lea.hbm %s1725_s1, 193536 }
  0x10   : > { %p1417_p13 = scmp.lt.u32.totalorder %s1545_s25, %s1725_s1  ;;  %p1418_p0 = scmp.lt.u32.totalorder %s1416_s4, %s1411_s29 }
  0x11   : > { %p1414_p11 = pnand %p1413_p10, %p1412_p9  ;;  %p1420_p2 = scmp.lt.u32.totalorder %s1411_s29, %s1545_s25 }
  0x12   : > { %p1419_p1 = por %p1418_p0, %p1417_p13 }
  0x13   : > { %p1415_p12 = pneg %p1414_p11 }
  0x14   : > { %p1421_p3 = por %p1420_p2, %p1419_p1 }
  0x16   : > { %p1422_p4 = pnand %p1421_p3, %p1415_p12 }
  0x18   : > { %1425 = shalt.err (!%p1422_p4)
}
  0x19   : > { %s1426_s7 = scalar_lea.vmem %s1547_s27, 13824  ;;  %s1477_s8 = smov [#allocation2]  }
  0x1a   : > { %p1427_p5 = scmp.ne.s32.totalorder %s1547_s27, %s1426_s7  ;;  %s1431_s9 = sshll.u32 %s1477_s8, 4  ;;  %s1432_s9 = int_to_ptr.vmem [resolvable:$false] %s1431_s9 }
  0x1b   : > { %s1433_s15 = scalar_lea.vmem %s1432_s9, 27648  ;;  %p1434_p11 = scmp.lt.s32.totalorder %s1547_s27, %s1432_s9 }
  0x1c   : > { %p1429_p6 = pnand %p1427_p5, %p1413_p10  ;;  %p1435_p13 = scmp.lt.s32.totalorder %s1433_s15, %s1426_s7 }
  0x1e   : > { %p1430_p9 = pneg %p1429_p6  ;;  %p1436_p0 = por %p1435_p13, %p1434_p11 }
  0x20   : > { %p1437_p1 = pnand %p1436_p0, %p1430_p9 }
  0x22   : > { %1440 = shalt.err (!%p1437_p1)
}
  0x23   : > { %s1478_s16 = smov 3584   ;;  %s1479_s19 = smov 256  }
  0x24   : > { %s1480_s20 = smov 16   ;;  %p1080_p10 = scmp.ge.s32.totalorder %s1475_s12, 1 }
  0x25   : > { %1211 = dma.hbm_to_vmem [thread:$0]  (!%p1538_p8), %s1545_s25, 13824, %s1547_s27, %s1549_s28, %s1478_s16, %s1479_s19, %s1480_s20  }
  0x26   : > { %p128_p12 = scmp.lt.s32.totalorder %s1475_s12, 15 }
  0x28   : > { %p129_p2 = pnand %p1080_p10, %p128_p12 }
  0x29   : > { %s134_s21 = sand.u32 (!%p129_p2), 1, %s1467_s10  }
  0x2a   : > { %132 = sbr.rel (%p129_p2) target bundleno = 374 (0x176), region = 28  ;;  %s135_s24 = scalar_lea.sflag (!%p129_p2), [#allocation3], %s134_s21 }
  0x2b   : > { %s1205_s23 = smul.u32 (!%p129_p2), 864, %s134_s21 }
  0x2d   : > { %s1580_s26 = scalar_lea.vmem (!%p129_p2), [#allocation2], %s1205_s23 }
  0x31   : > { %1458 = dma.done.wait (%p1532_p7), %s135_s24, 13824  }
  0x32   : > { %1460 = vsyncadd (%p1532_p7), %s135_s24, 4294953472  ;;  %v1249_v0 = vld [vmem:[%s1580_s26 + $0x4] ss:$16 sps:$4 sm:$0xff]   ;;  %v1251_v1 = vld [vmem:[%s1580_s26 + $0xc] ss:$16 sps:$4 sm:$0xff]   ;;  %vm819_vm0 = vcmask 384000  }
  0x33   : > { %839 = vmatprep.subr.bf16.mxu0 %v1249_v0  ;;  %v1253_v2 = vld [vmem:[%s1580_s26] ss:$16 sps:$4 sm:$0xff]   ;;  %v1254_v3 = vld [vmem:[%s1580_s26 + $0x8] ss:$16 sps:$4 sm:$0xff]   ;;  %921 = vmatprep.subr.bf16.mxu1 %v1251_v1  ;;  %v1255_v4 = vld [vmem:[%s1580_s26 + $0x24] ss:$16 sps:$4 sm:$0xff]  }
  0x34   : > { %840 = vmatpush1.bf16.msra.mxu0 %v1253_v2  ;;  %922 = vmatpush1.bf16.msra.mxu1 %v1254_v3  ;;  %v1257_v5 = vld [vmem:[%s1580_s26 + $0x2c] ss:$16 sps:$4 sm:$0xff]   ;;  %v1259_v6 = vld [vmem:[%s1580_s26 + $0x20] ss:$16 sps:$4 sm:$0xff]   ;;  %v1260_v7 = vld [vmem:[%s1580_s26 + $0x28] ss:$16 sps:$4 sm:$0xff]  }
  0x35   : > { %841 = vmatprep.subr.bf16.mxu0 %v1255_v4  ;;  %923 = vmatprep.subr.bf16.mxu1 %v1257_v5  ;;  %v1261_v8 = vld [vmem:[%s1580_s26 + $0x44] ss:$16 sps:$4 sm:$0xff]   ;;  %v1263_v9 = vld [vmem:[%s1580_s26 + $0x4c] ss:$16 sps:$4 sm:$0xff]   ;;  %v1265_v10 = vld [vmem:[%s1580_s26 + $0x40] ss:$16 sps:$4 sm:$0xff]  }
  0x36   : > { %v1266_v11 = vld [vmem:[%s1580_s26 + $0x48] ss:$16 sps:$4 sm:$0xff]   ;;  %v1267_v12 = vld [vmem:[%s1580_s26 + $0x64] ss:$16 sps:$4 sm:$0xff]   ;;  %v1269_v13 = vld [vmem:[%s1580_s26 + $0x6c] ss:$16 sps:$4 sm:$0xff]  }
  0x37   : > { %v1271_v14 = vld [vmem:[%s1580_s26 + $0x60] ss:$16 sps:$4 sm:$0xff]   ;;  %v1272_v15 = vld [vmem:[%s1580_s26 + $0x68] ss:$16 sps:$4 sm:$0xff]   ;;  %v1273_v16 = vld [vmem:[%s1580_s26 + $0x84] ss:$16 sps:$4 sm:$0xff]  }
  0x38   : > { %842 = vmatpush1.bf16.msra.mxu0 %v1259_v6  ;;  %924 = vmatpush1.bf16.msra.mxu1 %v1260_v7  ;;  %v1275_v17 = vld [vmem:[%s1580_s26 + $0x8c] ss:$16 sps:$4 sm:$0xff]   ;;  %v1277_v18 = vld [vmem:[%s1580_s26 + $0x80] ss:$16 sps:$4 sm:$0xff]   ;;  %v1278_v19 = vld [vmem:[%s1580_s26 + $0x88] ss:$16 sps:$4 sm:$0xff]  }
  0x39   : > { %843 = vmatprep.subr.bf16.mxu0 %v1261_v8  ;;  %925 = vmatprep.subr.bf16.mxu1 %v1263_v9  ;;  %v1279_v20 = vld [vmem:[%s1580_s26 + $0xa4] ss:$16 sps:$4 sm:$0xff]   ;;  %v1281_v21 = vld [vmem:[%s1580_s26 + $0xac] ss:$16 sps:$4 sm:$0xff]   ;;  %v1283_v22 = vld [vmem:[%s1580_s26 + $0xa0] ss:$16 sps:$4 sm:$0xff]  }
  0x3a   : > { %v1284_v23 = vld [vmem:[%s1580_s26 + $0xa8] ss:$16 sps:$4 sm:$0xff]   ;;  %v1285_v24 = vld [vmem:[%s1580_s26 + $0xc4] ss:$16 sps:$4 sm:$0xff]   ;;  %v1287_v25 = vld [vmem:[%s1580_s26 + $0xcc] ss:$16 sps:$4 sm:$0xff]  }
  0x3b   : > { %v1289_v26 = vld [vmem:[%s1580_s26 + $0xc0] ss:$16 sps:$4 sm:$0xff]   ;;  %v1290_v27 = vld [vmem:[%s1580_s26 + $0xc8] ss:$16 sps:$4 sm:$0xff]   ;;  %v1291_v28 = vld [vmem:[%s1580_s26 + $0xe4] ss:$16 sps:$4 sm:$0xff]  }
  0x3c   : > { %844 = vmatpush1.bf16.msra.mxu0 %v1265_v10  ;;  %926 = vmatpush1.bf16.msra.mxu1 %v1266_v11  ;;  %v1293_v29 = vld [vmem:[%s1580_s26 + $0xec] ss:$16 sps:$4 sm:$0xff]   ;;  %v1295_v30 = vld [vmem:[%s1580_s26 + $0xe0] ss:$16 sps:$4 sm:$0xff]   ;;  %v1296_v31 = vld [vmem:[%s1580_s26 + $0xe8] ss:$16 sps:$4 sm:$0xff]  }
  0x3d   : > { %845 = vmatprep.subr.bf16.mxu0 %v1267_v12  ;;  %927 = vmatprep.subr.bf16.mxu1 %v1269_v13  ;;  %v1297_v32 = vld [vmem:[%s1580_s26 + $0x104] ss:$16 sps:$4 sm:$0xff]   ;;  %v1299_v33 = vld [vmem:[%s1580_s26 + $0x10c] ss:$16 sps:$4 sm:$0xff]   ;;  %v1301_v34 = vld [vmem:[%s1580_s26 + $0x100] ss:$16 sps:$4 sm:$0xff]  }
  0x3e   : > { %v1302_v35 = vld [vmem:[%s1580_s26 + $0x108] ss:$16 sps:$4 sm:$0xff]   ;;  %v1303_v36 = vld [vmem:[%s1580_s26 + $0x124] ss:$16 sps:$4 sm:$0xff]   ;;  %v1305_v37 = vld [vmem:[%s1580_s26 + $0x12c] ss:$16 sps:$4 sm:$0xff]  }
  0x3f   : > { %v1307_v38 = vld [vmem:[%s1580_s26 + $0x120] ss:$16 sps:$4 sm:$0xff]   ;;  %v1308_v39 = vld [vmem:[%s1580_s26 + $0x128] ss:$16 sps:$4 sm:$0xff]   ;;  %v1309_v40 = vld [vmem:[%s1580_s26 + $0x144] ss:$16 sps:$4 sm:$0xff]  }
  0x40   : > { %846 = vmatpush1.bf16.msra.mxu0 %v1271_v14  ;;  %928 = vmatpush1.bf16.msra.mxu1 %v1272_v15  ;;  %v1311_v41 = vld [vmem:[%s1580_s26 + $0x14c] ss:$16 sps:$4 sm:$0xff]   ;;  %v1313_v42 = vld [vmem:[%s1580_s26 + $0x140] ss:$16 sps:$4 sm:$0xff]   ;;  %v1314_v43 = vld [vmem:[%s1580_s26 + $0x148] ss:$16 sps:$4 sm:$0xff]  }
  0x41   : > { %847 = vmatprep.subr.bf16.mxu0 %v1273_v16  ;;  %929 = vmatprep.subr.bf16.mxu1 %v1275_v17  ;;  %v1315_v44 = vld [vmem:[%s1580_s26 + $0x164] ss:$16 sps:$4 sm:$0xff]   ;;  %v1317_v45 = vld [vmem:[%s1580_s26 + $0x16c] ss:$16 sps:$4 sm:$0xff]   ;;  %v1319_v47 = vld [vmem:[%s1580_s26 + $0x160] ss:$16 sps:$4 sm:$0xff]  }
  0x42   : > { %v168_v46 = vld [vmem:[%s1724_s0 + $0x8] sm:$0x3f]  ;;  %v1321_v50 = vld [vmem:[%s1580_s26 + $0x184] ss:$16 sps:$4 sm:$0xff]   ;;  %v1325_v52 = vld [vmem:[%s1580_s26 + $0x180] ss:$16 sps:$4 sm:$0xff]  }
  0x43   : > { %v172_v48 = vpack.c.bf16 %v168_v46, %v168_v46  ;;  %v1320_v49 = vld [vmem:[%s1580_s26 + $0x168] ss:$16 sps:$4 sm:$0xff]   ;;  %v1323_v51 = vld [vmem:[%s1580_s26 + $0x18c] ss:$16 sps:$4 sm:$0xff]   ;;  %v1327_v54 = vld [vmem:[%s1580_s26 + $0x1a4] ss:$16 sps:$4 sm:$0xff]  }
  0x44   : > { %848 = vmatpush1.bf16.msra.mxu0 %v1277_v18  ;;  %930 = vmatpush1.bf16.msra.mxu1 %v1278_v19  ;;  %v1326_v53 = vld [vmem:[%s1580_s26 + $0x188] ss:$16 sps:$4 sm:$0xff]   ;;  %v1329_v55 = vld [vmem:[%s1580_s26 + $0x1ac] ss:$16 sps:$4 sm:$0xff]   ;;  %v1331_v56 = vld [vmem:[%s1580_s26 + $0x1a0] ss:$16 sps:$4 sm:$0xff]  }
  0x45   : > { %849 = vmatprep.subr.bf16.mxu0 %v1279_v20  ;;  %931 = vmatprep.subr.bf16.mxu1 %v1281_v21  ;;  %v1332_v57 = vld [vmem:[%s1580_s26 + $0x1a8] ss:$16 sps:$4 sm:$0xff]   ;;  %v1333_v58 = vld [vmem:[%s1580_s26 + $0x1c4] ss:$16 sps:$4 sm:$0xff]   ;;  %v1335_v59 = vld [vmem:[%s1580_s26 + $0x1cc] ss:$16 sps:$4 sm:$0xff]  }
  0x46   : > { %871 = vmatprep.mubr.bf16.mxu0 %v172_v48  ;;  %953 = vmatprep.mubr.bf16.mxu1 %v172_v48  ;;  %v1337_v60 = vld [vmem:[%s1580_s26 + $0x1c0] ss:$16 sps:$4 sm:$0xff]   ;;  %v1338_v61 = vld [vmem:[%s1580_s26 + $0x1c8] ss:$16 sps:$4 sm:$0xff]   ;;  %v1339_v62 = vld [vmem:[%s1580_s26 + $0x1e4] ss:$16 sps:$4 sm:$0xff]  }
  0x47   : > { %v1341_v63 = vld [vmem:[%s1580_s26 + $0x1ec] ss:$16 sps:$4 sm:$0xff]   ;;  %v1343_v0 = vld [vmem:[%s1580_s26 + $0x1e0] ss:$16 sps:$4 sm:$0xff]   ;;  %v1344_v1 = vld [vmem:[%s1580_s26 + $0x1e8] ss:$16 sps:$4 sm:$0xff]  }
  0x48   : > { %850 = vmatpush1.bf16.msra.mxu0 %v1283_v22  ;;  %932 = vmatpush1.bf16.msra.mxu1 %v1284_v23  ;;  %v167_v2 = vld [vmem:[%s1724_s0] sm:$0x3f]  ;;  %v1350_v4 = vld [vmem:[%s1580_s26 + $0x20c] ss:$16 sps:$4 sm:$0xff]   ;;  %v1348_v7 = vld [vmem:[%s1580_s26 + $0x208] ss:$16 sps:$4 sm:$0xff]  }
  0x49   : > { %851 = vmatprep.subr.bf16.mxu0 %v1285_v24  ;;  %933 = vmatprep.subr.bf16.mxu1 %v1287_v25  ;;  %v1347_v3 = vld [vmem:[%s1580_s26 + $0x204] ss:$16 sps:$4 sm:$0xff]   ;;  %v171_v5 = vpack.c.bf16 %v167_v2, %v167_v2  ;;  %v1345_v6 = vld [vmem:[%s1580_s26 + $0x200] ss:$16 sps:$4 sm:$0xff]   ;;  %v1356_v9 = vld [vmem:[%s1580_s26 + $0x22c] ss:$16 sps:$4 sm:$0xff]  }
  0x4a   : > { %v1353_v8 = vld [vmem:[%s1580_s26 + $0x224] ss:$16 sps:$4 sm:$0xff]   ;;  %v1351_v10 = vld [vmem:[%s1580_s26 + $0x220] ss:$16 sps:$4 sm:$0xff]   ;;  %v1354_v11 = vld [vmem:[%s1580_s26 + $0x228] ss:$16 sps:$4 sm:$0xff]  }
  0x4b   : > { %v1359_v12 = vld [vmem:[%s1580_s26 + $0x244] ss:$16 sps:$4 sm:$0xff]   ;;  %v1362_v13 = vld [vmem:[%s1580_s26 + $0x24c] ss:$16 sps:$4 sm:$0xff]   ;;  %v1357_v14 = vld [vmem:[%s1580_s26 + $0x240] ss:$16 sps:$4 sm:$0xff]  }
  0x4c   : > { %852 = vmatpush1.bf16.msra.mxu0 %v1289_v26  ;;  %934 = vmatpush1.bf16.msra.mxu1 %v1290_v27  ;;  %v1360_v15 = vld [vmem:[%s1580_s26 + $0x248] ss:$16 sps:$4 sm:$0xff]   ;;  %v1365_v17 = vld [vmem:[%s1580_s26 + $0x264] ss:$16 sps:$4 sm:$0xff]   ;;  %v1368_v18 = vld [vmem:[%s1580_s26 + $0x26c] ss:$16 sps:$4 sm:$0xff]  }
  0x4d   : > { %853 = vmatprep.subr.bf16.mxu0 %v1291_v28  ;;  %935 = vmatprep.subr.bf16.mxu1 %v1293_v29  ;;  %v170_v16 = vld [vmem:[%s1724_s0 + $0x18] sm:$0x3f]  ;;  %v1363_v20 = vld [vmem:[%s1580_s26 + $0x260] ss:$16 sps:$4 sm:$0xff]   ;;  %v1371_v22 = vld [vmem:[%s1580_s26 + $0x284] ss:$16 sps:$4 sm:$0xff]  }
  0x4e   : > { %v174_v19 = vpack.c.bf16 %v170_v16, %v170_v16  ;;  %v1366_v21 = vld [vmem:[%s1580_s26 + $0x268] ss:$16 sps:$4 sm:$0xff]   ;;  %v1374_v23 = vld [vmem:[%s1580_s26 + $0x28c] ss:$16 sps:$4 sm:$0xff]   ;;  %v1369_v24 = vld [vmem:[%s1580_s26 + $0x280] ss:$16 sps:$4 sm:$0xff]  }
  0x4f   : > { %v1372_v25 = vld [vmem:[%s1580_s26 + $0x288] ss:$16 sps:$4 sm:$0xff]   ;;  %v1377_v26 = vld [vmem:[%s1580_s26 + $0x2a4] ss:$16 sps:$4 sm:$0xff]   ;;  %v1380_v27 = vld [vmem:[%s1580_s26 + $0x2ac] ss:$16 sps:$4 sm:$0xff]  }
  0x50   : > { %854 = vmatpush1.bf16.msra.mxu0 %v1295_v30  ;;  %936 = vmatpush1.bf16.msra.mxu1 %v1296_v31  ;;  %v1375_v28 = vld [vmem:[%s1580_s26 + $0x2a0] ss:$16 sps:$4 sm:$0xff]   ;;  %v1378_v29 = vld [vmem:[%s1580_s26 + $0x2a8] ss:$16 sps:$4 sm:$0xff]   ;;  %v1383_v30 = vld [vmem:[%s1580_s26 + $0x2c4] ss:$16 sps:$4 sm:$0xff]  }
  0x51   : > { %855 = vmatprep.subr.bf16.mxu0 %v1297_v32  ;;  %937 = vmatprep.subr.bf16.mxu1 %v1299_v33  ;;  %v1386_v31 = vld [vmem:[%s1580_s26 + $0x2cc] ss:$16 sps:$4 sm:$0xff]   ;;  %v1381_v32 = vld [vmem:[%s1580_s26 + $0x2c0] ss:$16 sps:$4 sm:$0xff]   ;;  %v1384_v33 = vld [vmem:[%s1580_s26 + $0x2c8] ss:$16 sps:$4 sm:$0xff]  }
  0x52   : > { %vm823_vm1 = vcmask 1046528   ;;  %vm824_vm2 = vcmask 1047552   ;;  %v1407_v46 = vld [vmem:[%s1580_s26 + $0x344] ss:$16 sps:$4 sm:$0xff]   ;;  %s1081_s4 = sshll.u32 %s1074_s13, 2 }
  0x53   : > { %p161_p7 = scmp.lt.s32.totalorder %s1081_s4, 55 }
  0x54   : > { %856 = vmatpush1.bf16.msra.mxu0 %v1301_v34  ;;  %938 = vmatpush1.bf16.msra.mxu1 %v1302_v35  ;;  %v1389_v34 = vld [vmem:[%s1580_s26 + $0x2e4] ss:$16 sps:$4 sm:$0xff]   ;;  %v1392_v35 = vld [vmem:[%s1580_s26 + $0x2ec] ss:$16 sps:$4 sm:$0xff]  }
  0x55   : > { %857 = vmatprep.subr.bf16.mxu0 %v1303_v36  ;;  %939 = vmatprep.subr.bf16.mxu1 %v1305_v37  ;;  %v1387_v36 = vld [vmem:[%s1580_s26 + $0x2e0] ss:$16 sps:$4 sm:$0xff]   ;;  %v1390_v37 = vld [vmem:[%s1580_s26 + $0x2e8] ss:$16 sps:$4 sm:$0xff]   ;;  %s1734_s4 = smov (!%p161_p7, %s1081_s4), 55 }
  0x56   : > { %s1082_s5 = sshll.u32 %s1734_s4, 3 }
  0x57   : > { %s164_s8 = scalar_lea.vmem %s1726_s2, %s1082_s5 }
  0x58   : > { %858 = vmatpush1.bf16.msra.mxu0 %v1307_v38  ;;  %940 = vmatpush1.bf16.msra.mxu1 %v1308_v39  ;;  %v1395_v38 = vld [vmem:[%s1580_s26 + $0x304] ss:$16 sps:$4 sm:$0xff]   ;;  %v1398_v39 = vld [vmem:[%s1580_s26 + $0x30c] ss:$16 sps:$4 sm:$0xff]  }
  0x59   : > { %859 = vmatprep.subr.bf16.mxu0 %v1309_v40  ;;  %941 = vmatprep.subr.bf16.mxu1 %v1311_v41  ;;  %v1481_v40 = vmov 65535  }
  0x5a   : > { %v825_v41 = vsel %vm823_vm1, 4294967295, %v1481_v40 }
  0x5b   : > { %v826_v48 = vsel %vm824_vm2, %v825_v41, 0 }
  0x5c   : > { %860 = vmatpush1.bf16.msra.mxu0 %v1313_v42  ;;  %942 = vmatpush1.bf16.msra.mxu1 %v1314_v43  ;;  %v1393_v42 = vld [vmem:[%s1580_s26 + $0x300] ss:$16 sps:$4 sm:$0xff]   ;;  %v1396_v43 = vld [vmem:[%s1580_s26 + $0x308] ss:$16 sps:$4 sm:$0xff]  }
  0x5d   : > { %861 = vmatprep.subr.bf16.mxu0 %v1315_v44  ;;  %943 = vmatprep.subr.bf16.mxu1 %v1317_v45  ;;  %v1401_v44 = vld [vmem:[%s1580_s26 + $0x324] ss:$16 sps:$4 sm:$0xff]   ;;  %v1404_v45 = vld [vmem:[%s1580_s26 + $0x32c] ss:$16 sps:$4 sm:$0xff]  }
  0x60   : > { %862 = vmatpush1.bf16.msra.mxu0 %v1319_v47  ;;  %944 = vmatpush1.bf16.msra.mxu1 %v1320_v49  ;;  %v1410_v47 = vld [vmem:[%s1580_s26 + $0x34c] ss:$16 sps:$4 sm:$0xff]   ;;  %v1399_v49 = vld [vmem:[%s1580_s26 + $0x320] ss:$16 sps:$4 sm:$0xff]  }
  0x61   : > { %863 = vmatprep.subr.bf16.mxu0 %v1321_v50  ;;  %945 = vmatprep.subr.bf16.mxu1 %v1323_v51  ;;  %v1402_v50 = vld [vmem:[%s1580_s26 + $0x328] ss:$16 sps:$4 sm:$0xff]   ;;  %v1405_v51 = vld [vmem:[%s1580_s26 + $0x340] ss:$16 sps:$4 sm:$0xff]  }
  0x64   : > { %864 = vmatpush1.bf16.msra.mxu0 %v1325_v52  ;;  %946 = vmatpush1.bf16.msra.mxu1 %v1326_v53  ;;  %v1408_v52 = vld [vmem:[%s1580_s26 + $0x348] ss:$16 sps:$4 sm:$0xff]   ;;  %v831_v53 = vand.u32 %v1407_v46, %v826_v48 }
  0x65   : > { %865 = vmatprep.subr.bf16.mxu0 %v1327_v54  ;;  %947 = vmatprep.subr.bf16.mxu1 %v1329_v55  ;;  %v837_v54 = vand.u32 %v1410_v47, %v826_v48  ;;  %v828_v55 = vand.u32 %v1405_v51, %v826_v48 }
  0x68   : > { %866 = vmatpush1.bf16.msra.mxu0 %v1331_v56  ;;  %948 = vmatpush1.bf16.msra.mxu1 %v1332_v57  ;;  %v834_v56 = vand.u32 %v1408_v52, %v826_v48  ;;  %v169_v57 = vld [vmem:[%s1724_s0 + $0x10] sm:$0x3f] }
  0x69   : > { %867 = vmatprep.subr.bf16.mxu0 %v1333_v58  ;;  %949 = vmatprep.subr.bf16.mxu1 %v1335_v59  ;;  %v173_v58 = vpack.c.bf16 %v169_v57, %v169_v57 }
  0x6c   : > { %868 = vmatpush1.bf16.msra.mxu0 %v1337_v60  ;;  %950 = vmatpush1.bf16.msra.mxu1 %v1338_v61 }
  0x6d   : > { %869 = vmatprep.subr.bf16.mxu0 %v1339_v62  ;;  %951 = vmatprep.subr.bf16.mxu1 %v1341_v63 }
  0x70   : > { %870 = vmatpush1.bf16.msra.mxu0 %v1343_v0  ;;  %952 = vmatpush1.bf16.msra.mxu1 %v1344_v1 }
  0x71   : > { %880 = vmatprep.subr.bf16.mxu0 %v1347_v3  ;;  %962 = vmatprep.subr.bf16.mxu1 %v1350_v4 }
  0x73   : > { %872 = vmatmul.mubr.bf16.vlgmr.msra.gmra.mrb[0].mxu0 %v171_v5  ;;  %954 = vmatmul.mubr.bf16.vlgmr.msra.gmra.mrb[0].mxu1 %v171_v5 }
  0x74   : > { %881 = vmatpush1.bf16.msra.mxu0 %v1345_v6  ;;  %963 = vmatpush1.bf16.msra.mxu1 %v1348_v7 }
  0x75   : > { %882 = vmatprep.subr.bf16.mxu0 %v1353_v8  ;;  %964 = vmatprep.subr.bf16.mxu1 %v1356_v9 }
  0x76   : > { %1191 = vmatprep.mubr.msk.bf16.mxu0 %vm819_vm0, %v174_v19  ;;  %1192 = vmatprep.mubr.msk.bf16.mxu1 %vm819_vm0, %v174_v19 }
  0x78   : > { %883 = vmatpush1.bf16.msra.mxu0 %v1351_v10  ;;  %965 = vmatpush1.bf16.msra.mxu1 %v1354_v11 }
  0x79   : > { %884 = vmatprep.subr.bf16.mxu0 %v1359_v12  ;;  %966 = vmatprep.subr.bf16.mxu1 %v1362_v13 }
  0x7c   : > { %885 = vmatpush1.bf16.msra.mxu0 %v1357_v14  ;;  %967 = vmatpush1.bf16.msra.mxu1 %v1360_v15 }
  0x7d   : > { %886 = vmatprep.subr.bf16.mxu0 %v1365_v17  ;;  %968 = vmatprep.subr.bf16.mxu1 %v1368_v18 }
  0x80   : > { %887 = vmatpush1.bf16.msra.mxu0 %v1363_v20  ;;  %969 = vmatpush1.bf16.msra.mxu1 %v1366_v21 }
  0x81   : > { %888 = vmatprep.subr.bf16.mxu0 %v1371_v22  ;;  %970 = vmatprep.subr.bf16.mxu1 %v1374_v23 }
  0x84   : > { %889 = vmatpush1.bf16.msra.mxu0 %v1369_v24  ;;  %971 = vmatpush1.bf16.msra.mxu1 %v1372_v25 }
  0x85   : > { %890 = vmatprep.subr.bf16.mxu0 %v1377_v26  ;;  %972 = vmatprep.subr.bf16.mxu1 %v1380_v27 }
  0x88   : > { %891 = vmatpush1.bf16.msra.mxu0 %v1375_v28  ;;  %973 = vmatpush1.bf16.msra.mxu1 %v1378_v29 }
  0x89   : > { %892 = vmatprep.subr.bf16.mxu0 %v1383_v30  ;;  %974 = vmatprep.subr.bf16.mxu1 %v1386_v31 }
  0x8c   : > { %893 = vmatpush1.bf16.msra.mxu0 %v1381_v32  ;;  %975 = vmatpush1.bf16.msra.mxu1 %v1384_v33 }
  0x8d   : > { %894 = vmatprep.subr.bf16.mxu0 %v1389_v34  ;;  %976 = vmatprep.subr.bf16.mxu1 %v1392_v35 }
  0x90   : > { %895 = vmatpush1.bf16.msra.mxu0 %v1387_v36  ;;  %977 = vmatpush1.bf16.msra.mxu1 %v1390_v37 }
  0x91   : > { %896 = vmatprep.subr.bf16.mxu0 %v1395_v38  ;;  %978 = vmatprep.subr.bf16.mxu1 %v1398_v39 }
  0x94   : > { %897 = vmatpush1.bf16.msra.mxu0 %v1393_v42  ;;  %979 = vmatpush1.bf16.msra.mxu1 %v1396_v43 }
  0x95   : > { %898 = vmatprep.subr.bf16.mxu0 %v1401_v44  ;;  %980 = vmatprep.subr.bf16.mxu1 %v1404_v45 }
  0x98   : > { %899 = vmatpush1.bf16.msra.mxu0 %v1399_v49  ;;  %981 = vmatpush1.bf16.msra.mxu1 %v1402_v50 }
  0x99   : > { %900 = vmatprep.subr.bf16.mxu0 %v831_v53  ;;  %982 = vmatprep.subr.bf16.mxu1 %v837_v54 }
  0x9c   : > { %901 = vmatpush1.bf16.msra.mxu0 %v828_v55  ;;  %983 = vmatpush1.bf16.msra.mxu1 %v834_v56 }
  0x9f   : > { %913 = vmatmul.mubr.bf16.vlgmr.msra.gmra.mrb[0].mxu0 %v173_v58  ;;  %995 = vmatmul.mubr.bf16.vlgmr.msra.gmra.mrb[0].mxu1 %v173_v58 }
 0x172   : > { %v914_v59 = vpop.f32.mrb[0].mxu0  ;;  %v996_v60 = vpop.f32.mrb[0].mxu1 }
 0x173   : > { %1003 = vst [vmem:[%s164_s8] sm:$0x3f] %v914_v59  ;;  %1005 = vst [vmem:[%s164_s8 + $0x10] sm:$0x3f] %v996_v60  ;;  %v916_v61 = vpop.f32.mrb[1].mxu0  ;;  %v998_v62 = vpop.f32.mrb[1].mxu1 }
 0x174   : > { %1004 = vst [vmem:[%s164_s8 + $0x8] sm:$0x3f] %v916_v61  ;;  %1006 = vst [vmem:[%s164_s8 + $0x18] sm:$0x3f] %v998_v62  ;;  %v918_v63 = vpop.f32.mrb[2].mxu0  ;;  %v1000_v0 = vpop.f32.mrb[2].mxu1 }
 0x175   : > { %v919_v1 = vpop.f32.mrb[3].mxu0  ;;  %v1001_v2 = vpop.f32.mrb[3].mxu1 }
 0x176 PF: > { %p12_p8 = scmp.ge.s32.totalorder %s1517_s14, 16   ;;  %s1729_s9 = smov %s1467_s10 }
 0x177   : > { %s1730_s10 = smov %s1471_s11  ;;  %s1731_s11 = smov %s1527_s17 }
 0x178   : > { %s1732_s12 = smov %s1517_s14  ;;  %14 = sbr.rel (!%p12_p8) target bundleno = 3 (0x3), region = 68 }
 0x17f   :  { %1029 = vsyncpa [#allocation3], 1 }
 0x180   :  { %1031 = vsyncpa [#allocation3 + $0x1], 1 }

// kernel: gcn_mesh_regressor.3
= control target key start
LH: loop header
LB: loop body
LE: loop exit
PB: predicated region body
PF: predicated region fallthrough
CT: control target
= control target key end

     0   :  { %s10558_s0 = inlined_call_operand.vmem [shape: f32[2,431,3], index: 0, kind: input, shape index: {}]   ;;  %s10559_s1 = inlined_call_operand.hbm [shape: f32[431,431], index: 1, kind: input, shape index: {}]   ;;  %s10560_s2 = inlined_call_operand.hbm [shape: f32[1,3], index: 2, kind: input, shape index: {}]   ;;  %s10561_s3 = inlined_call_operand.hbm [shape: f32[1,3], index: 3, kind: input, shape index: {}]   ;;  %s10562_s4 = inlined_call_operand.hbm [shape: f32[3,64], index: 4, kind: input, shape index: {}]   ;;  %s10563_s5 = inlined_call_operand.hbm [shape: f32[1,64], index: 5, kind: input, shape index: {}]   ;;  %s10564_s6 = inlined_call_operand.hbm [shape: f32[1,64], index: 6, kind: input, shape index: {}]   ;;  %s10565_s7 = inlined_call_operand.hbm [shape: f32[1,64], index: 7, kind: input, shape index: {}]   ;;  %s10566_s8 = inlined_call_operand.hbm [shape: f32[64,64], index: 8, kind: input, shape index: {}]   ;;  %s10567_s9 = inlined_call_operand.hbm [shape: f32[1,64], index: 9, kind: input, shape index: {}]   ;;  %s10568_s10 = inlined_call_operand.hbm [shape: f32[1,64], index: 10, kind: input, shape index: {}]   ;;  %s10569_s11 = inlined_call_operand.hbm [shape: f32[1,64], index: 11, kind: input, shape index: {}]   ;;  %s10570_s12 = inlined_call_operand.vmem [shape: f32[64,3], index: 12, kind: input, shape index: {}]   ;;  %s10571_s13 = inlined_call_operand.hbm [shape: f32[1,3], index: 13, kind: input, shape index: {}]   ;;  %s10572_s14 = inlined_call_operand.vmem [shape: f32[2,431,3], index: 14, kind: output, shape index: {}]  }
   0x1   :  { %10638 = sst [smem:[#allocation44_spill]] %s10560_s2 }
   0x2   :  { %10639 = sst [smem:[#allocation45_spill]] %s10562_s4 }
   0x3   :  { %10640 = sst [smem:[#allocation46_spill]] %s10564_s6 }
   0x4   :  { %10641 = sst [smem:[#allocation47_spill]] %s10572_s14 }
   0x5   :  { %19 = vsyncpa [#allocation3], 0 }
   0x6   :  { %20 = vsyncpa [#allocation5], 0 }
   0x7   :  { %21 = vsyncpa [#allocation8], 0 }
   0x8   :  { %22 = vsyncpa [#allocation11], 0 }
   0x9   :  { %23 = vsyncpa [#allocation14], 0 }
   0xa   :  { %24 = vsyncpa [#allocation17], 0 }
   0xb   :  { %25 = vsyncpa [#allocation20], 0  ;;  %s6888_s29 = smov 0  }
   0xc LB: > { %10642 = sst [smem:[#allocation28_spill]] %s6793_s29  ;;  %s6795_s30 = smov [#allocation4]   ;;  %s6793_s29 = sphi %s6888_s29, %s31_s29  }
   0xd   : > { %s387_s15 = sshll.u32 %s6795_s30, 4  ;;  %s6894_s16 = sadd.s32 4294967295, %s6793_s29   ;;  %s6899_s15 = int_to_ptr.vmem [resolvable:$true] %s387_s15 }
   0xe   : > { %p5274_p0 = scmp.ge.s32.totalorder %s6793_s29, 1  ;;  %p361_p1 = scmp.lt.s32.totalorder %s6793_s29, 3 }
   0xf   : > { %p10574_p2 = scmp.eq.s32.totalorder %s6894_s16, 0  ;;  %s6796_s18 = smov [#allocation7]  }
  0x10   : > { %p6901_p3 = pnand %p5274_p0, %p361_p1  ;;  %s409_s19 = sshll.u32 %s6796_s18, 4  ;;  %s6907_s19 = int_to_ptr.vmem [resolvable:$true] %s409_s19 }
  0x11   : > { %s6797_s20 = smov [#allocation10]   ;;  %s6798_s23 = smov [#allocation13]  }
  0x12   : > { %s10643_s17 = scalar_select %p6901_p3, 1, 0 }
  0x13   : > { %p6276_p4 = pneg %p6901_p3  ;;  %s431_s21 = sshll.u32 %s6797_s20, 4  ;;  %s6915_s21 = int_to_ptr.vmem [resolvable:$true] %s431_s21 }
  0x14   : > { %s452_s24 = sshll.u32 %s6798_s23, 4  ;;  %s10645_s2 = sld [smem:[#allocation44_spill]]  ;;  %s6917_s24 = int_to_ptr.vmem [resolvable:$true] %s452_s24 }
  0x15   : > { %p6911_p5 = pnand %p10574_p2, %p6276_p4 }
  0x17   : > { %p6927_p7 = pneg %p6911_p5 }
  0x1a   : > { %s6423_s27 = scalar_lea.hbm %s10645_s2, 16 }
  0x1b   : > { %p6424_p6 = scmp.ne.s32.totalorder %s10645_s2, %s6423_s27  ;;  %p6430_p10 = scmp.lt.u32.totalorder %s6423_s27, %s10645_s2 }
  0x1d   : > { %p6426_p8 = pnand %p6927_p7, %p6424_p6 }
  0x1f   : > { %p6427_p9 = pneg %p6426_p8 }
  0x21   : > { %p6432_p11 = pnand %p6430_p10, %p6427_p9 }
  0x23   : > { %6435 = shalt.err (!%p6432_p11)
}
  0x24   : > { %s6436_s25 = scalar_lea.vmem %s6899_s15, 16  ;;  %s6443_s26 = scalar_lea.vmem %s6899_s15, 32 }
  0x25   : > { %p6437_p12 = scmp.ne.s32.totalorder %s6899_s15, %s6436_s25  ;;  %p6444_p1 = scmp.lt.s32.totalorder %s6899_s15, %s6899_s15 }
  0x26   : > { %p6445_p4 = scmp.lt.s32.totalorder %s6443_s26, %s6436_s25 }
  0x27   : > { %p6439_p13 = pnand %p6437_p12, %p6927_p7 }
  0x28   : > { %p6446_p6 = por %p6445_p4, %p6444_p1 }
  0x29   : > { %p6440_p0 = pneg %p6439_p13 }
  0x2b   : > { %p6447_p8 = pnand %p6446_p6, %p6440_p0 }
  0x2d   : > { %6450 = shalt.err (!%p6447_p8)
}
  0x2e   : > { %6282 = dma.hbm_to_vmem [thread:$0]  (!%p6911_p5), %s10645_s2, 16, %s6899_s15, [#allocation5]  }
  0x2f   : > { %s10647_s4 = sld [smem:[#allocation45_spill]] }
  0x35   : > { %s6451_s23 = scalar_lea.hbm %s10647_s4, 64 }
  0x36   : > { %p6452_p9 = scmp.ne.s32.totalorder %s10647_s4, %s6451_s23  ;;  %p6458_p12 = scmp.lt.u32.totalorder %s6451_s23, %s10647_s4 }
  0x38   : > { %p6454_p10 = pnand %p6452_p9, %p6927_p7 }
  0x3a   : > { %p6455_p11 = pneg %p6454_p10 }
  0x3c   : > { %p6460_p13 = pnand %p6458_p12, %p6455_p11 }
  0x3e   : > { %6463 = shalt.err (!%p6460_p13)
}
  0x3f   : > { %s6464_s15 = scalar_lea.vmem %s6907_s19, 64  ;;  %p6472_p6 = scmp.lt.s32.totalorder %s6907_s19, %s6907_s19 }
  0x40   : > { %p6465_p0 = scmp.ne.s32.totalorder %s6907_s19, %s6464_s15  ;;  %p6473_p8 = scmp.lt.s32.totalorder %s6464_s15, %s6464_s15 }
  0x42   : > { %p6467_p1 = pnand %p6465_p0, %p6927_p7  ;;  %p6474_p9 = por %p6473_p8, %p6472_p6 }
  0x44   : > { %p6468_p4 = pneg %p6467_p1 }
  0x46   : > { %p6475_p10 = pnand %p6474_p9, %p6468_p4 }
  0x48   : > { %6478 = shalt.err (!%p6475_p10)
}
  0x49   : > { %6288 = dma.hbm_to_vmem [thread:$0]  (!%p6911_p5), %s10647_s4, 64, %s6907_s19, [#allocation8]  }
  0x4a   : > { %s10648_s6 = sld [smem:[#allocation46_spill]] }
  0x50   : > { %s6479_s30 = scalar_lea.hbm %s10648_s6, 16 }
  0x51   : > { %p6480_p11 = scmp.ne.s32.totalorder %s10648_s6, %s6479_s30  ;;  %p6486_p0 = scmp.lt.u32.totalorder %s6479_s30, %s10648_s6 }
  0x53   : > { %p6482_p12 = pnand %p6480_p11, %p6927_p7 }
  0x55   : > { %p6483_p13 = pneg %p6482_p12 }
  0x57   : > { %p6488_p1 = pnand %p6486_p0, %p6483_p13 }
  0x59   : > { %6491 = shalt.err (!%p6488_p1)
}
  0x5a   : > { %s6492_s19 = scalar_lea.vmem %s6915_s21, 16  ;;  %s6499_s15 = scalar_lea.vmem %s6915_s21, 32 }
  0x5b   : > { %p6493_p4 = scmp.ne.s32.totalorder %s6915_s21, %s6492_s19  ;;  %p6500_p9 = scmp.lt.s32.totalorder %s6915_s21, %s6915_s21 }
  0x5c   : > { %p6501_p10 = scmp.lt.s32.totalorder %s6499_s15, %s6492_s19 }
  0x5d   : > { %p6495_p6 = pnand %p6493_p4, %p6927_p7 }
  0x5e   : > { %p6502_p11 = por %p6501_p10, %p6500_p9 }
  0x5f   : > { %p6496_p8 = pneg %p6495_p6 }
  0x61   : > { %p6503_p12 = pnand %p6502_p11, %p6496_p8 }
  0x63   : > { %6506 = shalt.err (!%p6503_p12)
}
  0x64   : > { %6294 = dma.hbm_to_vmem [thread:$0]  (!%p6911_p5), %s10648_s6, 16, %s6915_s21, [#allocation11]  }
  0x65   : > { %s6507_s30 = scalar_lea.hbm %s10566_s8, 1024 }
  0x66   : > { %p6508_p13 = scmp.ne.s32.totalorder %s10566_s8, %s6507_s30  ;;  %p6514_p4 = scmp.lt.u32.totalorder %s6507_s30, %s10566_s8 }
  0x68   : > { %p6510_p0 = pnand %p6508_p13, %p6927_p7 }
  0x6a   : > { %p6511_p1 = pneg %p6510_p0 }
  0x6c   : > { %p6516_p6 = pnand %p6514_p4, %p6511_p1 }
  0x6e   : > { %6519 = shalt.err (!%p6516_p6)
}
  0x6f   : > { %s6520_s21 = scalar_lea.vmem %s6917_s24, 1024  ;;  %p6528_p11 = scmp.lt.s32.totalorder %s6917_s24, %s6917_s24 }
  0x70   : > { %p6521_p8 = scmp.ne.s32.totalorder %s6917_s24, %s6520_s21  ;;  %p6529_p12 = scmp.lt.s32.totalorder %s6520_s21, %s6520_s21 }
  0x72   : > { %p6523_p9 = pnand %p6521_p8, %p6927_p7  ;;  %p6530_p13 = por %p6529_p12, %p6528_p11 }
  0x74   : > { %p6524_p10 = pneg %p6523_p9 }
  0x76   : > { %p6531_p0 = pnand %p6530_p13, %p6524_p10 }
  0x78   : > { %6534 = shalt.err (!%p6531_p0)
}
  0x79   : > { %s6799_s19 = smov 128   ;;  %s6800_s15 = smov 8  }
  0x7a   : > { %6300 = dma.hbm_to_vmem [thread:$0]  (!%p6911_p5), %s10566_s8, 1024, %s6917_s24, [#allocation14], %s6799_s19, %s6799_s19, %s6800_s15  }
  0x7b   : > { %s6801_s27 = smov [#allocation16]   ;;  %s6802_s30 = smov [#allocation2]  }
  0x7c   : > { %s477_s28 = sshll.u32 %s6801_s27, 4  ;;  %s373_s20 = sshll.u32 %s6802_s30, 4  ;;  %s478_s28 = int_to_ptr.vmem [resolvable:$true] %s477_s28  ;;  %s374_s20 = int_to_ptr.vmem [resolvable:$true] %s373_s20 }
  0x7d   : > { %s6535_s26 = scalar_lea.hbm %s10568_s10, 16 }
  0x7e   : > { %p6536_p1 = scmp.ne.s32.totalorder %s10568_s10, %s6535_s26  ;;  %p6542_p8 = scmp.lt.u32.totalorder %s6535_s26, %s10568_s10 }
  0x80   : > { %p6538_p4 = pnand %p6536_p1, %p6927_p7 }
  0x82   : > { %p6539_p6 = pneg %p6538_p4 }
  0x84   : > { %p6544_p9 = pnand %p6542_p8, %p6539_p6 }
  0x86   : > { %6547 = shalt.err (!%p6544_p9)
}
  0x87   : > { %s6548_s24 = scalar_lea.vmem %s478_s28, 16  ;;  %s6555_s19 = scalar_lea.vmem %s478_s28, 32 }
  0x88   : > { %p6549_p10 = scmp.ne.s32.totalorder %s478_s28, %s6548_s24  ;;  %p6556_p13 = scmp.lt.s32.totalorder %s478_s28, %s478_s28 }
  0x89   : > { %p6557_p0 = scmp.lt.s32.totalorder %s6555_s19, %s6548_s24 }
  0x8a   : > { %p6551_p11 = pnand %p6549_p10, %p6927_p7 }
  0x8b   : > { %p6558_p2 = por %p6557_p0, %p6556_p13 }
  0x8c   : > { %p6552_p12 = pneg %p6551_p11 }
  0x8e   : > { %p6559_p3 = pnand %p6558_p2, %p6552_p12 }
  0x90   : > { %6562 = shalt.err (!%p6559_p3)
}
  0x91   : > { %6306 = dma.hbm_to_vmem [thread:$0]  (!%p6911_p5), %s10568_s10, 16, %s478_s28, [#allocation17]  }
  0x92   : > { %s6563_s14 = scalar_lea.hbm %s10559_s1, 27648 }
  0x93   : > { %p6564_p1 = scmp.ne.s32.totalorder %s10559_s1, %s6563_s14  ;;  %p6570_p3 = scmp.lt.u32.totalorder %s6563_s14, %s10559_s1 }
  0x95   : > { %p6566_p4 = pnand %p6564_p1, %p6927_p7 }
  0x97   : > { %p6567_p2 = pneg %p6566_p4 }
  0x99   : > { %p6572_p6 = pnand %p6570_p3, %p6567_p2 }
  0x9b   : > { %6575 = shalt.err (!%p6572_p6)
}
  0x9c   : > { %s6576_s25 = scalar_lea.vmem %s374_s20, 27648  ;;  %p6584_p11 = scmp.lt.s32.totalorder %s374_s20, %s374_s20 }
  0x9d   : > { %p6577_p8 = scmp.ne.s32.totalorder %s374_s20, %s6576_s25  ;;  %p6585_p12 = scmp.lt.s32.totalorder %s6576_s25, %s6576_s25 }
  0x9f   : > { %p6579_p9 = pnand %p6577_p8, %p6927_p7  ;;  %p6586_p13 = por %p6585_p12, %p6584_p11 }
  0xa1   : > { %p6580_p10 = pneg %p6579_p9 }
  0xa3   : > { %p6587_p0 = pnand %p6586_p13, %p6580_p10 }
  0xa5   : > { %6590 = shalt.err (!%p6587_p0)
}
  0xa6   : > { %s6803_s28 = smov 512   ;;  %s6804_s26 = smov 32  }
  0xa7   : > { %6279 = dma.hbm_to_vmem [thread:$0]  (!%p6911_p5), %s10559_s1, 27648, %s374_s20, [#allocation3], %s6803_s28, %s6803_s28, %s6804_s26  }
  0xa8   : > { %s6805_s19 = smov [#allocation6]   ;;  %s6806_s15 = smov [#allocation9]  }
  0xa9   : > { %s398_s2 = sshll.u32 %s6805_s19, 4  ;;  %s420_s4 = sshll.u32 %s6806_s15, 4  ;;  %s399_s2 = int_to_ptr.vmem [resolvable:$true] %s398_s2  ;;  %s421_s4 = int_to_ptr.vmem [resolvable:$true] %s420_s4 }
  0xaa   : > { %s6591_s29 = scalar_lea.hbm %s10561_s3, 16 }
  0xab   : > { %p6592_p1 = scmp.ne.s32.totalorder %s10561_s3, %s6591_s29  ;;  %p6598_p3 = scmp.lt.u32.totalorder %s6591_s29, %s10561_s3 }
  0xad   : > { %p6594_p4 = pnand %p6592_p1, %p6927_p7 }
  0xaf   : > { %p6595_p2 = pneg %p6594_p4 }
  0xb1   : > { %p6600_p6 = pnand %p6598_p3, %p6595_p2 }
  0xb3   : > { %6603 = shalt.err (!%p6600_p6)
}
  0xb4   : > { %s6604_s20 = scalar_lea.vmem %s399_s2, 16  ;;  %s6611_s28 = scalar_lea.vmem %s399_s2, 32 }
  0xb5   : > { %p6605_p8 = scmp.ne.s32.totalorder %s399_s2, %s6604_s20  ;;  %p6612_p11 = scmp.lt.s32.totalorder %s399_s2, %s399_s2 }
  0xb6   : > { %p6613_p12 = scmp.lt.s32.totalorder %s6611_s28, %s6604_s20 }
  0xb7   : > { %p6607_p9 = pnand %p6605_p8, %p6927_p7 }
  0xb8   : > { %p6614_p13 = por %p6613_p12, %p6612_p11 }
  0xb9   : > { %p6608_p10 = pneg %p6607_p9 }
  0xbb   : > { %p6615_p0 = pnand %p6614_p13, %p6608_p10 }
  0xbd   : > { %6618 = shalt.err (!%p6615_p0)
}
  0xbe   : > { %6285 = dma.hbm_to_vmem [thread:$0]  (!%p6911_p5), %s10561_s3, 16, %s399_s2, [#allocation5]  }
  0xbf   : > { %s6619_s15 = scalar_lea.hbm %s10563_s5, 16 }
  0xc0   : > { %p6620_p1 = scmp.ne.s32.totalorder %s10563_s5, %s6619_s15  ;;  %p6626_p3 = scmp.lt.u32.totalorder %s6619_s15, %s10563_s5 }
  0xc2   : > { %p6622_p4 = pnand %p6620_p1, %p6927_p7 }
  0xc4   : > { %p6623_p2 = pneg %p6622_p4 }
  0xc6   : > { %p6628_p6 = pnand %p6626_p3, %p6623_p2 }
  0xc8   : > { %6631 = shalt.err (!%p6628_p6)
}
  0xc9   : > { %s6632_s30 = scalar_lea.vmem %s421_s4, 16  ;;  %s6639_s2 = scalar_lea.vmem %s421_s4, 32 }
  0xca   : > { %p6633_p8 = scmp.ne.s32.totalorder %s421_s4, %s6632_s30  ;;  %p6640_p11 = scmp.lt.s32.totalorder %s421_s4, %s421_s4 }
  0xcb   : > { %p6641_p12 = scmp.lt.s32.totalorder %s6639_s2, %s6632_s30 }
  0xcc   : > { %p6635_p9 = pnand %p6633_p8, %p6927_p7 }
  0xcd   : > { %p6642_p13 = por %p6641_p12, %p6640_p11 }
  0xce   : > { %p6636_p10 = pneg %p6635_p9 }
  0xd0   : > { %p6643_p0 = pnand %p6642_p13, %p6636_p10 }
  0xd2   : > { %6646 = shalt.err (!%p6643_p0)
}
  0xd3   : > { %6291 = dma.hbm_to_vmem [thread:$0]  (!%p6911_p5), %s10563_s5, 16, %s421_s4, [#allocation8]  }
  0xd4   : > { %s6807_s20 = smov [#allocation12]   ;;  %s6808_s26 = smov [#allocation15]  }
  0xd5   : > { %s442_s28 = sshll.u32 %s6807_s20, 4  ;;  %s466_s21 = sshll.u32 %s6808_s26, 4  ;;  %s443_s28 = int_to_ptr.vmem [resolvable:$true] %s442_s28  ;;  %s467_s21 = int_to_ptr.vmem [resolvable:$true] %s466_s21 }
  0xd6   : > { %s6647_s15 = scalar_lea.hbm %s10565_s7, 16 }
  0xd7   : > { %p6648_p1 = scmp.ne.s32.totalorder %s10565_s7, %s6647_s15  ;;  %p6654_p3 = scmp.lt.u32.totalorder %s6647_s15, %s10565_s7 }
  0xd9   : > { %p6650_p4 = pnand %p6648_p1, %p6927_p7 }
  0xdb   : > { %p6651_p2 = pneg %p6650_p4 }
  0xdd   : > { %p6656_p6 = pnand %p6654_p3, %p6651_p2 }
  0xdf   : > { %6659 = shalt.err (!%p6656_p6)
}
  0xe0   : > { %s6660_s4 = scalar_lea.vmem %s443_s28, 16  ;;  %s6667_s30 = scalar_lea.vmem %s443_s28, 32 }
  0xe1   : > { %p6661_p8 = scmp.ne.s32.totalorder %s443_s28, %s6660_s4  ;;  %p6668_p11 = scmp.lt.s32.totalorder %s443_s28, %s443_s28 }
  0xe2   : > { %p6669_p12 = scmp.lt.s32.totalorder %s6667_s30, %s6660_s4 }
  0xe3   : > { %p6663_p9 = pnand %p6661_p8, %p6927_p7 }
  0xe4   : > { %p6670_p13 = por %p6669_p12, %p6668_p11 }
  0xe5   : > { %p6664_p10 = pneg %p6663_p9 }
  0xe7   : > { %p6671_p0 = pnand %p6670_p13, %p6664_p10 }
  0xe9   : > { %6674 = shalt.err (!%p6671_p0)
}
  0xea   : > { %6297 = dma.hbm_to_vmem [thread:$0]  (!%p6911_p5), %s10565_s7, 16, %s443_s28, [#allocation11]  }
  0xeb   : > { %s6675_s26 = scalar_lea.hbm %s10567_s9, 16 }
  0xec   : > { %p6676_p1 = scmp.ne.s32.totalorder %s10567_s9, %s6675_s26  ;;  %p6682_p3 = scmp.lt.u32.totalorder %s6675_s26, %s10567_s9 }
  0xee   : > { %p6678_p4 = pnand %p6676_p1, %p6927_p7 }
  0xf0   : > { %p6679_p2 = pneg %p6678_p4 }
  0xf2   : > { %p6684_p6 = pnand %p6682_p3, %p6679_p2 }
  0xf4   : > { %6687 = shalt.err (!%p6684_p6)
}
  0xf5   : > { %s6688_s14 = scalar_lea.vmem %s467_s21, 16  ;;  %s6695_s28 = scalar_lea.vmem %s467_s21, 32 }
  0xf6   : > { %p6689_p8 = scmp.ne.s32.totalorder %s467_s21, %s6688_s14  ;;  %p6696_p11 = scmp.lt.s32.totalorder %s467_s21, %s467_s21 }
  0xf7   : > { %p6697_p12 = scmp.lt.s32.totalorder %s6695_s28, %s6688_s14 }
  0xf8   : > { %p6691_p9 = pnand %p6689_p8, %p6927_p7 }
  0xf9   : > { %p6698_p13 = por %p6697_p12, %p6696_p11 }
  0xfa   : > { %p6692_p10 = pneg %p6691_p9 }
  0xfc   : > { %p6699_p0 = pnand %p6698_p13, %p6692_p10 }
  0xfe   : > { %6702 = shalt.err (!%p6699_p0)
}
  0xff   : > { %6303 = dma.hbm_to_vmem [thread:$0]  (!%p6911_p5), %s10567_s9, 16, %s467_s21, [#allocation14]  }
 0x100   : > { %s6809_s4 = smov [#allocation18]   ;;  %s6810_s2 = smov [#allocation19]  }
 0x101   : > { %s488_s30 = sshll.u32 %s6809_s4, 4  ;;  %s502_s23 = sshll.u32 %s6810_s2, 4  ;;  %s489_s30 = int_to_ptr.vmem [resolvable:$true] %s488_s30  ;;  %s503_s23 = int_to_ptr.vmem [resolvable:$true] %s502_s23 }
 0x102   : > { %s6703_s26 = scalar_lea.hbm %s10569_s11, 16 }
 0x103   : > { %p6704_p1 = scmp.ne.s32.totalorder %s10569_s11, %s6703_s26  ;;  %p6710_p3 = scmp.lt.u32.totalorder %s6703_s26, %s10569_s11 }
 0x105   : > { %p6706_p4 = pnand %p6704_p1, %p6927_p7 }
 0x107   : > { %p6707_p2 = pneg %p6706_p4 }
 0x109   : > { %p6712_p6 = pnand %p6710_p3, %p6707_p2 }
 0x10b   : > { %6715 = shalt.err (!%p6712_p6)
}
 0x10c   : > { %s6716_s21 = scalar_lea.vmem %s489_s30, 16  ;;  %s6723_s14 = scalar_lea.vmem %s489_s30, 32 }
 0x10d   : > { %p6717_p8 = scmp.ne.s32.totalorder %s489_s30, %s6716_s21  ;;  %p6724_p11 = scmp.lt.s32.totalorder %s489_s30, %s489_s30 }
 0x10e   : > { %p6725_p12 = scmp.lt.s32.totalorder %s6723_s14, %s6716_s21 }
 0x10f   : > { %p6719_p9 = pnand %p6717_p8, %p6927_p7 }
 0x110   : > { %p6726_p13 = por %p6725_p12, %p6724_p11 }
 0x111   : > { %p6720_p10 = pneg %p6719_p9 }
 0x113   : > { %p6727_p0 = pnand %p6726_p13, %p6720_p10 }
 0x115   : > { %6730 = shalt.err (!%p6727_p0)
}
 0x116   : > { %6309 = dma.hbm_to_vmem [thread:$0]  (!%p6911_p5), %s10569_s11, 16, %s489_s30, [#allocation17]  }
 0x117   : > { %s6731_s2 = scalar_lea.hbm %s10571_s13, 16 }
 0x118   : > { %p6732_p1 = scmp.ne.s32.totalorder %s10571_s13, %s6731_s2  ;;  %p6738_p3 = scmp.lt.u32.totalorder %s6731_s2, %s10571_s13 }
 0x11a   : > { %p6734_p4 = pnand %p6732_p1, %p6927_p7 }
 0x11c   : > { %p6735_p2 = pneg %p6734_p4 }
 0x11e   : > { %p6740_p6 = pnand %p6738_p3, %p6735_p2 }
 0x120   : > { %6743 = shalt.err (!%p6740_p6)
}
 0x121   : > { %s6744_s19 = scalar_lea.vmem %s503_s23, 16  ;;  %s6751_s30 = scalar_lea.vmem %s503_s23, 32 }
 0x122   : > { %p6745_p8 = scmp.ne.s32.totalorder %s503_s23, %s6744_s19  ;;  %p6752_p11 = scmp.lt.s32.totalorder %s503_s23, %s503_s23 }
 0x123   : > { %p6753_p12 = scmp.lt.s32.totalorder %s6751_s30, %s6744_s19 }
 0x124   : > { %p6747_p9 = pnand %p6745_p8, %p6927_p7 }
 0x125   : > { %p6754_p13 = por %p6753_p12, %p6752_p11 }
 0x126   : > { %p6748_p10 = pneg %p6747_p9 }
 0x128   : > { %p6755_p0 = pnand %p6754_p13, %p6748_p10 }
 0x12a   : > { %6758 = shalt.err (!%p6755_p0)
}
 0x12b   : > { %6312 = dma.hbm_to_vmem [thread:$0]  (!%p6911_p5), %s10571_s13, 16, %s503_s23, [#allocation20]  }
 0x12c   : > { %p10649_p1 = scmp.ne.s32.totalorder %s10643_s17, 0 }
 0x12e   : > { %523 = sbr.rel (%p10649_p1) target bundleno = 2367 (0x93f), region = 76 }
 0x135   : > { %p10650_p4 = scmp.eq.s32.totalorder %s6894_s16, 0 }
 0x137   : > { %6764 = dma.done.wait (%p10650_p4), [#allocation3], 27648   ;;  %p10651_p7 = pmov %p10650_p4 }
 0x138   : > { %p10652_p2 = pmov %p10650_p4 }
 0x139   : > { %6766 = vsyncadd (%p10651_p7), [#allocation3], 4294939648 }
 0x13a   : > { %6768 = dma.done.wait (%p10652_p2), [#allocation5], 32   ;;  %p10653_p3 = pmov %p10652_p2 }
 0x13b   : > { %p10654_p6 = pmov %p10652_p2 }
 0x13c   : > { %6770 = vsyncadd (%p10653_p3), [#allocation5], 4294967264 }
 0x13d   : > { %6772 = dma.done.wait (%p10654_p6), [#allocation8], 80   ;;  %p10655_p5 = pmov %p10652_p2 }
 0x13e   : > { %p10656_p8 = pmov %p10652_p2 }
 0x13f   : > { %6774 = vsyncadd (%p10655_p5), [#allocation8], 4294967216 }
 0x140   : > { %6776 = dma.done.wait (%p10656_p8), [#allocation11], 32   ;;  %p10657_p9 = pmov %p10652_p2 }
 0x141   : > { %p10658_p10 = pmov %p10652_p2 }
 0x142   : > { %6778 = vsyncadd (%p10657_p9), [#allocation11], 4294967264 }
 0x143   : > { %6780 = dma.done.wait (%p10658_p10), [#allocation14], 1040   ;;  %p10659_p11 = pmov %p10652_p2 }
 0x144   : > { %p10660_p12 = pmov %p10652_p2 }
 0x145   : > { %6782 = vsyncadd (%p10659_p11), [#allocation14], 4294966256 }
 0x146   : > { %6784 = dma.done.wait (%p10660_p12), [#allocation17], 32   ;;  %p10661_p13 = pmov %p10652_p2 }
 0x147   : > { %p10662_p0 = pmov %p10652_p2 }
 0x148   : > { %6786 = vsyncadd (%p10661_p13), [#allocation17], 4294967264 }
 0x149   : > { %6788 = dma.done.wait (%p10662_p0), [#allocation20], 16   ;;  %p10663_p1 = pmov %p10662_p0 }
 0x14a   : > { %p613_p4 = scmp.lt.s32.totalorder %s6894_s16, 1  ;;  %vm677_vm0 = vcmask 23552   ;;  %vm783_vm1 = vcmask 22528   ;;  %vm1433_vm2 = vcmask 1042432   ;;  %vm1772_vm3 = vcmask 523264   ;;  %s10823_s26 = sld [smem:[#allocation47_spill]] }
 0x14b   : > { %6790 = vsyncadd (%p10663_p1), [#allocation20], 4294967280  ;;  %vm1878_vm4 = vcmask 522240   ;;  %vm2724_vm5 = vcmask 1046528   ;;  %vm6812_vm6 = vmmov 1   ;;  %vm2561_vm8 = vcmask 384000  }
 0x14c   : > { %s10826_s16 = smov (!%p613_p4, %s6894_s16), 1  ;;  %vm6068_vm7 = vmpackc.low %vm2724_vm5, %vm6812_vm6 }
 0x14d   : > { %s6221_s17 = smul.u32 432, %s10826_s16 }
 0x14f   : > { %s7203_s23 = scalar_lea.vmem %s10558_s0, %s6221_s17 }
 0x150   : > { %v7206_v0 = vld [vmem:[%s7203_s23] sm:$0xff]  ;;  %v7209_v1 = vld [vmem:[%s7203_s23 + $0x8] sm:$0xff]  ;;  %v7212_v2 = vld [vmem:[%s7203_s23 + $0x10] sm:$0xff]  ;;  %s10338_s24 = scalar_lea.vmem %s10823_s26, %s6221_s17 }
 0x151   : > { %v7215_v3 = vld [vmem:[%s7203_s23 + $0x18] sm:$0xff]  ;;  %v678_v4 = vsel %vm677_vm0, %v7206_v0, 0.0  ;;  %v679_v5 = vsel %vm677_vm0, %v7209_v1, 0.0  ;;  %v681_v6 = vsel %vm677_vm0, %v7212_v2, 0.0  ;;  %v7224_v7 = vld [vmem:[%s7203_s23 + $0x20] sm:$0xff]  ;;  %v7229_v10 = vld [vmem:[%s7203_s23 + $0x28] sm:$0xff]  ;;  %v798_v46 = vmul.f32 %v7206_v0, %v7206_v0 }
 0x152   : > { %v680_v8 = vadd.f32 %v679_v5, %v678_v4  ;;  %v683_v9 = vsel %vm677_vm0, %v7215_v3, 0.0  ;;  %v685_v12 = vsel %vm677_vm0, %v7224_v7, 0.0  ;;  %v7234_v13 = vld [vmem:[%s7203_s23 + $0x30] sm:$0xff]  ;;  %v687_v15 = vsel %vm677_vm0, %v7229_v10, 0.0  ;;  %v7239_v16 = vld [vmem:[%s7203_s23 + $0x38] sm:$0xff]  ;;  %v7244_v19 = vld [vmem:[%s7203_s23 + $0x40] sm:$0xff] }
 0x153   : > { %v689_v18 = vsel %vm677_vm0, %v7234_v13, 0.0  ;;  %v691_v21 = vsel %vm677_vm0, %v7239_v16, 0.0  ;;  %v7249_v22 = vld [vmem:[%s7203_s23 + $0x48] sm:$0xff]  ;;  %v693_v24 = vsel %vm677_vm0, %v7244_v19, 0.0  ;;  %v7254_v25 = vld [vmem:[%s7203_s23 + $0x50] sm:$0xff]  ;;  %v7259_v28 = vld [vmem:[%s7203_s23 + $0x58] sm:$0xff]  ;;  %v799_v49 = vmul.f32 %v7209_v1, %v7209_v1 }
 0x154   : > { %v682_v11 = vadd.f32 %v681_v6, %v680_v8  ;;  %v695_v27 = vsel %vm677_vm0, %v7249_v22, 0.0  ;;  %v697_v30 = vsel %vm677_vm0, %v7254_v25, 0.0  ;;  %v7264_v31 = vld [vmem:[%s7203_s23 + $0x60] sm:$0xff]  ;;  %v699_v33 = vsel %vm677_vm0, %v7259_v28, 0.0  ;;  %v7269_v34 = vld [vmem:[%s7203_s23 + $0x68] sm:$0xff]  ;;  %v7274_v37 = vld [vmem:[%s7203_s23 + $0x70] sm:$0xff] }
 0x155   : > { %v701_v36 = vsel %vm677_vm0, %v7264_v31, 0.0  ;;  %v703_v39 = vsel %vm677_vm0, %v7269_v34, 0.0  ;;  %v7279_v40 = vld [vmem:[%s7203_s23 + $0x78] sm:$0xff]  ;;  %v705_v42 = vsel %vm677_vm0, %v7274_v37, 0.0  ;;  %v7284_v43 = vld [vmem:[%s7203_s23 + $0x80] sm:$0xff]  ;;  %v7291_v47 = vld [vmem:[%s7203_s23 + $0x88] sm:$0xff]  ;;  %v800_v50 = vmul.f32 %v7212_v2, %v7212_v2 }
 0x156   : > { %v684_v14 = vadd.f32 %v683_v9, %v682_v11  ;;  %v707_v45 = vsel %vm677_vm0, %v7279_v40, 0.0  ;;  %v709_v51 = vsel %vm677_vm0, %v7284_v43, 0.0  ;;  %v7300_v52 = vld [vmem:[%s7203_s23 + $0x90] sm:$0xff]  ;;  %v801_v54 = vmul.f32 %v7215_v3, %v7215_v3  ;;  %v7308_v57 = vld [vmem:[%s7203_s23 + $0x98] sm:$0xff]  ;;  %v7317_v4 = vld [vmem:[%s7203_s23 + $0xa0] sm:$0xff] }
 0x157   : > { %v711_v55 = vsel %vm677_vm0, %v7291_v47, 0.0  ;;  %v852_v56 = vsel %vm677_vm0, %v798_v46, 0.0  ;;  %v802_v59 = vmul.f32 %v7224_v7, %v7224_v7  ;;  %v853_v60 = vsel %vm677_vm0, %v799_v49, 0.0 }
 0x158   : > { %v686_v17 = vadd.f32 %v685_v12, %v684_v14  ;;  %v855_v61 = vsel %vm677_vm0, %v800_v50, 0.0  ;;  %v713_v62 = vsel %vm677_vm0, %v7300_v52, 0.0  ;;  %v854_v63 = vadd.f32 %v853_v60, %v852_v56  ;;  %v7325_v12 = vld [vmem:[%s7203_s23 + $0xa8] sm:$0xff] }
 0x159   : > { %v803_v6 = vmul.f32 %v7229_v10, %v7229_v10  ;;  %v857_v8 = vsel %vm677_vm0, %v801_v54, 0.0  ;;  %v715_v9 = vsel %vm677_vm0, %v7308_v57, 0.0  ;;  %v808_v50 = vmul.f32 %v7254_v25, %v7254_v25 }
 0x15a   : > { %v688_v20 = vadd.f32 %v687_v15, %v686_v17  ;;  %v856_v11 = vadd.f32 %v855_v61, %v854_v63  ;;  %v804_v15 = vmul.f32 %v7234_v13, %v7234_v13  ;;  %v859_v17 = vsel %vm677_vm0, %v802_v59, 0.0 }
 0x15c   : > { %v690_v23 = vadd.f32 %v689_v18, %v688_v20  ;;  %v717_v18 = vsel %vm677_vm0, %v7317_v4, 0.0  ;;  %v858_v20 = vadd.f32 %v857_v8, %v856_v11  ;;  %v7381_v11 = vld [vmem:[%s7203_s23 + $0xe0] sm:$0xff] }
 0x15e   : > { %v692_v26 = vadd.f32 %v691_v21, %v690_v23  ;;  %v7333_v21 = vld [vmem:[%s7203_s23 + $0xb0] sm:$0xff] }
 0x160   : > { %v694_v29 = vadd.f32 %v693_v24, %v692_v26  ;;  %v805_v24 = vmul.f32 %v7239_v16, %v7239_v16  ;;  %v861_v26 = vsel %vm677_vm0, %v803_v6, 0.0  ;;  %v871_v6 = vsel %vm677_vm0, %v808_v50, 0.0 }
 0x162   : > { %v696_v32 = vadd.f32 %v695_v27, %v694_v29  ;;  %v719_v27 = vsel %vm677_vm0, %v7325_v12, 0.0  ;;  %v860_v29 = vadd.f32 %v859_v17, %v858_v20 }
 0x164   : > { %v698_v35 = vadd.f32 %v697_v30, %v696_v32  ;;  %v7341_v30 = vld [vmem:[%s7203_s23 + $0xb8] sm:$0xff] }
 0x166   : > { %v700_v38 = vadd.f32 %v699_v33, %v698_v35  ;;  %v806_v33 = vmul.f32 %v7244_v19, %v7244_v19  ;;  %v863_v35 = vsel %vm677_vm0, %v804_v15, 0.0  ;;  %v811_v15 = vmul.f32 %v7269_v34, %v7269_v34 }
 0x168   : > { %v702_v41 = vadd.f32 %v701_v36, %v700_v38  ;;  %v721_v36 = vsel %vm677_vm0, %v7333_v21, 0.0  ;;  %v862_v38 = vadd.f32 %v861_v26, %v860_v29  ;;  %v812_v26 = vmul.f32 %v7274_v37, %v7274_v37 }
 0x169   : > { %v733_v29 = vsel %vm677_vm0, %v7381_v11, 0.0 }
 0x16a   : > { %v704_v44 = vadd.f32 %v703_v39, %v702_v41  ;;  %v7349_v39 = vld [vmem:[%s7203_s23 + $0xc0] sm:$0xff]  ;;  %v864_v46 = vadd.f32 %v863_v35, %v862_v38  ;;  %v877_v38 = vsel %vm677_vm0, %v811_v15, 0.0 }
 0x16c   : > { %v706_v48 = vadd.f32 %v705_v42, %v704_v44  ;;  %v807_v42 = vmul.f32 %v7249_v22, %v7249_v22  ;;  %v865_v44 = vsel %vm677_vm0, %v805_v24, 0.0 }
 0x16d   : > { %v866_v54 = vadd.f32 %v865_v44, %v864_v46  ;;  %v7405_v44 = vld [vmem:[%s7203_s23 + $0xf8] sm:$0xff]  ;;  %v814_v46 = vmul.f32 %v7284_v43, %v7284_v43 }
 0x16e   : > { %v708_v53 = vadd.f32 %v707_v45, %v706_v48  ;;  %v723_v45 = vsel %vm677_vm0, %v7341_v30, 0.0  ;;  %v7357_v48 = vld [vmem:[%s7203_s23 + $0xc8] sm:$0xff]  ;;  %v869_v59 = vsel %vm677_vm0, %v807_v42, 0.0  ;;  %10665 = vst [vmem:[#allocation30_spill] sm:$0xff] %v7405_v44 }
 0x16f   : > { %v727_v60 = vsel %vm677_vm0, %v7357_v48, 0.0 }
 0x170   : > { %v710_v58 = vadd.f32 %v709_v51, %v708_v53  ;;  %v867_v51 = vsel %vm677_vm0, %v806_v33, 0.0  ;;  %v725_v53 = vsel %vm677_vm0, %v7349_v39, 0.0  ;;  %v7397_v33 = vld [vmem:[%s7203_s23 + $0xf0] sm:$0xff] }
 0x171   : > { %v868_v61 = vadd.f32 %v867_v51, %v866_v54  ;;  %10664 = vst [vmem:[#allocation29_spill] sm:$0xff] %v7397_v33  ;;  %v737_v50 = vsel %vm677_vm0, %v7397_v33, 0.0 }
 0x172   : > { %v712_v5 = vadd.f32 %v711_v55, %v710_v58  ;;  %v7365_v55 = vld [vmem:[%s7203_s23 + $0xd0] sm:$0xff]  ;;  %v809_v58 = vmul.f32 %v7259_v28, %v7259_v28 }
 0x173   : > { %v729_v8 = vsel %vm677_vm0, %v7365_v55, 0.0 }
 0x174   : > { %v714_v14 = vadd.f32 %v713_v62, %v712_v5  ;;  %v7373_v62 = vld [vmem:[%s7203_s23 + $0xd8] sm:$0xff]  ;;  %v810_v5 = vmul.f32 %v7264_v31, %v7264_v31  ;;  %v873_v17 = vsel %vm677_vm0, %v809_v58, 0.0 }
 0x176   : > { %v716_v23 = vadd.f32 %v715_v9, %v714_v14  ;;  %v870_v9 = vadd.f32 %v869_v59, %v868_v61  ;;  %v739_v59 = vsel %vm677_vm0, %v7405_v44, 0.0  ;;  %v7421_v61 = vld [vmem:[%s7203_s23 + $0x108] sm:$0xff] }
 0x177   : > { %10667 = vst [vmem:[#allocation32_spill] sm:$0xff] %v7421_v61 }
 0x178   : > { %v718_v32 = vadd.f32 %v717_v18, %v716_v23  ;;  %v731_v18 = vsel %vm677_vm0, %v7373_v62, 0.0  ;;  %v872_v20 = vadd.f32 %v871_v6, %v870_v9  ;;  %v7389_v23 = vld [vmem:[%s7203_s23 + $0xe8] sm:$0xff]  ;;  %v883_v6 = vsel %vm677_vm0, %v814_v46, 0.0 }
 0x17a   : > { %v720_v41 = vadd.f32 %v719_v27, %v718_v32  ;;  %v875_v27 = vsel %vm677_vm0, %v810_v5, 0.0  ;;  %v874_v32 = vadd.f32 %v873_v17, %v872_v20  ;;  %v816_v5 = vmul.f32 %v7300_v52, %v7300_v52 }
 0x17b   : > { %v817_v17 = vmul.f32 %v7308_v57, %v7308_v57  ;;  %v743_v20 = vsel %vm677_vm0, %v7421_v61, 0.0 }
 0x17c   : > { %v722_v49 = vadd.f32 %v721_v36, %v720_v41  ;;  %v813_v36 = vmul.f32 %v7279_v40, %v7279_v40  ;;  %v735_v41 = vsel %vm677_vm0, %v7389_v23, 0.0  ;;  %v876_v42 = vadd.f32 %v875_v27, %v874_v32 }
 0x17d   : > { %v887_v32 = vsel %vm677_vm0, %v816_v5, 0.0  ;;  %v821_v5 = vmul.f32 %v7341_v30, %v7341_v30 }
 0x17e   : > { %v724_v56 = vadd.f32 %v723_v45, %v722_v49  ;;  %v879_v49 = vsel %vm677_vm0, %v812_v26, 0.0  ;;  %v878_v51 = vadd.f32 %v877_v38, %v876_v42  ;;  %v881_v58 = vsel %vm677_vm0, %v813_v36, 0.0  ;;  %v7437_v26 = vld [vmem:[%s7203_s23 + $0x118] sm:$0xff]  ;;  %v7445_v38 = vld [vmem:[%s7203_s23 + $0x120] sm:$0xff] }
 0x17f   : > { %10669 = vst [vmem:[#allocation34_spill] sm:$0xff] %v7437_v26  ;;  %10670 = vst [vmem:[#allocation35_spill] sm:$0xff] %v7445_v38  ;;  %v819_v42 = vmul.f32 %v7325_v12, %v7325_v12  ;;  %v747_v46 = vsel %vm677_vm0, %v7437_v26, 0.0 }
 0x180   : > { %v726_v63 = vadd.f32 %v725_v53, %v724_v56  ;;  %v7413_v53 = vld [vmem:[%s7203_s23 + $0x100] sm:$0xff]  ;;  %v815_v56 = vmul.f32 %v7291_v47, %v7291_v47 }
 0x181   : > { %10666 = vst [vmem:[#allocation31_spill] sm:$0xff] %v7413_v53 }
 0x182   : > { %v728_v14 = vadd.f32 %v727_v60, %v726_v63  ;;  %v880_v60 = vadd.f32 %v879_v49, %v878_v51 }
 0x184   : > { %v730_v24 = vadd.f32 %v729_v8, %v728_v14  ;;  %v741_v8 = vsel %vm677_vm0, %v7413_v53, 0.0  ;;  %v882_v9 = vadd.f32 %v881_v58, %v880_v60  ;;  %v7429_v14 = vld [vmem:[%s7203_s23 + $0x110] sm:$0xff]  ;;  %v749_v58 = vsel %vm677_vm0, %v7445_v38, 0.0 }
 0x185   : > { %10668 = vst [vmem:[#allocation33_spill] sm:$0xff] %v7429_v14  ;;  %v7461_v60 = vld [vmem:[%s7203_s23 + $0x130] sm:$0xff] }
 0x186   : > { %v732_v35 = vadd.f32 %v731_v18, %v730_v24  ;;  %v885_v18 = vsel %vm677_vm0, %v815_v56, 0.0  ;;  %v884_v24 = vadd.f32 %v883_v6, %v882_v9  ;;  %10672 = vst [vmem:[#allocation37_spill] sm:$0xff] %v7461_v60  ;;  %v893_v6 = vsel %vm677_vm0, %v819_v42, 0.0 }
 0x188   : > { %v734_v45 = vadd.f32 %v733_v29, %v732_v35  ;;  %v818_v29 = vmul.f32 %v7317_v4, %v7317_v4  ;;  %v745_v35 = vsel %vm677_vm0, %v7429_v14, 0.0  ;;  %v886_v36 = vadd.f32 %v885_v18, %v884_v24 }
 0x189   : > { %v822_v18 = vmul.f32 %v7349_v39, %v7349_v39  ;;  %v753_v24 = vsel %vm677_vm0, %v7461_v60, 0.0 }
 0x18a   : > { %v736_v54 = vadd.f32 %v735_v41, %v734_v45  ;;  %v889_v45 = vsel %vm677_vm0, %v817_v17, 0.0  ;;  %v888_v49 = vadd.f32 %v887_v32, %v886_v36  ;;  %v891_v56 = vsel %vm677_vm0, %v818_v29, 0.0  ;;  %v7477_v29 = vld [vmem:[%s7203_s23 + $0x140] sm:$0xff] }
 0x18b   : > { %v897_v36 = vsel %vm677_vm0, %v821_v5, 0.0 }
 0x18c   : > { %v738_v63 = vadd.f32 %v737_v50, %v736_v54  ;;  %v7453_v50 = vld [vmem:[%s7203_s23 + $0x128] sm:$0xff]  ;;  %v820_v54 = vmul.f32 %v7333_v21, %v7333_v21 }
 0x18d   : > { %10671 = vst [vmem:[#allocation36_spill] sm:$0xff] %v7453_v50 }
 0x18e   : > { %v740_v15 = vadd.f32 %v739_v59, %v738_v63  ;;  %v890_v59 = vadd.f32 %v889_v45, %v888_v49  ;;  %v7485_v45 = vld [vmem:[%s7203_s23 + $0x148] sm:$0xff]  ;;  %v824_v49 = vmul.f32 %v7365_v55, %v7365_v55 }
 0x190   : > { %v742_v27 = vadd.f32 %v741_v8, %v740_v15  ;;  %v751_v8 = vsel %vm677_vm0, %v7453_v50, 0.0  ;;  %v892_v9 = vadd.f32 %v891_v56, %v890_v59  ;;  %v7469_v15 = vld [vmem:[%s7203_s23 + $0x138] sm:$0xff] }
 0x192   : > { %v744_v41 = vadd.f32 %v743_v20, %v742_v27  ;;  %v895_v20 = vsel %vm677_vm0, %v820_v54, 0.0  ;;  %v894_v27 = vadd.f32 %v893_v6, %v892_v9  ;;  %v757_v54 = vsel %vm677_vm0, %v7477_v29, 0.0  ;;  %v7501_v9 = vld [vmem:[%s7203_s23 + $0x158] sm:$0xff] }
 0x193   : > { %v759_v6 = vsel %vm677_vm0, %v7485_v45, 0.0 }
 0x194   : > { %v746_v51 = vadd.f32 %v745_v35, %v744_v41  ;;  %v823_v35 = vmul.f32 %v7357_v48, %v7357_v48  ;;  %v755_v41 = vsel %vm677_vm0, %v7469_v15, 0.0  ;;  %v896_v42 = vadd.f32 %v895_v20, %v894_v27 }
 0x195   : > { %v903_v20 = vsel %vm677_vm0, %v824_v49, 0.0 }
 0x196   : > { %v748_v63 = vadd.f32 %v747_v46, %v746_v51  ;;  %v899_v51 = vsel %vm677_vm0, %v822_v18, 0.0  ;;  %v898_v56 = vadd.f32 %v897_v36, %v896_v42  ;;  %v901_v5 = vsel %vm677_vm0, %v823_v35, 0.0 }
 0x197   : > { %v826_v18 = vmul.f32 %v7381_v11, %v7381_v11  ;;  %v827_v36 = vmul.f32 %v7389_v23, %v7389_v23  ;;  %v763_v42 = vsel %vm677_vm0, %v7501_v9, 0.0 }
 0x198   : > { %v750_v17 = vadd.f32 %v749_v58, %v748_v63  ;;  %v7493_v58 = vld [vmem:[%s7203_s23 + $0x150] sm:$0xff]  ;;  %v825_v63 = vmul.f32 %v7373_v62, %v7373_v62 }
 0x19a   : > { %v752_v32 = vadd.f32 %v751_v8, %v750_v17  ;;  %v900_v8 = vadd.f32 %v899_v51, %v898_v56  ;;  %v7517_v51 = vld [vmem:[%s7203_s23 + $0x168] sm:$0xff]  ;;  %v907_v56 = vsel %vm677_vm0, %v826_v18, 0.0 }
 0x19c   : > { %v754_v46 = vadd.f32 %v753_v24, %v752_v32  ;;  %v761_v24 = vsel %vm677_vm0, %v7493_v58, 0.0  ;;  %v902_v27 = vadd.f32 %v901_v5, %v900_v8  ;;  %v7509_v32 = vld [vmem:[%s7203_s23 + $0x160] sm:$0xff]  ;;  %v829_v8 = vmul.f32 %v7405_v44, %v7405_v44 }
 0x19d   : > { %v831_v44 = vmul.f32 %v7421_v61, %v7421_v61  ;;  %v833_v61 = vmul.f32 %v7437_v26, %v7437_v26 }
 0x19e   : > { %v756_v59 = vadd.f32 %v755_v41, %v754_v46  ;;  %v905_v41 = vsel %vm677_vm0, %v825_v63, 0.0  ;;  %v904_v46 = vadd.f32 %v903_v20, %v902_v27  ;;  %v767_v20 = vsel %vm677_vm0, %v7517_v51, 0.0  ;;  %v7533_v27 = vld [vmem:[%s7203_s23 + $0x178] sm:$0xff] }
 0x1a0   : > { %v758_v17 = vadd.f32 %v757_v54, %v756_v59  ;;  %v828_v54 = vmul.f32 %v7397_v33, %v7397_v33  ;;  %v765_v59 = vsel %vm677_vm0, %v7509_v32, 0.0  ;;  %v906_v5 = vadd.f32 %v905_v41, %v904_v46 }
 0x1a2   : > { %v760_v35 = vadd.f32 %v759_v6, %v758_v17  ;;  %v7525_v6 = vld [vmem:[%s7203_s23 + $0x170] sm:$0xff]  ;;  %v909_v17 = vsel %vm677_vm0, %v827_v36, 0.0  ;;  %v911_v41 = vsel %vm677_vm0, %v828_v54, 0.0 }
 0x1a4   : > { %v762_v49 = vadd.f32 %v761_v24, %v760_v35  ;;  %v908_v24 = vadd.f32 %v907_v56, %v906_v5  ;;  %v830_v35 = vmul.f32 %v7413_v53, %v7413_v53  ;;  %v913_v56 = vsel %vm677_vm0, %v829_v8, 0.0 }
 0x1a5   : > { %v832_v53 = vmul.f32 %v7429_v14, %v7429_v14  ;;  %v834_v14 = vmul.f32 %v7445_v38, %v7445_v38 }
 0x1a6   : > { %v764_v63 = vadd.f32 %v763_v42, %v762_v49  ;;  %v769_v42 = vsel %vm677_vm0, %v7525_v6, 0.0  ;;  %v910_v46 = vadd.f32 %v909_v17, %v908_v24  ;;  %v7541_v49 = vld [vmem:[%s7203_s23 + $0x180] sm:$0xff]  ;;  %v915_v17 = vsel %vm677_vm0, %v830_v35, 0.0 }
 0x1a8   : > { %v766_v18 = vadd.f32 %v765_v59, %v764_v63  ;;  %v771_v59 = vsel %vm677_vm0, %v7533_v27, 0.0  ;;  %v912_v5 = vadd.f32 %v911_v41, %v910_v46  ;;  %v7549_v63 = vld [vmem:[%s7203_s23 + $0x188] sm:$0xff]  ;;  %v917_v41 = vsel %vm677_vm0, %v831_v44, 0.0 }
 0x1a9   : > { %10673 = vst [vmem:[#allocation38_spill] sm:$0xff] %v7549_v63  ;;  %v835_v44 = vmul.f32 %v7453_v50, %v7453_v50 }
 0x1aa   : > { %v768_v36 = vadd.f32 %v767_v20, %v766_v18  ;;  %v773_v20 = vsel %vm677_vm0, %v7541_v49, 0.0  ;;  %v914_v24 = vadd.f32 %v913_v56, %v912_v5  ;;  %v7557_v18 = vld [vmem:[%s7203_s23 + $0x190] sm:$0xff]  ;;  %v919_v56 = vsel %vm677_vm0, %v832_v53, 0.0 }
 0x1ab   : > { %10674 = vst [vmem:[#allocation39_spill] sm:$0xff] %v7557_v18  ;;  %v836_v53 = vmul.f32 %v7461_v60, %v7461_v60  ;;  %v925_v50 = vsel %vm677_vm0, %v835_v44, 0.0  ;;  %v840_v44 = vmul.f32 %v7493_v58, %v7493_v58 }
 0x1ac   : > { %v770_v54 = vadd.f32 %v769_v42, %v768_v36  ;;  %v775_v42 = vsel %vm677_vm0, %v7549_v63, 0.0  ;;  %v916_v46 = vadd.f32 %v915_v17, %v914_v24  ;;  %v7565_v36 = vld [vmem:[%s7203_s23 + $0x198] sm:$0xff]  ;;  %v921_v17 = vsel %vm677_vm0, %v833_v61, 0.0 }
 0x1ad   : > { %v837_v61 = vmul.f32 %v7469_v15, %v7469_v15 }
 0x1ae   : > { %v772_v8 = vadd.f32 %v771_v59, %v770_v54  ;;  %v777_v59 = vsel %vm677_vm0, %v7557_v18, 0.0  ;;  %v918_v5 = vadd.f32 %v917_v41, %v916_v46  ;;  %v7573_v54 = vld [vmem:[%s7203_s23 + $0x1a0] sm:$0xff]  ;;  %v923_v41 = vsel %vm677_vm0, %v834_v14, 0.0 }
 0x1af   : > { %v927_v14 = vsel %vm677_vm0, %v836_v53, 0.0 }
 0x1b0   : > { %v774_v35 = vadd.f32 %v773_v20, %v772_v8  ;;  %v779_v20 = vsel %vm677_vm0, %v7565_v36, 0.0  ;;  %v920_v24 = vadd.f32 %v919_v56, %v918_v5  ;;  %v7581_v8 = vld [vmem:[%s7203_s23 + $0x1a8] sm:$0x7f]  ;;  %v838_v5 = vmul.f32 %v7477_v29, %v7477_v29 }
 0x1b1   : > { %v784_v56 = vsel %vm783_vm1, %v7581_v8, 0.0 }
 0x1b2   : > { %v776_v26 = vadd.f32 %v775_v42, %v774_v35  ;;  %v781_v42 = vsel %vm677_vm0, %v7573_v54, 0.0  ;;  %v922_v46 = vadd.f32 %v921_v17, %v920_v24  ;;  %v929_v17 = vsel %vm677_vm0, %v837_v61, 0.0 }
 0x1b3   : > { %v931_v24 = vsel %vm677_vm0, %v838_v5, 0.0 }
 0x1b4   : > { %v778_v38 = vadd.f32 %v777_v59, %v776_v26  ;;  %v924_v26 = vadd.f32 %v923_v41, %v922_v46  ;;  %v842_v46 = vmul.f32 %v7509_v32, %v7509_v32 }
 0x1b6   : > { %v780_v35 = vadd.f32 %v779_v20, %v778_v38  ;;  %v926_v60 = vadd.f32 %v925_v50, %v924_v26  ;;  %v839_v38 = vmul.f32 %v7485_v45, %v7485_v45  ;;  %v844_v26 = vmul.f32 %v7525_v6, %v7525_v6 }
 0x1b8   : > { %v782_v59 = vadd.f32 %v781_v42, %v780_v35  ;;  %v928_v20 = vadd.f32 %v927_v14, %v926_v60  ;;  %v841_v42 = vmul.f32 %v7501_v9, %v7501_v9  ;;  %v933_v53 = vsel %vm677_vm0, %v839_v38, 0.0 }
 0x1b9   : > { %v935_v35 = vsel %vm677_vm0, %v840_v44, 0.0  ;;  %v845_v14 = vmul.f32 %v7533_v27, %v7533_v27  ;;  %v943_v44 = vsel %vm677_vm0, %v844_v26, 0.0 }
 0x1ba   : > { %v785_v33 = vadd.f32 %v784_v56, %v782_v59  ;;  %v930_v41 = vadd.f32 %v929_v17, %v928_v20  ;;  %v937_v60 = vsel %vm677_vm0, %v841_v42, 0.0  ;;  %v939_v59 = vsel %vm677_vm0, %v842_v46, 0.0 }
 0x1bb   : > { %v846_v20 = vmul.f32 %v7541_v49, %v7541_v49  ;;  %v945_v42 = vsel %vm677_vm0, %v845_v14, 0.0 }
 0x1bc   : > { %786 = vadd.xlane.f32.xlu0 %v785_v33  ;;  %v932_v50 = vadd.f32 %v931_v24, %v930_v41  ;;  %v843_v33 = vmul.f32 %v7517_v51, %v7517_v51  ;;  %v847_v41 = vmul.f32 %v7549_v63, %v7549_v63 }
 0x1bd   : > { %v947_v46 = vsel %vm677_vm0, %v846_v20, 0.0 }
 0x1be   : > { %v934_v61 = vadd.f32 %v933_v53, %v932_v50  ;;  %v941_v38 = vsel %vm677_vm0, %v843_v33, 0.0  ;;  %v848_v50 = vmul.f32 %v7557_v18, %v7557_v18  ;;  %v949_v33 = vsel %vm677_vm0, %v847_v41, 0.0 }
 0x1c0   : > { %v936_v56 = vadd.f32 %v935_v35, %v934_v61  ;;  %v849_v61 = vmul.f32 %v7565_v36, %v7565_v36  ;;  %v951_v26 = vsel %vm677_vm0, %v848_v50, 0.0 }
 0x1c2   : > { %v938_v5 = vadd.f32 %v937_v60, %v936_v56  ;;  %v850_v56 = vmul.f32 %v7573_v54, %v7573_v54  ;;  %v953_v14 = vsel %vm677_vm0, %v849_v61, 0.0 }
 0x1c4   : > { %v940_v17 = vadd.f32 %v939_v59, %v938_v5  ;;  %v851_v5 = vmul.f32 %v7581_v8, %v7581_v8 }
 0x1c6   : > { %v942_v24 = vadd.f32 %v941_v38, %v940_v17  ;;  %v955_v17 = vsel %vm677_vm0, %v850_v56, 0.0 }
 0x1c8   : > { %v944_v53 = vadd.f32 %v943_v44, %v942_v24  ;;  %v957_v44 = vsel %vm783_vm1, %v851_v5, 0.0 }
 0x1ca   : > { %v946_v35 = vadd.f32 %v945_v42, %v944_v53 }
 0x1cc   : > { %v948_v60 = vadd.f32 %v947_v46, %v946_v35 }
 0x1ce   : > { %v950_v59 = vadd.f32 %v949_v33, %v948_v60 }
 0x1d0   : > { %v952_v38 = vadd.f32 %v951_v26, %v950_v59  ;;  %v1263_v26 = vld [vmem:[#allocation7] sm:$0x7] }
 0x1d1   : > { %5711 = vmatprep.subr.msk.mxu0 %vm1433_vm2, %v1263_v26 }
 0x1d2   : > { %v954_v20 = vadd.f32 %v953_v14, %v952_v38  ;;  %5712 = vmatpush3.msk.msra.mxu0 %vm1433_vm2, %v1263_v26 }
 0x1d4   : > { %v956_v24 = vadd.f32 %v955_v17, %v954_v20 }
 0x1d6   : > { %v958_v41 = vadd.f32 %v957_v44, %v956_v24 }
 0x1d8   : > { %959 = vadd.xlane.f32.xlu0 %v958_v41 }
 0x249   : > { %v787_v42 = vpop.xlane.xlu0 %786 }
 0x24a   : > { %v788_v53 = vrot.slane %v787_v42, 4 }
 0x24c   : > { %v789_v46 = vadd.f32 %v788_v53, %v787_v42 }
 0x24e   : > { %v790_v35 = vrot.slane %v789_v46, 2 }
 0x250   : > { %v791_v50 = vadd.f32 %v790_v35, %v789_v46 }
 0x252   : > { %v792_v33 = vrot.slane %v791_v50, 1 }
 0x254   : > { %v793_v60 = vadd.f32 %v792_v33, %v791_v50  ;;  %v7661_v50 = vld [vmem:[#allocation4] ss:$0 sm:$0xff] }
 0x256   : > { %6222 = vpush %v793_v60  ;;  %v7675_v60 = vld [vmem:[#allocation6] ss:$0 sm:$0xff] }
 0x265   : > { %v960_v18 = vpop.xlane.xlu0 %959 }
 0x266   : > { %v961_v63 = vrot.slane %v960_v18, 4 }
 0x268   : > { %v962_v61 = vadd.f32 %v961_v63, %v960_v18 }
 0x26a   : > { %v963_v56 = vrot.slane %v962_v61, 2 }
 0x26c   : > { %v964_v59 = vadd.f32 %v963_v56, %v962_v61 }
 0x26e   : > { %v965_v5 = vrot.slane %v964_v59, 1 }
 0x270   : > { %v966_v14 = vadd.f32 %v965_v5, %v964_v59 }
 0x272   : > { %6224 = vpush %v966_v14 }
 0x287   : > { %s6223_s21 = spop %6222 }
 0x288   : > { %s797_s14 = smul.f32 0.0007733952, %s6223_s21 }
 0x28a   : > { %s971_s28 = smul.f32 %s797_s14, %s797_s14  ;;  %v7637_v63 = vstv %s797_s14 }
 0x28b   : > { %v1027_v44 = vsub.f32 %v7581_v8, %v7637_v63  ;;  %v974_v24 = vsub.f32 %v7206_v0, %v7637_v63  ;;  %v975_v41 = vsub.f32 %v7209_v1, %v7637_v63  ;;  %v976_v42 = vsub.f32 %v7212_v2, %v7637_v63 }
 0x28c   : > { %v977_v53 = vsub.f32 %v7215_v3, %v7637_v63  ;;  %v978_v46 = vsub.f32 %v7224_v7, %v7637_v63  ;;  %v979_v35 = vsub.f32 %v7229_v10, %v7637_v63  ;;  %v980_v8 = vsub.f32 %v7234_v13, %v7637_v63 }
 0x28d   : > { %v981_v1 = vsub.f32 %v7239_v16, %v7637_v63  ;;  %v982_v2 = vsub.f32 %v7244_v19, %v7637_v63  ;;  %v983_v3 = vsub.f32 %v7249_v22, %v7637_v63  ;;  %v984_v19 = vsub.f32 %v7254_v25, %v7637_v63 }
 0x28e   : > { %v985_v22 = vsub.f32 %v7259_v28, %v7637_v63  ;;  %v986_v5 = vsub.f32 %v7264_v31, %v7637_v63  ;;  %v987_v25 = vsub.f32 %v7269_v34, %v7637_v63  ;;  %v988_v31 = vsub.f32 %v7274_v37, %v7637_v63 }
 0x28f   : > { %v991_v34 = vsub.f32 %v7291_v47, %v7637_v63 }
 0x2a3   : > { %s6225_s29 = spop %6224 }
 0x2a4   : > { %s970_s27 = smul.f32 0.0007733952, %s6225_s29 }
 0x2a6   : > { %s972_s4 = ssub.f32 %s970_s27, %s971_s28 }
 0x2a8   : > { %s1028_s2 = sadd.f32 1e-05, %s972_s4 }
 0x2aa   : > { %v1029_v38 = vstv %s1028_s2 }
 0x2ab   : > { %6363 = vrsqrt.f32 %v1029_v38 }
 0x2b5   : > { %v6364_v17 = vpop.eup %6363 }
 0x2b6   : > { %6226 = vpush %v6364_v17 }
 0x2e7   : > { %s6227_s25 = spop %6226 }
 0x2e8   : > { %v7659_v0 = vstv %s6227_s25 }
 0x2e9   : > { %v7670_v7 = vmul.f32 %v7659_v0, %v1027_v44  ;;  %v1033_v10 = vmul.f32 %v7659_v0, %v974_v24  ;;  %v1034_v13 = vmul.f32 %v7659_v0, %v975_v41  ;;  %v1035_v33 = vmul.f32 %v7659_v0, %v976_v42 }
 0x2ea   : > { %v1036_v61 = vmul.f32 %v7659_v0, %v977_v53  ;;  %v1037_v16 = vmul.f32 %v7659_v0, %v978_v46  ;;  %v1038_v38 = vmul.f32 %v7659_v0, %v979_v35  ;;  %v1039_v17 = vmul.f32 %v7659_v0, %v980_v8 }
 0x2eb   : > { %v1094_v26 = vmul.f32 %v7661_v50, %v1033_v10  ;;  %v1095_v56 = vmul.f32 %v7661_v50, %v1034_v13  ;;  %v1096_v59 = vmul.f32 %v7661_v50, %v1035_v33  ;;  %v989_v42 = vsub.f32 %v7279_v40, %v7637_v63 }
 0x2ec   : > { %v1097_v14 = vmul.f32 %v7661_v50, %v1036_v61  ;;  %v1098_v41 = vmul.f32 %v7661_v50, %v1037_v16  ;;  %v990_v53 = vsub.f32 %v7284_v43, %v7637_v63  ;;  %v992_v8 = vsub.f32 %v7300_v52, %v7637_v63 }
 0x2ed   : > { %v1155_v28 = vadd.f32 %v7675_v60, %v1094_v26  ;;  %v1156_v44 = vadd.f32 %v7675_v60, %v1095_v56  ;;  %v1157_v24 = vadd.f32 %v7675_v60, %v1096_v59  ;;  %v993_v10 = vsub.f32 %v7308_v57, %v7637_v63 }
 0x2ee   : > { %v1158_v13 = vadd.f32 %v7675_v60, %v1097_v14  ;;  %v1099_v37 = vmul.f32 %v7661_v50, %v1038_v38  ;;  %v1040_v40 = vmul.f32 %v7659_v0, %v981_v1  ;;  %v994_v33 = vsub.f32 %v7317_v4, %v7637_v63  ;;  %v10680_v14 = vld [vmem:[#allocation36_spill] sm:$0xff] }
 0x2ef   : > { %v1209_v46 = vmax.f32 %v1155_v28, 0.0  ;;  %v1210_v35 = vmax.f32 %v1156_v44, 0.0  ;;  %v1211_v61 = vmax.f32 %v1157_v24, 0.0  ;;  %v1159_v16 = vadd.f32 %v7675_v60, %v1098_v41  ;;  %v10679_v44 = vld [vmem:[#allocation35_spill] sm:$0xff] }
 0x2f0   : > { %v1100_v26 = vmul.f32 %v7661_v50, %v1039_v17  ;;  %v1041_v56 = vmul.f32 %v7659_v0, %v982_v2  ;;  %v1042_v17 = vmul.f32 %v7659_v0, %v983_v3  ;;  %v1212_v24 = vmax.f32 %v1158_v13, 0.0  ;;  %v10675_v13 = vld [vmem:[#allocation29_spill] sm:$0xff] }
 0x2f1   : > { %5713 = vmatprep.mubr.msk.f32.mxu0 %vm677_vm0, %v1209_v46  ;;  %v1160_v41 = vadd.f32 %v7675_v60, %v1099_v37  ;;  %v1101_v46 = vmul.f32 %v7661_v50, %v1040_v40  ;;  %v1043_v18 = vmul.f32 %v7659_v0, %v984_v19  ;;  %v10676_v40 = vld [vmem:[#allocation32_spill] sm:$0xff]  ;;  %v1044_v19 = vmul.f32 %v7659_v0, %v985_v22  ;;  %v10681_v22 = vld [vmem:[#allocation37_spill] sm:$0xff] }
 0x2f2   : > { %5714 = vmatmul.mubr.msk.f32.vlgmr.msra.gmra.mrb[0].mxu0 %vm677_vm0, %v1210_v35  ;;  %v1161_v3 = vadd.f32 %v7675_v60, %v1100_v26  ;;  %v1102_v20 = vmul.f32 %v7661_v50, %v1041_v56  ;;  %v10677_v35 = vld [vmem:[#allocation33_spill] sm:$0xff]  ;;  %v1103_v26 = vmul.f32 %v7661_v50, %v1042_v17  ;;  %v10678_v56 = vld [vmem:[#allocation34_spill] sm:$0xff]  ;;  %v1045_v28 = vmul.f32 %v7659_v0, %v986_v5 }
 0x2f3   : > { %5716 = vmatprep.mubr.msk.f32.mxu0 %vm677_vm0, %v1211_v61  ;;  %v1213_v61 = vmax.f32 %v1159_v16, 0.0  ;;  %v1214_v38 = vmax.f32 %v1160_v41, 0.0  ;;  %v1162_v37 = vadd.f32 %v7675_v60, %v1101_v46  ;;  %v1011_v16 = vsub.f32 %v10680_v14, %v7637_v63 }
 0x2f4   : > { %v1215_v1 = vmax.f32 %v1161_v3, 0.0  ;;  %v1104_v17 = vmul.f32 %v7661_v50, %v1043_v18  ;;  %v1012_v59 = vsub.f32 %v10681_v22, %v7637_v63  ;;  %v1046_v2 = vmul.f32 %v7659_v0, %v987_v25 }
 0x2f5   : > { %v1047_v41 = vmul.f32 %v7659_v0, %v988_v31  ;;  %v1105_v18 = vmul.f32 %v7661_v50, %v1044_v19  ;;  %v1048_v3 = vmul.f32 %v7659_v0, %v989_v42  ;;  %v1216_v25 = vmax.f32 %v1162_v37, 0.0 }
 0x2f6   : > { %5717 = vmatmul.mubr.msk.f32.gmra.mrb[2].mxu0 %vm677_vm0, %v1212_v24  ;;  %v1009_v24 = vsub.f32 %v10678_v56, %v7637_v63  ;;  %v1106_v31 = vmul.f32 %v7661_v50, %v1045_v28  ;;  %v1049_v5 = vmul.f32 %v7659_v0, %v990_v53  ;;  %v1050_v42 = vmul.f32 %v7659_v0, %v991_v34 }
 0x2f7   : > { %5719 = vmatprep.mubr.msk.f32.mxu0 %vm677_vm0, %v1213_v61  ;;  %v1163_v61 = vadd.f32 %v7675_v60, %v1102_v20  ;;  %v1164_v20 = vadd.f32 %v7675_v60, %v1103_v26  ;;  %v1165_v26 = vadd.f32 %v7675_v60, %v1104_v17  ;;  %v1051_v28 = vmul.f32 %v7659_v0, %v992_v8 }
 0x2f8   : > { %v1107_v43 = vmul.f32 %v7661_v50, %v1046_v2  ;;  %v1108_v53 = vmul.f32 %v7661_v50, %v1047_v41  ;;  %v1017_v37 = vsub.f32 %v7501_v9, %v7637_v63  ;;  %v1018_v19 = vsub.f32 %v7509_v32, %v7637_v63 }
 0x2f9   : > { %v1217_v46 = vmax.f32 %v1163_v61, 0.0  ;;  %v1218_v47 = vmax.f32 %v1164_v20, 0.0  ;;  %v1166_v34 = vadd.f32 %v7675_v60, %v1105_v18  ;;  %v1109_v52 = vmul.f32 %v7661_v50, %v1048_v3 }
 0x2fa   : > { %5720 = vmatmul.mubr.msk.f32.gmra.mrb[4].mxu0 %vm677_vm0, %v1214_v38  ;;  %v1015_v38 = vsub.f32 %v7485_v45, %v7637_v63  ;;  %v1052_v8 = vmul.f32 %v7659_v0, %v993_v10  ;;  %v1110_v2 = vmul.f32 %v7661_v50, %v1049_v5  ;;  %v1053_v61 = vmul.f32 %v7659_v0, %v994_v33 }
 0x2fb   : > { %5722 = vmatprep.mubr.msk.f32.mxu0 %vm677_vm0, %v1215_v1  ;;  %v1016_v1 = vsub.f32 %v7493_v58, %v7637_v63  ;;  %v10682_v17 = vsub.f32 %v7325_v12, %v7637_v63  ;;  %v1219_v57 = vmax.f32 %v1165_v26, 0.0  ;;  %v1167_v10 = vadd.f32 %v7675_v60, %v1106_v31 }
 0x2fc   : > { %v1111_v5 = vmul.f32 %v7661_v50, %v1050_v42  ;;  %v1112_v18 = vmul.f32 %v7661_v50, %v1051_v28  ;;  %v1168_v4 = vadd.f32 %v7675_v60, %v1107_v43  ;;  %v1169_v12 = vadd.f32 %v7675_v60, %v1108_v53 }
 0x2fd   : > { %v1054_v41 = vmul.f32 %v7659_v0, %v10682_v17  ;;  %v1019_v33 = vsub.f32 %v7517_v51, %v7637_v63  ;;  %v1220_v3 = vmax.f32 %v1166_v34, 0.0  ;;  %v1113_v31 = vmul.f32 %v7661_v50, %v1052_v8 }
 0x2fe   : > { %5723 = vmatmul.mubr.msk.f32.gmra.mrb[6].mxu0 %vm677_vm0, %v1216_v25  ;;  %v1170_v25 = vadd.f32 %v7675_v60, %v1109_v52  ;;  %v10684_v26 = vsub.f32 %v7341_v30, %v7637_v63  ;;  %v1171_v28 = vadd.f32 %v7675_v60, %v1110_v2  ;;  %v1114_v43 = vmul.f32 %v7661_v50, %v1053_v61  ;;  %v10685_v61 = vld [vmem:[#allocation38_spill] sm:$0xff] }
 0x2ff   : > { %5725 = vmatprep.mubr.msk.f32.mxu0 %vm677_vm0, %v1217_v46  ;;  %v10683_v46 = vsub.f32 %v7333_v21, %v7637_v63  ;;  %v1020_v21 = vsub.f32 %v7525_v6, %v7637_v63  ;;  %v1115_v53 = vmul.f32 %v7661_v50, %v1054_v41  ;;  %v1221_v17 = vmax.f32 %v1167_v10, 0.0  ;;  %v10686_v41 = vld [vmem:[#allocation39_spill] sm:$0xff] }
 0x300   : > { %v1056_v42 = vmul.f32 %v7659_v0, %v10684_v26  ;;  %v1172_v34 = vadd.f32 %v7675_v60, %v1111_v5  ;;  %v1173_v52 = vadd.f32 %v7675_v60, %v1112_v18  ;;  %v1021_v8 = vsub.f32 %v7533_v27, %v7637_v63 }
 0x301   : > { %v1055_v20 = vmul.f32 %v7659_v0, %v10683_v46  ;;  %v1222_v30 = vmax.f32 %v1168_v4, 0.0  ;;  %v1224_v10 = vmax.f32 %v1170_v25, 0.0  ;;  %v7856_v5 = vadd.f32 %v7675_v60, %v1113_v31 }
 0x302   : > { %5726 = vmatmul.mubr.msk.f32.gmra.mrb[8].mxu0 %vm677_vm0, %v1218_v47  ;;  %v1117_v18 = vmul.f32 %v7661_v50, %v1056_v42  ;;  %v7860_v4 = vadd.f32 %v7675_v60, %v1114_v43  ;;  %v7863_v26 = vadd.f32 %v7675_v60, %v1115_v53  ;;  %v1227_v2 = vmax.f32 %v1173_v52, 0.0 }
 0x303   : > { %5728 = vmatprep.mubr.msk.f32.mxu0 %vm677_vm0, %v1219_v57  ;;  %v1116_v47 = vmul.f32 %v7661_v50, %v1055_v20  ;;  %v1223_v57 = vmax.f32 %v1169_v12, 0.0  ;;  %v1226_v20 = vmax.f32 %v1172_v34, 0.0  ;;  %v10687_v12 = vsub.f32 %v10676_v40, %v7637_v63 }
 0x304   : > { %v10688_v31 = vsub.f32 %v10677_v35, %v7637_v63  ;;  %v10689_v43 = vsub.f32 %v10679_v44, %v7637_v63  ;;  %v1070_v40 = vmul.f32 %v7659_v0, %v1011_v16  ;;  %v1071_v35 = vmul.f32 %v7659_v0, %v1012_v59 }
 0x305   : > { %v7866_v46 = vadd.f32 %v7675_v60, %v1116_v47  ;;  %v1066_v25 = vmul.f32 %v7659_v0, %v10687_v12  ;;  %v7895_v56 = vadd.f32 %v7675_v60, %v1117_v18  ;;  %v10690_v47 = vsub.f32 %v7469_v15, %v7637_v63 }
 0x306   : > { %5729 = vmatmul.mubr.msk.f32.gmra.mrb[10].mxu0 %vm677_vm0, %v1220_v3  ;;  %v1225_v3 = vmax.f32 %v1171_v28, 0.0  ;;  %v1067_v42 = vmul.f32 %v7659_v0, %v10688_v31  ;;  %v1068_v28 = vmul.f32 %v7659_v0, %v1009_v24  ;;  %v1069_v53 = vmul.f32 %v7659_v0, %v10689_v43 }
 0x307   : > { %5731 = vmatprep.mubr.msk.f32.mxu0 %vm677_vm0, %v1221_v17  ;;  %v1127_v24 = vmul.f32 %v7661_v50, %v1066_v25  ;;  %v1072_v14 = vmul.f32 %v7659_v0, %v10690_v47  ;;  %v1131_v59 = vmul.f32 %v7661_v50, %v1070_v40  ;;  %v1132_v17 = vmul.f32 %v7661_v50, %v1071_v35 }
 0x308   : > { %v1128_v44 = vmul.f32 %v7661_v50, %v1067_v42  ;;  %v1129_v16 = vmul.f32 %v7661_v50, %v1068_v28  ;;  %v1130_v22 = vmul.f32 %v7661_v50, %v1069_v53  ;;  %v10691_v34 = vsub.f32 %v7349_v39, %v7637_v63 }
 0x309   : > { %v7926_v39 = vadd.f32 %v7675_v60, %v1131_v59  ;;  %v7929_v25 = vadd.f32 %v7675_v60, %v1132_v17  ;;  %v1228_v31 = vmax.f32 %v7856_v5, 0.0  ;;  %v1229_v42 = vmax.f32 %v7860_v4, 0.0 }
 0x30a   : > { %5732 = vmatmul.mubr.msk.f32.gmra.mrb[12].mxu0 %vm677_vm0, %v1222_v30  ;;  %v1057_v52 = vmul.f32 %v7659_v0, %v10691_v34  ;;  %v7912_v30 = vadd.f32 %v7675_v60, %v1127_v24  ;;  %v7915_v15 = vadd.f32 %v7675_v60, %v1128_v44  ;;  %v7920_v18 = vadd.f32 %v7675_v60, %v1129_v16 }
 0x30b   : > { %5734 = vmatprep.mubr.msk.f32.mxu0 %vm677_vm0, %v1223_v57  ;;  %v1133_v57 = vmul.f32 %v7661_v50, %v1072_v14  ;;  %v7923_v12 = vadd.f32 %v7675_v60, %v1130_v22  ;;  %v10692_v43 = vsub.f32 %v7357_v48, %v7637_v63  ;;  %v10693_v40 = vsub.f32 %v7365_v55, %v7637_v63 }
 0x30c   : > { %v10694_v5 = vsub.f32 %v7373_v62, %v7637_v63  ;;  %v10695_v4 = vsub.f32 %v7381_v11, %v7637_v63  ;;  %v1118_v24 = vmul.f32 %v7661_v50, %v1057_v52  ;;  %v10696_v48 = vsub.f32 %v7477_v29, %v7637_v63 }
 0x30d   : > { %v7936_v28 = vadd.f32 %v7675_v60, %v1133_v57  ;;  %v1058_v53 = vmul.f32 %v7659_v0, %v10692_v43  ;;  %v1059_v35 = vmul.f32 %v7659_v0, %v10693_v40  ;;  %v1074_v55 = vmul.f32 %v7659_v0, %v1015_v38 }
 0x30e   : > { %5735 = vmatmul.mubr.msk.f32.gmra.mrb[14].mxu0 %vm677_vm0, %v1224_v10  ;;  %v1230_v10 = vmax.f32 %v7863_v26, 0.0  ;;  %v1061_v26 = vmul.f32 %v7659_v0, %v10695_v4  ;;  %v1073_v44 = vmul.f32 %v7659_v0, %v10696_v48  ;;  %v1075_v62 = vmul.f32 %v7659_v0, %v1016_v1 }
 0x30f   : > { %5737 = vmatprep.mubr.msk.f32.mxu0 %vm677_vm0, %v1225_v3  ;;  %v1060_v3 = vmul.f32 %v7659_v0, %v10694_v5  ;;  %v1076_v11 = vmul.f32 %v7659_v0, %v1017_v37  ;;  %v1077_v29 = vmul.f32 %v7659_v0, %v1018_v19  ;;  %v1078_v45 = vmul.f32 %v7659_v0, %v1019_v33 }
 0x310   : > { %v1079_v58 = vmul.f32 %v7659_v0, %v1020_v21  ;;  %v1134_v9 = vmul.f32 %v7661_v50, %v1073_v44  ;;  %v1135_v38 = vmul.f32 %v7661_v50, %v1074_v55  ;;  %v1136_v32 = vmul.f32 %v7661_v50, %v1075_v62 }
 0x311   : > { %v1080_v51 = vmul.f32 %v7659_v0, %v1021_v8  ;;  %v1137_v1 = vmul.f32 %v7661_v50, %v1076_v11  ;;  %v1138_v37 = vmul.f32 %v7661_v50, %v1077_v29  ;;  %v1139_v6 = vmul.f32 %v7661_v50, %v1078_v45  ;;  %v10704_v45 = vld [vmem:[#allocation30_spill] sm:$0xff] }
 0x312   : > { %5738 = vmatmul.mubr.msk.f32.gmra.mrb[16].mxu0 %vm677_vm0, %v1226_v20  ;;  %v1140_v19 = vmul.f32 %v7661_v50, %v1079_v58  ;;  %v7997_v33 = vadd.f32 %v7675_v60, %v1134_v9  ;;  %v8000_v21 = vadd.f32 %v7675_v60, %v1135_v38  ;;  %v1231_v16 = vmax.f32 %v7866_v46, 0.0 }
 0x313   : > { %5740 = vmatprep.mubr.msk.f32.mxu0 %vm677_vm0, %v1227_v2  ;;  %v8003_v2 = vadd.f32 %v7675_v60, %v1136_v32  ;;  %v1141_v27 = vmul.f32 %v7661_v50, %v1080_v51  ;;  %v8008_v8 = vadd.f32 %v7675_v60, %v1137_v1  ;;  %v8011_v20 = vadd.f32 %v7675_v60, %v1138_v37  ;;  %v10705_v32 = vld [vmem:[#allocation31_spill] sm:$0xff] }
 0x314   : > { %v8014_v47 = vadd.f32 %v7675_v60, %v1139_v6  ;;  %v8017_v14 = vadd.f32 %v7675_v60, %v1140_v19  ;;  %v1232_v22 = vmax.f32 %v7895_v56, 0.0  ;;  %v1119_v59 = vmul.f32 %v7661_v50, %v1058_v53 }
 0x315   : > { %v8024_v17 = vadd.f32 %v7675_v60, %v1141_v27  ;;  %v1120_v34 = vmul.f32 %v7661_v50, %v1059_v35  ;;  %v1121_v52 = vmul.f32 %v7661_v50, %v1060_v3  ;;  %v10697_v57 = vsub.f32 %v7389_v23, %v7637_v63 }
 0x316   : > { %5741 = vmatmul.mubr.msk.f32.gmra.mrb[18].mxu0 %vm677_vm0, %v1228_v31  ;;  %v1179_v56 = vadd.f32 %v7675_v60, %v1118_v24  ;;  %v10699_v43 = vsub.f32 %v7541_v49, %v7637_v63  ;;  %v10700_v40 = vsub.f32 %v10685_v61, %v7637_v63  ;;  %v10701_v23 = vsub.f32 %v10686_v41, %v7637_v63 }
 0x317   : > { %5743 = vmatprep.mubr.msk.f32.mxu0 %vm677_vm0, %v1229_v42  ;;  %v1062_v31 = vmul.f32 %v7659_v0, %v10697_v57  ;;  %v10698_v42 = vsub.f32 %v10675_v13, %v7637_v63  ;;  %v1122_v13 = vmul.f32 %v7661_v50, %v1061_v26  ;;  %v10702_v3 = vsub.f32 %v7565_v36, %v7637_v63 }
 0x318   : > { %v1081_v53 = vmul.f32 %v7659_v0, %v10699_v43  ;;  %v1082_v35 = vmul.f32 %v7659_v0, %v10700_v40  ;;  %v1083_v5 = vmul.f32 %v7659_v0, %v10701_v23  ;;  %v10703_v4 = vsub.f32 %v7573_v54, %v7637_v63 }
 0x319   : > { %v1063_v46 = vmul.f32 %v7659_v0, %v10698_v42  ;;  %v1084_v49 = vmul.f32 %v7659_v0, %v10702_v3  ;;  %v1147_v24 = vmul.f32 %v7661_v50, %v7670_v7  ;;  %v1180_v41 = vadd.f32 %v7675_v60, %v1119_v59  ;;  %v8155_v3 = vld [vmem:[#allocation9] ss:$0 sm:$0xff] }
 0x31a   : > { %5744 = vmatmul.mubr.msk.f32.gmra.mrb[20].mxu0 %vm677_vm0, %v1230_v10  ;;  %v1085_v61 = vmul.f32 %v7659_v0, %v10703_v4  ;;  %v1142_v10 = vmul.f32 %v7661_v50, %v1081_v53  ;;  %v1143_v26 = vmul.f32 %v7661_v50, %v1082_v35  ;;  %v1144_v36 = vmul.f32 %v7661_v50, %v1083_v5 }
 0x31b   : > { %5746 = vmatprep.mubr.msk.f32.mxu0 %vm677_vm0, %v1231_v16  ;;  %v1181_v48 = vadd.f32 %v7675_v60, %v1120_v34  ;;  %v1145_v44 = vmul.f32 %v7661_v50, %v1084_v49  ;;  %v8070_v55 = vadd.f32 %v7675_v60, %v1147_v24  ;;  %v1233_v7 = vmax.f32 %v1179_v56, 0.0 }
 0x31c   : > { %v1146_v54 = vmul.f32 %v7661_v50, %v1085_v61  ;;  %v8073_v62 = vadd.f32 %v7675_v60, %v1142_v10  ;;  %v8076_v11 = vadd.f32 %v7675_v60, %v1143_v26  ;;  %v8079_v29 = vadd.f32 %v7675_v60, %v1144_v36 }
 0x31d   : > { %v1005_v58 = vsub.f32 %v10704_v45, %v7637_v63  ;;  %v8085_v9 = vadd.f32 %v7675_v60, %v1145_v44  ;;  %v1006_v51 = vsub.f32 %v10705_v32, %v7637_v63  ;;  %v1234_v1 = vmax.f32 %v1180_v41, 0.0 }
 0x31e   : > { %5747 = vmatmul.mubr.msk.f32.gmra.mrb[22].mxu0 %vm677_vm0, %v1232_v22  ;;  %v8088_v38 = vadd.f32 %v7675_v60, %v1146_v54  ;;  %v1182_v37 = vadd.f32 %v7675_v60, %v1121_v52  ;;  %v1123_v6 = vmul.f32 %v7661_v50, %v1062_v31  ;;  %v1235_v27 = vmax.f32 %v1181_v48, 0.0 }
 0x31f   : > { %5749 = vmatprep.mubr.msk.f32.mxu0 %vm677_vm0, %v1233_v7  ;;  %v1064_v19 = vmul.f32 %v7659_v0, %v1005_v58  ;;  %v1183_v16 = vadd.f32 %v7675_v60, %v1122_v13  ;;  %v1124_v22 = vmul.f32 %v7661_v50, %v1063_v46  ;;  %v1065_v59 = vmul.f32 %v7659_v0, %v1006_v51 }
 0x320   : > { %v1236_v34 = vmax.f32 %v1182_v37, 0.0  ;;  %v1184_v63 = vadd.f32 %v7675_v60, %v1123_v6  ;;  %v1243_v35 = vmax.f32 %v7915_v15, 0.0  ;;  %v1245_v23 = vmax.f32 %v7923_v12, 0.0 }
 0x321   : > { %v1125_v52 = vmul.f32 %v7661_v50, %v1064_v19  ;;  %v1237_v57 = vmax.f32 %v1183_v16, 0.0  ;;  %v1185_v31 = vadd.f32 %v7675_v60, %v1124_v22  ;;  %v1126_v42 = vmul.f32 %v7661_v50, %v1065_v59 }
 0x322   : > { %5750 = vmatmul.mubr.msk.f32.gmra.mrb[24].mxu0 %vm677_vm0, %v1234_v1  ;;  %v1238_v46 = vmax.f32 %v1184_v63, 0.0  ;;  %v1242_v50 = vmax.f32 %v7912_v30, 0.0  ;;  %v1246_v5 = vmax.f32 %v7926_v39, 0.0  ;;  %v1247_v13 = vmax.f32 %v7929_v25, 0.0 }
 0x323   : > { %5752 = vmatprep.mubr.msk.f32.mxu0 %vm677_vm0, %v1235_v27  ;;  %v1186_v0 = vadd.f32 %v7675_v60, %v1125_v52  ;;  %v1239_v56 = vmax.f32 %v1185_v31, 0.0  ;;  %v1187_v43 = vadd.f32 %v7675_v60, %v1126_v42  ;;  %v1244_v60 = vmax.f32 %v7920_v18, 0.0 }
 0x324   : > { %v1248_v30 = vmax.f32 %v7936_v28, 0.0  ;;  %v1249_v15 = vmax.f32 %v7997_v33, 0.0  ;;  %v1250_v18 = vmax.f32 %v8000_v21, 0.0  ;;  %v1251_v12 = vmax.f32 %v8003_v2, 0.0 }
 0x325   : > { %v1240_v53 = vmax.f32 %v1186_v0, 0.0  ;;  %v1241_v40 = vmax.f32 %v1187_v43, 0.0  ;;  %v1252_v39 = vmax.f32 %v8008_v8, 0.0  ;;  %v1253_v25 = vmax.f32 %v8011_v20, 0.0 }
 0x326   : > { %5753 = vmatmul.mubr.msk.f32.gmra.mrb[26].mxu0 %vm677_vm0, %v1236_v34  ;;  %v1254_v28 = vmax.f32 %v8014_v47, 0.0  ;;  %v1255_v33 = vmax.f32 %v8017_v14, 0.0  ;;  %v1256_v21 = vmax.f32 %v8024_v17, 0.0  ;;  %v1257_v2 = vmax.f32 %v8073_v62, 0.0 }
 0x327   : > { %5755 = vmatprep.mubr.msk.f32.mxu0 %vm677_vm0, %v1237_v57  ;;  %v1258_v8 = vmax.f32 %v8076_v11, 0.0  ;;  %v1259_v20 = vmax.f32 %v8079_v29, 0.0  ;;  %v1260_v47 = vmax.f32 %v8085_v9, 0.0  ;;  %v1261_v14 = vmax.f32 %v8088_v38, 0.0 }
 0x328   : > { %v1262_v17 = vmax.f32 %v8070_v55, 0.0 }
 0x32a   : > { %5756 = vmatmul.mubr.msk.f32.gmra.mrb[28].mxu0 %vm677_vm0, %v1238_v46 }
 0x32b   : > { %5758 = vmatprep.mubr.msk.f32.mxu0 %vm677_vm0, %v1239_v56 }
 0x32e   : > { %5759 = vmatmul.mubr.msk.f32.gmra.mrb[30].mxu0 %vm677_vm0, %v1240_v53 }
 0x32f   : > { %5761 = vmatprep.mubr.msk.f32.mxu0 %vm677_vm0, %v1241_v40 }
 0x332   : > { %5762 = vmatmul.mubr.msk.f32.gmra.mrb[32].mxu0 %vm677_vm0, %v1242_v50 }
 0x333   : > { %5764 = vmatprep.mubr.msk.f32.mxu0 %vm677_vm0, %v1243_v35 }
 0x336   : > { %5765 = vmatmul.mubr.msk.f32.gmra.mrb[34].mxu0 %vm677_vm0, %v1244_v60 }
 0x337   : > { %5767 = vmatprep.mubr.msk.f32.mxu0 %vm677_vm0, %v1245_v23 }
 0x33a   : > { %5768 = vmatmul.mubr.msk.f32.gmra.mrb[36].mxu0 %vm677_vm0, %v1246_v5 }
 0x33b   : > { %5770 = vmatprep.mubr.msk.f32.mxu0 %vm677_vm0, %v1247_v13 }
 0x33e   : > { %5771 = vmatmul.mubr.msk.f32.gmra.mrb[38].mxu0 %vm677_vm0, %v1248_v30 }
 0x33f   : > { %5773 = vmatprep.mubr.msk.f32.mxu0 %vm677_vm0, %v1249_v15 }
 0x342   : > { %5774 = vmatmul.mubr.msk.f32.gmra.mrb[40].mxu0 %vm677_vm0, %v1250_v18 }
 0x343   : > { %5776 = vmatprep.mubr.msk.f32.mxu0 %vm677_vm0, %v1251_v12 }
 0x346   : > { %5777 = vmatmul.mubr.msk.f32.gmra.mrb[42].mxu0 %vm677_vm0, %v1252_v39 }
 0x347   : > { %5779 = vmatprep.mubr.msk.f32.mxu0 %vm677_vm0, %v1253_v25 }
 0x34a   : > { %5780 = vmatmul.mubr.msk.f32.gmra.mrb[44].mxu0 %vm677_vm0, %v1254_v28 }
 0x34b   : > { %5782 = vmatprep.mubr.msk.f32.mxu0 %vm677_vm0, %v1255_v33 }
 0x34e   : > { %5783 = vmatmul.mubr.msk.f32.gmra.mrb[46].mxu0 %vm677_vm0, %v1256_v21 }
 0x34f   : > { %5785 = vmatprep.mubr.msk.f32.mxu0 %vm677_vm0, %v1257_v2 }
 0x352   : > { %5786 = vmatmul.mubr.msk.f32.gmra.mrb[48].mxu0 %vm677_vm0, %v1258_v8 }
 0x353   : > { %5788 = vmatprep.mubr.msk.f32.mxu0 %vm677_vm0, %v1259_v20 }
 0x356   : > { %5789 = vmatmul.mubr.msk.f32.gmra.mrb[50].mxu0 %vm677_vm0, %v1260_v47 }
 0x357   : > { %5791 = vmatprep.mubr.msk.f32.mxu0 %vm677_vm0, %v1261_v14 }
 0x35a   : > { %5792 = vmatmul.mubr.msk.f32.gmra.mrb[52].mxu0 %vm677_vm0, %v1262_v17 }
 0x3c5   : > { %v5715_v49 = vpop.f32.mrb[0].mxu0 }
 0x3c6   : > { %v8158_v4 = vadd.f32 %v5715_v49, %v8155_v3  ;;  %v1503_v61 = vpop.f32.mrb[1].mxu0 }
 0x3c7   : > { %v8161_v24 = vadd.f32 %v8155_v3, %v1503_v61 }
 0x3c8   : > { %v1890_v41 = vmul.f32 %v8158_v4, %v8158_v4  ;;  %v1774_v10 = vsel %vm1772_vm3, %v8158_v4, 0.0 }
 0x3c9   : > { %v1773_v26 = vsel %vm1772_vm3, %v8161_v24, 0.0  ;;  %v1889_v36 = vmul.f32 %v8161_v24, %v8161_v24  ;;  %v5718_v48 = vpop.f32.mrb[2].mxu0 }
 0x3ca   : > { %v8172_v44 = vadd.f32 %v5718_v48, %v8155_v3  ;;  %v1513_v54 = vpop.f32.mrb[3].mxu0  ;;  %v1944_v55 = vsel %vm1772_vm3, %v1890_v41, 0.0  ;;  %v1775_v11 = vadd.f32 %v1774_v10, %v1773_v26 }
 0x3cb   : > { %v1943_v7 = vsel %vm1772_vm3, %v1889_v36, 0.0  ;;  %v8177_v62 = vadd.f32 %v8155_v3, %v1513_v54 }
 0x3cc   : > { %v1892_v29 = vmul.f32 %v8172_v44, %v8172_v44  ;;  %v1945_v38 = vadd.f32 %v1944_v55, %v1943_v7  ;;  %v1778_v37 = vsel %vm1772_vm3, %v8172_v44, 0.0 }
 0x3cd   : > { %v1776_v45 = vsel %vm1772_vm3, %v8177_v62, 0.0  ;;  %v1891_v58 = vmul.f32 %v8177_v62, %v8177_v62  ;;  %v5721_v9 = vpop.f32.mrb[4].mxu0 }
 0x3ce   : > { %v1777_v32 = vadd.f32 %v1776_v45, %v1775_v11  ;;  %v8186_v51 = vadd.f32 %v5721_v9, %v8155_v3  ;;  %v1523_v1 = vpop.f32.mrb[5].mxu0  ;;  %v1948_v22 = vsel %vm1772_vm3, %v1892_v29, 0.0 }
 0x3cf   : > { %v1946_v6 = vsel %vm1772_vm3, %v1891_v58, 0.0  ;;  %v8192_v19 = vadd.f32 %v8155_v3, %v1523_v1 }
 0x3d0   : > { %v1947_v27 = vadd.f32 %v1946_v6, %v1945_v38  ;;  %v1779_v16 = vadd.f32 %v1778_v37, %v1777_v32  ;;  %v1894_v59 = vmul.f32 %v8186_v51, %v8186_v51  ;;  %v1782_v0 = vsel %vm1772_vm3, %v8186_v51, 0.0 }
 0x3d1   : > { %v1780_v34 = vsel %vm1772_vm3, %v8192_v19, 0.0  ;;  %v1893_v63 = vmul.f32 %v8192_v19, %v8192_v19  ;;  %v5724_v52 = vpop.f32.mrb[6].mxu0 }
 0x3d2   : > { %v1781_v57 = vadd.f32 %v1780_v34, %v1779_v16  ;;  %v1949_v31 = vadd.f32 %v1948_v22, %v1947_v27  ;;  %v8202_v42 = vadd.f32 %v5724_v52, %v8155_v3  ;;  %v1533_v46 = vpop.f32.mrb[7].mxu0  ;;  %v1952_v50 = vsel %vm1772_vm3, %v1894_v59, 0.0 }
 0x3d3   : > { %v1950_v56 = vsel %vm1772_vm3, %v1893_v63, 0.0  ;;  %v8208_v43 = vadd.f32 %v8155_v3, %v1533_v46 }
 0x3d4   : > { %v1951_v53 = vadd.f32 %v1950_v56, %v1949_v31  ;;  %v1783_v40 = vadd.f32 %v1782_v0, %v1781_v57  ;;  %v1896_v35 = vmul.f32 %v8202_v42, %v8202_v42  ;;  %v1786_v12 = vsel %vm1772_vm3, %v8202_v42, 0.0 }
 0x3d5   : > { %v1784_v60 = vsel %vm1772_vm3, %v8208_v43, 0.0  ;;  %v1895_v23 = vmul.f32 %v8208_v43, %v8208_v43  ;;  %v5727_v5 = vpop.f32.mrb[8].mxu0 }
 0x3d6   : > { %v1785_v13 = vadd.f32 %v1784_v60, %v1783_v40  ;;  %v1953_v30 = vadd.f32 %v1952_v50, %v1951_v53  ;;  %v8218_v15 = vadd.f32 %v5727_v5, %v8155_v3  ;;  %v1543_v18 = vpop.f32.mrb[9].mxu0  ;;  %v1956_v21 = vsel %vm1772_vm3, %v1896_v35, 0.0 }
 0x3d7   : > { %v1954_v39 = vsel %vm1772_vm3, %v1895_v23, 0.0  ;;  %v8224_v25 = vadd.f32 %v8155_v3, %v1543_v18 }
 0x3d8   : > { %v1955_v28 = vadd.f32 %v1954_v39, %v1953_v30  ;;  %v1787_v33 = vadd.f32 %v1786_v12, %v1785_v13  ;;  %v1898_v2 = vmul.f32 %v8218_v15, %v8218_v15  ;;  %v1790_v41 = vsel %vm1772_vm3, %v8218_v15, 0.0 }
 0x3d9   : > { %v1788_v8 = vsel %vm1772_vm3, %v8224_v25, 0.0  ;;  %v1897_v20 = vmul.f32 %v8224_v25, %v8224_v25  ;;  %v5730_v47 = vpop.f32.mrb[10].mxu0 }
 0x3da   : > { %v1789_v14 = vadd.f32 %v1788_v8, %v1787_v33  ;;  %v1957_v17 = vadd.f32 %v1956_v21, %v1955_v28  ;;  %v8234_v49 = vadd.f32 %v5730_v47, %v8155_v3  ;;  %v1553_v61 = vpop.f32.mrb[11].mxu0  ;;  %v1960_v54 = vsel %vm1772_vm3, %v1898_v2, 0.0 }
 0x3db   : > { %v1958_v10 = vsel %vm1772_vm3, %v1897_v20, 0.0  ;;  %v8240_v26 = vadd.f32 %v8155_v3, %v1553_v61 }
 0x3dc   : > { %v1959_v36 = vadd.f32 %v1958_v10, %v1957_v17  ;;  %v1791_v48 = vadd.f32 %v1790_v41, %v1789_v14  ;;  %v1900_v55 = vmul.f32 %v8234_v49, %v8234_v49  ;;  %v1794_v32 = vsel %vm1772_vm3, %v8234_v49, 0.0 }
 0x3dd   : > { %v1792_v7 = vsel %vm1772_vm3, %v8240_v26, 0.0  ;;  %v1899_v11 = vmul.f32 %v8240_v26, %v8240_v26  ;;  %v5733_v29 = vpop.f32.mrb[12].mxu0 }
 0x3de   : > { %v1793_v45 = vadd.f32 %v1792_v7, %v1791_v48  ;;  %v1961_v58 = vadd.f32 %v1960_v54, %v1959_v36  ;;  %v8250_v9 = vadd.f32 %v5733_v29, %v8155_v3  ;;  %v1563_v38 = vpop.f32.mrb[13].mxu0  ;;  %v1964_v16 = vsel %vm1772_vm3, %v1900_v55, 0.0 }
 0x3df   : > { %v1962_v1 = vsel %vm1772_vm3, %v1899_v11, 0.0  ;;  %v8256_v37 = vadd.f32 %v8155_v3, %v1563_v38 }
 0x3e0   : > { %v1963_v6 = vadd.f32 %v1962_v1, %v1961_v58  ;;  %v1795_v27 = vadd.f32 %v1794_v32, %v1793_v45  ;;  %v1902_v22 = vmul.f32 %v8250_v9, %v8250_v9  ;;  %v1798_v0 = vsel %vm1772_vm3, %v8250_v9, 0.0 }
 0x3e1   : > { %v1796_v59 = vsel %vm1772_vm3, %v8256_v37, 0.0  ;;  %v1901_v34 = vmul.f32 %v8256_v37, %v8256_v37  ;;  %v5736_v63 = vpop.f32.mrb[14].mxu0 }
 0x3e2   : > { %v1797_v52 = vadd.f32 %v1796_v59, %v1795_v27  ;;  %v1965_v57 = vadd.f32 %v1964_v16, %v1963_v6  ;;  %v8266_v31 = vadd.f32 %v5736_v63, %v8155_v3  ;;  %v1573_v46 = vpop.f32.mrb[15].mxu0  ;;  %v1968_v35 = vsel %vm1772_vm3, %v1902_v22, 0.0 }
 0x3e3   : > { %v1966_v56 = vsel %vm1772_vm3, %v1901_v34, 0.0  ;;  %v8272_v53 = vadd.f32 %v8155_v3, %v1573_v46 }
 0x3e4   : > { %v1967_v40 = vadd.f32 %v1966_v56, %v1965_v57  ;;  %v1799_v50 = vadd.f32 %v1798_v0, %v1797_v52  ;;  %v1904_v60 = vmul.f32 %v8266_v31, %v8266_v31  ;;  %v1802_v28 = vsel %vm1772_vm3, %v8266_v31, 0.0 }
 0x3e5   : > { %v1800_v23 = vsel %vm1772_vm3, %v8272_v53, 0.0  ;;  %v1903_v5 = vmul.f32 %v8272_v53, %v8272_v53  ;;  %v5739_v13 = vpop.f32.mrb[16].mxu0 }
 0x3e6   : > { %v1801_v30 = vadd.f32 %v1800_v23, %v1799_v50  ;;  %v1969_v18 = vadd.f32 %v1968_v35, %v1967_v40  ;;  %v8282_v12 = vadd.f32 %v5739_v13, %v8155_v3  ;;  %v1583_v39 = vpop.f32.mrb[17].mxu0  ;;  %v1972_v20 = vsel %vm1772_vm3, %v1904_v60, 0.0 }
 0x3e7   : > { %v1970_v33 = vsel %vm1772_vm3, %v1903_v5, 0.0  ;;  %v8288_v21 = vadd.f32 %v8155_v3, %v1583_v39 }
 0x3e8   : > { %v1971_v2 = vadd.f32 %v1970_v33, %v1969_v18  ;;  %v1803_v8 = vadd.f32 %v1802_v28, %v1801_v30  ;;  %v1906_v47 = vmul.f32 %v8282_v12, %v8282_v12  ;;  %v1806_v54 = vsel %vm1772_vm3, %v8282_v12, 0.0 }
 0x3e9   : > { %v1804_v14 = vsel %vm1772_vm3, %v8288_v21, 0.0  ;;  %v1905_v17 = vmul.f32 %v8288_v21, %v8288_v21  ;;  %v5742_v61 = vpop.f32.mrb[18].mxu0 }
 0x3ea   : > { %v1805_v41 = vadd.f32 %v1804_v14, %v1803_v8  ;;  %v1973_v10 = vadd.f32 %v1972_v20, %v1971_v2  ;;  %v8298_v36 = vadd.f32 %v5742_v61, %v8155_v3  ;;  %v1593_v48 = vpop.f32.mrb[19].mxu0  ;;  %v1976_v45 = vsel %vm1772_vm3, %v1906_v47, 0.0 }
 0x3eb   : > { %v1974_v55 = vsel %vm1772_vm3, %v1905_v17, 0.0  ;;  %v8304_v7 = vadd.f32 %v8155_v3, %v1593_v48 }
 0x3ec   : > { %v1975_v11 = vadd.f32 %v1974_v55, %v1973_v10  ;;  %v1807_v29 = vadd.f32 %v1806_v54, %v1805_v41  ;;  %v1908_v58 = vmul.f32 %v8298_v36, %v8298_v36  ;;  %v1810_v59 = vsel %vm1772_vm3, %v8298_v36, 0.0 }
 0x3ed   : > { %v1808_v38 = vsel %vm1772_vm3, %v8304_v7, 0.0  ;;  %v1907_v32 = vmul.f32 %v8304_v7, %v8304_v7  ;;  %v5745_v1 = vpop.f32.mrb[20].mxu0  ;;  %v10596_v10 = vmov 0.0|0.0  }
 0x3ee   : > { %v1809_v6 = vadd.f32 %v1808_v38, %v1807_v29  ;;  %v1977_v27 = vadd.f32 %v1976_v45, %v1975_v11  ;;  %v8314_v16 = vadd.f32 %v5745_v1, %v8155_v3  ;;  %v1603_v22 = vpop.f32.mrb[21].mxu0  ;;  %v1980_v0 = vsel %vm1772_vm3, %v1908_v58, 0.0  ;;  %5988 = vmatprep.subr.bf16.mxu0 %v10596_v10  ;;  %6102 = vmatprep.subr.bf16.mxu1 %v10596_v10 }
 0x3ef   : > { %v1978_v34 = vsel %vm1772_vm3, %v1907_v32, 0.0  ;;  %v8320_v63 = vadd.f32 %v8155_v3, %v1603_v22 }
 0x3f0   : > { %v1979_v52 = vadd.f32 %v1978_v34, %v1977_v27  ;;  %v1910_v57 = vmul.f32 %v8314_v16, %v8314_v16  ;;  %v1811_v46 = vadd.f32 %v1810_v59, %v1809_v6  ;;  %v1814_v13 = vsel %vm1772_vm3, %v8314_v16, 0.0 }
 0x3f1   : > { %v1812_v56 = vsel %vm1772_vm3, %v8320_v63, 0.0  ;;  %v1909_v40 = vmul.f32 %v8320_v63, %v8320_v63  ;;  %v5748_v50 = vpop.f32.mrb[22].mxu0 }
 0x3f2   : > { %v1813_v35 = vadd.f32 %v1812_v56, %v1811_v46  ;;  %v1981_v60 = vadd.f32 %v1980_v0, %v1979_v52  ;;  %v8330_v23 = vadd.f32 %v5748_v50, %v8155_v3  ;;  %v1613_v5 = vpop.f32.mrb[23].mxu0  ;;  %v1984_v39 = vsel %vm1772_vm3, %v1910_v57, 0.0 }
 0x3f3   : > { %v1982_v30 = vsel %vm1772_vm3, %v1909_v40, 0.0  ;;  %v8336_v18 = vadd.f32 %v8155_v3, %v1613_v5 }
 0x3f4   : > { %v1983_v28 = vadd.f32 %v1982_v30, %v1981_v60  ;;  %v1815_v33 = vadd.f32 %v1814_v13, %v1813_v35  ;;  %v1912_v2 = vmul.f32 %v8330_v23, %v8330_v23  ;;  %v1818_v48 = vsel %vm1772_vm3, %v8330_v23, 0.0 }
 0x3f5   : > { %v1816_v8 = vsel %vm1772_vm3, %v8336_v18, 0.0  ;;  %v1911_v20 = vmul.f32 %v8336_v18, %v8336_v18  ;;  %v5751_v47 = vpop.f32.mrb[24].mxu0 }
 0x3f6   : > { %v1817_v14 = vadd.f32 %v1816_v8, %v1815_v33  ;;  %v1985_v17 = vadd.f32 %v1984_v39, %v1983_v28  ;;  %v8346_v61 = vadd.f32 %v5751_v47, %v8155_v3  ;;  %v1623_v41 = vpop.f32.mrb[25].mxu0  ;;  %v1988_v45 = vsel %vm1772_vm3, %v1912_v2, 0.0 }
 0x3f7   : > { %v1986_v54 = vsel %vm1772_vm3, %v1911_v20, 0.0  ;;  %v8354_v55 = vadd.f32 %v8155_v3, %v1623_v41 }
 0x3f8   : > { %v1987_v11 = vadd.f32 %v1986_v54, %v1985_v17  ;;  %v1819_v29 = vadd.f32 %v1818_v48, %v1817_v14  ;;  %v1914_v58 = vmul.f32 %v8346_v61, %v8346_v61  ;;  %v1822_v34 = vsel %vm1772_vm3, %v8346_v61, 0.0 }
 0x3f9   : > { %v1820_v38 = vsel %vm1772_vm3, %v8354_v55, 0.0  ;;  %v1913_v32 = vmul.f32 %v8354_v55, %v8354_v55  ;;  %v5754_v1 = vpop.f32.mrb[26].mxu0 }
 0x3fa   : > { %v1821_v6 = vadd.f32 %v1820_v38, %v1819_v29  ;;  %v1989_v27 = vadd.f32 %v1988_v45, %v1987_v11  ;;  %v8364_v22 = vadd.f32 %v5754_v1, %v8155_v3  ;;  %v1633_v59 = vpop.f32.mrb[27].mxu0  ;;  %v1992_v56 = vsel %vm1772_vm3, %v1914_v58, 0.0 }
 0x3fb   : > { %v1990_v52 = vsel %vm1772_vm3, %v1913_v32, 0.0  ;;  %v8370_v57 = vadd.f32 %v8155_v3, %v1633_v59 }
 0x3fc   : > { %10706 = vst [vmem:[#allocation29_spill] sm:$0xff] %v8364_v22  ;;  %v1991_v46 = vadd.f32 %v1990_v52, %v1989_v27  ;;  %v1823_v0 = vadd.f32 %v1822_v34, %v1821_v6  ;;  %v1916_v40 = vmul.f32 %v8364_v22, %v8364_v22  ;;  %v1826_v28 = vsel %vm1772_vm3, %v8364_v22, 0.0 }
 0x3fd   : > { %10707 = vst [vmem:[#allocation32_spill] sm:$0xff] %v8370_v57  ;;  %v1824_v50 = vsel %vm1772_vm3, %v8370_v57, 0.0  ;;  %v1915_v35 = vmul.f32 %v8370_v57, %v8370_v57  ;;  %v5757_v60 = vpop.f32.mrb[28].mxu0 }
 0x3fe   : > { %v1825_v5 = vadd.f32 %v1824_v50, %v1823_v0  ;;  %v1993_v13 = vadd.f32 %v1992_v56, %v1991_v46  ;;  %v8380_v30 = vadd.f32 %v5757_v60, %v8155_v3  ;;  %v1643_v39 = vpop.f32.mrb[29].mxu0  ;;  %v1996_v47 = vsel %vm1772_vm3, %v1916_v40, 0.0 }
 0x3ff   : > { %v1994_v33 = vsel %vm1772_vm3, %v1915_v35, 0.0  ;;  %v8386_v2 = vadd.f32 %v8155_v3, %v1643_v39 }
 0x400   : > { %10708 = vst [vmem:[#allocation33_spill] sm:$0xff] %v8380_v30  ;;  %v1995_v8 = vadd.f32 %v1994_v33, %v1993_v13  ;;  %v1827_v20 = vadd.f32 %v1826_v28, %v1825_v5  ;;  %v1918_v14 = vmul.f32 %v8380_v30, %v8380_v30  ;;  %v1830_v58 = vsel %vm1772_vm3, %v8380_v30, 0.0 }
 0x401   : > { %10709 = vst [vmem:[#allocation34_spill] sm:$0xff] %v8386_v2  ;;  %v1828_v17 = vsel %vm1772_vm3, %v8386_v2, 0.0  ;;  %v1917_v41 = vmul.f32 %v8386_v2, %v8386_v2  ;;  %v5760_v48 = vpop.f32.mrb[30].mxu0 }
 0x402   : > { %v1829_v54 = vadd.f32 %v1828_v17, %v1827_v20  ;;  %v1997_v11 = vadd.f32 %v1996_v47, %v1995_v8  ;;  %v8396_v29 = vadd.f32 %v5760_v48, %v8155_v3  ;;  %v1653_v45 = vpop.f32.mrb[31].mxu0  ;;  %v2000_v27 = vsel %vm1772_vm3, %v1918_v14, 0.0 }
 0x403   : > { %v1998_v38 = vsel %vm1772_vm3, %v1917_v41, 0.0  ;;  %v8402_v32 = vadd.f32 %v8155_v3, %v1653_v45 }
 0x404   : > { %10710 = vst [vmem:[#allocation35_spill] sm:$0xff] %v8396_v29  ;;  %v1999_v1 = vadd.f32 %v1998_v38, %v1997_v11  ;;  %v1831_v6 = vadd.f32 %v1830_v58, %v1829_v54  ;;  %v1920_v59 = vmul.f32 %v8396_v29, %v8396_v29  ;;  %v1834_v35 = vsel %vm1772_vm3, %v8396_v29, 0.0 }
 0x405   : > { %10711 = vst [vmem:[#allocation36_spill] sm:$0xff] %v8402_v32  ;;  %v1832_v34 = vsel %vm1772_vm3, %v8402_v32, 0.0  ;;  %v1919_v52 = vmul.f32 %v8402_v32, %v8402_v32  ;;  %v5763_v46 = vpop.f32.mrb[32].mxu0 }
 0x406   : > { %v1833_v0 = vadd.f32 %v1832_v34, %v1831_v6  ;;  %v2001_v56 = vadd.f32 %v2000_v27, %v1999_v1  ;;  %v8412_v40 = vadd.f32 %v5763_v46, %v8155_v3  ;;  %v1663_v50 = vpop.f32.mrb[33].mxu0  ;;  %v2004_v28 = vsel %vm1772_vm3, %v1920_v59, 0.0 }
 0x407   : > { %v2002_v60 = vsel %vm1772_vm3, %v1919_v52, 0.0  ;;  %v8418_v5 = vadd.f32 %v8155_v3, %v1663_v50 }
 0x408   : > { %10712 = vst [vmem:[#allocation37_spill] sm:$0xff] %v8412_v40  ;;  %v2003_v13 = vadd.f32 %v2002_v60, %v2001_v56  ;;  %v1835_v39 = vadd.f32 %v1834_v35, %v1833_v0  ;;  %v1922_v33 = vmul.f32 %v8412_v40, %v8412_v40  ;;  %v1838_v54 = vsel %vm1772_vm3, %v8412_v40, 0.0 }
 0x409   : > { %10713 = vst [vmem:[#allocation38_spill] sm:$0xff] %v8418_v5  ;;  %v1836_v8 = vsel %vm1772_vm3, %v8418_v5, 0.0  ;;  %v1921_v20 = vmul.f32 %v8418_v5, %v8418_v5  ;;  %v5766_v47 = vpop.f32.mrb[34].mxu0 }
 0x40a   : > { %v1837_v14 = vadd.f32 %v1836_v8, %v1835_v39  ;;  %v2005_v17 = vadd.f32 %v2004_v28, %v2003_v13  ;;  %v8428_v41 = vadd.f32 %v5766_v47, %v8155_v3  ;;  %v1673_v48 = vpop.f32.mrb[35].mxu0  ;;  %v2008_v1 = vsel %vm1772_vm3, %v1922_v33, 0.0 }
 0x40b   : > { %v2006_v11 = vsel %vm1772_vm3, %v1921_v20, 0.0  ;;  %v8434_v45 = vadd.f32 %v8155_v3, %v1673_v48 }
 0x40c   : > { %10714 = vst [vmem:[#allocation39_spill] sm:$0xff] %v8428_v41  ;;  %v2007_v58 = vadd.f32 %v2006_v11, %v2005_v17  ;;  %v1839_v38 = vadd.f32 %v1838_v54, %v1837_v14  ;;  %v1924_v6 = vmul.f32 %v8428_v41, %v8428_v41  ;;  %v1842_v50 = vsel %vm1772_vm3, %v8428_v41, 0.0 }
 0x40d   : > { %10715 = vst [vmem:[#allocation30_spill] sm:$0xff] %v8434_v45  ;;  %v1840_v27 = vsel %vm1772_vm3, %v8434_v45, 0.0  ;;  %v1923_v59 = vmul.f32 %v8434_v45, %v8434_v45  ;;  %v5769_v34 = vpop.f32.mrb[36].mxu0 }
 0x40e   : > { %v1841_v52 = vadd.f32 %v1840_v27, %v1839_v38  ;;  %v2009_v46 = vadd.f32 %v2008_v1, %v2007_v58  ;;  %v8444_v0 = vadd.f32 %v5769_v34, %v8155_v3  ;;  %v1683_v56 = vpop.f32.mrb[37].mxu0  ;;  %v2012_v28 = vsel %vm1772_vm3, %v1924_v6, 0.0 }
 0x40f   : > { %v2010_v35 = vsel %vm1772_vm3, %v1923_v59, 0.0  ;;  %v8450_v60 = vadd.f32 %v8155_v3, %v1683_v56 }
 0x410   : > { %v2011_v13 = vadd.f32 %v2010_v35, %v2009_v46  ;;  %v1843_v39 = vadd.f32 %v1842_v50, %v1841_v52  ;;  %v1926_v33 = vmul.f32 %v8444_v0, %v8444_v0  ;;  %v1846_v11 = vsel %vm1772_vm3, %v8444_v0, 0.0 }
 0x411   : > { %v1844_v8 = vsel %vm1772_vm3, %v8450_v60, 0.0  ;;  %v1925_v20 = vmul.f32 %v8450_v60, %v8450_v60  ;;  %v5772_v47 = vpop.f32.mrb[38].mxu0 }
 0x412   : > { %v1845_v14 = vadd.f32 %v1844_v8, %v1843_v39  ;;  %v2013_v17 = vadd.f32 %v2012_v28, %v2011_v13  ;;  %v8460_v48 = vadd.f32 %v5772_v47, %v8155_v3  ;;  %v1693_v54 = vpop.f32.mrb[39].mxu0  ;;  %v2016_v27 = vsel %vm1772_vm3, %v1926_v33, 0.0 }
 0x413   : > { %v2014_v58 = vsel %vm1772_vm3, %v1925_v20, 0.0  ;;  %v8466_v38 = vadd.f32 %v8155_v3, %v1693_v54 }
 0x414   : > { %v2015_v1 = vadd.f32 %v2014_v58, %v2013_v17  ;;  %v1847_v6 = vadd.f32 %v1846_v11, %v1845_v14  ;;  %v1928_v59 = vmul.f32 %v8460_v48, %v8460_v48  ;;  %v1850_v39 = vsel %vm1772_vm3, %v8460_v48, 0.0 }
 0x415   : > { %v1848_v34 = vsel %vm1772_vm3, %v8466_v38, 0.0  ;;  %v1927_v52 = vmul.f32 %v8466_v38, %v8466_v38  ;;  %v5775_v46 = vpop.f32.mrb[40].mxu0 }
 0x416   : > { %v1849_v56 = vadd.f32 %v1848_v34, %v1847_v6  ;;  %v2017_v50 = vadd.f32 %v2016_v27, %v2015_v1  ;;  %v8476_v35 = vadd.f32 %v5775_v46, %v8155_v3  ;;  %v1703_v13 = vpop.f32.mrb[41].mxu0  ;;  %v2020_v47 = vsel %vm1772_vm3, %v1928_v59, 0.0 }
 0x417   : > { %v2018_v28 = vsel %vm1772_vm3, %v1927_v52, 0.0  ;;  %v8482_v33 = vadd.f32 %v8155_v3, %v1703_v13 }
 0x418   : > { %v2019_v8 = vadd.f32 %v2018_v28, %v2017_v50  ;;  %v1851_v20 = vadd.f32 %v1850_v39, %v1849_v56  ;;  %v1930_v14 = vmul.f32 %v8476_v35, %v8476_v35  ;;  %v1854_v34 = vsel %vm1772_vm3, %v8476_v35, 0.0 }
 0x419   : > { %v1852_v17 = vsel %vm1772_vm3, %v8482_v33, 0.0  ;;  %v1929_v54 = vmul.f32 %v8482_v33, %v8482_v33  ;;  %v5778_v11 = vpop.f32.mrb[42].mxu0 }
 0x41a   : > { %v1853_v58 = vadd.f32 %v1852_v17, %v1851_v20  ;;  %v2021_v1 = vadd.f32 %v2020_v47, %v2019_v8  ;;  %v8492_v6 = vadd.f32 %v5778_v11, %v8155_v3  ;;  %v1713_v27 = vpop.f32.mrb[43].mxu0  ;;  %v2024_v50 = vsel %vm1772_vm3, %v1930_v14, 0.0 }
 0x41b   : > { %v2022_v59 = vsel %vm1772_vm3, %v1929_v54, 0.0  ;;  %v8498_v52 = vadd.f32 %v8155_v3, %v1713_v27 }
 0x41c   : > { %v2023_v46 = vadd.f32 %v2022_v59, %v2021_v1  ;;  %v1855_v56 = vadd.f32 %v1854_v34, %v1853_v58  ;;  %v1932_v13 = vmul.f32 %v8492_v6, %v8492_v6  ;;  %v1858_v11 = vsel %vm1772_vm3, %v8492_v6, 0.0 }
 0x41d   : > { %v1856_v39 = vsel %vm1772_vm3, %v8498_v52, 0.0  ;;  %v1931_v28 = vmul.f32 %v8498_v52, %v8498_v52  ;;  %v5781_v8 = vpop.f32.mrb[44].mxu0 }
 0x41e   : > { %v1857_v20 = vadd.f32 %v1856_v39, %v1855_v56  ;;  %v2025_v47 = vadd.f32 %v2024_v50, %v2023_v46  ;;  %v8508_v17 = vadd.f32 %v5781_v8, %v8155_v3  ;;  %v1723_v54 = vpop.f32.mrb[45].mxu0  ;;  %v2028_v34 = vsel %vm1772_vm3, %v1932_v13, 0.0 }
 0x41f   : > { %v2026_v14 = vsel %vm1772_vm3, %v1931_v28, 0.0  ;;  %v8514_v58 = vadd.f32 %v8155_v3, %v1723_v54 }
 0x420   : > { %v2027_v1 = vadd.f32 %v2026_v14, %v2025_v47  ;;  %v1859_v27 = vadd.f32 %v1858_v11, %v1857_v20  ;;  %v1934_v59 = vmul.f32 %v8508_v17, %v8508_v17  ;;  %v1862_v20 = vsel %vm1772_vm3, %v8508_v17, 0.0 }
 0x421   : > { %v1860_v46 = vsel %vm1772_vm3, %v8514_v58, 0.0  ;;  %v1933_v56 = vmul.f32 %v8514_v58, %v8514_v58  ;;  %v5784_v50 = vpop.f32.mrb[46].mxu0 }
 0x422   : > { %v1861_v39 = vadd.f32 %v1860_v46, %v1859_v27  ;;  %v2029_v8 = vadd.f32 %v2028_v34, %v2027_v1  ;;  %v8524_v28 = vadd.f32 %v5784_v50, %v8155_v3  ;;  %v1733_v54 = vpop.f32.mrb[47].mxu0  ;;  %v2032_v10 = vsel %vm1772_vm3, %v1934_v59, 0.0 }
 0x423   : > { %v2030_v13 = vsel %vm1772_vm3, %v1933_v56, 0.0  ;;  %v8530_v47 = vadd.f32 %v8155_v3, %v1733_v54 }
 0x424   : > { %v2031_v11 = vadd.f32 %v2030_v13, %v2029_v8  ;;  %v1863_v14 = vadd.f32 %v1862_v20, %v1861_v39  ;;  %v1936_v27 = vmul.f32 %v8524_v28, %v8524_v28  ;;  %v1866_v39 = vsel %vm1772_vm3, %v8524_v28, 0.0 }
 0x425   : > { %v1864_v1 = vsel %vm1772_vm3, %v8530_v47, 0.0  ;;  %v1935_v34 = vmul.f32 %v8530_v47, %v8530_v47  ;;  %v5787_v46 = vpop.f32.mrb[48].mxu0 }
 0x426   : > { %v1865_v50 = vadd.f32 %v1864_v1, %v1863_v14  ;;  %v2033_v41 = vadd.f32 %v2032_v10, %v2031_v11  ;;  %v8540_v56 = vadd.f32 %v5787_v46, %v8155_v3  ;;  %v1743_v54 = vpop.f32.mrb[49].mxu0  ;;  %v2036_v45 = vsel %vm1772_vm3, %v1936_v27, 0.0 }
 0x427   : > { %v2034_v59 = vsel %vm1772_vm3, %v1935_v34, 0.0  ;;  %v8546_v8 = vadd.f32 %v8155_v3, %v1743_v54 }
 0x428   : > { %v2035_v20 = vadd.f32 %v2034_v59, %v2033_v41  ;;  %v1867_v13 = vadd.f32 %v1866_v39, %v1865_v50  ;;  %v1938_v14 = vmul.f32 %v8540_v56, %v8540_v56  ;;  %v1870_v41 = vsel %vm1772_vm3, %v8540_v56, 0.0 }
 0x429   : > { %v1868_v10 = vsel %vm1772_vm3, %v8546_v8, 0.0  ;;  %v1937_v11 = vmul.f32 %v8546_v8, %v8546_v8  ;;  %v5790_v1 = vpop.f32.mrb[50].mxu0 }
 0x42a   : > { %v1869_v46 = vadd.f32 %v1868_v10, %v1867_v13  ;;  %v2037_v40 = vadd.f32 %v2036_v45, %v2035_v20  ;;  %v8556_v34 = vadd.f32 %v5790_v1, %v8155_v3  ;;  %v1753_v54 = vpop.f32.mrb[51].mxu0  ;;  %v2040_v5 = vsel %vm1772_vm3, %v1938_v14, 0.0 }
 0x42b   : > { %v2038_v27 = vsel %vm1772_vm3, %v1937_v11, 0.0  ;;  %v8562_v50 = vadd.f32 %v8155_v3, %v1753_v54 }
 0x42c   : > { %10716 = vst [vmem:[#allocation31_spill] sm:$0xff] %v8556_v34  ;;  %v2039_v39 = vadd.f32 %v2038_v27, %v2037_v40  ;;  %v1871_v59 = vadd.f32 %v1870_v41, %v1869_v46  ;;  %v1940_v13 = vmul.f32 %v8556_v34, %v8556_v34  ;;  %v1874_v40 = vsel %vm1772_vm3, %v8556_v34, 0.0 }
 0x42d   : > { %10717 = vst [vmem:[#allocation40_spill] sm:$0xff] %v8562_v50  ;;  %v1872_v45 = vsel %vm1772_vm3, %v8562_v50, 0.0  ;;  %v1939_v20 = vmul.f32 %v8562_v50, %v8562_v50  ;;  %v5793_v10 = vpop.f32.mrb[52].mxu0 }
 0x42e   : > { %v1873_v1 = vadd.f32 %v1872_v45, %v1871_v59  ;;  %v2041_v29 = vadd.f32 %v2040_v5, %v2039_v39  ;;  %v8572_v11 = vadd.f32 %v5793_v10, %v8155_v3  ;;  %v1763_v54 = vpop.f32.mrb[53].mxu0  ;;  %v2044_v32 = vsel %vm1772_vm3, %v1940_v13, 0.0 }
 0x42f   : > { %v2042_v14 = vsel %vm1772_vm3, %v1939_v20, 0.0  ;;  %v8578_v46 = vadd.f32 %v8155_v3, %v1763_v54  ;;  %v2430_v20 = vld [vmem:[#allocation2 + $0x2a8] sm:$0xff] }
 0x430   : > { %10718 = vst [vmem:[#allocation41_spill] sm:$0xff] %v8572_v11  ;;  %v2043_v41 = vadd.f32 %v2042_v14, %v2041_v29  ;;  %v1875_v27 = vadd.f32 %v1874_v40, %v1873_v1  ;;  %v1942_v5 = vmul.f32 %v8572_v11, %v8572_v11  ;;  %v1879_v3 = vsel %vm1878_vm4, %v8572_v11, 0.0  ;;  %2897 = vmatprep.mubr.f32.mxu1 %v2430_v20 }
 0x431   : > { %v1876_v39 = vsel %vm1772_vm3, %v8578_v46, 0.0  ;;  %v1941_v59 = vmul.f32 %v8578_v46, %v8578_v46 }
 0x432   : > { %v1877_v45 = vadd.f32 %v1876_v39, %v1875_v27  ;;  %v2045_v10 = vadd.f32 %v2044_v32, %v2043_v41  ;;  %v2048_v54 = vsel %vm1878_vm4, %v1942_v5, 0.0 }
 0x433   : > { %v2046_v29 = vsel %vm1772_vm3, %v1941_v59, 0.0 }
 0x434   : > { %v1880_v1 = vadd.f32 %v1879_v3, %v1877_v45  ;;  %v2047_v13 = vadd.f32 %v2046_v29, %v2045_v10 }
 0x436   : > { %v1881_v40 = vrot.slane %v1880_v1, 4  ;;  %v2049_v14 = vadd.f32 %v2048_v54, %v2047_v13 }
 0x438   : > { %v1882_v30 = vadd.f32 %v1881_v40, %v1880_v1  ;;  %v2050_v2 = vrot.slane %v2049_v14, 4  ;;  %v10723_v40 = vld [vmem:[#allocation29_spill] sm:$0xff] }
 0x43a   : > { %v1883_v22 = vrot.slane %v1882_v30, 2  ;;  %v2051_v34 = vadd.f32 %v2050_v2, %v2049_v14  ;;  %v10724_v14 = vld [vmem:[#allocation34_spill] sm:$0xff] }
 0x43c   : > { %v1884_v50 = vadd.f32 %v1883_v22, %v1882_v30  ;;  %v2052_v27 = vrot.slane %v2051_v34, 2 }
 0x43e   : > { %v1885_v32 = vrot.slane %v1884_v50, 1  ;;  %v2053_v41 = vadd.f32 %v2052_v27, %v2051_v34  ;;  %v10725_v27 = vld [vmem:[#allocation33_spill] sm:$0xff] }
 0x440   : > { %v1886_v39 = vadd.f32 %v1885_v32, %v1884_v50  ;;  %v2054_v57 = vrot.slane %v2053_v41, 1  ;;  %v10719_v32 = vld [vmem:[#allocation32_spill] sm:$0xff] }
 0x442   : > { %v8591_v11 = vmul.f32 0.0023201855, %v1886_v39  ;;  %v2055_v59 = vadd.f32 %v2054_v57, %v2053_v41 }
 0x444   : > { %v2056_v20 = vmul.f32 0.0023201855, %v2055_v59  ;;  %v2057_v45 = vmul.f32 %v8591_v11, %v8591_v11  ;;  %v2111_v5 = vsub.f32 %v8578_v46, %v8591_v11  ;;  %v2059_v2 = vsub.f32 %v8161_v24, %v8591_v11  ;;  %v8695_v59 = vld [vmem:[#allocation10] ss:$0 sm:$0xff] }
 0x445   : > { %v2060_v22 = vsub.f32 %v8158_v4, %v8591_v11  ;;  %v2061_v34 = vsub.f32 %v8177_v62, %v8591_v11  ;;  %v2062_v57 = vsub.f32 %v8172_v44, %v8591_v11  ;;  %v2063_v50 = vsub.f32 %v8192_v19, %v8591_v11  ;;  %10727 = vst [vmem:[#allocation32_spill] sm:$0xff] %v8695_v59 }
 0x446   : > { %v2058_v10 = vsub.f32 %v2056_v20, %v2057_v45  ;;  %v2064_v46 = vsub.f32 %v8186_v51, %v8591_v11  ;;  %v2065_v3 = vsub.f32 %v8208_v43, %v8591_v11  ;;  %v2066_v24 = vsub.f32 %v8202_v42, %v8591_v11  ;;  %v10728_v45 = vld [vmem:[#allocation35_spill] sm:$0xff] }
 0x447   : > { %v2067_v4 = vsub.f32 %v8224_v25, %v8591_v11  ;;  %v2068_v62 = vsub.f32 %v8218_v15, %v8591_v11  ;;  %v2069_v44 = vsub.f32 %v8240_v26, %v8591_v11  ;;  %v2070_v19 = vsub.f32 %v8234_v49, %v8591_v11 }
 0x448   : > { %v2113_v30 = vadd.f32 1e-05, %v2058_v10  ;;  %v2071_v51 = vsub.f32 %v8256_v37, %v8591_v11  ;;  %v2072_v43 = vsub.f32 %v8250_v9, %v8591_v11  ;;  %v2073_v42 = vsub.f32 %v8272_v53, %v8591_v11  ;;  %v8709_v10 = vld [vmem:[#allocation12] ss:$0 sm:$0xff] }
 0x449   : > { %v2074_v25 = vsub.f32 %v8266_v31, %v8591_v11  ;;  %v2075_v15 = vsub.f32 %v8288_v21, %v8591_v11  ;;  %v2076_v26 = vsub.f32 %v8282_v12, %v8591_v11  ;;  %v2077_v49 = vsub.f32 %v8304_v7, %v8591_v11  ;;  %10732 = vst [vmem:[#allocation29_spill] sm:$0xff] %v8709_v10 }
 0x44a   : > { %6365 = vrsqrt.f32 %v2113_v30  ;;  %v2078_v37 = vsub.f32 %v8298_v36, %v8591_v11  ;;  %v2079_v9 = vsub.f32 %v8320_v63, %v8591_v11  ;;  %v2080_v53 = vsub.f32 %v8314_v16, %v8591_v11  ;;  %v10729_v30 = vld [vmem:[#allocation38_spill] sm:$0xff] }
 0x44b   : > { %v2081_v31 = vsub.f32 %v8336_v18, %v8591_v11  ;;  %v2082_v21 = vsub.f32 %v8330_v23, %v8591_v11  ;;  %v2083_v12 = vsub.f32 %v8354_v55, %v8591_v11  ;;  %v2084_v7 = vsub.f32 %v8346_v61, %v8591_v11 }
 0x44c   : > { %v2085_v41 = vsub.f32 %v10719_v32, %v8591_v11  ;;  %v2086_v54 = vsub.f32 %v10723_v40, %v8591_v11  ;;  %v2087_v13 = vsub.f32 %v10724_v14, %v8591_v11  ;;  %v2088_v1 = vsub.f32 %v10725_v27, %v8591_v11  ;;  %v10726_v32 = vld [vmem:[#allocation36_spill] sm:$0xff]  ;;  %v10730_v40 = vld [vmem:[#allocation37_spill] sm:$0xff]  ;;  %v10731_v14 = vld [vmem:[#allocation30_spill] sm:$0xff] }
 0x44d   : > { %v2089_v29 = vsub.f32 %v10726_v32, %v8591_v11  ;;  %v2090_v55 = vsub.f32 %v10728_v45, %v8591_v11  ;;  %v2091_v23 = vsub.f32 %v10729_v30, %v8591_v11  ;;  %v2092_v18 = vsub.f32 %v10730_v40, %v8591_v11 }
 0x44e   : > { %v2093_v16 = vsub.f32 %v10731_v14, %v8591_v11 }
 0x454   : > { %v8693_v61 = vpop.eup %6365 }
 0x455   : > { %v2167_v27 = vmul.f32 %v8693_v61, %v2111_v5  ;;  %v2115_v32 = vmul.f32 %v8693_v61, %v2059_v2  ;;  %v2116_v63 = vmul.f32 %v8693_v61, %v2060_v22  ;;  %v2117_v36 = vmul.f32 %v8693_v61, %v2061_v34 }
 0x456   : > { %v2118_v45 = vmul.f32 %v8693_v61, %v2062_v57  ;;  %v2119_v30 = vmul.f32 %v8693_v61, %v2063_v50  ;;  %v2120_v20 = vmul.f32 %v8693_v61, %v2064_v46  ;;  %v2121_v40 = vmul.f32 %v8693_v61, %v2065_v3 }
 0x457   : > { %v2228_v14 = vmul.f32 %v8695_v59, %v2167_v27  ;;  %v2122_v5 = vmul.f32 %v8693_v61, %v2066_v24  ;;  %v2123_v2 = vmul.f32 %v8693_v61, %v2067_v4  ;;  %v2124_v22 = vmul.f32 %v8693_v61, %v2068_v62 }
 0x458   : > { %v2125_v34 = vmul.f32 %v8693_v61, %v2069_v44  ;;  %v2126_v39 = vmul.f32 %v8693_v61, %v2070_v19  ;;  %v2127_v57 = vmul.f32 %v8693_v61, %v2071_v51  ;;  %v2128_v50 = vmul.f32 %v8693_v61, %v2072_v43  ;;  %v10734_v51 = vld [vmem:[#allocation39_spill] sm:$0xff] }
 0x459   : > { %v8724_v46 = vadd.f32 %v8709_v10, %v2228_v14  ;;  %v2129_v3 = vmul.f32 %v8693_v61, %v2073_v42  ;;  %v2130_v27 = vmul.f32 %v8693_v61, %v2074_v25  ;;  %v2131_v24 = vmul.f32 %v8693_v61, %v2075_v15 }
 0x45a   : > { %v2132_v4 = vmul.f32 %v8693_v61, %v2076_v26  ;;  %v2133_v62 = vmul.f32 %v8693_v61, %v2077_v49  ;;  %v2134_v44 = vmul.f32 %v8693_v61, %v2078_v37  ;;  %v2135_v19 = vmul.f32 %v8693_v61, %v2079_v9 }
 0x45b   : > { %10733 = vst [vmem:[#allocation34_spill] sm:$0xff] %v8724_v46  ;;  %v2094_v43 = vsub.f32 %v10734_v51, %v8591_v11  ;;  %v2136_v14 = vmul.f32 %v8693_v61, %v2080_v53  ;;  %v2137_v10 = vmul.f32 %v8693_v61, %v2081_v31  ;;  %v2138_v42 = vmul.f32 %v8693_v61, %v2082_v21 }
 0x45c   : > { %v2139_v25 = vmul.f32 %v8693_v61, %v2083_v12  ;;  %v2140_v15 = vmul.f32 %v8693_v61, %v2084_v7  ;;  %v2141_v26 = vmul.f32 %v8693_v61, %v2085_v41  ;;  %v2142_v49 = vmul.f32 %v8693_v61, %v2086_v54 }
 0x45d   : > { %v2143_v37 = vmul.f32 %v8693_v61, %v2087_v13  ;;  %v2144_v9 = vmul.f32 %v8693_v61, %v2088_v1  ;;  %v2145_v51 = vmul.f32 %v8693_v61, %v2089_v29  ;;  %v8746_v53 = vmul.f32 %v8693_v61, %v2090_v55 }
 0x45e   : > { %v2147_v31 = vmul.f32 %v8693_v61, %v2091_v23  ;;  %v2148_v21 = vmul.f32 %v8693_v61, %v2092_v18  ;;  %v2149_v12 = vmul.f32 %v8693_v61, %v2093_v16  ;;  %v2150_v7 = vmul.f32 %v8693_v61, %v2094_v43 }
 0x45f   : > { %10735 = vst [vmem:[#allocation33_spill] sm:$0xff] %v8746_v53  ;;  %v10736_v54 = vsub.f32 %v8450_v60, %v8591_v11  ;;  %v10737_v1 = vsub.f32 %v8444_v0, %v8591_v11  ;;  %v10738_v55 = vsub.f32 %v8466_v38, %v8591_v11  ;;  %v10739_v16 = vsub.f32 %v8460_v48, %v8591_v11 }
 0x460   : > { %v10740_v60 = vsub.f32 %v8482_v33, %v8591_v11  ;;  %v10741_v0 = vsub.f32 %v8476_v35, %v8591_v11  ;;  %v10742_v38 = vsub.f32 %v8498_v52, %v8591_v11  ;;  %v10743_v48 = vsub.f32 %v8492_v6, %v8591_v11 }
 0x461   : > { %v2151_v13 = vmul.f32 %v8693_v61, %v10736_v54  ;;  %v2152_v29 = vmul.f32 %v8693_v61, %v10737_v1  ;;  %v2153_v23 = vmul.f32 %v8693_v61, %v10738_v55  ;;  %v2154_v18 = vmul.f32 %v8693_v61, %v10739_v16 }
 0x462   : > { %v2155_v41 = vmul.f32 %v8693_v61, %v10740_v60  ;;  %v2156_v43 = vmul.f32 %v8693_v61, %v10741_v0  ;;  %v2157_v54 = vmul.f32 %v8693_v61, %v10742_v38  ;;  %v2158_v1 = vmul.f32 %v8693_v61, %v10743_v48 }
 0x463   : > { %v10744_v33 = vsub.f32 %v8514_v58, %v8591_v11  ;;  %v10745_v35 = vsub.f32 %v8508_v17, %v8591_v11  ;;  %v10746_v52 = vsub.f32 %v8530_v47, %v8591_v11  ;;  %v10747_v6 = vsub.f32 %v8524_v28, %v8591_v11 }
 0x464   : > { %v10748_v58 = vsub.f32 %v8546_v8, %v8591_v11  ;;  %v10749_v17 = vsub.f32 %v8540_v56, %v8591_v11  ;;  %v10754_v8 = vld [vmem:[#allocation41_spill] sm:$0xff]  ;;  %v10756_v56 = vld [vmem:[#allocation32_spill] sm:$0xff] }
 0x465   : > { %v2159_v55 = vmul.f32 %v8693_v61, %v10744_v33  ;;  %v2160_v16 = vmul.f32 %v8693_v61, %v10745_v35  ;;  %v2161_v60 = vmul.f32 %v8693_v61, %v10746_v52  ;;  %v2162_v0 = vmul.f32 %v8693_v61, %v10747_v6  ;;  %v10750_v33 = vld [vmem:[#allocation40_spill] sm:$0xff]  ;;  %v10752_v52 = vld [vmem:[#allocation31_spill] sm:$0xff] }
 0x466   : > { %v2163_v38 = vmul.f32 %v8693_v61, %v10748_v58  ;;  %v2164_v48 = vmul.f32 %v8693_v61, %v10749_v17  ;;  %v10751_v47 = vsub.f32 %v10750_v33, %v8591_v11  ;;  %v10753_v28 = vsub.f32 %v10752_v52, %v8591_v11 }
 0x467   : > { %v10755_v58 = vsub.f32 %v10754_v8, %v8591_v11  ;;  %v2176_v17 = vmul.f32 %v10756_v56, %v2115_v32  ;;  %v2177_v33 = vmul.f32 %v10756_v56, %v2116_v63  ;;  %v2179_v52 = vmul.f32 %v10756_v56, %v2118_v45 }
 0x468   : > { %v2165_v35 = vmul.f32 %v8693_v61, %v10751_v47  ;;  %v2166_v6 = vmul.f32 %v8693_v61, %v10753_v28  ;;  %v2178_v47 = vmul.f32 %v10756_v56, %v2117_v36  ;;  %v2180_v28 = vmul.f32 %v10756_v56, %v2119_v30 }
 0x469   : > { %v2168_v59 = vmul.f32 %v8693_v61, %v10755_v58  ;;  %v2181_v46 = vmul.f32 %v10756_v56, %v2120_v20  ;;  %v2182_v53 = vmul.f32 %v10756_v56, %v2121_v40  ;;  %v2183_v8 = vmul.f32 %v10756_v56, %v2122_v5 }
 0x46a   : > { %v8830_v11 = vmul.f32 %v10756_v56, %v2123_v2  ;;  %v8833_v61 = vmul.f32 %v10756_v56, %v2124_v22  ;;  %v8836_v63 = vmul.f32 %v10756_v56, %v2125_v34  ;;  %v8839_v36 = vmul.f32 %v10756_v56, %v2126_v39 }
 0x46b   : > { %v8842_v32 = vmul.f32 %v10756_v56, %v2127_v57  ;;  %v8845_v20 = vmul.f32 %v10756_v56, %v2128_v50  ;;  %v8848_v45 = vmul.f32 %v10756_v56, %v2129_v3  ;;  %v8851_v30 = vmul.f32 %v10756_v56, %v2130_v27 }
 0x46c   : > { %v8854_v40 = vmul.f32 %v10756_v56, %v2131_v24  ;;  %v8857_v5 = vmul.f32 %v10756_v56, %v2132_v4  ;;  %v8860_v39 = vmul.f32 %v10756_v56, %v2133_v62  ;;  %v8863_v2 = vmul.f32 %v10756_v56, %v2134_v44 }
 0x46d   : > { %v8866_v22 = vmul.f32 %v10756_v56, %v2135_v19  ;;  %v8869_v34 = vmul.f32 %v10756_v56, %v2136_v14  ;;  %v8872_v57 = vmul.f32 %v10756_v56, %v2137_v10  ;;  %v8875_v50 = vmul.f32 %v10756_v56, %v2138_v42 }
 0x46e   : > { %v8878_v3 = vmul.f32 %v10756_v56, %v2139_v25  ;;  %v8881_v27 = vmul.f32 %v10756_v56, %v2140_v15  ;;  %v8884_v24 = vmul.f32 %v10756_v56, %v2141_v26  ;;  %v8887_v4 = vmul.f32 %v10756_v56, %v2142_v49 }
 0x46f   : > { %v8890_v62 = vmul.f32 %v10756_v56, %v2143_v37  ;;  %v8893_v10 = vmul.f32 %v10756_v56, %v2144_v9  ;;  %v8896_v44 = vmul.f32 %v10756_v56, %v2145_v51  ;;  %v8899_v19 = vmul.f32 %v10756_v56, %v2147_v31 }
 0x470   : > { %v8902_v14 = vmul.f32 %v10756_v56, %v2148_v21  ;;  %v8905_v42 = vmul.f32 %v10756_v56, %v2149_v12  ;;  %v8908_v25 = vmul.f32 %v10756_v56, %v2150_v7  ;;  %v8911_v15 = vmul.f32 %v10756_v56, %v2151_v13 }
 0x471   : > { %v8914_v26 = vmul.f32 %v10756_v56, %v2152_v29  ;;  %v8917_v49 = vmul.f32 %v10756_v56, %v2153_v23  ;;  %v8920_v37 = vmul.f32 %v10756_v56, %v2154_v18  ;;  %v8923_v9 = vmul.f32 %v10756_v56, %v2155_v41 }
 0x472   : > { %v8926_v51 = vmul.f32 %v10756_v56, %v2156_v43  ;;  %v8929_v31 = vmul.f32 %v10756_v56, %v2157_v54  ;;  %v8932_v21 = vmul.f32 %v10756_v56, %v2158_v1  ;;  %v8935_v12 = vmul.f32 %v10756_v56, %v2159_v55  ;;  %v10762_v1 = vld [vmem:[#allocation29_spill] sm:$0xff] }
 0x473   : > { %v8938_v7 = vmul.f32 %v10756_v56, %v2160_v16  ;;  %v8941_v13 = vmul.f32 %v10756_v56, %v2161_v60  ;;  %v8944_v29 = vmul.f32 %v10756_v56, %v2162_v0  ;;  %v8947_v23 = vmul.f32 %v10756_v56, %v2163_v38 }
 0x474   : > { %v8950_v18 = vmul.f32 %v10756_v56, %v2164_v48  ;;  %v8953_v41 = vmul.f32 %v10756_v56, %v2165_v35  ;;  %v8956_v43 = vmul.f32 %v10756_v56, %v2166_v6  ;;  %v2229_v54 = vmul.f32 %v10756_v56, %v2168_v59 }
 0x475   : > { %10757 = vst [vmem:[#allocation36_spill] sm:$0xff] %v8944_v29  ;;  %10758 = vst [vmem:[#allocation35_spill] sm:$0xff] %v8947_v23  ;;  %v2237_v55 = vadd.f32 %v10762_v1, %v2176_v17  ;;  %v2238_v16 = vadd.f32 %v10762_v1, %v2177_v33  ;;  %v2239_v60 = vadd.f32 %v10762_v1, %v2178_v47  ;;  %v10763_v33 = vld [vmem:[#allocation33_spill] sm:$0xff] }
 0x476   : > { %10759 = vst [vmem:[#allocation38_spill] sm:$0xff] %v8950_v18  ;;  %10760 = vst [vmem:[#allocation37_spill] sm:$0xff] %v8953_v41  ;;  %v2240_v0 = vadd.f32 %v10762_v1, %v2179_v52  ;;  %v2241_v38 = vadd.f32 %v10762_v1, %v2180_v28  ;;  %v2242_v48 = vadd.f32 %v10762_v1, %v2181_v46 }
 0x477   : > { %10761 = vst [vmem:[#allocation30_spill] sm:$0xff] %v8956_v43  ;;  %v8966_v35 = vadd.f32 %v10762_v1, %v2229_v54  ;;  %v2291_v58 = vmax.f32 %v2237_v55, 0.0  ;;  %v2292_v6 = vmax.f32 %v2238_v16, 0.0  ;;  %v2243_v43 = vadd.f32 %v10762_v1, %v2182_v53 }
 0x478   : > { %v2293_v59 = vmax.f32 %v2239_v60, 0.0  ;;  %v2294_v41 = vmax.f32 %v2240_v0, 0.0  ;;  %v2295_v17 = vmax.f32 %v2241_v38, 0.0  ;;  %v2296_v18 = vmax.f32 %v2242_v48, 0.0 }
 0x479   : > { %v8971_v47 = vmul.f32 %v10756_v56, %v10763_v33  ;;  %v5989_v52 = vpack.c.bf16 %v2292_v6, %v2291_v58  ;;  %v2244_v28 = vadd.f32 %v10762_v1, %v2183_v8  ;;  %v2297_v23 = vmax.f32 %v2243_v43, 0.0 }
 0x47a   : > { %v5992_v46 = vpack.c.bf16 %v2294_v41, %v2293_v59  ;;  %v5995_v29 = vpack.c.bf16 %v2296_v18, %v2295_v17  ;;  %v2245_v54 = vadd.f32 %v10762_v1, %v8830_v11  ;;  %v2246_v53 = vadd.f32 %v10762_v1, %v8833_v61 }
 0x47b   : > { %5990 = vmatpush1.bf16.msra.mxu0 %v5989_v52  ;;  %6118 = vmatpush1.bf16.msra.mxu1 %v5989_v52  ;;  %v2298_v55 = vmax.f32 %v2244_v28, 0.0  ;;  %v2247_v16 = vadd.f32 %v10762_v1, %v8836_v63  ;;  %v2248_v56 = vadd.f32 %v10762_v1, %v8839_v36  ;;  %v2249_v8 = vadd.f32 %v10762_v1, %v8842_v32 }
 0x47c   : > { %v10764_v41 = vmov 0.0|0.0   ;;  %v2299_v11 = vmax.f32 %v2245_v54, 0.0  ;;  %v2300_v18 = vmax.f32 %v2246_v53, 0.0  ;;  %v2250_v61 = vadd.f32 %v10762_v1, %v8845_v20 }
 0x47d   : > { %5991 = vmatprep.subr.bf16.mxu0 %v10764_v41  ;;  %6103 = vmatprep.subr.bf16.mxu1 %v10764_v41  ;;  %v2251_v43 = vadd.f32 %v10762_v1, %v8848_v45  ;;  %v5998_v60 = vpack.c.bf16 %v2298_v55, %v2297_v23  ;;  %v2301_v63 = vmax.f32 %v2247_v16, 0.0  ;;  %v2302_v0 = vmax.f32 %v2248_v56, 0.0 }
 0x47e   : > { %v2303_v38 = vmax.f32 %v2249_v8, 0.0  ;;  %v8990_v36 = vpack.c.bf16 %v2300_v18, %v2299_v11  ;;  %v2304_v48 = vmax.f32 %v2250_v61, 0.0  ;;  %v2252_v32 = vadd.f32 %v10762_v1, %v8851_v30 }
 0x47f   : > { %v2305_v58 = vmax.f32 %v2251_v43, 0.0  ;;  %v2344_v6 = vmax.f32 %v8966_v35, 0.0  ;;  %5993 = vmatpush1.bf16.msra.mxu0 %v5992_v46  ;;  %6119 = vmatpush1.bf16.msra.mxu1 %v5992_v46  ;;  %v8995_v59 = vpack.c.bf16 %v2302_v0, %v2301_v63  ;;  %v2253_v20 = vadd.f32 %v10762_v1, %v8854_v40  ;;  %v2429_v35 = vld [vmem:[#allocation2 + $0x2a0] sm:$0xff] }
 0x480   : > { %v2254_v45 = vadd.f32 %v10762_v1, %v8857_v5  ;;  %5994 = vmatprep.subr.bf16.mxu0 %v10764_v41  ;;  %6104 = vmatprep.subr.bf16.mxu1 %v10764_v41  ;;  %v9003_v23 = vpack.c.bf16 %v2304_v48, %v2303_v38  ;;  %v2306_v30 = vmax.f32 %v2252_v32, 0.0  ;;  %v2255_v17 = vadd.f32 %v10762_v1, %v8860_v39 }
 0x481   : > { %v2256_v33 = vadd.f32 %v10762_v1, %v8863_v2  ;;  %v2307_v52 = vmax.f32 %v2253_v20, 0.0  ;;  %v2257_v40 = vadd.f32 %v10762_v1, %v8866_v22  ;;  %v2258_v5 = vadd.f32 %v10762_v1, %v8869_v34 }
 0x482   : > { %v2308_v28 = vmax.f32 %v2254_v45, 0.0  ;;  %v9013_v46 = vpack.c.bf16 %v2306_v30, %v2305_v58  ;;  %v2309_v54 = vmax.f32 %v2255_v17, 0.0  ;;  %v2259_v55 = vadd.f32 %v10762_v1, %v8872_v57 }
 0x483   : > { %v2310_v53 = vmax.f32 %v2256_v33, 0.0  ;;  %5996 = vmatpush1.bf16.msra.mxu0 %v5995_v29  ;;  %6120 = vmatpush1.bf16.msra.mxu1 %v5995_v29  ;;  %v2311_v2 = vmax.f32 %v2257_v40, 0.0  ;;  %v2312_v16 = vmax.f32 %v2258_v5, 0.0  ;;  %v2260_v56 = vadd.f32 %v10762_v1, %v8875_v50 }
 0x484   : > { %v9017_v39 = vpack.c.bf16 %v2308_v28, %v2307_v52  ;;  %5997 = vmatprep.subr.bf16.mxu0 %v10764_v41  ;;  %6105 = vmatprep.subr.bf16.mxu1 %v10764_v41  ;;  %v2313_v34 = vmax.f32 %v2259_v55, 0.0  ;;  %v2261_v8 = vadd.f32 %v10762_v1, %v8878_v3  ;;  %v2262_v57 = vadd.f32 %v10762_v1, %v8881_v27 }
 0x485   : > { %v9023_v22 = vpack.c.bf16 %v2310_v53, %v2309_v54  ;;  %v9029_v29 = vpack.c.bf16 %v2312_v16, %v2311_v2  ;;  %v2314_v11 = vmax.f32 %v2260_v56, 0.0  ;;  %v2263_v18 = vadd.f32 %v10762_v1, %v8884_v24 }
 0x486   : > { %v2264_v50 = vadd.f32 %v10762_v1, %v8887_v4  ;;  %v2315_v61 = vmax.f32 %v2261_v8, 0.0  ;;  %v2316_v43 = vmax.f32 %v2262_v57, 0.0  ;;  %v2265_v63 = vadd.f32 %v10762_v1, %v8890_v62 }
 0x487   : > { %v2266_v3 = vadd.f32 %v10762_v1, %v8893_v10  ;;  %5999 = vmatpush1.bf16.msra.mxu0 %v5998_v60  ;;  %6121 = vmatpush1.bf16.msra.mxu1 %v5998_v60  ;;  %v9039_v27 = vpack.c.bf16 %v2314_v11, %v2313_v34  ;;  %v2317_v0 = vmax.f32 %v2263_v18, 0.0  ;;  %v2267_v24 = vadd.f32 %v10762_v1, %v8896_v44 }
 0x488   : > { %v2318_v38 = vmax.f32 %v2264_v50, 0.0  ;;  %6000 = vmatprep.subr.bf16.mxu0 %v10764_v41  ;;  %6106 = vmatprep.subr.bf16.mxu1 %v10764_v41  ;;  %v9045_v4 = vpack.c.bf16 %v2316_v43, %v2315_v61  ;;  %v2319_v48 = vmax.f32 %v2265_v63, 0.0  ;;  %v2268_v10 = vadd.f32 %v10762_v1, %v8971_v47  ;;  %v10765_v50 = vld [vmem:[#allocation36_spill] sm:$0xff]  ;;  %v10766_v43 = vld [vmem:[#allocation35_spill] sm:$0xff] }
 0x489   : > { %v2320_v62 = vmax.f32 %v2266_v3, 0.0  ;;  %v2321_v60 = vmax.f32 %v2267_v24, 0.0  ;;  %v2269_v58 = vadd.f32 %v10762_v1, %v8899_v19  ;;  %v2270_v44 = vadd.f32 %v10762_v1, %v8902_v14  ;;  %v10767_v3 = vld [vmem:[#allocation38_spill] sm:$0xff]  ;;  %v10768_v24 = vld [vmem:[#allocation37_spill] sm:$0xff] }
 0x48a   : > { %v9049_v32 = vpack.c.bf16 %v2318_v38, %v2317_v0  ;;  %v2322_v45 = vmax.f32 %v2268_v10, 0.0  ;;  %v2271_v30 = vadd.f32 %v10762_v1, %v8905_v42  ;;  %v2272_v17 = vadd.f32 %v10762_v1, %v8908_v25 }
 0x48b   : > { %v9055_v20 = vpack.c.bf16 %v2320_v62, %v2319_v48  ;;  %6002 = vmatpush1.bf16.msra.mxu0 %v8990_v36  ;;  %6122 = vmatpush1.bf16.msra.mxu1 %v8990_v36  ;;  %v2323_v47 = vmax.f32 %v2269_v58, 0.0  ;;  %v2324_v33 = vmax.f32 %v2270_v44, 0.0  ;;  %v2273_v19 = vadd.f32 %v10762_v1, %v8911_v15  ;;  %v10770_v58 = vld [vmem:[#allocation34_spill] sm:$0xff] }
 0x48c   : > { %v2274_v14 = vadd.f32 %v10762_v1, %v8914_v26  ;;  %6003 = vmatprep.subr.bf16.mxu0 %v10764_v41  ;;  %6107 = vmatprep.subr.bf16.mxu1 %v10764_v41  ;;  %v9069_v42 = vpack.c.bf16 %v2322_v45, %v2321_v60  ;;  %v2325_v52 = vmax.f32 %v2271_v30, 0.0  ;;  %v2326_v25 = vmax.f32 %v2272_v17, 0.0 }
 0x48d   : > { %v2275_v28 = vadd.f32 %v10762_v1, %v8917_v49  ;;  %v9073_v36 = vpack.c.bf16 %v2324_v33, %v2323_v47  ;;  %v2327_v40 = vmax.f32 %v2273_v19, 0.0  ;;  %v2276_v15 = vadd.f32 %v10762_v1, %v8920_v37  ;;  %v2354_v19 = vld [vmem:[#allocation2 + $0x48] sm:$0xff] }
 0x48e   : > { %v2328_v5 = vmax.f32 %v2274_v14, 0.0  ;;  %v9077_v54 = vpack.c.bf16 %v2326_v25, %v2325_v52  ;;  %v2277_v53 = vadd.f32 %v10762_v1, %v8923_v9  ;;  %v2278_v55 = vadd.f32 %v10762_v1, %v8926_v51  ;;  %v2441_v14 = vld [vmem:[#allocation2 + $0x300] sm:$0xff]  ;;  %v2446_v52 = vld [vmem:[#allocation2 + $0x328] sm:$0xff] }
 0x48f   : > { %v2329_v26 = vmax.f32 %v2275_v28, 0.0  ;;  %6005 = vmatpush1.bf16.msra.mxu0 %v8995_v59  ;;  %6123 = vmatpush1.bf16.msra.mxu1 %v8995_v59  ;;  %v2330_v2 = vmax.f32 %v2276_v15, 0.0  ;;  %v2279_v16 = vadd.f32 %v10762_v1, %v8929_v31  ;;  %v2280_v37 = vadd.f32 %v10762_v1, %v8932_v21  ;;  %v2358_v25 = vld [vmem:[#allocation2 + $0x68] sm:$0xff]  ;;  %v2445_v28 = vld [vmem:[#allocation2 + $0x320] sm:$0xff] }
 0x490   : > { %v9085_v49 = vpack.c.bf16 %v2328_v5, %v2327_v40  ;;  %6006 = vmatprep.subr.bf16.mxu0 %v10764_v41  ;;  %6108 = vmatprep.subr.bf16.mxu1 %v10764_v41  ;;  %v2331_v9 = vmax.f32 %v2277_v53, 0.0  ;;  %v2332_v56 = vmax.f32 %v2278_v55, 0.0  ;;  %v2281_v51 = vadd.f32 %v10762_v1, %v8935_v12  ;;  %v2450_v40 = vld [vmem:[#allocation2 + $0x348] sm:$0xff]  ;;  %v2449_v15 = vld [vmem:[#allocation2 + $0x340] sm:$0xff] }
 0x491   : > { %v2282_v59 = vadd.f32 %v10762_v1, %v8938_v7  ;;  %v9097_v34 = vpack.c.bf16 %v2330_v2, %v2329_v26  ;;  %v2333_v8 = vmax.f32 %v2279_v16, 0.0  ;;  %v2334_v57 = vmax.f32 %v2280_v37, 0.0  ;;  %v2362_v5 = vld [vmem:[#allocation2 + $0x88] sm:$0xff]  ;;  %v2453_v55 = vld [vmem:[#allocation2 + $0x360] sm:$0xff] }
 0x492   : > { %v2283_v31 = vadd.f32 %v10762_v1, %v8941_v13  ;;  %v9101_v21 = vpack.c.bf16 %v2332_v56, %v2331_v9  ;;  %v2335_v11 = vmax.f32 %v2281_v51, 0.0  ;;  %v2284_v61 = vadd.f32 %v10762_v1, %v10765_v50  ;;  %v2454_v26 = vld [vmem:[#allocation2 + $0x368] sm:$0xff]  ;;  %v2457_v37 = vld [vmem:[#allocation2 + $0x380] sm:$0xff] }
 0x493   : > { %v2336_v18 = vmax.f32 %v2282_v59, 0.0  ;;  %6008 = vmatpush1.bf16.msra.mxu0 %v9003_v23  ;;  %6124 = vmatpush1.bf16.msra.mxu1 %v9003_v23  ;;  %v9107_v12 = vpack.c.bf16 %v2334_v57, %v2333_v8  ;;  %v2285_v63 = vadd.f32 %v10762_v1, %v10766_v43  ;;  %v2286_v13 = vadd.f32 %v10762_v1, %v10767_v3  ;;  %v10769_v23 = vld [vmem:[#allocation30_spill] sm:$0xff]  ;;  %v2366_v53 = vld [vmem:[#allocation2 + $0xa8] sm:$0xff] }
 0x494   : > { %v2337_v7 = vmax.f32 %v2283_v31, 0.0  ;;  %6009 = vmatprep.subr.bf16.mxu0 %v10764_v41  ;;  %6109 = vmatprep.subr.bf16.mxu1 %v10764_v41  ;;  %v2338_v38 = vmax.f32 %v2284_v61, 0.0  ;;  %v2287_v48 = vadd.f32 %v10762_v1, %v10768_v24  ;;  %v2288_v62 = vadd.f32 %v10762_v1, %v10769_v23  ;;  %v2458_v2 = vld [vmem:[#allocation2 + $0x388] sm:$0xff]  ;;  %v2369_v9 = vld [vmem:[#allocation2 + $0xc0] sm:$0xff] }
 0x495   : > { %v9115_v0 = vpack.c.bf16 %v2336_v18, %v2335_v11  ;;  %v2339_v10 = vmax.f32 %v2285_v63, 0.0  ;;  %v2340_v60 = vmax.f32 %v2286_v13, 0.0  ;;  %v10771_v44 = vmax.f32 %v10770_v58, 0.0  ;;  %v2370_v16 = vld [vmem:[#allocation2 + $0xc8] sm:$0xff]  ;;  %v2461_v59 = vld [vmem:[#allocation2 + $0x3a0] sm:$0xff] }
 0x496   : > { %v9127_v30 = vpack.c.bf16 %v2338_v38, %v2337_v7  ;;  %v2341_v17 = vmax.f32 %v2287_v48, 0.0  ;;  %v2342_v47 = vmax.f32 %v2288_v62, 0.0  ;;  %v2462_v56 = vld [vmem:[#allocation2 + $0x3a8] sm:$0xff]  ;;  %v2465_v31 = vld [vmem:[#allocation2 + $0x3c0] sm:$0xff] }
 0x497   : > { %v9125_v45 = vpack.c.bf16 %v2344_v6, %v10771_v44  ;;  %6011 = vmatpush1.bf16.msra.mxu0 %v9013_v46  ;;  %6125 = vmatpush1.bf16.msra.mxu1 %v9013_v46  ;;  %v9131_v33 = vpack.c.bf16 %v2340_v60, %v2339_v10  ;;  %v2434_v6 = vld [vmem:[#allocation2 + $0x2c8] sm:$0xff]  ;;  %v2469_v50 = vld [vmem:[#allocation2 + $0x3e0] sm:$0xff] }
 0x498   : > { %6012 = vmatprep.subr.bf16.mxu0 %v10764_v41  ;;  %6110 = vmatprep.subr.bf16.mxu1 %v10764_v41  ;;  %v9135_v1 = vpack.c.bf16 %v2342_v47, %v2341_v17  ;;  %v2346_v46 = vld [vmem:[#allocation2 + $0x8] sm:$0xff]  ;;  %v2381_v61 = vld [vmem:[#allocation2 + $0x120] sm:$0xff] }
 0x499   : > { %2792 = vmatprep.mubr.f32.mxu0 %v2346_v46  ;;  %v2374_v51 = vld [vmem:[#allocation2 + $0xe8] sm:$0xff]  ;;  %v2473_v43 = vld [vmem:[#allocation2 + $0x400] sm:$0xff] }
 0x49a   : > { %v2466_v8 = vld [vmem:[#allocation2 + $0x3c8] sm:$0xff]  ;;  %v2385_v63 = vld [vmem:[#allocation2 + $0x140] sm:$0xff] }
 0x49b   : > { %6014 = vmatpush1.bf16.msra.mxu0 %v9017_v39  ;;  %6126 = vmatpush1.bf16.msra.mxu1 %v9017_v39  ;;  %v2433_v39 = vld [vmem:[#allocation2 + $0x2c0] sm:$0xff]  ;;  %v2378_v57 = vld [vmem:[#allocation2 + $0x108] sm:$0xff] }
 0x49c   : > { %6015 = vmatprep.subr.bf16.mxu0 %v10764_v41  ;;  %6111 = vmatprep.subr.bf16.mxu1 %v10764_v41  ;;  %v2470_v11 = vld [vmem:[#allocation2 + $0x3e8] sm:$0xff]  ;;  %v2481_v48 = vld [vmem:[#allocation2 + $0x440] sm:$0xff] }
 0x49d   : > { %v2382_v18 = vld [vmem:[#allocation2 + $0x128] sm:$0xff]  ;;  %v2393_v23 = vld [vmem:[#allocation2 + $0x180] sm:$0xff] }
 0x49e   : > { %v2386_v7 = vld [vmem:[#allocation2 + $0x148] sm:$0xff]  ;;  %v2485_v60 = vld [vmem:[#allocation2 + $0x460] sm:$0xff] }
 0x49f   : > { %6017 = vmatpush1.bf16.msra.mxu0 %v9023_v22  ;;  %6127 = vmatpush1.bf16.msra.mxu1 %v9023_v22  ;;  %v2345_v22 = vld [vmem:[#allocation2] sm:$0xff]  ;;  %v2478_v3 = vld [vmem:[#allocation2 + $0x428] sm:$0xff] }
 0x4a0   : > { %6018 = vmatprep.subr.bf16.mxu0 %v10764_v41  ;;  %6112 = vmatprep.subr.bf16.mxu1 %v10764_v41  ;;  %v2390_v13 = vld [vmem:[#allocation2 + $0x168] sm:$0xff]  ;;  %v2397_v58 = vld [vmem:[#allocation2 + $0x1a0] sm:$0xff] }
 0x4a1   : > { %v2482_v38 = vld [vmem:[#allocation2 + $0x448] sm:$0xff]  ;;  %v2401_v17 = vld [vmem:[#allocation2 + $0x1c0] sm:$0xff] }
 0x4a2   : > { %v2394_v24 = vld [vmem:[#allocation2 + $0x188] sm:$0xff] }
 0x4a3   : > { %6020 = vmatpush1.bf16.msra.mxu0 %v9029_v29  ;;  %6128 = vmatpush1.bf16.msra.mxu1 %v9029_v29  ;;  %v2438_v29 = vld [vmem:[#allocation2 + $0x2e8] sm:$0xff] }
 0x4a4   : > { %6021 = vmatprep.subr.bf16.mxu0 %v10764_v41  ;;  %6113 = vmatprep.subr.bf16.mxu1 %v10764_v41  ;;  %v2486_v62 = vld [vmem:[#allocation2 + $0x468] sm:$0xff] }
 0x4a5   : > { %v2398_v10 = vld [vmem:[#allocation2 + $0x1a8] sm:$0xff] }
 0x4a6   : > { %v2490_v44 = vld [vmem:[#allocation2 + $0x488] sm:$0xff] }
 0x4a7   : > { %6023 = vmatpush1.bf16.msra.mxu0 %v9039_v27  ;;  %6129 = vmatpush1.bf16.msra.mxu1 %v9039_v27  ;;  %v2350_v27 = vld [vmem:[#allocation2 + $0x28] sm:$0xff] }
 0x4a8   : > { %6024 = vmatprep.subr.bf16.mxu0 %v10764_v41  ;;  %6114 = vmatprep.subr.bf16.mxu1 %v10764_v41  ;;  %v2494_v47 = vld [vmem:[#allocation2 + $0x4a8] sm:$0xff] }
 0x4a9   : > { %v2410_v46 = vld [vmem:[#allocation2 + $0x208] sm:$0xff] }
 0x4ab   : > { %6026 = vmatpush1.bf16.msra.mxu0 %v9045_v4  ;;  %6130 = vmatpush1.bf16.msra.mxu1 %v9045_v4  ;;  %v2437_v4 = vld [vmem:[#allocation2 + $0x2e0] sm:$0xff] }
 0x4ac   : > { %6027 = vmatprep.subr.bf16.mxu0 %v10764_v41  ;;  %6115 = vmatprep.subr.bf16.mxu1 %v10764_v41 }
 0x4af   : > { %6029 = vmatpush1.bf16.msra.mxu0 %v9049_v32  ;;  %6131 = vmatpush1.bf16.msra.mxu1 %v9049_v32  ;;  %v2349_v32 = vld [vmem:[#allocation2 + $0x20] sm:$0xff] }
 0x4b0   : > { %6030 = vmatprep.subr.bf16.mxu0 %v10764_v41  ;;  %6116 = vmatprep.subr.bf16.mxu1 %v10764_v41 }
 0x4b3   : > { %6032 = vmatpush1.bf16.msra.mxu0 %v9055_v20  ;;  %6132 = vmatpush1.bf16.msra.mxu1 %v9055_v20  ;;  %v2442_v20 = vld [vmem:[#allocation2 + $0x308] sm:$0xff] }
 0x4b4   : > { %6033 = vmatprep.subr.bf16.mxu0 %v10764_v41  ;;  %6117 = vmatprep.subr.bf16.mxu1 %v10764_v41 }
 0x4b7   : > { %6035 = vmatpush1.bf16.msra.mxu0 %v9069_v42  ;;  %6133 = vmatpush1.bf16.msra.mxu1 %v9069_v42  ;;  %v2353_v42 = vld [vmem:[#allocation2 + $0x40] sm:$0xff] }
 0x4b8   : > { %6036 = vmatprep.subr.bf16.mxu1 %v10764_v41 }
 0x4ba   : > { %2898 = vmatmul.mubr.f32.vlgmr.msra.gmra.mrb[0].mxu1 %v2429_v35  ;;  %2793 = vmatmul.mubr.f32.vlgmr.msra.gmra.mrb[54].mxu0 %v2345_v22  ;;  %v2405_v35 = vld [vmem:[#allocation2 + $0x1e0] sm:$0xff] }
 0x4bb   : > { %6038 = vmatpush1.bf16.msra.mxu1 %v9073_v36  ;;  %2902 = vmatprep.mubr.f32.mxu1 %v2434_v6  ;;  %v2357_v36 = vld [vmem:[#allocation2 + $0x60] sm:$0xff]  ;;  %v2498_v6 = vld [vmem:[#allocation2 + $0x4c8] sm:$0xff] }
 0x4bc   : > { %6039 = vmatprep.subr.bf16.mxu1 %v10764_v41  ;;  %2797 = vmatprep.mubr.f32.mxu0 %v2350_v27  ;;  %v2409_v22 = vld [vmem:[#allocation2 + $0x200] sm:$0xff]  ;;  %v2414_v27 = vld [vmem:[#allocation2 + $0x228] sm:$0xff] }
 0x4be   : > { %2903 = vmatmul.mubr.f32.gmra.mrb[2].mxu1 %v2433_v39  ;;  %2798 = vmatmul.mubr.f32.gmra.mrb[56].mxu0 %v2349_v32  ;;  %v2497_v39 = vld [vmem:[#allocation2 + $0x4c0] sm:$0xff] }
 0x4bf   : > { %6041 = vmatpush1.bf16.msra.mxu1 %v9077_v54  ;;  %2907 = vmatprep.mubr.f32.mxu1 %v2438_v29  ;;  %v2361_v54 = vld [vmem:[#allocation2 + $0x80] sm:$0xff]  ;;  %v2502_v29 = vld [vmem:[#allocation2 + $0x4e8] sm:$0xff] }
 0x4c0   : > { %6042 = vmatprep.subr.bf16.mxu1 %v10764_v41  ;;  %2802 = vmatprep.mubr.f32.mxu0 %v2354_v19  ;;  %v2413_v32 = vld [vmem:[#allocation2 + $0x220] sm:$0xff]  ;;  %v2418_v19 = vld [vmem:[#allocation2 + $0x248] sm:$0xff] }
 0x4c2   : > { %2908 = vmatmul.mubr.f32.gmra.mrb[4].mxu1 %v2437_v4  ;;  %2803 = vmatmul.mubr.f32.gmra.mrb[58].mxu0 %v2353_v42  ;;  %v2501_v4 = vld [vmem:[#allocation2 + $0x4e0] sm:$0xff] }
 0x4c3   : > { %6044 = vmatpush1.bf16.msra.mxu1 %v9085_v49  ;;  %2912 = vmatprep.mubr.f32.mxu1 %v2442_v20  ;;  %v2365_v49 = vld [vmem:[#allocation2 + $0xa0] sm:$0xff]  ;;  %v2506_v20 = vld [vmem:[#allocation2 + $0x508] sm:$0xff] }
 0x4c4   : > { %6045 = vmatprep.subr.bf16.mxu1 %v10764_v41  ;;  %2807 = vmatprep.mubr.f32.mxu0 %v2358_v25  ;;  %v2417_v42 = vld [vmem:[#allocation2 + $0x240] sm:$0xff]  ;;  %v2422_v25 = vld [vmem:[#allocation2 + $0x268] sm:$0xff] }
 0x4c6   : > { %2913 = vmatmul.mubr.f32.gmra.mrb[6].mxu1 %v2441_v14  ;;  %2808 = vmatmul.mubr.f32.gmra.mrb[60].mxu0 %v2357_v36  ;;  %v2505_v14 = vld [vmem:[#allocation2 + $0x500] sm:$0xff] }
 0x4c7   : > { %6047 = vmatpush1.bf16.msra.mxu1 %v9097_v34  ;;  %2917 = vmatprep.mubr.f32.mxu1 %v2446_v52  ;;  %v2373_v34 = vld [vmem:[#allocation2 + $0xe0] sm:$0xff]  ;;  %v2510_v52 = vld [vmem:[#allocation2 + $0x528] sm:$0xff] }
 0x4c8   : > { %6048 = vmatprep.subr.bf16.mxu1 %v10764_v41  ;;  %2812 = vmatprep.mubr.f32.mxu0 %v2362_v5  ;;  %v2421_v36 = vld [vmem:[#allocation2 + $0x260] sm:$0xff] }
 0x4c9   : > { %v2513_v5 = vld [vmem:[#allocation2 + $0x540] sm:$0xff] }
 0x4ca   : > { %2918 = vmatmul.mubr.f32.gmra.mrb[8].mxu1 %v2445_v28  ;;  %2813 = vmatmul.mubr.f32.gmra.mrb[62].mxu0 %v2361_v54  ;;  %v2509_v28 = vld [vmem:[#allocation2 + $0x520] sm:$0xff]  ;;  %v2518_v54 = vld [vmem:[#allocation2 + $0x568] sm:$0xff] }
 0x4cb   : > { %6050 = vmatpush1.bf16.msra.mxu1 %v9101_v21  ;;  %2922 = vmatprep.mubr.f32.mxu1 %v2450_v40  ;;  %v2377_v21 = vld [vmem:[#allocation2 + $0x100] sm:$0xff]  ;;  %v2514_v40 = vld [vmem:[#allocation2 + $0x548] sm:$0xff] }
 0x4cc   : > { %6051 = vmatprep.subr.bf16.mxu1 %v10764_v41  ;;  %2817 = vmatprep.mubr.f32.mxu0 %v2366_v53  ;;  %v2517_v53 = vld [vmem:[#allocation2 + $0x560] sm:$0xff] }
 0x4ce   : > { %2923 = vmatmul.mubr.f32.gmra.mrb[10].mxu1 %v2449_v15  ;;  %2818 = vmatmul.mubr.f32.gmra.mrb[64].mxu0 %v2365_v49  ;;  %v2426_v15 = vld [vmem:[#allocation2 + $0x288] sm:$0xff]  ;;  %v2521_v49 = vld [vmem:[#allocation2 + $0x580] sm:$0xff] }
 0x4cf   : > { %6053 = vmatpush1.bf16.msra.mxu1 %v9107_v12  ;;  %2927 = vmatprep.mubr.f32.mxu1 %v2454_v26  ;;  %v2474_v12 = vld [vmem:[#allocation2 + $0x408] sm:$0xff]  ;;  %v2425_v26 = vld [vmem:[#allocation2 + $0x280] sm:$0xff] }
 0x4d0   : > { %6054 = vmatprep.subr.bf16.mxu1 %v10764_v41  ;;  %2822 = vmatprep.mubr.f32.mxu0 %v2370_v16  ;;  %v2525_v16 = vld [vmem:[#allocation2 + $0x5a0] sm:$0xff] }
 0x4d2   : > { %2928 = vmatmul.mubr.f32.gmra.mrb[12].mxu1 %v2453_v55  ;;  %2823 = vmatmul.mubr.f32.gmra.mrb[66].mxu0 %v2369_v9  ;;  %v2522_v55 = vld [vmem:[#allocation2 + $0x588] sm:$0xff]  ;;  %v2529_v9 = vld [vmem:[#allocation2 + $0x5c0] sm:$0xff] }
 0x4d3   : > { %6056 = vmatpush1.bf16.msra.mxu1 %v9115_v0  ;;  %2932 = vmatprep.mubr.f32.mxu1 %v2458_v2  ;;  %v2477_v0 = vld [vmem:[#allocation2 + $0x420] sm:$0xff]  ;;  %v2526_v2 = vld [vmem:[#allocation2 + $0x5a8] sm:$0xff] }
 0x4d4   : > { %6057 = vmatprep.subr.bf16.mxu1 %v10764_v41  ;;  %2827 = vmatprep.mubr.f32.mxu0 %v2374_v51  ;;  %v2533_v51 = vld [vmem:[#allocation2 + $0x5e0] sm:$0xff] }
 0x4d6   : > { %2933 = vmatmul.mubr.f32.gmra.mrb[14].mxu1 %v2457_v37  ;;  %2828 = vmatmul.mubr.f32.gmra.mrb[68].mxu0 %v2373_v34  ;;  %v2530_v37 = vld [vmem:[#allocation2 + $0x5c8] sm:$0xff]  ;;  %v2537_v34 = vld [vmem:[#allocation2 + $0x600] sm:$0xff] }
 0x4d7   : > { %6059 = vmatpush1.bf16.msra.mxu1 %v9127_v30  ;;  %2937 = vmatprep.mubr.f32.mxu1 %v2462_v56  ;;  %v2489_v30 = vld [vmem:[#allocation2 + $0x480] sm:$0xff]  ;;  %v2534_v56 = vld [vmem:[#allocation2 + $0x5e8] sm:$0xff] }
 0x4d8   : > { %6060 = vmatprep.subr.bf16.mxu1 %v10764_v41  ;;  %2832 = vmatprep.mubr.f32.mxu0 %v2378_v57  ;;  %v2541_v57 = vld [vmem:[#allocation2 + $0x620] sm:$0xff] }
 0x4da   : > { %2938 = vmatmul.mubr.f32.gmra.mrb[16].mxu1 %v2461_v59  ;;  %2833 = vmatmul.mubr.f32.gmra.mrb[70].mxu0 %v2377_v21  ;;  %v2538_v59 = vld [vmem:[#allocation2 + $0x608] sm:$0xff]  ;;  %v2545_v21 = vld [vmem:[#allocation2 + $0x640] sm:$0xff] }
 0x4db   : > { %6062 = vmatpush1.bf16.msra.mxu1 %v9131_v33  ;;  %2942 = vmatprep.mubr.f32.mxu1 %v2466_v8  ;;  %v2406_v33 = vld [vmem:[#allocation2 + $0x1e8] sm:$0xff] }
 0x4dc   : > { %6063 = vmatprep.subr.bf16.mxu1 %v10764_v41  ;;  %2837 = vmatprep.mubr.f32.mxu0 %v2382_v18  ;;  %v2542_v8 = vld [vmem:[#allocation2 + $0x628] sm:$0xff]  ;;  %v2549_v18 = vld [vmem:[#allocation2 + $0x660] sm:$0xff] }
 0x4de   : > { %2943 = vmatmul.mubr.f32.gmra.mrb[18].mxu1 %v2465_v31  ;;  %2838 = vmatmul.mubr.f32.gmra.mrb[72].mxu0 %v2381_v61  ;;  %v2546_v31 = vld [vmem:[#allocation2 + $0x648] sm:$0xff]  ;;  %v2553_v61 = vld [vmem:[#allocation2 + $0x680] sm:$0xff] }
 0x4df   : > { %6065 = vmatpush1.bf16.msra.mxu1 %v9135_v1  ;;  %2947 = vmatprep.mubr.f32.mxu1 %v2470_v11  ;;  %v2493_v1 = vld [vmem:[#allocation2 + $0x4a0] sm:$0xff]  ;;  %v2550_v11 = vld [vmem:[#allocation2 + $0x668] sm:$0xff] }
 0x4e0   : > { %6066 = vmatprep.subr.bf16.mxu1 %v10764_v41  ;;  %2842 = vmatprep.mubr.f32.mxu0 %v2386_v7  ;;  %v2389_v41 = vld [vmem:[#allocation2 + $0x160] sm:$0xff] }
 0x4e1   : > { %v2557_v7 = vld [vmem:[#allocation2 + $0x6a0] sm:$0x7f] }
 0x4e2   : > { %2948 = vmatmul.mubr.f32.gmra.mrb[20].mxu1 %v2469_v50  ;;  %2843 = vmatmul.mubr.f32.gmra.mrb[74].mxu0 %v2385_v63  ;;  %v2554_v50 = vld [vmem:[#allocation2 + $0x688] sm:$0xff]  ;;  %v2347_v63 = vld [vmem:[#allocation2 + $0x10] sm:$0xff] }
 0x4e3   : > { %6069 = vmatpush1.bf16.msk.msra.mxu1 %vm6068_vm7, %v9125_v45  ;;  %2952 = vmatprep.mubr.f32.mxu1 %v2474_v12  ;;  %v2402_v45 = vld [vmem:[#allocation2 + $0x1c8] sm:$0xff] }
 0x4e4   : > { %2847 = vmatprep.mubr.f32.mxu0 %v2390_v13  ;;  %v2558_v12 = vld [vmem:[#allocation2 + $0x6a8] sm:$0x7f]  ;;  %v2351_v13 = vld [vmem:[#allocation2 + $0x30] sm:$0xff] }
 0x4e6   : > { %2953 = vmatmul.mubr.f32.gmra.mrb[22].mxu1 %v2473_v43  ;;  %2848 = vmatmul.mubr.f32.gmra.mrb[76].mxu0 %v2389_v41  ;;  %v2348_v43 = vld [vmem:[#allocation2 + $0x18] sm:$0xff]  ;;  %v2355_v41 = vld [vmem:[#allocation2 + $0x50] sm:$0xff] }
 0x4e7   : > { %2957 = vmatprep.mubr.f32.mxu1 %v2478_v3  ;;  %2852 = vmatprep.mubr.f32.mxu0 %v2394_v24  ;;  %v2352_v3 = vld [vmem:[#allocation2 + $0x38] sm:$0xff]  ;;  %v2359_v24 = vld [vmem:[#allocation2 + $0x70] sm:$0xff] }
 0x4ea   : > { %2958 = vmatmul.mubr.f32.gmra.mrb[24].mxu1 %v2477_v0  ;;  %2853 = vmatmul.mubr.f32.gmra.mrb[78].mxu0 %v2393_v23  ;;  %v2356_v0 = vld [vmem:[#allocation2 + $0x58] sm:$0xff]  ;;  %v2363_v23 = vld [vmem:[#allocation2 + $0x90] sm:$0xff] }
 0x4eb   : > { %2962 = vmatprep.mubr.f32.mxu1 %v2482_v38  ;;  %2857 = vmatprep.mubr.f32.mxu0 %v2398_v10  ;;  %v2360_v38 = vld [vmem:[#allocation2 + $0x78] sm:$0xff]  ;;  %v2367_v10 = vld [vmem:[#allocation2 + $0xb0] sm:$0xff] }
 0x4ee   : > { %2963 = vmatmul.mubr.f32.gmra.mrb[26].mxu1 %v2481_v48  ;;  %2858 = vmatmul.mubr.f32.gmra.mrb[80].mxu0 %v2397_v58  ;;  %v2364_v48 = vld [vmem:[#allocation2 + $0x98] sm:$0xff]  ;;  %v2371_v58 = vld [vmem:[#allocation2 + $0xd0] sm:$0xff] }
 0x4ef   : > { %2967 = vmatprep.mubr.f32.mxu1 %v2486_v62  ;;  %2862 = vmatprep.mubr.f32.mxu0 %v2402_v45  ;;  %v2368_v62 = vld [vmem:[#allocation2 + $0xb8] sm:$0xff]  ;;  %v2375_v45 = vld [vmem:[#allocation2 + $0xf0] sm:$0xff] }
 0x4f2   : > { %2968 = vmatmul.mubr.f32.gmra.mrb[28].mxu1 %v2485_v60  ;;  %2863 = vmatmul.mubr.f32.gmra.mrb[82].mxu0 %v2401_v17  ;;  %v2372_v60 = vld [vmem:[#allocation2 + $0xd8] sm:$0xff]  ;;  %v2379_v17 = vld [vmem:[#allocation2 + $0x110] sm:$0xff] }
 0x4f3   : > { %2972 = vmatprep.mubr.f32.mxu1 %v2490_v44  ;;  %2867 = vmatprep.mubr.f32.mxu0 %v2406_v33  ;;  %v2376_v44 = vld [vmem:[#allocation2 + $0xf8] sm:$0xff]  ;;  %v2383_v33 = vld [vmem:[#allocation2 + $0x130] sm:$0xff] }
 0x4f6   : > { %2973 = vmatmul.mubr.f32.gmra.mrb[30].mxu1 %v2489_v30  ;;  %2868 = vmatmul.mubr.f32.gmra.mrb[84].mxu0 %v2405_v35  ;;  %v2380_v30 = vld [vmem:[#allocation2 + $0x118] sm:$0xff]  ;;  %v2387_v35 = vld [vmem:[#allocation2 + $0x150] sm:$0xff] }
 0x4f7   : > { %2977 = vmatprep.mubr.f32.mxu1 %v2494_v47  ;;  %2872 = vmatprep.mubr.f32.mxu0 %v2410_v46  ;;  %v2384_v47 = vld [vmem:[#allocation2 + $0x138] sm:$0xff]  ;;  %v2391_v46 = vld [vmem:[#allocation2 + $0x170] sm:$0xff] }
 0x4fa   : > { %2978 = vmatmul.mubr.f32.gmra.mrb[32].mxu1 %v2493_v1  ;;  %2873 = vmatmul.mubr.f32.gmra.mrb[86].mxu0 %v2409_v22  ;;  %v2388_v1 = vld [vmem:[#allocation2 + $0x158] sm:$0xff]  ;;  %v2395_v22 = vld [vmem:[#allocation2 + $0x190] sm:$0xff] }
 0x4fb   : > { %2982 = vmatprep.mubr.f32.mxu1 %v2498_v6  ;;  %2877 = vmatprep.mubr.f32.mxu0 %v2414_v27  ;;  %v2392_v6 = vld [vmem:[#allocation2 + $0x178] sm:$0xff]  ;;  %v2399_v27 = vld [vmem:[#allocation2 + $0x1b0] sm:$0xff] }
 0x4fe   : > { %2983 = vmatmul.mubr.f32.gmra.mrb[34].mxu1 %v2497_v39  ;;  %2878 = vmatmul.mubr.f32.gmra.mrb[88].mxu0 %v2413_v32  ;;  %v2396_v39 = vld [vmem:[#allocation2 + $0x198] sm:$0xff]  ;;  %v2403_v32 = vld [vmem:[#allocation2 + $0x1d0] sm:$0xff] }
 0x4ff   : > { %2987 = vmatprep.mubr.f32.mxu1 %v2502_v29  ;;  %2882 = vmatprep.mubr.f32.mxu0 %v2418_v19  ;;  %v2400_v29 = vld [vmem:[#allocation2 + $0x1b8] sm:$0xff]  ;;  %v2407_v19 = vld [vmem:[#allocation2 + $0x1f0] sm:$0xff] }
 0x502   : > { %2988 = vmatmul.mubr.f32.gmra.mrb[36].mxu1 %v2501_v4  ;;  %2883 = vmatmul.mubr.f32.gmra.mrb[90].mxu0 %v2417_v42  ;;  %v2404_v4 = vld [vmem:[#allocation2 + $0x1d8] sm:$0xff]  ;;  %v2411_v42 = vld [vmem:[#allocation2 + $0x210] sm:$0xff] }
 0x503   : > { %2992 = vmatprep.mubr.f32.mxu1 %v2506_v20  ;;  %2887 = vmatprep.mubr.f32.mxu0 %v2422_v25  ;;  %v2408_v20 = vld [vmem:[#allocation2 + $0x1f8] sm:$0xff]  ;;  %v2415_v25 = vld [vmem:[#allocation2 + $0x230] sm:$0xff] }
 0x506   : > { %2993 = vmatmul.mubr.f32.gmra.mrb[38].mxu1 %v2505_v14  ;;  %2888 = vmatmul.mubr.f32.gmra.mrb[92].mxu0 %v2421_v36  ;;  %v2412_v14 = vld [vmem:[#allocation2 + $0x218] sm:$0xff]  ;;  %v2419_v36 = vld [vmem:[#allocation2 + $0x250] sm:$0xff] }
 0x507   : > { %2997 = vmatprep.mubr.f32.mxu1 %v2510_v52  ;;  %2892 = vmatprep.mubr.f32.mxu0 %v2426_v15  ;;  %v2416_v52 = vld [vmem:[#allocation2 + $0x238] sm:$0xff] }
 0x508   : > { %v3399_v15 = vld [vmem:[#allocation13 + $0x8] sm:$0xff] }
 0x50a   : > { %2998 = vmatmul.mubr.f32.gmra.mrb[40].mxu1 %v2509_v28  ;;  %2893 = vmatmul.mubr.f32.gmra.mrb[94].mxu0 %v2425_v26  ;;  %v2420_v28 = vld [vmem:[#allocation2 + $0x258] sm:$0xff] }
 0x50b   : > { %3002 = vmatprep.mubr.f32.mxu1 %v2514_v40  ;;  %v2424_v40 = vld [vmem:[#allocation2 + $0x278] sm:$0xff] }
 0x50e   : > { %3003 = vmatmul.mubr.f32.gmra.mrb[42].mxu1 %v2513_v5  ;;  %v3398_v5 = vld [vmem:[#allocation13] sm:$0xff] }
 0x50f   : > { %3007 = vmatprep.mubr.f32.mxu1 %v2518_v54  ;;  %v2423_v54 = vld [vmem:[#allocation2 + $0x270] sm:$0xff]  ;;  %v6070_v26 = vpack.c.bf16 %v3399_v15, %v3398_v5  ;;  %v2484_v15 = vld [vmem:[#allocation2 + $0x458] sm:$0xff] }
 0x510   : > { %v2479_v5 = vld [vmem:[#allocation2 + $0x430] sm:$0xff] }
 0x511   : > { %6071 = vmatprep.subr.bf16.mxu0 %v6070_v26 }
 0x512   : > { %3008 = vmatmul.mubr.f32.gmra.mrb[44].mxu1 %v2517_v53  ;;  %v2428_v53 = vld [vmem:[#allocation2 + $0x298] sm:$0xff]  ;;  %6073 = vmatpush3.bf16.msra.mxu0 %v6070_v26 }
 0x513   : > { %3012 = vmatprep.mubr.f32.mxu1 %v2522_v55  ;;  %v3400_v55 = vld [vmem:[#allocation13 + $0x10] sm:$0xff] }
 0x516   : > { %3013 = vmatmul.mubr.f32.gmra.mrb[46].mxu1 %v2521_v49  ;;  %v3401_v49 = vld [vmem:[#allocation13 + $0x18] sm:$0xff] }
 0x517   : > { %3017 = vmatprep.mubr.f32.mxu1 %v2526_v2  ;;  %v2427_v2 = vld [vmem:[#allocation2 + $0x290] sm:$0xff] }
 0x51a   : > { %3018 = vmatmul.mubr.f32.gmra.mrb[48].mxu1 %v2525_v16  ;;  %v6074_v16 = vpack.c.bf16 %v3401_v49, %v3400_v55  ;;  %v2488_v55 = vld [vmem:[#allocation2 + $0x478] sm:$0xff] }
 0x51b   : > { %3022 = vmatprep.mubr.f32.mxu1 %v2530_v37  ;;  %v2432_v37 = vld [vmem:[#allocation2 + $0x2b8] sm:$0xff] }
 0x51c   : > { %6075 = vmatprep.subr.bf16.mxu0 %v6074_v16 }
 0x51d   : > { %6077 = vmatpush3.bf16.msra.mxu0 %v6074_v16  ;;  %v2487_v16 = vld [vmem:[#allocation2 + $0x470] sm:$0xff] }
 0x51e   : > { %3023 = vmatmul.mubr.f32.gmra.mrb[50].mxu1 %v2529_v9  ;;  %v3402_v9 = vld [vmem:[#allocation13 + $0x20] sm:$0xff] }
 0x51f   : > { %3027 = vmatprep.mubr.f32.mxu1 %v2534_v56  ;;  %v3403_v56 = vld [vmem:[#allocation13 + $0x28] sm:$0xff] }
 0x522   : > { %3028 = vmatmul.mubr.f32.gmra.mrb[52].mxu1 %v2533_v51  ;;  %v2431_v51 = vld [vmem:[#allocation2 + $0x2b0] sm:$0xff] }
 0x523   : > { %3032 = vmatprep.mubr.f32.mxu1 %v2538_v59  ;;  %v6078_v59 = vpack.c.bf16 %v3403_v56, %v3402_v9 }
 0x525   : > { %6079 = vmatprep.subr.bf16.mxu0 %v6078_v59 }
 0x526   : > { %3033 = vmatmul.mubr.f32.gmra.mrb[54].mxu1 %v2537_v34  ;;  %v2436_v34 = vld [vmem:[#allocation2 + $0x2d8] sm:$0xff]  ;;  %6081 = vmatpush3.bf16.msra.mxu0 %v6078_v59 }
 0x527   : > { %3037 = vmatprep.mubr.f32.mxu1 %v2542_v8  ;;  %v2496_v59 = vld [vmem:[#allocation2 + $0x4b8] sm:$0xff] }
 0x52a   : > { %3038 = vmatmul.mubr.f32.gmra.mrb[56].mxu1 %v2541_v57 }
 0x52b   : > { %3042 = vmatprep.mubr.f32.mxu1 %v2546_v31  ;;  %v3404_v31 = vld [vmem:[#allocation13 + $0x30] sm:$0xff] }
 0x52e   : > { %3043 = vmatmul.mubr.f32.gmra.mrb[58].mxu1 %v2545_v21  ;;  %v3405_v21 = vld [vmem:[#allocation13 + $0x38] sm:$0xff] }
 0x52f   : > { %3047 = vmatprep.mubr.f32.mxu1 %v2550_v11  ;;  %v2435_v11 = vld [vmem:[#allocation2 + $0x2d0] sm:$0xff] }
 0x532   : > { %3048 = vmatmul.mubr.f32.gmra.mrb[60].mxu1 %v2549_v18  ;;  %v6082_v18 = vpack.c.bf16 %v3405_v21, %v3404_v31  ;;  %v2495_v31 = vld [vmem:[#allocation2 + $0x4b0] sm:$0xff]  ;;  %v2500_v21 = vld [vmem:[#allocation2 + $0x4d8] sm:$0xff] }
 0x533   : > { %3052 = vmatprep.mubr.f32.mxu1 %v2554_v50  ;;  %v2440_v50 = vld [vmem:[#allocation2 + $0x2f8] sm:$0xff] }
 0x534   : > { %6083 = vmatprep.subr.bf16.mxu0 %v6082_v18 }
 0x535   : > { %6085 = vmatpush3.bf16.msra.mxu0 %v6082_v18 }
 0x536   : > { %3053 = vmatmul.mubr.f32.gmra.mrb[62].mxu1 %v2553_v61 }
 0x537   : > { %3057 = vmatprep.mubr.f32.mxu1 %v2558_v12 }
 0x53a   : > { %3058 = vmatmul.mubr.f32.gmra.mrb[64].mxu1 %v2557_v7  ;;  %v2439_v7 = vld [vmem:[#allocation2 + $0x2f0] sm:$0xff] }
 0x53b   : > { %5364 = vmatprep.mubr.msk.f32.mxu1 %vm2561_vm8, %v2348_v43  ;;  %v2444_v43 = vld [vmem:[#allocation2 + $0x318] sm:$0xff] }
 0x53e   : > { %3128 = vmatmul.mubr.f32.vlgmr.msra.gmra.mrb[66].mxu1 %v2347_v63 }
 0x53f   : > { %5365 = vmatprep.mubr.msk.f32.mxu1 %vm2561_vm8, %v2352_v3 }
 0x542   : > { %3133 = vmatmul.mubr.f32.gmra.mrb[68].mxu1 %v2351_v13  ;;  %v2443_v13 = vld [vmem:[#allocation2 + $0x310] sm:$0xff] }
 0x543   : > { %5366 = vmatprep.mubr.msk.f32.mxu1 %vm2561_vm8, %v2356_v0  ;;  %v2448_v0 = vld [vmem:[#allocation2 + $0x338] sm:$0xff] }
 0x546   : > { %3138 = vmatmul.mubr.f32.gmra.mrb[70].mxu1 %v2355_v41 }
 0x547   : > { %5367 = vmatprep.mubr.msk.f32.mxu1 %vm2561_vm8, %v2360_v38 }
 0x54a   : > { %3143 = vmatmul.mubr.f32.gmra.mrb[72].mxu1 %v2359_v24  ;;  %v2447_v24 = vld [vmem:[#allocation2 + $0x330] sm:$0xff] }
 0x54b   : > { %5368 = vmatprep.mubr.msk.f32.mxu1 %vm2561_vm8, %v2364_v48  ;;  %v2452_v48 = vld [vmem:[#allocation2 + $0x358] sm:$0xff] }
 0x54e   : > { %3148 = vmatmul.mubr.f32.gmra.mrb[74].mxu1 %v2363_v23 }
 0x54f   : > { %5369 = vmatprep.mubr.msk.f32.mxu1 %vm2561_vm8, %v2368_v62 }
 0x552   : > { %3153 = vmatmul.mubr.f32.gmra.mrb[76].mxu1 %v2367_v10  ;;  %v2451_v10 = vld [vmem:[#allocation2 + $0x350] sm:$0xff] }
 0x553   : > { %5370 = vmatprep.mubr.msk.f32.mxu1 %vm2561_vm8, %v2372_v60  ;;  %v2456_v60 = vld [vmem:[#allocation2 + $0x378] sm:$0xff] }
 0x556   : > { %3158 = vmatmul.mubr.f32.gmra.mrb[78].mxu1 %v2371_v58 }
 0x557   : > { %5371 = vmatprep.mubr.msk.f32.mxu1 %vm2561_vm8, %v2376_v44 }
 0x55a   : > { %3163 = vmatmul.mubr.f32.gmra.mrb[80].mxu1 %v2375_v45  ;;  %v2455_v45 = vld [vmem:[#allocation2 + $0x370] sm:$0xff] }
 0x55b   : > { %5372 = vmatprep.mubr.msk.f32.mxu1 %vm2561_vm8, %v2380_v30  ;;  %v2460_v30 = vld [vmem:[#allocation2 + $0x398] sm:$0xff] }
 0x55e   : > { %3168 = vmatmul.mubr.f32.gmra.mrb[82].mxu1 %v2379_v17 }
 0x55f   : > { %5373 = vmatprep.mubr.msk.f32.mxu1 %vm2561_vm8, %v2384_v47 }
 0x562   : > { %3173 = vmatmul.mubr.f32.gmra.mrb[84].mxu1 %v2383_v33  ;;  %v2459_v33 = vld [vmem:[#allocation2 + $0x390] sm:$0xff] }
 0x563   : > { %5374 = vmatprep.mubr.msk.f32.mxu1 %vm2561_vm8, %v2388_v1  ;;  %v2464_v1 = vld [vmem:[#allocation2 + $0x3b8] sm:$0xff] }
 0x566   : > { %3178 = vmatmul.mubr.f32.gmra.mrb[86].mxu1 %v2387_v35 }
 0x567   : > { %5375 = vmatprep.mubr.msk.f32.mxu1 %vm2561_vm8, %v2392_v6 }
 0x56a   : > { %3183 = vmatmul.mubr.f32.gmra.mrb[88].mxu1 %v2391_v46  ;;  %v2463_v46 = vld [vmem:[#allocation2 + $0x3b0] sm:$0xff] }
 0x56b   : > { %5376 = vmatprep.mubr.msk.f32.mxu1 %vm2561_vm8, %v2396_v39  ;;  %v2468_v39 = vld [vmem:[#allocation2 + $0x3d8] sm:$0xff] }
 0x56e   : > { %3188 = vmatmul.mubr.f32.gmra.mrb[90].mxu1 %v2395_v22 }
 0x56f   : > { %5377 = vmatprep.mubr.msk.f32.mxu1 %vm2561_vm8, %v2400_v29 }
 0x572   : > { %3193 = vmatmul.mubr.f32.gmra.mrb[92].mxu1 %v2399_v27  ;;  %v2467_v27 = vld [vmem:[#allocation2 + $0x3d0] sm:$0xff] }
 0x573   : > { %5378 = vmatprep.mubr.msk.f32.mxu1 %vm2561_vm8, %v2404_v4  ;;  %v2472_v4 = vld [vmem:[#allocation2 + $0x3f8] sm:$0xff] }
 0x576   : > { %3198 = vmatmul.mubr.f32.gmra.mrb[94].mxu1 %v2403_v32 }
 0x577   : > { %5379 = vmatprep.mubr.msk.f32.mxu1 %vm2561_vm8, %v2408_v20 }
 0x57a   : > { %3203 = vmatmul.mubr.f32.gmra.mrb[96].mxu1 %v2407_v19  ;;  %v2471_v19 = vld [vmem:[#allocation2 + $0x3f0] sm:$0xff] }
 0x57b   : > { %5380 = vmatprep.mubr.msk.f32.mxu1 %vm2561_vm8, %v2412_v14  ;;  %v2476_v14 = vld [vmem:[#allocation2 + $0x418] sm:$0xff] }
 0x57e   : > { %3208 = vmatmul.mubr.f32.gmra.mrb[98].mxu1 %v2411_v42 }
 0x57f   : > { %5381 = vmatprep.mubr.msk.f32.mxu1 %vm2561_vm8, %v2416_v52 }
 0x582   : > { %3213 = vmatmul.mubr.f32.gmra.mrb[100].mxu1 %v2415_v25  ;;  %v2475_v25 = vld [vmem:[#allocation2 + $0x410] sm:$0xff] }
 0x583   : > { %5382 = vmatprep.mubr.msk.f32.mxu1 %vm2561_vm8, %v2420_v28  ;;  %v2480_v28 = vld [vmem:[#allocation2 + $0x438] sm:$0xff] }
 0x586   : > { %3218 = vmatmul.mubr.f32.gmra.mrb[102].mxu1 %v2419_v36 }
 0x587   : > { %5383 = vmatprep.mubr.msk.f32.mxu1 %vm2561_vm8, %v2424_v40 }
 0x58a   : > { %3223 = vmatmul.mubr.f32.gmra.mrb[104].mxu1 %v2423_v54 }
 0x58b   : > { %5384 = vmatprep.mubr.msk.f32.mxu1 %vm2561_vm8, %v2428_v53  ;;  %v2483_v53 = vld [vmem:[#allocation2 + $0x450] sm:$0xff] }
 0x58d   : > { %v9211_v8 = vpop.f32.mrb[54].mxu0 }
 0x58e   : > { %3228 = vmatmul.mubr.f32.gmra.mrb[106].mxu1 %v2427_v2  ;;  %v2796_v57 = vpop.f32.mrb[55].mxu0 }
 0x58f   : > { %5385 = vmatprep.mubr.msk.f32.mxu1 %vm2561_vm8, %v2432_v37  ;;  %v2492_v37 = vld [vmem:[#allocation2 + $0x498] sm:$0xff] }
 0x591   : > { %v9214_v61 = vpop.f32.mrb[56].mxu0 }
 0x592   : > { %3233 = vmatmul.mubr.f32.gmra.mrb[0].mxu1 %v2431_v51  ;;  %v2801_v12 = vpop.f32.mrb[57].mxu0  ;;  %v2491_v51 = vld [vmem:[#allocation2 + $0x490] sm:$0xff] }
 0x593   : > { %5386 = vmatprep.mubr.msk.f32.mxu1 %vm2561_vm8, %v2436_v34  ;;  %v2504_v12 = vld [vmem:[#allocation2 + $0x4f8] sm:$0xff] }
 0x595   : > { %v9217_v63 = vpop.f32.mrb[58].mxu0 }
 0x596   : > { %3238 = vmatmul.mubr.f32.gmra.mrb[2].mxu1 %v2435_v11  ;;  %v2806_v3 = vpop.f32.mrb[59].mxu0 }
 0x597   : > { %5387 = vmatprep.mubr.msk.f32.mxu1 %vm2561_vm8, %v2440_v50  ;;  %v2499_v50 = vld [vmem:[#allocation2 + $0x4d0] sm:$0xff] }
 0x598   : > { %v2503_v3 = vld [vmem:[#allocation2 + $0x4f0] sm:$0xff] }
 0x599   : > { %v9220_v41 = vpop.f32.mrb[60].mxu0 }
 0x59a   : > { %3243 = vmatmul.mubr.f32.gmra.mrb[4].mxu1 %v2439_v7  ;;  %v2811_v38 = vpop.f32.mrb[61].mxu0 }
 0x59b   : > { %5388 = vmatprep.mubr.msk.f32.mxu1 %vm2561_vm8, %v2444_v43 }
 0x59d   : > { %v9223_v23 = vpop.f32.mrb[62].mxu0 }
 0x59e   : > { %3248 = vmatmul.mubr.f32.gmra.mrb[6].mxu1 %v2443_v13  ;;  %v2816_v62 = vpop.f32.mrb[63].mxu0  ;;  %v2508_v13 = vld [vmem:[#allocation2 + $0x518] sm:$0xff] }
 0x59f   : > { %5389 = vmatprep.mubr.msk.f32.mxu1 %vm2561_vm8, %v2448_v0 }
 0x5a1   : > { %v9226_v58 = vpop.f32.mrb[64].mxu0 }
 0x5a2   : > { %3253 = vmatmul.mubr.f32.gmra.mrb[8].mxu1 %v2447_v24  ;;  %v2821_v44 = vpop.f32.mrb[65].mxu0  ;;  %v2507_v24 = vld [vmem:[#allocation2 + $0x510] sm:$0xff] }
 0x5a3   : > { %5390 = vmatprep.mubr.msk.f32.mxu1 %vm2561_vm8, %v2452_v48  ;;  %v2512_v48 = vld [vmem:[#allocation2 + $0x538] sm:$0xff] }
 0x5a4   : > { %v2516_v44 = vld [vmem:[#allocation2 + $0x558] sm:$0xff] }
 0x5a5   : > { %v9229_v17 = vpop.f32.mrb[66].mxu0 }
 0x5a6   : > { %3258 = vmatmul.mubr.f32.gmra.mrb[10].mxu1 %v2451_v10  ;;  %v2826_v47 = vpop.f32.mrb[67].mxu0 }
 0x5a7   : > { %5391 = vmatprep.mubr.msk.f32.mxu1 %vm2561_vm8, %v2456_v60  ;;  %v2511_v60 = vld [vmem:[#allocation2 + $0x530] sm:$0xff] }
 0x5a9   : > { %v9232_v35 = vpop.f32.mrb[68].mxu0 }
 0x5aa   : > { %3263 = vmatmul.mubr.f32.gmra.mrb[12].mxu1 %v2455_v45  ;;  %v2831_v6 = vpop.f32.mrb[69].mxu0 }
 0x5ab   : > { %5392 = vmatprep.mubr.msk.f32.mxu1 %vm2561_vm8, %v2460_v30  ;;  %v2515_v30 = vld [vmem:[#allocation2 + $0x550] sm:$0xff]  ;;  %v2524_v6 = vld [vmem:[#allocation2 + $0x598] sm:$0xff] }
 0x5ad   : > { %v9235_v22 = vpop.f32.mrb[70].mxu0 }
 0x5ae   : > { %3268 = vmatmul.mubr.f32.gmra.mrb[14].mxu1 %v2459_v33  ;;  %v2836_v29 = vpop.f32.mrb[71].mxu0  ;;  %v2520_v33 = vld [vmem:[#allocation2 + $0x578] sm:$0xff] }
 0x5af   : > { %5393 = vmatprep.mubr.msk.f32.mxu1 %vm2561_vm8, %v2464_v1  ;;  %v2519_v1 = vld [vmem:[#allocation2 + $0x570] sm:$0xff] }
 0x5b0   : > { %v2527_v29 = vld [vmem:[#allocation2 + $0x5b0] sm:$0xff] }
 0x5b1   : > { %v9238_v32 = vpop.f32.mrb[72].mxu0 }
 0x5b2   : > { %3273 = vmatmul.mubr.f32.gmra.mrb[16].mxu1 %v2463_v46  ;;  %v2841_v20 = vpop.f32.mrb[73].mxu0  ;;  %v2523_v46 = vld [vmem:[#allocation2 + $0x590] sm:$0xff] }
 0x5b3   : > { %5394 = vmatprep.mubr.msk.f32.mxu1 %vm2561_vm8, %v2468_v39  ;;  %v2528_v39 = vld [vmem:[#allocation2 + $0x5b8] sm:$0xff] }
 0x5b4   : > { %v2536_v20 = vld [vmem:[#allocation2 + $0x5f8] sm:$0xff] }
 0x5b5   : > { %v9241_v42 = vpop.f32.mrb[74].mxu0 }
 0x5b6   : > { %3278 = vmatmul.mubr.f32.gmra.mrb[18].mxu1 %v2467_v27  ;;  %v2846_v52 = vpop.f32.mrb[75].mxu0  ;;  %v2532_v27 = vld [vmem:[#allocation2 + $0x5d8] sm:$0xff] }
 0x5b7   : > { %5395 = vmatprep.mubr.msk.f32.mxu1 %vm2561_vm8, %v2472_v4  ;;  %v2531_v4 = vld [vmem:[#allocation2 + $0x5d0] sm:$0xff] }
 0x5b8   : > { %v2539_v52 = vld [vmem:[#allocation2 + $0x610] sm:$0xff] }
 0x5b9   : > { %v9244_v36 = vpop.f32.mrb[76].mxu0 }
 0x5ba   : > { %3283 = vmatmul.mubr.f32.gmra.mrb[20].mxu1 %v2471_v19  ;;  %v2851_v40 = vpop.f32.mrb[77].mxu0  ;;  %v2535_v19 = vld [vmem:[#allocation2 + $0x5f0] sm:$0xff] }
 0x5bb   : > { %5396 = vmatprep.mubr.msk.f32.mxu1 %vm2561_vm8, %v2476_v14  ;;  %v2540_v14 = vld [vmem:[#allocation2 + $0x618] sm:$0xff] }
 0x5bc   : > { %v2548_v40 = vld [vmem:[#allocation2 + $0x658] sm:$0xff] }
 0x5bd   : > { %v9247_v54 = vpop.f32.mrb[78].mxu0 }
 0x5be   : > { %3288 = vmatmul.mubr.f32.gmra.mrb[22].mxu1 %v2475_v25  ;;  %v2856_v26 = vpop.f32.mrb[79].mxu0  ;;  %v2544_v25 = vld [vmem:[#allocation2 + $0x638] sm:$0xff] }
 0x5bf   : > { %5397 = vmatprep.mubr.msk.f32.mxu1 %vm2561_vm8, %v2480_v28  ;;  %v2543_v28 = vld [vmem:[#allocation2 + $0x630] sm:$0xff] }
 0x5c0   : > { %v2551_v26 = vld [vmem:[#allocation2 + $0x670] sm:$0xff] }
 0x5c1   : > { %v9250_v49 = vpop.f32.mrb[80].mxu0 }
 0x5c2   : > { %3293 = vmatmul.mubr.f32.gmra.mrb[24].mxu1 %v2479_v5  ;;  %v2861_v2 = vpop.f32.mrb[81].mxu0  ;;  %v2547_v5 = vld [vmem:[#allocation2 + $0x650] sm:$0xff] }
 0x5c3   : > { %5398 = vmatprep.mubr.msk.f32.mxu1 %vm2561_vm8, %v2484_v15  ;;  %v2552_v15 = vld [vmem:[#allocation2 + $0x678] sm:$0xff] }
 0x5c4   : > { %v2560_v2 = vld [vmem:[#allocation2 + $0x6b8] sm:$0x7f] }
 0x5c5   : > { %v9253_v9 = vpop.f32.mrb[82].mxu0 }
 0x5c6   : > { %3298 = vmatmul.mubr.f32.gmra.mrb[26].mxu1 %v2483_v53  ;;  %v2866_v56 = vpop.f32.mrb[83].mxu0  ;;  %v2556_v53 = vld [vmem:[#allocation2 + $0x698] sm:$0xff] }
 0x5c7   : > { %5399 = vmatprep.mubr.msk.f32.mxu1 %vm2561_vm8, %v2488_v55  ;;  %v2555_v55 = vld [vmem:[#allocation2 + $0x690] sm:$0xff] }
 0x5c9   : > { %v9256_v34 = vpop.f32.mrb[84].mxu0 }
 0x5ca   : > { %3303 = vmatmul.mubr.f32.gmra.mrb[28].mxu1 %v2487_v16  ;;  %v2871_v57 = vpop.f32.mrb[85].mxu0  ;;  %v2559_v16 = vld [vmem:[#allocation2 + $0x6b0] sm:$0x7f] }
 0x5cb   : > { %5400 = vmatprep.mubr.msk.f32.mxu1 %vm2561_vm8, %v2492_v37 }
 0x5cd   : > { %v9259_v11 = vpop.f32.mrb[86].mxu0 }
 0x5ce   : > { %3308 = vmatmul.mubr.f32.gmra.mrb[30].mxu1 %v2491_v51  ;;  %v2876_v18 = vpop.f32.mrb[87].mxu0 }
 0x5cf   : > { %5401 = vmatprep.mubr.msk.f32.mxu1 %vm2561_vm8, %v2496_v59 }
 0x5d1   : > { %v9262_v7 = vpop.f32.mrb[88].mxu0 }
 0x5d2   : > { %3313 = vmatmul.mubr.f32.gmra.mrb[32].mxu1 %v2495_v31  ;;  %v2881_v43 = vpop.f32.mrb[89].mxu0 }
 0x5d3   : > { %5402 = vmatprep.mubr.msk.f32.mxu1 %vm2561_vm8, %v2500_v21 }
 0x5d5   : > { %v9265_v0 = vpop.f32.mrb[90].mxu0 }
 0x5d6   : > { %3318 = vmatmul.mubr.f32.gmra.mrb[34].mxu1 %v2499_v50  ;;  %v2886_v38 = vpop.f32.mrb[91].mxu0 }
 0x5d7   : > { %5403 = vmatprep.mubr.msk.f32.mxu1 %vm2561_vm8, %v2504_v12 }
 0x5d9   : > { %v9268_v62 = vpop.f32.mrb[92].mxu0 }
 0x5da   : > { %3323 = vmatmul.mubr.f32.gmra.mrb[36].mxu1 %v2503_v3  ;;  %v2891_v10 = vpop.f32.mrb[93].mxu0 }
 0x5db   : > { %5404 = vmatprep.mubr.msk.f32.mxu1 %vm2561_vm8, %v2508_v13 }
 0x5dd   : > { %v9271_v45 = vpop.f32.mrb[94].mxu0 }
 0x5de   : > { %3328 = vmatmul.mubr.f32.gmra.mrb[38].mxu1 %v2507_v24  ;;  %v2896_v47 = vpop.f32.mrb[95].mxu0 }
 0x5df   : > { %5405 = vmatprep.mubr.msk.f32.mxu1 %vm2561_vm8, %v2512_v48 }
 0x5e2   : > { %3333 = vmatmul.mubr.f32.gmra.mrb[40].mxu1 %v2511_v60 }
 0x5e3   : > { %5406 = vmatprep.mubr.msk.f32.mxu1 %vm2561_vm8, %v2516_v44 }
 0x5e6   : > { %3338 = vmatmul.mubr.f32.gmra.mrb[42].mxu1 %v2515_v30 }
 0x5e7   : > { %5407 = vmatprep.mubr.msk.f32.mxu1 %vm2561_vm8, %v2520_v33 }
 0x5ea   : > { %3343 = vmatmul.mubr.f32.gmra.mrb[44].mxu1 %v2519_v1 }
 0x5eb   : > { %5408 = vmatprep.mubr.msk.f32.mxu1 %vm2561_vm8, %v2524_v6 }
 0x5ee   : > { %3348 = vmatmul.mubr.f32.gmra.mrb[46].mxu1 %v2523_v46 }
 0x5ef   : > { %5409 = vmatprep.mubr.msk.f32.mxu1 %vm2561_vm8, %v2528_v39 }
 0x5f2   : > { %3353 = vmatmul.mubr.f32.gmra.mrb[48].mxu1 %v2527_v29 }
 0x5f3   : > { %5410 = vmatprep.mubr.msk.f32.mxu1 %vm2561_vm8, %v2532_v27 }
 0x5f6   : > { %3358 = vmatmul.mubr.f32.gmra.mrb[50].mxu1 %v2531_v4 }
 0x5f7   : > { %5411 = vmatprep.mubr.msk.f32.mxu1 %vm2561_vm8, %v2536_v20 }
 0x5fa   : > { %3363 = vmatmul.mubr.f32.gmra.mrb[52].mxu1 %v2535_v19 }
 0x5fb   : > { %5412 = vmatprep.mubr.msk.f32.mxu1 %vm2561_vm8, %v2540_v14 }
 0x5fe   : > { %3368 = vmatmul.mubr.f32.gmra.mrb[54].mxu1 %v2539_v52 }
 0x5ff   : > { %5413 = vmatprep.mubr.msk.f32.mxu1 %vm2561_vm8, %v2544_v25 }
 0x602   : > { %3373 = vmatmul.mubr.f32.gmra.mrb[56].mxu1 %v2543_v28 }
 0x603   : > { %5414 = vmatprep.mubr.msk.f32.mxu1 %vm2561_vm8, %v2548_v40 }
 0x606   : > { %3378 = vmatmul.mubr.f32.gmra.mrb[58].mxu1 %v2547_v5 }
 0x607   : > { %5415 = vmatprep.mubr.msk.f32.mxu1 %vm2561_vm8, %v2552_v15 }
 0x60a   : > { %3383 = vmatmul.mubr.f32.gmra.mrb[60].mxu1 %v2551_v26 }
 0x60b   : > { %5416 = vmatprep.mubr.msk.f32.mxu1 %vm2561_vm8, %v2556_v53 }
 0x60e   : > { %3388 = vmatmul.mubr.f32.gmra.mrb[62].mxu1 %v2555_v55 }
 0x60f   : > { %5417 = vmatprep.mubr.msk.f32.mxu1 %vm2561_vm8, %v2560_v2 }
 0x611   : > { %v3129_v37 = vpop.f32.mrb[66].mxu1 }
 0x612   : > { %v3130_v56 = vadd.f32 %v3129_v37, %v9211_v8  ;;  %v3131_v51 = vpop.f32.mrb[67].mxu1  ;;  %3393 = vmatmul.mubr.f32.gmra.mrb[64].mxu1 %v2559_v16 }
 0x614   : > { %5810 = vmatprep.mubr.msk.f32.mxu0 %vm1772_vm3, %v3130_v56 }
 0x615   : > { %v3134_v59 = vpop.f32.mrb[68].mxu1 }
 0x616   : > { %v3135_v57 = vadd.f32 %v3134_v59, %v9214_v61  ;;  %v3136_v31 = vpop.f32.mrb[69].mxu1 }
 0x618   : > { %5811 = vmatmul.mubr.msk.f32.vlgmr.msra.gmra.mrb[96].mxu0 %vm1772_vm3, %v3135_v57 }
 0x619   : > { %v3139_v21 = vpop.f32.mrb[70].mxu1 }
 0x61a   : > { %v3140_v18 = vadd.f32 %v3139_v21, %v9217_v63  ;;  %v3141_v50 = vpop.f32.mrb[71].mxu1 }
 0x61c   : > { %5813 = vmatprep.mubr.msk.f32.mxu0 %vm1772_vm3, %v3140_v18 }
 0x61d   : > { %v3144_v12 = vpop.f32.mrb[72].mxu1 }
 0x61e   : > { %v3145_v43 = vadd.f32 %v3144_v12, %v9220_v41  ;;  %v3146_v8 = vpop.f32.mrb[73].mxu1 }
 0x620   : > { %5814 = vmatmul.mubr.msk.f32.gmra.mrb[98].mxu0 %vm1772_vm3, %v3145_v43 }
 0x621   : > { %v3149_v3 = vpop.f32.mrb[74].mxu1 }
 0x622   : > { %v3150_v13 = vadd.f32 %v3149_v3, %v9223_v23  ;;  %v3151_v38 = vpop.f32.mrb[75].mxu1 }
 0x624   : > { %5816 = vmatprep.mubr.msk.f32.mxu0 %vm1772_vm3, %v3150_v13 }
 0x625   : > { %v3154_v61 = vpop.f32.mrb[76].mxu1 }
 0x626   : > { %v3155_v24 = vadd.f32 %v3154_v61, %v9226_v58  ;;  %v3156_v48 = vpop.f32.mrb[77].mxu1 }
 0x628   : > { %5817 = vmatmul.mubr.msk.f32.gmra.mrb[100].mxu0 %vm1772_vm3, %v3155_v24 }
 0x629   : > { %v3159_v63 = vpop.f32.mrb[78].mxu1 }
 0x62a   : > { %v3160_v10 = vadd.f32 %v3159_v63, %v9229_v17  ;;  %v3161_v60 = vpop.f32.mrb[79].mxu1 }
 0x62c   : > { %5819 = vmatprep.mubr.msk.f32.mxu0 %vm1772_vm3, %v3160_v10 }
 0x62d   : > { %v3164_v41 = vpop.f32.mrb[80].mxu1 }
 0x62e   : > { %v3165_v44 = vadd.f32 %v3164_v41, %v9232_v35  ;;  %v3166_v30 = vpop.f32.mrb[81].mxu1 }
 0x630   : > { %5820 = vmatmul.mubr.msk.f32.gmra.mrb[102].mxu0 %vm1772_vm3, %v3165_v44 }
 0x631   : > { %v3169_v23 = vpop.f32.mrb[82].mxu1 }
 0x632   : > { %v3170_v47 = vadd.f32 %v3169_v23, %v9235_v22  ;;  %v3171_v33 = vpop.f32.mrb[83].mxu1 }
 0x634   : > { %5822 = vmatprep.mubr.msk.f32.mxu0 %vm1772_vm3, %v3170_v47 }
 0x635   : > { %v3174_v58 = vpop.f32.mrb[84].mxu1 }
 0x636   : > { %v3175_v1 = vadd.f32 %v3174_v58, %v9238_v32  ;;  %v3176_v6 = vpop.f32.mrb[85].mxu1 }
 0x638   : > { %5823 = vmatmul.mubr.msk.f32.gmra.mrb[104].mxu0 %vm1772_vm3, %v3175_v1 }
 0x639   : > { %v3179_v17 = vpop.f32.mrb[86].mxu1 }
 0x63a   : > { %v3180_v46 = vadd.f32 %v3179_v17, %v9241_v42  ;;  %v3181_v39 = vpop.f32.mrb[87].mxu1 }
 0x63c   : > { %5825 = vmatprep.mubr.msk.f32.mxu0 %vm1772_vm3, %v3180_v46 }
 0x63d   : > { %v3184_v35 = vpop.f32.mrb[88].mxu1 }
 0x63e   : > { %v3185_v29 = vadd.f32 %v3184_v35, %v9244_v36  ;;  %v3186_v27 = vpop.f32.mrb[89].mxu1 }
 0x640   : > { %5826 = vmatmul.mubr.msk.f32.gmra.mrb[106].mxu0 %vm1772_vm3, %v3185_v29 }
 0x641   : > { %v3189_v22 = vpop.f32.mrb[90].mxu1 }
 0x642   : > { %v3190_v4 = vadd.f32 %v3189_v22, %v9247_v54  ;;  %v3191_v20 = vpop.f32.mrb[91].mxu1 }
 0x644   : > { %5828 = vmatprep.mubr.msk.f32.mxu0 %vm1772_vm3, %v3190_v4 }
 0x645   : > { %v3194_v32 = vpop.f32.mrb[92].mxu1 }
 0x646   : > { %v3195_v19 = vadd.f32 %v3194_v32, %v9250_v49  ;;  %v3196_v14 = vpop.f32.mrb[93].mxu1 }
 0x648   : > { %5829 = vmatmul.mubr.msk.f32.gmra.mrb[108].mxu0 %vm1772_vm3, %v3195_v19 }
 0x649   : > { %v3199_v42 = vpop.f32.mrb[94].mxu1 }
 0x64a   : > { %v3200_v52 = vadd.f32 %v3199_v42, %v9253_v9  ;;  %v3201_v25 = vpop.f32.mrb[95].mxu1 }
 0x64c   : > { %5831 = vmatprep.mubr.msk.f32.mxu0 %vm1772_vm3, %v3200_v52 }
 0x64d   : > { %v3204_v36 = vpop.f32.mrb[96].mxu1 }
 0x64e   : > { %v3205_v28 = vadd.f32 %v3204_v36, %v9256_v34  ;;  %v3206_v40 = vpop.f32.mrb[97].mxu1 }
 0x650   : > { %5832 = vmatmul.mubr.msk.f32.gmra.mrb[110].mxu0 %vm1772_vm3, %v3205_v28 }
 0x651   : > { %v3209_v54 = vpop.f32.mrb[98].mxu1 }
 0x652   : > { %v3210_v5 = vadd.f32 %v3209_v54, %v9259_v11  ;;  %v3211_v15 = vpop.f32.mrb[99].mxu1 }
 0x654   : > { %5834 = vmatprep.mubr.msk.f32.mxu0 %vm1772_vm3, %v3210_v5 }
 0x655   : > { %v3214_v49 = vpop.f32.mrb[100].mxu1 }
 0x656   : > { %v3215_v26 = vadd.f32 %v3214_v49, %v9262_v7  ;;  %v3216_v53 = vpop.f32.mrb[101].mxu1 }
 0x658   : > { %5835 = vmatmul.mubr.msk.f32.gmra.mrb[112].mxu0 %vm1772_vm3, %v3215_v26 }
 0x659   : > { %v3219_v9 = vpop.f32.mrb[102].mxu1 }
 0x65a   : > { %v3220_v55 = vadd.f32 %v3219_v9, %v9265_v0  ;;  %v3221_v2 = vpop.f32.mrb[103].mxu1 }
 0x65c   : > { %5837 = vmatprep.mubr.msk.f32.mxu0 %vm1772_vm3, %v3220_v55 }
 0x65d   : > { %v3224_v34 = vpop.f32.mrb[104].mxu1 }
 0x65e   : > { %v3225_v16 = vadd.f32 %v3224_v34, %v9268_v62  ;;  %v3226_v37 = vpop.f32.mrb[105].mxu1 }
 0x660   : > { %5838 = vmatmul.mubr.msk.f32.gmra.mrb[114].mxu0 %vm1772_vm3, %v3225_v16 }
 0x661   : > { %v3229_v11 = vpop.f32.mrb[106].mxu1 }
 0x662   : > { %v3230_v56 = vadd.f32 %v3229_v11, %v9271_v45  ;;  %v3231_v51 = vpop.f32.mrb[107].mxu1 }
 0x664   : > { %5840 = vmatprep.mubr.msk.f32.mxu0 %vm1772_vm3, %v3230_v56 }
 0x665   : > { %v3234_v7 = vpop.f32.mrb[0].mxu1 }
 0x666   : > { %v3236_v59 = vpop.f32.mrb[1].mxu1  ;;  %5841 = vmatmul.mubr.msk.f32.gmra.mrb[116].mxu0 %vm1772_vm3, %v3234_v7 }
 0x669   : > { %v3239_v0 = vpop.f32.mrb[2].mxu1 }
 0x66a   : > { %v3241_v57 = vpop.f32.mrb[3].mxu1  ;;  %5843 = vmatprep.mubr.msk.f32.mxu0 %vm1772_vm3, %v3239_v0 }
 0x66d   : > { %v3244_v31 = vpop.f32.mrb[4].mxu1 }
 0x66e   : > { %v3246_v21 = vpop.f32.mrb[5].mxu1  ;;  %5844 = vmatmul.mubr.msk.f32.gmra.mrb[118].mxu0 %vm1772_vm3, %v3244_v31 }
 0x671   : > { %v3249_v62 = vpop.f32.mrb[6].mxu1 }
 0x672   : > { %v3251_v18 = vpop.f32.mrb[7].mxu1  ;;  %5846 = vmatprep.mubr.msk.f32.mxu0 %vm1772_vm3, %v3249_v62 }
 0x675   : > { %v3254_v45 = vpop.f32.mrb[8].mxu1 }
 0x676   : > { %v3256_v50 = vpop.f32.mrb[9].mxu1  ;;  %5847 = vmatmul.mubr.msk.f32.gmra.mrb[120].mxu0 %vm1772_vm3, %v3254_v45  ;;  %v4480_v45 = vld [vmem:[%s10570_s12] sm:$0xff] }
 0x677   : > { %v4481_v50 = vld [vmem:[%s10570_s12 + $0x8] sm:$0xff] }
 0x679   : > { %v3259_v12 = vpop.f32.mrb[10].mxu1 }
 0x67a   : > { %v3261_v43 = vpop.f32.mrb[11].mxu1  ;;  %5849 = vmatprep.mubr.msk.f32.mxu0 %vm1772_vm3, %v3259_v12  ;;  %v6086_v12 = vpack.c.bf16 %v4481_v50, %v4480_v45 }
 0x67c   : > { %6087 = vmatprep.subr.bf16.mxu0 %v6086_v12 }
 0x67d   : > { %v3264_v8 = vpop.f32.mrb[12].mxu1  ;;  %6089 = vmatpush3.bf16.msra.mxu0 %v6086_v12 }
 0x67e   : > { %v3266_v3 = vpop.f32.mrb[13].mxu1  ;;  %5850 = vmatmul.mubr.msk.f32.gmra.mrb[122].mxu0 %vm1772_vm3, %v3264_v8 }
 0x681   : > { %v3269_v13 = vpop.f32.mrb[14].mxu1 }
 0x682   : > { %v3271_v38 = vpop.f32.mrb[15].mxu1  ;;  %5852 = vmatprep.mubr.msk.f32.mxu0 %vm1772_vm3, %v3269_v13 }
 0x683   : > { %v9366_v38 = vld [vmem:[#allocation15] ss:$0 sm:$0xff] }
 0x685   : > { %v3274_v61 = vpop.f32.mrb[16].mxu1 }
 0x686   : > { %v3276_v24 = vpop.f32.mrb[17].mxu1  ;;  %5853 = vmatmul.mubr.msk.f32.gmra.mrb[124].mxu0 %vm1772_vm3, %v3274_v61 }
 0x689   : > { %v3279_v48 = vpop.f32.mrb[18].mxu1 }
 0x68a   : > { %v3281_v63 = vpop.f32.mrb[19].mxu1  ;;  %5855 = vmatprep.mubr.msk.f32.mxu0 %vm1772_vm3, %v3279_v48 }
 0x68d   : > { %v3284_v10 = vpop.f32.mrb[20].mxu1 }
 0x68e   : > { %v3286_v60 = vpop.f32.mrb[21].mxu1  ;;  %5856 = vmatmul.mubr.msk.f32.gmra.mrb[126].mxu0 %vm1772_vm3, %v3284_v10 }
 0x691   : > { %v3289_v41 = vpop.f32.mrb[22].mxu1 }
 0x692   : > { %v3291_v44 = vpop.f32.mrb[23].mxu1  ;;  %5858 = vmatprep.mubr.msk.f32.mxu0 %vm1772_vm3, %v3289_v41 }
 0x695   : > { %v3294_v30 = vpop.f32.mrb[24].mxu1 }
 0x696   : > { %v3296_v23 = vpop.f32.mrb[25].mxu1  ;;  %5859 = vmatmul.mubr.msk.f32.gmra.mrb[128].mxu0 %vm1772_vm3, %v3294_v30 }
 0x699   : > { %v3299_v47 = vpop.f32.mrb[26].mxu1 }
 0x69a   : > { %v3301_v33 = vpop.f32.mrb[27].mxu1  ;;  %5861 = vmatprep.mubr.msk.f32.mxu0 %vm1772_vm3, %v3299_v47 }
 0x69d   : > { %v3304_v58 = vpop.f32.mrb[28].mxu1 }
 0x69e   : > { %v3306_v1 = vpop.f32.mrb[29].mxu1  ;;  %5862 = vmatmul.mubr.msk.f32.gmra.mrb[130].mxu0 %vm1772_vm3, %v3304_v58 }
 0x6a1   : > { %v3309_v6 = vpop.f32.mrb[30].mxu1 }
 0x6a2   : > { %v3311_v17 = vpop.f32.mrb[31].mxu1  ;;  %5864 = vmatprep.mubr.msk.f32.mxu0 %vm1772_vm3, %v3309_v6 }
 0x6a5   : > { %v3314_v46 = vpop.f32.mrb[32].mxu1 }
 0x6a6   : > { %v3316_v39 = vpop.f32.mrb[33].mxu1  ;;  %5865 = vmatmul.mubr.msk.f32.gmra.mrb[132].mxu0 %vm1772_vm3, %v3314_v46 }
 0x6a9   : > { %v3319_v35 = vpop.f32.mrb[34].mxu1 }
 0x6aa   : > { %v3321_v29 = vpop.f32.mrb[35].mxu1  ;;  %5867 = vmatprep.mubr.msk.f32.mxu0 %vm1772_vm3, %v3319_v35  ;;  %v4482_v35 = vld [vmem:[%s10570_s12 + $0x10] sm:$0xff] }
 0x6ab   : > { %v4483_v29 = vld [vmem:[%s10570_s12 + $0x18] sm:$0xff] }
 0x6ad   : > { %v3324_v27 = vpop.f32.mrb[36].mxu1 }
 0x6ae   : > { %v3326_v22 = vpop.f32.mrb[37].mxu1  ;;  %5868 = vmatmul.mubr.msk.f32.gmra.mrb[134].mxu0 %vm1772_vm3, %v3324_v27 }
 0x6af   : > { %v6090_v22 = vpack.c.bf16 %v4483_v29, %v4482_v35 }
 0x6b1   : > { %v3329_v4 = vpop.f32.mrb[38].mxu1  ;;  %6091 = vmatprep.subr.bf16.mxu0 %v6090_v22 }
 0x6b2   : > { %v3331_v20 = vpop.f32.mrb[39].mxu1  ;;  %5870 = vmatprep.mubr.msk.f32.mxu0 %vm1772_vm3, %v3329_v4  ;;  %6093 = vmatpush3.bf16.msra.mxu0 %v6090_v22 }
 0x6b5   : > { %v3334_v32 = vpop.f32.mrb[40].mxu1 }
 0x6b6   : > { %v3336_v19 = vpop.f32.mrb[41].mxu1  ;;  %5871 = vmatmul.mubr.msk.f32.gmra.mrb[136].mxu0 %vm1772_vm3, %v3334_v32 }
 0x6b9   : > { %v3339_v14 = vpop.f32.mrb[42].mxu1 }
 0x6ba   : > { %v3341_v42 = vpop.f32.mrb[43].mxu1  ;;  %5873 = vmatprep.mubr.msk.f32.mxu0 %vm1772_vm3, %v3339_v14 }
 0x6bd   : > { %v3344_v52 = vpop.f32.mrb[44].mxu1 }
 0x6be   : > { %v3346_v25 = vpop.f32.mrb[45].mxu1  ;;  %5874 = vmatmul.mubr.msk.f32.gmra.mrb[138].mxu0 %vm1772_vm3, %v3344_v52 }
 0x6c1   : > { %v3349_v36 = vpop.f32.mrb[46].mxu1 }
 0x6c2   : > { %v3351_v28 = vpop.f32.mrb[47].mxu1  ;;  %5876 = vmatprep.mubr.msk.f32.mxu0 %vm1772_vm3, %v3349_v36 }
 0x6c5   : > { %v3354_v40 = vpop.f32.mrb[48].mxu1 }
 0x6c6   : > { %v3356_v54 = vpop.f32.mrb[49].mxu1  ;;  %5877 = vmatmul.mubr.msk.f32.gmra.mrb[140].mxu0 %vm1772_vm3, %v3354_v40 }
 0x6c9   : > { %v3359_v5 = vpop.f32.mrb[50].mxu1 }
 0x6ca   : > { %v3361_v15 = vpop.f32.mrb[51].mxu1  ;;  %5879 = vmatprep.mubr.msk.f32.mxu0 %vm1772_vm3, %v3359_v5 }
 0x6cd   : > { %v3364_v49 = vpop.f32.mrb[52].mxu1 }
 0x6ce   : > { %v3366_v26 = vpop.f32.mrb[53].mxu1  ;;  %5880 = vmatmul.mubr.msk.f32.gmra.mrb[142].mxu0 %vm1772_vm3, %v3364_v49 }
 0x6d1   : > { %v3369_v53 = vpop.f32.mrb[54].mxu1 }
 0x6d2   : > { %v3371_v9 = vpop.f32.mrb[55].mxu1  ;;  %5882 = vmatprep.mubr.msk.f32.mxu0 %vm1772_vm3, %v3369_v53 }
 0x6d5   : > { %v3374_v55 = vpop.f32.mrb[56].mxu1 }
 0x6d6   : > { %v3376_v2 = vpop.f32.mrb[57].mxu1  ;;  %5883 = vmatmul.mubr.msk.f32.gmra.mrb[144].mxu0 %vm1772_vm3, %v3374_v55 }
 0x6d9   : > { %v3379_v34 = vpop.f32.mrb[58].mxu1 }
 0x6da   : > { %v3381_v16 = vpop.f32.mrb[59].mxu1  ;;  %5885 = vmatprep.mubr.msk.f32.mxu0 %vm1772_vm3, %v3379_v34 }
 0x6dd   : > { %v3384_v37 = vpop.f32.mrb[60].mxu1 }
 0x6de   : > { %v3386_v11 = vpop.f32.mrb[61].mxu1  ;;  %5886 = vmatmul.mubr.msk.f32.gmra.mrb[146].mxu0 %vm1772_vm3, %v3384_v37 }
 0x6e1   : > { %v3389_v56 = vpop.f32.mrb[62].mxu1 }
 0x6e2   : > { %v3391_v51 = vpop.f32.mrb[63].mxu1  ;;  %5888 = vmatprep.mubr.msk.f32.mxu0 %vm1772_vm3, %v3389_v56 }
 0x6e5   : > { %v3394_v7 = vpop.f32.mrb[64].mxu1 }
 0x6e6   : > { %v3396_v59 = vpop.f32.mrb[65].mxu1  ;;  %5889 = vmatmul.mubr.msk.f32.gmra.mrb[148].mxu0 %vm1772_vm3, %v3394_v7 }
 0x6eb   : > { %v5812_v0 = vpop.f32.mrb[96].mxu0 }
 0x6ec   : > { %v3641_v57 = vpop.f32.mrb[97].mxu0  ;;  %v9371_v24 = vadd.f32 %v5812_v0, %v9366_v38 }
 0x6ed   : > { %v9374_v63 = vadd.f32 %v9366_v38, %v3641_v57 }
 0x6ee   : > { %v4025_v60 = vmul.f32 %v9371_v24, %v9371_v24  ;;  %v3911_v44 = vsel %vm1772_vm3, %v9371_v24, 0.0 }
 0x6ef   : > { %v4024_v41 = vmul.f32 %v9374_v63, %v9374_v63  ;;  %v3910_v30 = vsel %vm1772_vm3, %v9374_v63, 0.0 }
 0x6f0   : > { %v4079_v33 = vsel %vm1772_vm3, %v4025_v60, 0.0  ;;  %v3912_v39 = vadd.f32 %v3911_v44, %v3910_v30 }
 0x6f1   : > { %v4078_v1 = vsel %vm1772_vm3, %v4024_v41, 0.0 }
 0x6f2   : > { %v4080_v4 = vadd.f32 %v4079_v33, %v4078_v1 }
 0x6f3   : > { %v5815_v31 = vpop.f32.mrb[98].mxu0 }
 0x6f4   : > { %v3651_v21 = vpop.f32.mrb[99].mxu0  ;;  %v9394_v6 = vadd.f32 %v5815_v31, %v9366_v38 }
 0x6f5   : > { %v9377_v10 = vadd.f32 %v9366_v38, %v3651_v21 }
 0x6f6   : > { %v4027_v32 = vmul.f32 %v9394_v6, %v9394_v6  ;;  %v3915_v42 = vsel %vm1772_vm3, %v9394_v6, 0.0 }
 0x6f7   : > { %v4026_v23 = vmul.f32 %v9377_v10, %v9377_v10  ;;  %v3913_v17 = vsel %vm1772_vm3, %v9377_v10, 0.0 }
 0x6f8   : > { %v3914_v20 = vadd.f32 %v3913_v17, %v3912_v39  ;;  %v4083_v5 = vsel %vm1772_vm3, %v4027_v32, 0.0 }
 0x6f9   : > { %v4081_v27 = vsel %vm1772_vm3, %v4026_v23, 0.0 }
 0x6fa   : > { %v4082_v14 = vadd.f32 %v4081_v27, %v4080_v4  ;;  %v3916_v40 = vadd.f32 %v3915_v42, %v3914_v20  ;;  %v4484_v20 = vld [vmem:[%s10570_s12 + $0x20] sm:$0xff] }
 0x6fb   : > { %v5818_v62 = vpop.f32.mrb[100].mxu0 }
 0x6fc   : > { %v3661_v18 = vpop.f32.mrb[101].mxu0  ;;  %v9415_v52 = vadd.f32 %v5818_v62, %v9366_v38  ;;  %v4084_v26 = vadd.f32 %v4083_v5, %v4082_v14 }
 0x6fd   : > { %v9399_v46 = vadd.f32 %v9366_v38, %v3661_v18 }
 0x6fe   : > { %v4029_v53 = vmul.f32 %v9415_v52, %v9415_v52  ;;  %v3919_v2 = vsel %vm1772_vm3, %v9415_v52, 0.0 }
 0x6ff   : > { %v4028_v19 = vmul.f32 %v9399_v46, %v9399_v46  ;;  %v3917_v25 = vsel %vm1772_vm3, %v9399_v46, 0.0 }
 0x700   : > { %v3918_v49 = vadd.f32 %v3917_v25, %v3916_v40  ;;  %v4087_v56 = vsel %vm1772_vm3, %v4029_v53, 0.0 }
 0x701   : > { %v4085_v15 = vsel %vm1772_vm3, %v4028_v19, 0.0 }
 0x702   : > { %v4086_v55 = vadd.f32 %v4085_v15, %v4084_v26  ;;  %v3920_v11 = vadd.f32 %v3919_v2, %v3918_v49 }
 0x703   : > { %v5821_v43 = vpop.f32.mrb[102].mxu0 }
 0x704   : > { %v3671_v8 = vpop.f32.mrb[103].mxu0  ;;  %v9433_v34 = vadd.f32 %v5821_v43, %v9366_v38  ;;  %v4088_v0 = vadd.f32 %v4087_v56, %v4086_v55 }
 0x705   : > { %v9420_v36 = vadd.f32 %v9366_v38, %v3671_v8 }
 0x706   : > { %v4031_v31 = vmul.f32 %v9433_v34, %v9433_v34  ;;  %v3923_v18 = vsel %vm1772_vm3, %v9433_v34, 0.0 }
 0x707   : > { %v4030_v9 = vmul.f32 %v9420_v36, %v9420_v36  ;;  %v3921_v16 = vsel %vm1772_vm3, %v9420_v36, 0.0 }
 0x708   : > { %v3922_v59 = vadd.f32 %v3921_v16, %v3920_v11  ;;  %v4091_v8 = vsel %vm1772_vm3, %v4031_v31, 0.0 }
 0x709   : > { %v4089_v51 = vsel %vm1772_vm3, %v4030_v9, 0.0 }
 0x70a   : > { %v4090_v62 = vadd.f32 %v4089_v51, %v4088_v0  ;;  %v3924_v43 = vadd.f32 %v3923_v18, %v3922_v59 }
 0x70b   : > { %v5824_v3 = vpop.f32.mrb[104].mxu0 }
 0x70c   : > { %v3681_v13 = vpop.f32.mrb[105].mxu0  ;;  %v9451_v45 = vadd.f32 %v5824_v3, %v9366_v38  ;;  %v4092_v41 = vadd.f32 %v4091_v8, %v4090_v62 }
 0x70d   : > { %v9438_v37 = vadd.f32 %v9366_v38, %v3681_v13 }
 0x70e   : > { %v4033_v44 = vmul.f32 %v9451_v45, %v9451_v45 }
 0x70f   : > { %v4032_v21 = vmul.f32 %v9438_v37, %v9438_v37  ;;  %v3925_v50 = vsel %vm1772_vm3, %v9438_v37, 0.0 }
 0x710   : > { %v3926_v60 = vadd.f32 %v3925_v50, %v3924_v43  ;;  %v4095_v29 = vsel %vm1772_vm3, %v4033_v44, 0.0 }
 0x711   : > { %v4093_v13 = vsel %vm1772_vm3, %v4032_v21, 0.0 }
 0x712   : > { %v4094_v23 = vadd.f32 %v4093_v13, %v4092_v41 }
 0x713   : > { %v9368_v61 = vpop.f32.mrb[106].mxu0 }
 0x714   : > { %v3691_v48 = vpop.f32.mrb[107].mxu0  ;;  %v9470_v1 = vadd.f32 %v9368_v61, %v9366_v38  ;;  %v4096_v4 = vadd.f32 %v4095_v29, %v4094_v23  ;;  %v4485_v61 = vld [vmem:[%s10570_s12 + $0x28] sm:$0xff] }
 0x715   : > { %v9456_v12 = vadd.f32 %v9366_v38, %v3691_v48  ;;  %v3927_v48 = vsel %vm1772_vm3, %v9451_v45, 0.0  ;;  %v6094_v14 = vpack.c.bf16 %v4485_v61, %v4484_v20 }
 0x716   : > { %v3928_v35 = vadd.f32 %v3927_v48, %v3926_v60  ;;  %v4035_v32 = vmul.f32 %v9470_v1, %v9470_v1  ;;  %v3931_v40 = vsel %vm1772_vm3, %v9470_v1, 0.0 }
 0x717   : > { %v4034_v3 = vmul.f32 %v9456_v12, %v9456_v12  ;;  %v3929_v17 = vsel %vm1772_vm3, %v9456_v12, 0.0  ;;  %6095 = vmatprep.subr.bf16.mxu0 %v6094_v14 }
 0x718   : > { %v3930_v22 = vadd.f32 %v3929_v17, %v3928_v35  ;;  %6097 = vmatpush3.bf16.msra.mxu0 %v6094_v14  ;;  %v4099_v53 = vsel %vm1772_vm3, %v4035_v32, 0.0 }
 0x719   : > { %v4097_v27 = vsel %vm1772_vm3, %v4034_v3, 0.0 }
 0x71a   : > { %v4098_v42 = vadd.f32 %v4097_v27, %v4096_v4  ;;  %v3932_v26 = vadd.f32 %v3931_v40, %v3930_v22 }
 0x71b   : > { %v9389_v47 = vpop.f32.mrb[108].mxu0 }
 0x71c   : > { %v3701_v58 = vpop.f32.mrb[109].mxu0  ;;  %v9493_v5 = vadd.f32 %v9389_v47, %v9366_v38  ;;  %v4100_v2 = vadd.f32 %v4099_v53, %v4098_v42 }
 0x71d   : > { %v9475_v39 = vadd.f32 %v9366_v38, %v3701_v58 }
 0x71e   : > { %v4037_v16 = vmul.f32 %v9493_v5, %v9493_v5 }
 0x71f   : > { %v4036_v58 = vmul.f32 %v9475_v39, %v9475_v39  ;;  %v3933_v15 = vsel %vm1772_vm3, %v9475_v39, 0.0 }
 0x720   : > { %v3934_v55 = vadd.f32 %v3933_v15, %v3932_v26  ;;  %v4103_v62 = vsel %vm1772_vm3, %v4037_v16, 0.0 }
 0x721   : > { %v4101_v9 = vsel %vm1772_vm3, %v4036_v58, 0.0 }
 0x722   : > { %v4102_v11 = vadd.f32 %v4101_v9, %v4100_v2 }
 0x723   : > { %v9422_v28 = vpop.f32.mrb[110].mxu0 }
 0x724   : > { %v3711_v54 = vpop.f32.mrb[111].mxu0  ;;  %v9510_v56 = vadd.f32 %v9422_v28, %v9366_v38  ;;  %v4104_v43 = vadd.f32 %v4103_v62, %v4102_v11 }
 0x725   : > { %v9498_v49 = vadd.f32 %v9366_v38, %v3711_v54  ;;  %v3935_v54 = vsel %vm1772_vm3, %v9493_v5, 0.0 }
 0x726   : > { %v3936_v31 = vadd.f32 %v3935_v54, %v3934_v55  ;;  %v4039_v8 = vmul.f32 %v9510_v56, %v9510_v56 }
 0x727   : > { %v4038_v47 = vmul.f32 %v9498_v49, %v9498_v49  ;;  %v3937_v51 = vsel %vm1772_vm3, %v9498_v49, 0.0 }
 0x728   : > { %v3938_v50 = vadd.f32 %v3937_v51, %v3936_v31  ;;  %v4107_v23 = vsel %vm1772_vm3, %v4039_v8, 0.0 }
 0x729   : > { %v4105_v18 = vsel %vm1772_vm3, %v4038_v47, 0.0 }
 0x72a   : > { %v4106_v13 = vadd.f32 %v4105_v18, %v4104_v43 }
 0x72b   : > { %v9442_v7 = vpop.f32.mrb[112].mxu0 }
 0x72c   : > { %v3721_v57 = vpop.f32.mrb[113].mxu0  ;;  %v9527_v60 = vadd.f32 %v9442_v7, %v9366_v38  ;;  %v4108_v29 = vadd.f32 %v4107_v23, %v4106_v13 }
 0x72d   : > { %v9515_v59 = vadd.f32 %v9366_v38, %v3721_v57  ;;  %v3939_v57 = vsel %vm1772_vm3, %v9510_v56, 0.0 }
 0x72e   : > { %v3940_v3 = vadd.f32 %v3939_v57, %v3938_v50  ;;  %v4041_v22 = vmul.f32 %v9527_v60, %v9527_v60 }
 0x72f   : > { %v4040_v28 = vmul.f32 %v9515_v59, %v9515_v59  ;;  %v3941_v41 = vsel %vm1772_vm3, %v9515_v59, 0.0 }
 0x730   : > { %v3942_v35 = vadd.f32 %v3941_v41, %v3940_v3  ;;  %v4111_v14 = vsel %vm1772_vm3, %v4041_v22, 0.0 }
 0x731   : > { %v4109_v48 = vsel %vm1772_vm3, %v4040_v28, 0.0 }
 0x732   : > { %v4110_v4 = vadd.f32 %v4109_v48, %v4108_v29 }
 0x733   : > { %v9464_v30 = vpop.f32.mrb[114].mxu0 }
 0x734   : > { %v3731_v33 = vpop.f32.mrb[115].mxu0  ;;  %v9544_v20 = vadd.f32 %v9464_v30, %v9366_v38  ;;  %v4112_v15 = vadd.f32 %v4111_v14, %v4110_v4 }
 0x735   : > { %v9532_v44 = vadd.f32 %v9366_v38, %v3731_v33  ;;  %v3943_v33 = vsel %vm1772_vm3, %v9527_v60, 0.0 }
 0x736   : > { %v3944_v58 = vadd.f32 %v3943_v33, %v3942_v35  ;;  %v4043_v26 = vmul.f32 %v9544_v20, %v9544_v20 }
 0x737   : > { %v4042_v7 = vmul.f32 %v9532_v44, %v9532_v44  ;;  %v3945_v61 = vsel %vm1772_vm3, %v9532_v44, 0.0 }
 0x738   : > { %v3946_v40 = vadd.f32 %v3945_v61, %v3944_v58  ;;  %v4115_v54 = vsel %vm1772_vm3, %v4043_v26, 0.0 }
 0x739   : > { %v5842_v19 = vpop.f32.mrb[116].mxu0  ;;  %v4113_v42 = vsel %vm1772_vm3, %v4042_v7, 0.0 }
 0x73a   : > { %v3741_v25 = vpop.f32.mrb[117].mxu0  ;;  %v4114_v9 = vadd.f32 %v4113_v42, %v4112_v15  ;;  %v9560_v2 = vadd.f32 %v5842_v19, %v9366_v38 }
 0x73b   : > { %v9549_v32 = vadd.f32 %v9366_v38, %v3741_v25  ;;  %v3947_v25 = vsel %vm1772_vm3, %v9544_v20, 0.0 }
 0x73c   : > { %v3948_v11 = vadd.f32 %v3947_v25, %v3946_v40  ;;  %v4116_v62 = vadd.f32 %v4115_v54, %v4114_v9  ;;  %v4045_v18 = vmul.f32 %v9560_v2, %v9560_v2  ;;  %v3951_v43 = vsel %vm1772_vm3, %v9560_v2, 0.0 }
 0x73d   : > { %v4044_v30 = vmul.f32 %v9549_v32, %v9549_v32  ;;  %v3949_v16 = vsel %vm1772_vm3, %v9549_v32, 0.0 }
 0x73e   : > { %v3950_v31 = vadd.f32 %v3949_v16, %v3948_v11  ;;  %v4119_v3 = vsel %vm1772_vm3, %v4045_v18, 0.0 }
 0x73f   : > { %v4117_v51 = vsel %vm1772_vm3, %v4044_v30, 0.0 }
 0x740   : > { %v4118_v50 = vadd.f32 %v4117_v51, %v4116_v62  ;;  %v3952_v57 = vadd.f32 %v3951_v43, %v3950_v31 }
 0x741   : > { %v5845_v0 = vpop.f32.mrb[118].mxu0 }
 0x742   : > { %v3751_v21 = vpop.f32.mrb[119].mxu0  ;;  %v4120_v35 = vadd.f32 %v4119_v3, %v4118_v50 }
 0x743   : > { %v9565_v47 = vadd.f32 %v9366_v38, %v3751_v21  ;;  %v9576_v21 = vadd.f32 %v5845_v0, %v9366_v38 }
 0x745   : > { %v4046_v19 = vmul.f32 %v9565_v47, %v9565_v47  ;;  %v3953_v8 = vsel %vm1772_vm3, %v9565_v47, 0.0  ;;  %v4047_v29 = vmul.f32 %v9576_v21, %v9576_v21 }
 0x746   : > { %v3954_v48 = vadd.f32 %v3953_v8, %v3952_v57 }
 0x747   : > { %v4121_v23 = vsel %vm1772_vm3, %v4046_v19, 0.0  ;;  %v4123_v58 = vsel %vm1772_vm3, %v4047_v29, 0.0 }
 0x748   : > { %v4122_v22 = vadd.f32 %v4121_v23, %v4120_v35 }
 0x749   : > { %v5848_v17 = vpop.f32.mrb[120].mxu0 }
 0x74a   : > { %v3761_v27 = vpop.f32.mrb[121].mxu0  ;;  %v9592_v7 = vadd.f32 %v5848_v17, %v9366_v38  ;;  %v4124_v15 = vadd.f32 %v4123_v58, %v4122_v22 }
 0x74b   : > { %v9581_v28 = vadd.f32 %v9366_v38, %v3761_v27  ;;  %v3955_v27 = vsel %vm1772_vm3, %v9576_v21, 0.0 }
 0x74c   : > { %v3956_v61 = vadd.f32 %v3955_v27, %v3954_v48  ;;  %v4049_v30 = vmul.f32 %v9592_v7, %v9592_v7 }
 0x74d   : > { %v4048_v0 = vmul.f32 %v9581_v28, %v9581_v28  ;;  %v3957_v4 = vsel %vm1772_vm3, %v9581_v28, 0.0 }
 0x74e   : > { %v3958_v40 = vadd.f32 %v3957_v4, %v3956_v61  ;;  %v4127_v51 = vsel %vm1772_vm3, %v4049_v30, 0.0 }
 0x74f   : > { %v4125_v14 = vsel %vm1772_vm3, %v4048_v0, 0.0 }
 0x750   : > { %v4126_v9 = vadd.f32 %v4125_v14, %v4124_v15 }
 0x751   : > { %v5851_v53 = vpop.f32.mrb[122].mxu0 }
 0x752   : > { %v3771_v55 = vpop.f32.mrb[123].mxu0  ;;  %v9608_v25 = vadd.f32 %v5851_v53, %v9366_v38  ;;  %v4128_v18 = vadd.f32 %v4127_v51, %v4126_v9 }
 0x753   : > { %v9597_v33 = vadd.f32 %v9366_v38, %v3771_v55  ;;  %v3959_v55 = vsel %vm1772_vm3, %v9592_v7, 0.0 }
 0x754   : > { %v3960_v54 = vadd.f32 %v3959_v55, %v3958_v40  ;;  %v4051_v19 = vmul.f32 %v9608_v25, %v9608_v25  ;;  %v3963_v57 = vsel %vm1772_vm3, %v9608_v25, 0.0 }
 0x755   : > { %v4050_v17 = vmul.f32 %v9597_v33, %v9597_v33  ;;  %v3961_v16 = vsel %vm1772_vm3, %v9597_v33, 0.0 }
 0x756   : > { %v3962_v62 = vadd.f32 %v3961_v16, %v3960_v54  ;;  %v4131_v35 = vsel %vm1772_vm3, %v4051_v19, 0.0 }
 0x757   : > { %v4129_v31 = vsel %vm1772_vm3, %v4050_v17, 0.0 }
 0x758   : > { %v4130_v43 = vadd.f32 %v4129_v31, %v4128_v18  ;;  %v3964_v48 = vadd.f32 %v3963_v57, %v3962_v62 }
 0x759   : > { %v5854_v13 = vpop.f32.mrb[124].mxu0 }
 0x75a   : > { %v3781_v41 = vpop.f32.mrb[125].mxu0  ;;  %v4132_v22 = vadd.f32 %v4131_v35, %v4130_v43 }
 0x75b   : > { %v9613_v11 = vadd.f32 %v9366_v38, %v3781_v41  ;;  %v9624_v41 = vadd.f32 %v5854_v13, %v9366_v38 }
 0x75d   : > { %v4052_v53 = vmul.f32 %v9613_v11, %v9613_v11  ;;  %v3965_v3 = vsel %vm1772_vm3, %v9613_v11, 0.0  ;;  %v4053_v27 = vmul.f32 %v9624_v41, %v9624_v41  ;;  %v3967_v61 = vsel %vm1772_vm3, %v9624_v41, 0.0 }
 0x75e   : > { %v3966_v0 = vadd.f32 %v3965_v3, %v3964_v48 }
 0x75f   : > { %v4133_v29 = vsel %vm1772_vm3, %v4052_v53, 0.0  ;;  %v4135_v17 = vsel %vm1772_vm3, %v4053_v27, 0.0 }
 0x760   : > { %v4134_v4 = vadd.f32 %v4133_v29, %v4132_v22 }
 0x761   : > { %v5857_v42 = vpop.f32.mrb[126].mxu0 }
 0x762   : > { %v3791_v26 = vpop.f32.mrb[127].mxu0  ;;  %v9640_v58 = vadd.f32 %v5857_v42, %v9366_v38  ;;  %v4136_v16 = vadd.f32 %v4135_v17, %v4134_v4 }
 0x763   : > { %v9629_v23 = vadd.f32 %v9366_v38, %v3791_v26  ;;  %v3968_v26 = vadd.f32 %v3967_v61, %v3966_v0 }
 0x764   : > { %v4055_v54 = vmul.f32 %v9640_v58, %v9640_v58  ;;  %v3971_v31 = vsel %vm1772_vm3, %v9640_v58, 0.0 }
 0x765   : > { %v4054_v13 = vmul.f32 %v9629_v23, %v9629_v23  ;;  %v3969_v14 = vsel %vm1772_vm3, %v9629_v23, 0.0 }
 0x766   : > { %v3970_v55 = vadd.f32 %v3969_v14, %v3968_v26  ;;  %v4139_v43 = vsel %vm1772_vm3, %v4055_v54, 0.0  ;;  %v4486_v14 = vld [vmem:[%s10570_s12 + $0x30] sm:$0xff]  ;;  %v4487_v26 = vld [vmem:[%s10570_s12 + $0x38] sm:$0xff] }
 0x767   : > { %v4137_v9 = vsel %vm1772_vm3, %v4054_v13, 0.0  ;;  %v6098_v17 = vpack.c.bf16 %v4487_v26, %v4486_v14 }
 0x768   : > { %v4138_v51 = vadd.f32 %v4137_v9, %v4136_v16  ;;  %v3972_v53 = vadd.f32 %v3971_v31, %v3970_v55 }
 0x769   : > { %v5860_v50 = vpop.f32.mrb[128].mxu0  ;;  %6099 = vmatprep.subr.bf16.mxu0 %v6098_v17 }
 0x76a   : > { %v3801_v8 = vpop.f32.mrb[129].mxu0  ;;  %v9656_v62 = vadd.f32 %v5860_v50, %v9366_v38  ;;  %v4140_v48 = vadd.f32 %v4139_v43, %v4138_v51  ;;  %6101 = vmatpush3.bf16.msra.mxu0 %v6098_v17 }
 0x76b   : > { %v9645_v40 = vadd.f32 %v9366_v38, %v3801_v8 }
 0x76c   : > { %v4057_v29 = vmul.f32 %v9656_v62, %v9656_v62  ;;  %v3975_v22 = vsel %vm1772_vm3, %v9656_v62, 0.0 }
 0x76d   : > { %v4056_v42 = vmul.f32 %v9645_v40, %v9645_v40  ;;  %v3973_v18 = vsel %vm1772_vm3, %v9645_v40, 0.0 }
 0x76e   : > { %v3974_v3 = vadd.f32 %v3973_v18, %v3972_v53 }
 0x76f   : > { %v4141_v8 = vsel %vm1772_vm3, %v4056_v42, 0.0 }
 0x770   : > { %v4142_v0 = vadd.f32 %v4141_v8, %v4140_v48  ;;  %v3976_v61 = vadd.f32 %v3975_v22, %v3974_v3 }
 0x771   : > { %v5863_v15 = vpop.f32.mrb[130].mxu0 }
 0x772   : > { %v3811_v30 = vpop.f32.mrb[131].mxu0  ;;  %v9672_v27 = vadd.f32 %v5863_v15, %v9366_v38 }
 0x773   : > { %v9661_v19 = vadd.f32 %v9366_v38, %v3811_v30  ;;  %v4143_v30 = vsel %vm1772_vm3, %v4057_v29, 0.0 }
 0x774   : > { %10772 = vst [vmem:[#allocation39_spill] sm:$0xff] %v9672_v27  ;;  %v4144_v55 = vadd.f32 %v4143_v30, %v4142_v0  ;;  %v4059_v16 = vmul.f32 %v9672_v27, %v9672_v27  ;;  %v3979_v18 = vsel %vm1772_vm3, %v9672_v27, 0.0 }
 0x775   : > { %v4058_v50 = vmul.f32 %v9661_v19, %v9661_v19  ;;  %v3977_v13 = vsel %vm1772_vm3, %v9661_v19, 0.0 }
 0x776   : > { %v3978_v9 = vadd.f32 %v3977_v13, %v3976_v61  ;;  %v4147_v48 = vsel %vm1772_vm3, %v4059_v16, 0.0 }
 0x777   : > { %v4145_v15 = vsel %vm1772_vm3, %v4058_v50, 0.0 }
 0x778   : > { %v4146_v51 = vadd.f32 %v4145_v15, %v4144_v55  ;;  %v3980_v3 = vadd.f32 %v3979_v18, %v3978_v9 }
 0x779   : > { %v5866_v57 = vpop.f32.mrb[132].mxu0 }
 0x77a   : > { %v3821_v35 = vpop.f32.mrb[133].mxu0  ;;  %v9694_v53 = vadd.f32 %v5866_v57, %v9366_v38  ;;  %v4148_v50 = vadd.f32 %v4147_v48, %v4146_v51 }
 0x77b   : > { %v9677_v4 = vadd.f32 %v9366_v38, %v3821_v35 }
 0x77c   : > { %10774 = vst [vmem:[#allocation31_spill] sm:$0xff] %v9694_v53  ;;  %v4061_v0 = vmul.f32 %v9694_v53, %v9694_v53  ;;  %v3983_v13 = vsel %vm1772_vm3, %v9694_v53, 0.0 }
 0x77d   : > { %10773 = vst [vmem:[#allocation40_spill] sm:$0xff] %v9677_v4  ;;  %v4060_v54 = vmul.f32 %v9677_v4, %v9677_v4  ;;  %v3981_v43 = vsel %vm1772_vm3, %v9677_v4, 0.0 }
 0x77e   : > { %v3982_v29 = vadd.f32 %v3981_v43, %v3980_v3  ;;  %v4151_v17 = vsel %vm1772_vm3, %v4061_v0, 0.0 }
 0x77f   : > { %v4149_v35 = vsel %vm1772_vm3, %v4060_v54, 0.0 }
 0x780   : > { %v4150_v22 = vadd.f32 %v4149_v35, %v4148_v50  ;;  %v3984_v30 = vadd.f32 %v3983_v13, %v3982_v29 }
 0x781   : > { %v5869_v42 = vpop.f32.mrb[134].mxu0 }
 0x782   : > { %v3831_v31 = vpop.f32.mrb[135].mxu0  ;;  %v9710_v61 = vadd.f32 %v5869_v42, %v9366_v38  ;;  %v4152_v54 = vadd.f32 %v4151_v17, %v4150_v22 }
 0x783   : > { %v9699_v8 = vadd.f32 %v9366_v38, %v3831_v31 }
 0x784   : > { %10776 = vst [vmem:[#allocation32_spill] sm:$0xff] %v9710_v61  ;;  %v4063_v51 = vmul.f32 %v9710_v61, %v9710_v61  ;;  %v3987_v18 = vsel %vm1772_vm3, %v9710_v61, 0.0 }
 0x785   : > { %10775 = vst [vmem:[#allocation41_spill] sm:$0xff] %v9699_v8  ;;  %v4062_v57 = vmul.f32 %v9699_v8, %v9699_v8  ;;  %v3985_v14 = vsel %vm1772_vm3, %v9699_v8, 0.0 }
 0x786   : > { %v3986_v16 = vadd.f32 %v3985_v14, %v3984_v30  ;;  %v4155_v35 = vsel %vm1772_vm3, %v4063_v51, 0.0 }
 0x787   : > { %v4153_v9 = vsel %vm1772_vm3, %v4062_v57, 0.0 }
 0x788   : > { %v4154_v31 = vadd.f32 %v4153_v9, %v4152_v54  ;;  %v3988_v48 = vadd.f32 %v3987_v18, %v3986_v16 }
 0x789   : > { %v5872_v26 = vpop.f32.mrb[136].mxu0 }
 0x78a   : > { %v3841_v15 = vpop.f32.mrb[137].mxu0  ;;  %v9726_v43 = vadd.f32 %v5872_v26, %v9366_v38  ;;  %v4156_v57 = vadd.f32 %v4155_v35, %v4154_v31 }
 0x78b   : > { %v9717_v55 = vadd.f32 %v9366_v38, %v3841_v15 }
 0x78c   : > { %10778 = vst [vmem:[#allocation33_spill] sm:$0xff] %v9726_v43  ;;  %v4065_v13 = vmul.f32 %v9726_v43, %v9726_v43  ;;  %v3991_v30 = vsel %vm1772_vm3, %v9726_v43, 0.0 }
 0x78d   : > { %10777 = vst [vmem:[#allocation29_spill] sm:$0xff] %v9717_v55  ;;  %v4064_v42 = vmul.f32 %v9717_v55, %v9717_v55  ;;  %v3989_v3 = vsel %vm1772_vm3, %v9717_v55, 0.0 }
 0x78e   : > { %v3990_v0 = vadd.f32 %v3989_v3, %v3988_v48  ;;  %v4159_v54 = vsel %vm1772_vm3, %v4065_v13, 0.0 }
 0x78f   : > { %v4157_v29 = vsel %vm1772_vm3, %v4064_v42, 0.0 }
 0x790   : > { %v4158_v26 = vadd.f32 %v4157_v29, %v4156_v57  ;;  %v3992_v16 = vadd.f32 %v3991_v30, %v3990_v0 }
 0x791   : > { %v5875_v50 = vpop.f32.mrb[138].mxu0 }
 0x792   : > { %v3851_v22 = vpop.f32.mrb[139].mxu0  ;;  %v9740_v15 = vadd.f32 %v5875_v50, %v9366_v38  ;;  %v4160_v31 = vadd.f32 %v4159_v54, %v4158_v26 }
 0x793   : > { %v9735_v14 = vadd.f32 %v9366_v38, %v3851_v22 }
 0x794   : > { %10780 = vst [vmem:[#allocation35_spill] sm:$0xff] %v9740_v15  ;;  %v4067_v18 = vmul.f32 %v9740_v15, %v9740_v15  ;;  %v3995_v50 = vsel %vm1772_vm3, %v9740_v15, 0.0 }
 0x795   : > { %10779 = vst [vmem:[#allocation36_spill] sm:$0xff] %v9735_v14  ;;  %v3993_v17 = vsel %vm1772_vm3, %v9735_v14, 0.0  ;;  %v4066_v9 = vmul.f32 %v9735_v14, %v9735_v14 }
 0x796   : > { %v3994_v42 = vadd.f32 %v3993_v17, %v3992_v16  ;;  %v4163_v22 = vsel %vm1772_vm3, %v4067_v18, 0.0 }
 0x797   : > { %v4161_v51 = vsel %vm1772_vm3, %v4066_v9, 0.0 }
 0x798   : > { %v4162_v48 = vadd.f32 %v4161_v51, %v4160_v31  ;;  %v3996_v57 = vadd.f32 %v3995_v50, %v3994_v42 }
 0x799   : > { %v5878_v3 = vpop.f32.mrb[140].mxu0 }
 0x79a   : > { %v9751_v35 = vadd.f32 %v5878_v3, %v9366_v38  ;;  %v3861_v29 = vpop.f32.mrb[141].mxu0  ;;  %v4164_v9 = vadd.f32 %v4163_v22, %v4162_v48 }
 0x79b   : > { %v9756_v0 = vadd.f32 %v9366_v38, %v3861_v29 }
 0x79c   : > { %v4069_v13 = vmul.f32 %v9751_v35, %v9751_v35  ;;  %v3999_v16 = vsel %vm1772_vm3, %v9751_v35, 0.0 }
 0x79d   : > { %v3997_v26 = vsel %vm1772_vm3, %v9756_v0, 0.0  ;;  %v4068_v30 = vmul.f32 %v9756_v0, %v9756_v0 }
 0x79e   : > { %v3998_v17 = vadd.f32 %v3997_v26, %v3996_v57  ;;  %v4167_v31 = vsel %vm1772_vm3, %v4069_v13, 0.0 }
 0x79f   : > { %v4165_v54 = vsel %vm1772_vm3, %v4068_v30, 0.0 }
 0x7a0   : > { %v4166_v51 = vadd.f32 %v4165_v54, %v4164_v9  ;;  %v4000_v42 = vadd.f32 %v3999_v16, %v3998_v17 }
 0x7a1   : > { %v5881_v18 = vpop.f32.mrb[142].mxu0 }
 0x7a2   : > { %v9770_v3 = vadd.f32 %v5881_v18, %v9366_v38  ;;  %v3871_v29 = vpop.f32.mrb[143].mxu0  ;;  %v4168_v50 = vadd.f32 %v4167_v31, %v4166_v51 }
 0x7a3   : > { %v9773_v15 = vadd.f32 %v9366_v38, %v3871_v29 }
 0x7a4   : > { %10781 = vst [vmem:[#allocation38_spill] sm:$0xff] %v9770_v3  ;;  %v4071_v48 = vmul.f32 %v9770_v3, %v9770_v3  ;;  %v4003_v13 = vsel %vm1772_vm3, %v9770_v3, 0.0 }
 0x7a5   : > { %v4001_v57 = vsel %vm1772_vm3, %v9773_v15, 0.0  ;;  %v4070_v22 = vmul.f32 %v9773_v15, %v9773_v15 }
 0x7a6   : > { %v4002_v26 = vadd.f32 %v4001_v57, %v4000_v42  ;;  %v4171_v16 = vsel %vm1772_vm3, %v4071_v48, 0.0 }
 0x7a7   : > { %v4169_v30 = vsel %vm1772_vm3, %v4070_v22, 0.0 }
 0x7a8   : > { %v4170_v17 = vadd.f32 %v4169_v30, %v4168_v50  ;;  %v4004_v9 = vadd.f32 %v4003_v13, %v4002_v26 }
 0x7a9   : > { %v5884_v54 = vpop.f32.mrb[144].mxu0 }
 0x7aa   : > { %v9786_v51 = vadd.f32 %v5884_v54, %v9366_v38  ;;  %v3881_v31 = vpop.f32.mrb[145].mxu0  ;;  %v4172_v18 = vadd.f32 %v4171_v16, %v4170_v17 }
 0x7ab   : > { %v9789_v29 = vadd.f32 %v9366_v38, %v3881_v31 }
 0x7ac   : > { %10782 = vst [vmem:[#allocation37_spill] sm:$0xff] %v9786_v51  ;;  %v4073_v42 = vmul.f32 %v9786_v51, %v9786_v51  ;;  %v4007_v48 = vsel %vm1772_vm3, %v9786_v51, 0.0 }
 0x7ad   : > { %10783 = vst [vmem:[#allocation30_spill] sm:$0xff] %v9789_v29  ;;  %v4005_v57 = vsel %vm1772_vm3, %v9789_v29, 0.0  ;;  %v4072_v50 = vmul.f32 %v9789_v29, %v9789_v29 }
 0x7ae   : > { %v4006_v22 = vadd.f32 %v4005_v57, %v4004_v9  ;;  %v4175_v17 = vsel %vm1772_vm3, %v4073_v42, 0.0 }
 0x7af   : > { %v4173_v26 = vsel %vm1772_vm3, %v4072_v50, 0.0 }
 0x7b0   : > { %v4174_v13 = vadd.f32 %v4173_v26, %v4172_v18  ;;  %v4008_v30 = vadd.f32 %v4007_v48, %v4006_v22 }
 0x7b1   : > { %v5887_v16 = vpop.f32.mrb[146].mxu0 }
 0x7b2   : > { %v9802_v54 = vadd.f32 %v5887_v16, %v9366_v38  ;;  %v3891_v31 = vpop.f32.mrb[147].mxu0  ;;  %v4176_v14 = vadd.f32 %v4175_v17, %v4174_v13 }
 0x7b3   : > { %v9805_v43 = vadd.f32 %v9366_v38, %v3891_v31 }
 0x7b4   : > { %10784 = vst [vmem:[#allocation34_spill] sm:$0xff] %v9802_v54  ;;  %v4075_v9 = vmul.f32 %v9802_v54, %v9802_v54  ;;  %v4011_v42 = vsel %vm1772_vm3, %v9802_v54, 0.0 }
 0x7b5   : > { %10785 = vst [vmem:[#allocation42_spill] sm:$0xff] %v9805_v43  ;;  %v4009_v57 = vsel %vm1772_vm3, %v9805_v43, 0.0  ;;  %v4074_v18 = vmul.f32 %v9805_v43, %v9805_v43 }
 0x7b6   : > { %v4010_v50 = vadd.f32 %v4009_v57, %v4008_v30  ;;  %v4179_v13 = vsel %vm1772_vm3, %v4075_v9, 0.0 }
 0x7b7   : > { %v4177_v22 = vsel %vm1772_vm3, %v4074_v18, 0.0 }
 0x7b8   : > { %v4178_v48 = vadd.f32 %v4177_v22, %v4176_v14  ;;  %v4012_v26 = vadd.f32 %v4011_v42, %v4010_v50 }
 0x7b9   : > { %v5890_v17 = vpop.f32.mrb[148].mxu0 }
 0x7ba   : > { %v9818_v16 = vadd.f32 %v5890_v17, %v9366_v38  ;;  %v3901_v31 = vpop.f32.mrb[149].mxu0  ;;  %v4180_v55 = vadd.f32 %v4179_v13, %v4178_v48 }
 0x7bb   : > { %v9821_v61 = vadd.f32 %v9366_v38, %v3901_v31 }
 0x7bc   : > { %10786 = vst [vmem:[#allocation43_spill] sm:$0xff] %v9818_v16  ;;  %v4077_v30 = vmul.f32 %v9818_v16, %v9818_v16  ;;  %v4015_v9 = vsel %vm1878_vm4, %v9818_v16, 0.0 }
 0x7bd   : > { %v4013_v57 = vsel %vm1772_vm3, %v9821_v61, 0.0  ;;  %v4076_v14 = vmul.f32 %v9821_v61, %v9821_v61 }
 0x7be   : > { %v4014_v18 = vadd.f32 %v4013_v57, %v4012_v26  ;;  %v4183_v38 = vsel %vm1878_vm4, %v4077_v30, 0.0 }
 0x7bf   : > { %v4181_v50 = vsel %vm1772_vm3, %v4076_v14, 0.0 }
 0x7c0   : > { %v4016_v42 = vadd.f32 %v4015_v9, %v4014_v18  ;;  %v4182_v22 = vadd.f32 %v4181_v50, %v4180_v55 }
 0x7c2   : > { %v4017_v48 = vrot.slane %v4016_v42, 4  ;;  %v4184_v13 = vadd.f32 %v4183_v38, %v4182_v22  ;;  %v9937_v22 = vld [vmem:[#allocation16] ss:$0 sm:$0xff] }
 0x7c4   : > { %v4018_v17 = vadd.f32 %v4017_v48, %v4016_v42  ;;  %v4185_v31 = vrot.slane %v4184_v13, 4  ;;  %v10796_v48 = vld [vmem:[#allocation29_spill] sm:$0xff] }
 0x7c6   : > { %v4019_v8 = vrot.slane %v4018_v17, 2  ;;  %v4186_v53 = vadd.f32 %v4185_v31, %v4184_v13  ;;  %v10792_v31 = vld [vmem:[#allocation40_spill] sm:$0xff] }
 0x7c8   : > { %v4020_v4 = vadd.f32 %v4019_v8, %v4018_v17  ;;  %v4187_v54 = vrot.slane %v4186_v53, 2  ;;  %v10797_v17 = vld [vmem:[#allocation33_spill] sm:$0xff] }
 0x7ca   : > { %v4021_v43 = vrot.slane %v4020_v4, 1  ;;  %v4188_v27 = vadd.f32 %v4187_v54, %v4186_v53 }
 0x7cc   : > { %v4022_v26 = vadd.f32 %v4021_v43, %v4020_v4  ;;  %v4189_v57 = vrot.slane %v4188_v27, 1 }
 0x7ce   : > { %v9833_v51 = vmul.f32 0.0023201855, %v4022_v26  ;;  %v4190_v16 = vadd.f32 %v4189_v57, %v4188_v27  ;;  %v10793_v57 = vld [vmem:[#allocation31_spill] sm:$0xff] }
 0x7d0   : > { %v4191_v14 = vmul.f32 0.0023201855, %v4190_v16  ;;  %v4192_v55 = vmul.f32 %v9833_v51, %v9833_v51  ;;  %v4246_v30 = vsub.f32 %v9821_v61, %v9833_v51  ;;  %v4194_v9 = vsub.f32 %v9374_v63, %v9833_v51 }
 0x7d1   : > { %v4195_v8 = vsub.f32 %v9371_v24, %v9833_v51  ;;  %v4196_v4 = vsub.f32 %v9377_v10, %v9833_v51  ;;  %v4197_v27 = vsub.f32 %v9394_v6, %v9833_v51  ;;  %v4198_v43 = vsub.f32 %v9399_v46, %v9833_v51 }
 0x7d2   : > { %v4193_v18 = vsub.f32 %v4191_v14, %v4192_v55  ;;  %v4199_v61 = vsub.f32 %v9415_v52, %v9833_v51  ;;  %v4200_v54 = vsub.f32 %v9420_v36, %v9833_v51  ;;  %v4201_v63 = vsub.f32 %v9433_v34, %v9833_v51  ;;  %v10794_v55 = vld [vmem:[#allocation41_spill] sm:$0xff] }
 0x7d3   : > { %v4202_v24 = vsub.f32 %v9438_v37, %v9833_v51  ;;  %v4203_v10 = vsub.f32 %v9451_v45, %v9833_v51  ;;  %v4204_v6 = vsub.f32 %v9456_v12, %v9833_v51  ;;  %v4205_v46 = vsub.f32 %v9470_v1, %v9833_v51 }
 0x7d4   : > { %v4248_v53 = vadd.f32 1e-05, %v4193_v18  ;;  %v4206_v52 = vsub.f32 %v9475_v39, %v9833_v51  ;;  %v4207_v36 = vsub.f32 %v9493_v5, %v9833_v51  ;;  %v4208_v34 = vsub.f32 %v9498_v49, %v9833_v51 }
 0x7d5   : > { %v4209_v37 = vsub.f32 %v9510_v56, %v9833_v51  ;;  %v4210_v45 = vsub.f32 %v9515_v59, %v9833_v51  ;;  %v4211_v12 = vsub.f32 %v9527_v60, %v9833_v51  ;;  %v4212_v1 = vsub.f32 %v9532_v44, %v9833_v51 }
 0x7d6   : > { %6367 = vrsqrt.f32 %v4248_v53  ;;  %v4213_v39 = vsub.f32 %v9544_v20, %v9833_v51  ;;  %v4214_v5 = vsub.f32 %v9549_v32, %v9833_v51  ;;  %v4215_v49 = vsub.f32 %v9560_v2, %v9833_v51  ;;  %v10795_v53 = vld [vmem:[#allocation32_spill] sm:$0xff] }
 0x7d7   : > { %v4216_v56 = vsub.f32 %v9565_v47, %v9833_v51  ;;  %v4217_v59 = vsub.f32 %v9576_v21, %v9833_v51  ;;  %v4218_v60 = vsub.f32 %v9581_v28, %v9833_v51  ;;  %v4219_v44 = vsub.f32 %v9592_v7, %v9833_v51 }
 0x7d8   : > { %v4220_v20 = vsub.f32 %v9597_v33, %v9833_v51  ;;  %v4221_v32 = vsub.f32 %v9608_v25, %v9833_v51  ;;  %v4222_v2 = vsub.f32 %v9613_v11, %v9833_v51  ;;  %v4223_v47 = vsub.f32 %v9624_v41, %v9833_v51 }
 0x7d9   : > { %v4224_v21 = vsub.f32 %v9629_v23, %v9833_v51  ;;  %v4225_v28 = vsub.f32 %v9640_v58, %v9833_v51  ;;  %v4226_v7 = vsub.f32 %v9645_v40, %v9833_v51  ;;  %v4227_v33 = vsub.f32 %v9656_v62, %v9833_v51 }
 0x7da   : > { %v4228_v25 = vsub.f32 %v9661_v19, %v9833_v51  ;;  %v10788_v19 = vld [vmem:[#allocation39_spill] sm:$0xff]  ;;  %v4230_v26 = vsub.f32 %v10792_v31, %v9833_v51  ;;  %v4231_v14 = vsub.f32 %v10793_v57, %v9833_v51  ;;  %v4232_v18 = vsub.f32 %v10794_v55, %v9833_v51  ;;  %v10798_v31 = vld [vmem:[#allocation36_spill] sm:$0xff] }
 0x7db   : > { %v4229_v50 = vsub.f32 %v10788_v19, %v9833_v51  ;;  %v4233_v19 = vsub.f32 %v10795_v53, %v9833_v51  ;;  %v4234_v40 = vsub.f32 %v10796_v48, %v9833_v51  ;;  %v4235_v58 = vsub.f32 %v10797_v17, %v9833_v51  ;;  %v10799_v57 = vld [vmem:[#allocation35_spill] sm:$0xff] }
 0x7dc   : > { %v4236_v23 = vsub.f32 %v10798_v31, %v9833_v51  ;;  %v4237_v41 = vsub.f32 %v10799_v57, %v9833_v51 }
 0x7e0   : > { %v6368_v16 = vpop.eup %6367 }
 0x7e1   : > { %v4302_v11 = vmul.f32 %v6368_v16, %v4246_v30  ;;  %v4250_v55 = vmul.f32 %v6368_v16, %v4194_v9  ;;  %v4251_v13 = vmul.f32 %v6368_v16, %v4195_v8  ;;  %v4252_v38 = vmul.f32 %v6368_v16, %v4196_v4 }
 0x7e2   : > { %v4253_v53 = vmul.f32 %v6368_v16, %v4197_v27  ;;  %v9947_v42 = vmul.f32 %v6368_v16, %v4198_v43  ;;  %v9949_v62 = vmul.f32 %v6368_v16, %v4199_v61  ;;  %v9951_v29 = vmul.f32 %v6368_v16, %v4200_v54 }
 0x7e3   : > { %v9954_v48 = vmul.f32 %v9937_v22, %v4302_v11  ;;  %v9956_v17 = vmul.f32 %v6368_v16, %v4201_v63  ;;  %v9958_v31 = vmul.f32 %v6368_v16, %v4202_v24  ;;  %v9960_v3 = vmul.f32 %v6368_v16, %v4203_v10 }
 0x7e4   : > { %v9962_v30 = vmul.f32 %v6368_v16, %v4204_v6  ;;  %v9964_v9 = vmul.f32 %v6368_v16, %v4205_v46  ;;  %v9966_v8 = vmul.f32 %v6368_v16, %v4206_v52  ;;  %v9968_v4 = vmul.f32 %v6368_v16, %v4207_v36 }
 0x7e5   : > { %v9970_v27 = vmul.f32 %v6368_v16, %v4208_v34  ;;  %v9972_v43 = vmul.f32 %v6368_v16, %v4209_v37  ;;  %v9974_v61 = vmul.f32 %v6368_v16, %v4210_v45  ;;  %v9976_v54 = vmul.f32 %v6368_v16, %v4211_v12 }
 0x7e6   : > { %v9978_v63 = vmul.f32 %v6368_v16, %v4212_v1  ;;  %v9980_v24 = vmul.f32 %v6368_v16, %v4213_v39  ;;  %v9982_v10 = vmul.f32 %v6368_v16, %v4214_v5  ;;  %v9984_v6 = vmul.f32 %v6368_v16, %v4215_v49 }
 0x7e7   : > { %v9986_v46 = vmul.f32 %v6368_v16, %v4216_v56  ;;  %v9988_v52 = vmul.f32 %v6368_v16, %v4217_v59  ;;  %v9990_v36 = vmul.f32 %v6368_v16, %v4218_v60  ;;  %v9992_v34 = vmul.f32 %v6368_v16, %v4219_v44 }
 0x7e8   : > { %v9994_v37 = vmul.f32 %v6368_v16, %v4220_v20  ;;  %v9996_v45 = vmul.f32 %v6368_v16, %v4221_v32  ;;  %v9998_v12 = vmul.f32 %v6368_v16, %v4222_v2  ;;  %v10000_v1 = vmul.f32 %v6368_v16, %v4223_v47 }
 0x7e9   : > { %v10002_v39 = vmul.f32 %v6368_v16, %v4224_v21  ;;  %v10004_v5 = vmul.f32 %v6368_v16, %v4225_v28  ;;  %v10006_v49 = vmul.f32 %v6368_v16, %v4226_v7  ;;  %v4283_v56 = vmul.f32 %v6368_v16, %v4227_v33 }
 0x7ea   : > { %10800 = vst [vmem:[#allocation39_spill] sm:$0xff] %v9994_v37  ;;  %10801 = vst [vmem:[#allocation40_spill] sm:$0xff] %v9996_v45  ;;  %v4284_v59 = vmul.f32 %v6368_v16, %v4228_v25  ;;  %v4285_v60 = vmul.f32 %v6368_v16, %v4229_v50  ;;  %v4286_v11 = vmul.f32 %v6368_v16, %v4230_v26  ;;  %v10807_v50 = vld [vmem:[#allocation38_spill] sm:$0xff] }
 0x7eb   : > { %10802 = vst [vmem:[#allocation31_spill] sm:$0xff] %v10004_v5  ;;  %10803 = vst [vmem:[#allocation41_spill] sm:$0xff] %v10006_v49  ;;  %v4287_v44 = vmul.f32 %v6368_v16, %v4231_v14  ;;  %v4288_v57 = vmul.f32 %v6368_v16, %v4232_v18  ;;  %v4289_v20 = vmul.f32 %v6368_v16, %v4233_v19  ;;  %v10813_v19 = vld [vmem:[#allocation42_spill] sm:$0xff]  ;;  %v10817_v49 = vld [vmem:[#allocation43_spill] sm:$0xff] }
 0x7ec   : > { %v4290_v37 = vmul.f32 %v6368_v16, %v4234_v40  ;;  %v4291_v32 = vmul.f32 %v6368_v16, %v4235_v58  ;;  %v4292_v45 = vmul.f32 %v6368_v16, %v4236_v23  ;;  %v4293_v2 = vmul.f32 %v6368_v16, %v4237_v41  ;;  %v10809_v40 = vld [vmem:[#allocation30_spill] sm:$0xff]  ;;  %v10811_v58 = vld [vmem:[#allocation37_spill] sm:$0xff] }
 0x7ed   : > { %v10804_v47 = vsub.f32 %v9756_v0, %v9833_v51  ;;  %v10805_v28 = vsub.f32 %v9751_v35, %v9833_v51  ;;  %v10806_v33 = vsub.f32 %v9773_v15, %v9833_v51  ;;  %v10808_v26 = vsub.f32 %v10807_v50, %v9833_v51 }
 0x7ee   : > { %v10810_v23 = vsub.f32 %v10809_v40, %v9833_v51  ;;  %v10812_v0 = vsub.f32 %v10811_v58, %v9833_v51  ;;  %v10814_v35 = vsub.f32 %v10813_v19, %v9833_v51  ;;  %v10818_v50 = vsub.f32 %v10817_v49, %v9833_v51 }
 0x7ef   : > { %v4294_v21 = vmul.f32 %v6368_v16, %v10804_v47  ;;  %v4295_v7 = vmul.f32 %v6368_v16, %v10805_v28  ;;  %v4296_v25 = vmul.f32 %v6368_v16, %v10806_v33  ;;  %v4297_v14 = vmul.f32 %v6368_v16, %v10808_v26  ;;  %v10815_v28 = vld [vmem:[#allocation34_spill] sm:$0xff] }
 0x7f0   : > { %v4298_v41 = vmul.f32 %v6368_v16, %v10810_v23  ;;  %v4299_v18 = vmul.f32 %v6368_v16, %v10812_v0  ;;  %v4300_v47 = vmul.f32 %v6368_v16, %v10814_v35  ;;  %v10816_v15 = vsub.f32 %v10815_v28, %v9833_v51 }
 0x7f1   : > { %v4303_v26 = vmul.f32 %v6368_v16, %v10818_v50  ;;  %v4311_v5 = vmul.f32 %v9937_v22, %v4250_v55  ;;  %v4312_v40 = vmul.f32 %v9937_v22, %v4251_v13  ;;  %v4313_v23 = vmul.f32 %v9937_v22, %v4252_v38  ;;  %v10049_v38 = vld [vmem:[#allocation18] ss:$0 sm:$0xff] }
 0x7f2   : > { %v4301_v33 = vmul.f32 %v6368_v16, %v10816_v15  ;;  %v4314_v58 = vmul.f32 %v9937_v22, %v4253_v53  ;;  %v4344_v0 = vmul.f32 %v9937_v22, %v4283_v56  ;;  %v4345_v19 = vmul.f32 %v9937_v22, %v4284_v59 }
 0x7f3   : > { %v4346_v35 = vmul.f32 %v9937_v22, %v4285_v60  ;;  %v4347_v28 = vmul.f32 %v9937_v22, %v4286_v11  ;;  %v4348_v15 = vmul.f32 %v9937_v22, %v4287_v44  ;;  %v4349_v51 = vmul.f32 %v9937_v22, %v4288_v57 }
 0x7f4   : > { %v4350_v16 = vmul.f32 %v9937_v22, %v4289_v20  ;;  %v10047_v13 = vmul.f32 %v9937_v22, %v4290_v37  ;;  %v10052_v55 = vmul.f32 %v9937_v22, %v4291_v32  ;;  %v10055_v53 = vmul.f32 %v9937_v22, %v4292_v45 }
 0x7f5   : > { %v10058_v49 = vmul.f32 %v9937_v22, %v4293_v2  ;;  %v10061_v56 = vmul.f32 %v9937_v22, %v4294_v21  ;;  %v10064_v59 = vmul.f32 %v9937_v22, %v4295_v7  ;;  %v10067_v37 = vmul.f32 %v9937_v22, %v4296_v25 }
 0x7f6   : > { %v10070_v60 = vmul.f32 %v9937_v22, %v4297_v14  ;;  %v10073_v11 = vmul.f32 %v9937_v22, %v4298_v41  ;;  %v10076_v45 = vmul.f32 %v9937_v22, %v4299_v18  ;;  %v10079_v44 = vmul.f32 %v9937_v22, %v4300_v47 }
 0x7f7   : > { %v10082_v57 = vmul.f32 %v9937_v22, %v4301_v33  ;;  %v10085_v20 = vmul.f32 %v9937_v22, %v4303_v26  ;;  %v4315_v32 = vmul.f32 %v9937_v22, %v9947_v42  ;;  %v4373_v2 = vadd.f32 %v10049_v38, %v4312_v40 }
 0x7f8   : > { %v4372_v21 = vadd.f32 %v10049_v38, %v4311_v5  ;;  %v4374_v7 = vadd.f32 %v10049_v38, %v4313_v23  ;;  %v4316_v41 = vmul.f32 %v9937_v22, %v9949_v62  ;;  %v4375_v18 = vadd.f32 %v10049_v38, %v4314_v58 }
 0x7f9   : > { %v4427_v25 = vmax.f32 %v4373_v2, 0.0  ;;  %v4317_v47 = vmul.f32 %v9937_v22, %v9951_v29  ;;  %v4376_v42 = vadd.f32 %v10049_v38, %v4315_v32  ;;  %v4318_v5 = vmul.f32 %v9937_v22, %v9956_v17 }
 0x7fa   : > { %v4426_v14 = vmax.f32 %v4372_v21, 0.0  ;;  %v4428_v33 = vmax.f32 %v4374_v7, 0.0  ;;  %v4429_v50 = vmax.f32 %v4375_v18, 0.0  ;;  %v4377_v62 = vadd.f32 %v10049_v38, %v4316_v41 }
 0x7fb   : > { %v4319_v26 = vmul.f32 %v9937_v22, %v9958_v31  ;;  %v4430_v40 = vmax.f32 %v4376_v42, 0.0  ;;  %v4378_v29 = vadd.f32 %v10049_v38, %v4317_v47  ;;  %v4320_v23 = vmul.f32 %v9937_v22, %v9960_v3 }
 0x7fc   : > { %5907 = vmatprep.mubr.msk.f32.mxu0 %vm1772_vm3, %v4426_v14  ;;  %v4321_v58 = vmul.f32 %v9937_v22, %v9962_v30  ;;  %v4431_v17 = vmax.f32 %v4377_v62, 0.0  ;;  %v4379_v32 = vadd.f32 %v10049_v38, %v4318_v5  ;;  %v4322_v31 = vmul.f32 %v9937_v22, %v9964_v9 }
 0x7fd   : > { %5908 = vmatmul.mubr.msk.f32.vlgmr.msra.gmra.mrb[150].mxu0 %vm1772_vm3, %v4427_v25  ;;  %v4432_v2 = vmax.f32 %v4378_v29, 0.0  ;;  %v4380_v21 = vadd.f32 %v10049_v38, %v4319_v26  ;;  %v4323_v7 = vmul.f32 %v9937_v22, %v9966_v8  ;;  %v4381_v25 = vadd.f32 %v10049_v38, %v4320_v23 }
 0x7fe   : > { %5910 = vmatprep.mubr.msk.f32.mxu0 %vm1772_vm3, %v4428_v33  ;;  %v4433_v3 = vmax.f32 %v4379_v32, 0.0  ;;  %v4382_v30 = vadd.f32 %v10049_v38, %v4321_v58  ;;  %v10124_v41 = vadd.f32 %v10049_v38, %v4344_v0  ;;  %v10127_v18 = vadd.f32 %v10049_v38, %v4345_v19 }
 0x7ff   : > { %v4434_v14 = vmax.f32 %v4380_v21, 0.0  ;;  %v10130_v47 = vadd.f32 %v10049_v38, %v4346_v35  ;;  %v10134_v9 = vadd.f32 %v10049_v38, %v4347_v28  ;;  %v10137_v8 = vadd.f32 %v10049_v38, %v4348_v15 }
 0x800   : > { %v10140_v33 = vadd.f32 %v10049_v38, %v4349_v51  ;;  %v10143_v0 = vadd.f32 %v10049_v38, %v4350_v16  ;;  %v4324_v19 = vmul.f32 %v9937_v22, %v9968_v4  ;;  %v4325_v35 = vmul.f32 %v9937_v22, %v9970_v27 }
 0x801   : > { %5911 = vmatmul.mubr.msk.f32.gmra.mrb[152].mxu0 %vm1772_vm3, %v4429_v50  ;;  %v4435_v42 = vmax.f32 %v4381_v25, 0.0  ;;  %v4436_v28 = vmax.f32 %v4382_v30, 0.0  ;;  %v4383_v5 = vadd.f32 %v10049_v38, %v4322_v31  ;;  %v4384_v15 = vadd.f32 %v10049_v38, %v4323_v7 }
 0x802   : > { %5913 = vmatprep.mubr.msk.f32.mxu0 %vm1772_vm3, %v4430_v40  ;;  %v10154_v51 = vadd.f32 %v10049_v38, %v10047_v13  ;;  %v10158_v16 = vadd.f32 %v10049_v38, %v10052_v55  ;;  %v10162_v4 = vadd.f32 %v10049_v38, %v10055_v53  ;;  %v10166_v27 = vadd.f32 %v10049_v38, %v10058_v49 }
 0x803   : > { %v10171_v50 = vadd.f32 %v10049_v38, %v10061_v56  ;;  %v10175_v13 = vadd.f32 %v10049_v38, %v10064_v59  ;;  %v10179_v55 = vadd.f32 %v10049_v38, %v10067_v37  ;;  %v10183_v53 = vadd.f32 %v10049_v38, %v10070_v60 }
 0x804   : > { %v4326_v49 = vmul.f32 %v9937_v22, %v9972_v43  ;;  %v4327_v62 = vmul.f32 %v9937_v22, %v9974_v61  ;;  %v4437_v56 = vmax.f32 %v4383_v5, 0.0  ;;  %v4438_v26 = vmax.f32 %v4384_v15, 0.0 }
 0x805   : > { %5914 = vmatmul.mubr.msk.f32.gmra.mrb[154].mxu0 %vm1772_vm3, %v4431_v17  ;;  %v4385_v59 = vadd.f32 %v10049_v38, %v4324_v19  ;;  %v4386_v40 = vadd.f32 %v10049_v38, %v4325_v35  ;;  %v10194_v37 = vadd.f32 %v10049_v38, %v10073_v11  ;;  %v10198_v60 = vadd.f32 %v10049_v38, %v10076_v45 }
 0x806   : > { %5916 = vmatprep.mubr.msk.f32.mxu0 %vm1772_vm3, %v4432_v2  ;;  %v10202_v43 = vadd.f32 %v10049_v38, %v10079_v44  ;;  %v10206_v61 = vadd.f32 %v10049_v38, %v10082_v57  ;;  %v10211_v29 = vadd.f32 %v10049_v38, %v9954_v48  ;;  %v10215_v11 = vadd.f32 %v10049_v38, %v10085_v20 }
 0x807   : > { %v4328_v45 = vmul.f32 %v9937_v22, %v9976_v54  ;;  %v4439_v44 = vmax.f32 %v4385_v59, 0.0  ;;  %v4387_v23 = vadd.f32 %v10049_v38, %v4326_v49  ;;  %v4329_v57 = vmul.f32 %v9937_v22, %v9978_v63 }
 0x808   : > { %v4440_v58 = vmax.f32 %v4386_v40, 0.0  ;;  %v4388_v17 = vadd.f32 %v10049_v38, %v4327_v62  ;;  %v4330_v48 = vmul.f32 %v9937_v22, %v9980_v24  ;;  %v4331_v54 = vmul.f32 %v9937_v22, %v9982_v10 }
 0x809   : > { %5917 = vmatmul.mubr.msk.f32.gmra.mrb[156].mxu0 %vm1772_vm3, %v4433_v3  ;;  %v4441_v20 = vmax.f32 %v4387_v23, 0.0  ;;  %v4389_v32 = vadd.f32 %v10049_v38, %v4328_v45  ;;  %v4390_v21 = vadd.f32 %v10049_v38, %v4329_v57  ;;  %v4332_v63 = vmul.f32 %v9937_v22, %v9984_v6 }
 0x80a   : > { %5919 = vmatprep.mubr.msk.f32.mxu0 %vm1772_vm3, %v4434_v14  ;;  %v4442_v2 = vmax.f32 %v4388_v17, 0.0  ;;  %v4391_v7 = vadd.f32 %v10049_v38, %v4330_v48  ;;  %v4333_v24 = vmul.f32 %v9937_v22, %v9986_v46  ;;  %v4392_v25 = vadd.f32 %v10049_v38, %v4331_v54 }
 0x80b   : > { %v4443_v31 = vmax.f32 %v4389_v32, 0.0  ;;  %v4444_v3 = vmax.f32 %v4390_v21, 0.0  ;;  %v4334_v10 = vmul.f32 %v9937_v22, %v9988_v52  ;;  %v4393_v14 = vadd.f32 %v10049_v38, %v4332_v63  ;;  %v10819_v52 = vld [vmem:[#allocation39_spill] sm:$0xff] }
 0x80c   : > { %v4445_v30 = vmax.f32 %v4391_v7, 0.0  ;;  %v4335_v6 = vmul.f32 %v9937_v22, %v9990_v36  ;;  %v4446_v19 = vmax.f32 %v4392_v25, 0.0  ;;  %v4394_v35 = vadd.f32 %v10049_v38, %v4333_v24  ;;  %v10820_v36 = vld [vmem:[#allocation40_spill] sm:$0xff] }
 0x80d   : > { %5920 = vmatmul.mubr.msk.f32.gmra.mrb[158].mxu0 %vm1772_vm3, %v4435_v42  ;;  %v4336_v46 = vmul.f32 %v9937_v22, %v9992_v34  ;;  %v4447_v42 = vmax.f32 %v4393_v14, 0.0  ;;  %v4337_v5 = vmul.f32 %v9937_v22, %v10819_v52  ;;  %v4338_v62 = vmul.f32 %v9937_v22, %v10820_v36 }
 0x80e   : > { %5922 = vmatprep.mubr.msk.f32.mxu0 %vm1772_vm3, %v4436_v28  ;;  %v4395_v28 = vadd.f32 %v10049_v38, %v4334_v10  ;;  %v4448_v15 = vmax.f32 %v4394_v35, 0.0  ;;  %v4396_v49 = vadd.f32 %v10049_v38, %v4335_v6  ;;  %v4339_v34 = vmul.f32 %v9937_v22, %v9998_v12  ;;  %v10821_v12 = vld [vmem:[#allocation31_spill] sm:$0xff] }
 0x80f   : > { %v4398_v40 = vadd.f32 %v10049_v38, %v4337_v5  ;;  %v4340_v45 = vmul.f32 %v9937_v22, %v10000_v1  ;;  %v4399_v23 = vadd.f32 %v10049_v38, %v4338_v62  ;;  %v4341_v57 = vmul.f32 %v9937_v22, %v10002_v39  ;;  %v10822_v1 = vld [vmem:[#allocation41_spill] sm:$0xff] }
 0x810   : > { %v4450_v59 = vmax.f32 %v4396_v49, 0.0  ;;  %v4400_v17 = vadd.f32 %v10049_v38, %v4339_v34  ;;  %v4342_v48 = vmul.f32 %v9937_v22, %v10821_v12  ;;  %v4343_v54 = vmul.f32 %v9937_v22, %v10822_v1  ;;  %v6371_v5 = vld [vmem:[%s7203_s23 + $0x18] sm:$0xff]  ;;  %v6372_v49 = vld [vmem:[%s7203_s23 + $0x10] sm:$0xff] }
 0x811   : > { %5923 = vmatmul.mubr.msk.f32.gmra.mrb[160].mxu0 %vm1772_vm3, %v4437_v56  ;;  %v4449_v56 = vmax.f32 %v4395_v28, 0.0  ;;  %v4401_v32 = vadd.f32 %v10049_v38, %v4340_v45  ;;  %v4402_v21 = vadd.f32 %v10049_v38, %v4341_v57  ;;  %v4459_v22 = vmax.f32 %v10124_v41, 0.0  ;;  %v6374_v45 = vld [vmem:[%s7203_s23 + $0x20] sm:$0xff]  ;;  %v6375_v12 = vld [vmem:[%s7203_s23 + $0x38] sm:$0xff] }
 0x812   : > { %5925 = vmatprep.mubr.msk.f32.mxu0 %vm1772_vm3, %v4438_v26  ;;  %v4397_v26 = vadd.f32 %v10049_v38, %v4336_v46  ;;  %v4403_v63 = vadd.f32 %v10049_v38, %v4342_v48  ;;  %v4404_v7 = vadd.f32 %v10049_v38, %v4343_v54  ;;  %v4460_v25 = vmax.f32 %v10127_v18, 0.0 }
 0x813   : > { %v4455_v39 = vmax.f32 %v4401_v32, 0.0  ;;  %v4461_v38 = vmax.f32 %v10130_v47, 0.0  ;;  %v4462_v10 = vmax.f32 %v10134_v9, 0.0  ;;  %v4464_v14 = vmax.f32 %v10140_v33, 0.0 }
 0x814   : > { %v4457_v24 = vmax.f32 %v4403_v63, 0.0  ;;  %v4465_v41 = vmax.f32 %v10143_v0, 0.0  ;;  %v4466_v18 = vmax.f32 %v10154_v51, 0.0  ;;  %v4467_v47 = vmax.f32 %v10158_v16, 0.0 }
 0x815   : > { %5926 = vmatmul.mubr.msk.f32.gmra.mrb[162].mxu0 %vm1772_vm3, %v4439_v44  ;;  %v4451_v44 = vmax.f32 %v4397_v26, 0.0  ;;  %v4468_v9 = vmax.f32 %v10162_v4, 0.0  ;;  %v4470_v33 = vmax.f32 %v10171_v50, 0.0  ;;  %v4471_v0 = vmax.f32 %v10175_v13, 0.0 }
 0x816   : > { %5928 = vmatprep.mubr.msk.f32.mxu0 %vm1772_vm3, %v4440_v58  ;;  %v4452_v58 = vmax.f32 %v4398_v40, 0.0  ;;  %v4472_v51 = vmax.f32 %v10179_v55, 0.0  ;;  %v4473_v16 = vmax.f32 %v10183_v53, 0.0  ;;  %v4474_v4 = vmax.f32 %v10194_v37, 0.0  ;;  %v10330_v37 = vld [vmem:[#allocation19] ss:$0 sm:$0xff] }
 0x817   : > { %v4476_v50 = vmax.f32 %v10202_v43, 0.0  ;;  %v4477_v13 = vmax.f32 %v10206_v61, 0.0  ;;  %v4478_v55 = vmax.f32 %v10211_v29, 0.0  ;;  %v4479_v53 = vmax.f32 %v10215_v11, 0.0  ;;  %v6369_v29 = vld [vmem:[%s7203_s23 + $0x8] sm:$0xff] }
 0x819   : > { %5929 = vmatmul.mubr.msk.f32.gmra.mrb[164].mxu0 %vm1772_vm3, %v4441_v20  ;;  %v4453_v20 = vmax.f32 %v4399_v23, 0.0 }
 0x81a   : > { %5931 = vmatprep.mubr.msk.f32.mxu0 %vm1772_vm3, %v4442_v2  ;;  %v4454_v2 = vmax.f32 %v4400_v17, 0.0 }
 0x81d   : > { %5932 = vmatmul.mubr.msk.f32.gmra.mrb[166].mxu0 %vm1772_vm3, %v4443_v31  ;;  %v4456_v31 = vmax.f32 %v4402_v21, 0.0 }
 0x81e   : > { %5934 = vmatprep.mubr.msk.f32.mxu0 %vm1772_vm3, %v4444_v3  ;;  %v4458_v3 = vmax.f32 %v4404_v7, 0.0 }
 0x821   : > { %5935 = vmatmul.mubr.msk.f32.gmra.mrb[168].mxu0 %vm1772_vm3, %v4445_v30  ;;  %v4463_v30 = vmax.f32 %v10137_v8, 0.0  ;;  %v4469_v8 = vmax.f32 %v10166_v27, 0.0  ;;  %v4475_v27 = vmax.f32 %v10198_v60, 0.0 }
 0x822   : > { %5937 = vmatprep.mubr.msk.f32.mxu0 %vm1772_vm3, %v4446_v19  ;;  %v6370_v19 = vld [vmem:[%s7203_s23] sm:$0xff] }
 0x825   : > { %5938 = vmatmul.mubr.msk.f32.gmra.mrb[170].mxu0 %vm1772_vm3, %v4447_v42 }
 0x826   : > { %5940 = vmatprep.mubr.msk.f32.mxu0 %vm1772_vm3, %v4448_v15 }
 0x829   : > { %5941 = vmatmul.mubr.msk.f32.gmra.mrb[172].mxu0 %vm1772_vm3, %v4449_v56 }
 0x82a   : > { %5943 = vmatprep.mubr.msk.f32.mxu0 %vm1772_vm3, %v4450_v59  ;;  %v6373_v59 = vld [vmem:[%s7203_s23 + $0x28] sm:$0xff] }
 0x82d   : > { %5944 = vmatmul.mubr.msk.f32.gmra.mrb[174].mxu0 %vm1772_vm3, %v4451_v44 }
 0x82e   : > { %5946 = vmatprep.mubr.msk.f32.mxu0 %vm1772_vm3, %v4452_v58 }
 0x831   : > { %5947 = vmatmul.mubr.msk.f32.gmra.mrb[176].mxu0 %vm1772_vm3, %v4453_v20  ;;  %v6376_v20 = vld [vmem:[%s7203_s23 + $0x30] sm:$0xff] }
 0x832   : > { %5949 = vmatprep.mubr.msk.f32.mxu0 %vm1772_vm3, %v4454_v2 }
 0x835   : > { %5950 = vmatmul.mubr.msk.f32.gmra.mrb[178].mxu0 %vm1772_vm3, %v4455_v39  ;;  %v6377_v39 = vld [vmem:[%s7203_s23 + $0x48] sm:$0xff] }
 0x836   : > { %5952 = vmatprep.mubr.msk.f32.mxu0 %vm1772_vm3, %v4456_v31  ;;  %v6378_v31 = vld [vmem:[%s7203_s23 + $0x40] sm:$0xff] }
 0x839   : > { %5953 = vmatmul.mubr.msk.f32.gmra.mrb[180].mxu0 %vm1772_vm3, %v4457_v24 }
 0x83a   : > { %5955 = vmatprep.mubr.msk.f32.mxu0 %vm1772_vm3, %v4458_v3 }
 0x83d   : > { %5956 = vmatmul.mubr.msk.f32.gmra.mrb[182].mxu0 %vm1772_vm3, %v4459_v22 }
 0x83e   : > { %5958 = vmatprep.mubr.msk.f32.mxu0 %vm1772_vm3, %v4460_v25 }
 0x841   : > { %5959 = vmatmul.mubr.msk.f32.gmra.mrb[184].mxu0 %vm1772_vm3, %v4461_v38  ;;  %v6379_v38 = vld [vmem:[%s7203_s23 + $0x58] sm:$0xff] }
 0x842   : > { %5961 = vmatprep.mubr.msk.f32.mxu0 %vm1772_vm3, %v4462_v10 }
 0x845   : > { %5962 = vmatmul.mubr.msk.f32.gmra.mrb[186].mxu0 %vm1772_vm3, %v4463_v30  ;;  %v6380_v30 = vld [vmem:[%s7203_s23 + $0x50] sm:$0xff] }
 0x846   : > { %5964 = vmatprep.mubr.msk.f32.mxu0 %vm1772_vm3, %v4464_v14 }
 0x849   : > { %5965 = vmatmul.mubr.msk.f32.gmra.mrb[188].mxu0 %vm1772_vm3, %v4465_v41 }
 0x84a   : > { %5967 = vmatprep.mubr.msk.f32.mxu0 %vm1772_vm3, %v4466_v18 }
 0x84d   : > { %5968 = vmatmul.mubr.msk.f32.gmra.mrb[190].mxu0 %vm1772_vm3, %v4467_v47 }
 0x84e   : > { %5970 = vmatprep.mubr.msk.f32.mxu0 %vm1772_vm3, %v4468_v9 }
 0x851   : > { %5971 = vmatmul.mubr.msk.f32.gmra.mrb[192].mxu0 %vm1772_vm3, %v4469_v8  ;;  %v6381_v8 = vld [vmem:[%s7203_s23 + $0x68] sm:$0xff] }
 0x852   : > { %5973 = vmatprep.mubr.msk.f32.mxu0 %vm1772_vm3, %v4470_v33 }
 0x855   : > { %5974 = vmatmul.mubr.msk.f32.gmra.mrb[194].mxu0 %vm1772_vm3, %v4471_v0  ;;  %v6382_v0 = vld [vmem:[%s7203_s23 + $0x60] sm:$0xff] }
 0x856   : > { %5976 = vmatprep.mubr.msk.f32.mxu0 %vm1772_vm3, %v4472_v51 }
 0x859   : > { %5977 = vmatmul.mubr.msk.f32.gmra.mrb[196].mxu0 %vm1772_vm3, %v4473_v16 }
 0x85a   : > { %5979 = vmatprep.mubr.msk.f32.mxu0 %vm1772_vm3, %v4474_v4 }
 0x85d   : > { %5980 = vmatmul.mubr.msk.f32.gmra.mrb[198].mxu0 %vm1772_vm3, %v4475_v27 }
 0x85e   : > { %5982 = vmatprep.mubr.msk.f32.mxu0 %vm1772_vm3, %v4476_v50 }
 0x861   : > { %5983 = vmatmul.mubr.msk.f32.gmra.mrb[200].mxu0 %vm1772_vm3, %v4477_v13  ;;  %v6383_v13 = vld [vmem:[%s7203_s23 + $0x78] sm:$0xff] }
 0x862   : > { %5985 = vmatprep.mubr.msk.f32.mxu0 %vm1772_vm3, %v4478_v55 }
 0x865   : > { %5986 = vmatmul.mubr.msk.f32.gmra.mrb[202].mxu0 %vm1772_vm3, %v4479_v53  ;;  %v6384_v53 = vld [vmem:[%s7203_s23 + $0x70] sm:$0xff] }
 0x8d0   : > { %v5909_v60 = vpop.f32.mrb[150].mxu0 }
 0x8d1   : > { %v4729_v43 = vadd.f32 %v5909_v60, %v10330_v37  ;;  %v4723_v6 = vpop.f32.mrb[151].mxu0 }
 0x8d2   : > { %v4724_v61 = vadd.f32 %v10330_v37, %v4723_v6 }
 0x8d3   : > { %v4993_v11 = vadd.f32 %v6369_v29, %v4729_v43 }
 0x8d4   : > { %v4992_v35 = vadd.f32 %v6370_v19, %v4724_v61  ;;  %v5912_v46 = vpop.f32.mrb[152].mxu0 }
 0x8d5   : > { %5047 = vst.msk [vmem:[%s10338_s24 + $0x8] sm:$0xff] %vm677_vm0, %v4993_v11  ;;  %v4739_v42 = vadd.f32 %v5912_v46, %v10330_v37  ;;  %v4733_v28 = vpop.f32.mrb[153].mxu0  ;;  %v6385_v11 = vld [vmem:[%s7203_s23 + $0x88] sm:$0xff] }
 0x8d6   : > { %5046 = vst.msk [vmem:[%s10338_s24] sm:$0xff] %vm677_vm0, %v4992_v35  ;;  %v4734_v52 = vadd.f32 %v10330_v37, %v4733_v28  ;;  %v6386_v35 = vld [vmem:[%s7203_s23 + $0x80] sm:$0xff] }
 0x8d7   : > { %v4995_v15 = vadd.f32 %v6371_v5, %v4739_v42 }
 0x8d8   : > { %v4994_v36 = vadd.f32 %v6372_v49, %v4734_v52  ;;  %v5915_v62 = vpop.f32.mrb[154].mxu0 }
 0x8d9   : > { %5049 = vst.msk [vmem:[%s10338_s24 + $0x18] sm:$0xff] %vm677_vm0, %v4995_v15  ;;  %v4749_v56 = vadd.f32 %v5915_v62, %v10330_v37  ;;  %v4743_v26 = vpop.f32.mrb[155].mxu0  ;;  %v6387_v15 = vld [vmem:[%s7203_s23 + $0x98] sm:$0xff] }
 0x8da   : > { %5048 = vst.msk [vmem:[%s10338_s24 + $0x10] sm:$0xff] %vm677_vm0, %v4994_v36  ;;  %v4744_v34 = vadd.f32 %v10330_v37, %v4743_v26  ;;  %v6388_v36 = vld [vmem:[%s7203_s23 + $0x90] sm:$0xff] }
 0x8db   : > { %v4997_v40 = vadd.f32 %v6373_v59, %v4749_v56 }
 0x8dc   : > { %v4996_v44 = vadd.f32 %v6374_v45, %v4744_v34  ;;  %v5918_v23 = vpop.f32.mrb[156].mxu0 }
 0x8dd   : > { %5051 = vst.msk [vmem:[%s10338_s24 + $0x28] sm:$0xff] %vm677_vm0, %v4997_v40  ;;  %v4759_v57 = vadd.f32 %v5918_v23, %v10330_v37  ;;  %v4753_v58 = vpop.f32.mrb[157].mxu0  ;;  %v6389_v40 = vld [vmem:[%s7203_s23 + $0xa8] sm:$0xff] }
 0x8de   : > { %5050 = vst.msk [vmem:[%s10338_s24 + $0x20] sm:$0xff] %vm677_vm0, %v4996_v44  ;;  %v4754_v17 = vadd.f32 %v10330_v37, %v4753_v58  ;;  %v6390_v44 = vld [vmem:[%s7203_s23 + $0xa0] sm:$0xff] }
 0x8df   : > { %v4999_v48 = vadd.f32 %v6375_v12, %v4759_v57 }
 0x8e0   : > { %v4998_v32 = vadd.f32 %v6376_v20, %v4754_v17  ;;  %v5921_v1 = vpop.f32.mrb[158].mxu0 }
 0x8e1   : > { %5053 = vst.msk [vmem:[%s10338_s24 + $0x38] sm:$0xff] %vm677_vm0, %v4999_v48  ;;  %v4769_v54 = vadd.f32 %v5921_v1, %v10330_v37  ;;  %v4763_v2 = vpop.f32.mrb[159].mxu0  ;;  %v6391_v48 = vld [vmem:[%s7203_s23 + $0xb8] sm:$0xff] }
 0x8e2   : > { %5052 = vst.msk [vmem:[%s10338_s24 + $0x30] sm:$0xff] %vm677_vm0, %v4998_v32  ;;  %v4764_v21 = vadd.f32 %v10330_v37, %v4763_v2  ;;  %v6392_v32 = vld [vmem:[%s7203_s23 + $0xb0] sm:$0xff] }
 0x8e3   : > { %v5001_v63 = vadd.f32 %v6377_v39, %v4769_v54 }
 0x8e4   : > { %v5000_v7 = vadd.f32 %v6378_v31, %v4764_v21  ;;  %v5924_v24 = vpop.f32.mrb[160].mxu0 }
 0x8e5   : > { %5055 = vst.msk [vmem:[%s10338_s24 + $0x48] sm:$0xff] %vm677_vm0, %v5001_v63  ;;  %v4779_v3 = vadd.f32 %v5924_v24, %v10330_v37  ;;  %v4773_v22 = vpop.f32.mrb[161].mxu0  ;;  %v6393_v63 = vld [vmem:[%s7203_s23 + $0xc8] sm:$0xff] }
 0x8e6   : > { %5054 = vst.msk [vmem:[%s10338_s24 + $0x40] sm:$0xff] %vm677_vm0, %v5000_v7  ;;  %v4774_v25 = vadd.f32 %v10330_v37, %v4773_v22  ;;  %v6394_v7 = vld [vmem:[%s7203_s23 + $0xc0] sm:$0xff] }
 0x8e7   : > { %v5003_v10 = vadd.f32 %v6379_v38, %v4779_v3 }
 0x8e8   : > { %v5002_v14 = vadd.f32 %v6380_v30, %v4774_v25  ;;  %v5927_v41 = vpop.f32.mrb[162].mxu0 }
 0x8e9   : > { %5057 = vst.msk [vmem:[%s10338_s24 + $0x58] sm:$0xff] %vm677_vm0, %v5003_v10  ;;  %v4789_v18 = vadd.f32 %v5927_v41, %v10330_v37  ;;  %v4783_v47 = vpop.f32.mrb[163].mxu0  ;;  %v6395_v10 = vld [vmem:[%s7203_s23 + $0xd8] sm:$0xff] }
 0x8ea   : > { %5056 = vst.msk [vmem:[%s10338_s24 + $0x50] sm:$0xff] %vm677_vm0, %v5002_v14  ;;  %v4784_v9 = vadd.f32 %v10330_v37, %v4783_v47  ;;  %v6396_v14 = vld [vmem:[%s7203_s23 + $0xd0] sm:$0xff] }
 0x8eb   : > { %v5005_v33 = vadd.f32 %v6381_v8, %v4789_v18 }
 0x8ec   : > { %v5004_v51 = vadd.f32 %v6382_v0, %v4784_v9  ;;  %v5930_v16 = vpop.f32.mrb[164].mxu0 }
 0x8ed   : > { %5059 = vst.msk [vmem:[%s10338_s24 + $0x68] sm:$0xff] %vm677_vm0, %v5005_v33  ;;  %v4799_v4 = vadd.f32 %v5930_v16, %v10330_v37  ;;  %v4793_v27 = vpop.f32.mrb[165].mxu0  ;;  %v6397_v33 = vld [vmem:[%s7203_s23 + $0xe8] sm:$0xff] }
 0x8ee   : > { %5058 = vst.msk [vmem:[%s10338_s24 + $0x60] sm:$0xff] %vm677_vm0, %v5004_v51  ;;  %v4794_v50 = vadd.f32 %v10330_v37, %v4793_v27  ;;  %v6398_v51 = vld [vmem:[%s7203_s23 + $0xe0] sm:$0xff] }
 0x8ef   : > { %v5007_v55 = vadd.f32 %v6383_v13, %v4799_v4 }
 0x8f0   : > { %v5006_v60 = vadd.f32 %v6384_v53, %v4794_v50  ;;  %v5933_v43 = vpop.f32.mrb[166].mxu0 }
 0x8f1   : > { %5061 = vst.msk [vmem:[%s10338_s24 + $0x78] sm:$0xff] %vm677_vm0, %v5007_v55  ;;  %v4809_v6 = vadd.f32 %v5933_v43, %v10330_v37  ;;  %v4803_v61 = vpop.f32.mrb[167].mxu0  ;;  %v6399_v55 = vld [vmem:[%s7203_s23 + $0xf8] sm:$0xff] }
 0x8f2   : > { %5060 = vst.msk [vmem:[%s10338_s24 + $0x70] sm:$0xff] %vm677_vm0, %v5006_v60  ;;  %v4804_v29 = vadd.f32 %v10330_v37, %v4803_v61  ;;  %v6400_v60 = vld [vmem:[%s7203_s23 + $0xf0] sm:$0xff] }
 0x8f3   : > { %v5009_v19 = vadd.f32 %v6385_v11, %v4809_v6 }
 0x8f4   : > { %v5008_v46 = vadd.f32 %v6386_v35, %v4804_v29  ;;  %v5936_v42 = vpop.f32.mrb[168].mxu0 }
 0x8f5   : > { %5063 = vst.msk [vmem:[%s10338_s24 + $0x88] sm:$0xff] %vm677_vm0, %v5009_v19  ;;  %v4819_v28 = vadd.f32 %v5936_v42, %v10330_v37  ;;  %v4813_v52 = vpop.f32.mrb[169].mxu0  ;;  %v6401_v19 = vld [vmem:[%s7203_s23 + $0x108] sm:$0xff] }
 0x8f6   : > { %5062 = vst.msk [vmem:[%s10338_s24 + $0x80] sm:$0xff] %vm677_vm0, %v5008_v46  ;;  %v4814_v5 = vadd.f32 %v10330_v37, %v4813_v52  ;;  %v6402_v46 = vld [vmem:[%s7203_s23 + $0x100] sm:$0xff] }
 0x8f7   : > { %v5011_v49 = vadd.f32 %v6387_v15, %v4819_v28 }
 0x8f8   : > { %v5010_v62 = vadd.f32 %v6388_v36, %v4814_v5  ;;  %v5939_v56 = vpop.f32.mrb[170].mxu0 }
 0x8f9   : > { %5065 = vst.msk [vmem:[%s10338_s24 + $0x98] sm:$0xff] %vm677_vm0, %v5011_v49  ;;  %v4829_v26 = vadd.f32 %v5939_v56, %v10330_v37  ;;  %v4823_v34 = vpop.f32.mrb[171].mxu0  ;;  %v6403_v49 = vld [vmem:[%s7203_s23 + $0x118] sm:$0xff] }
 0x8fa   : > { %5064 = vst.msk [vmem:[%s10338_s24 + $0x90] sm:$0xff] %vm677_vm0, %v5010_v62  ;;  %v4824_v59 = vadd.f32 %v10330_v37, %v4823_v34  ;;  %v6404_v62 = vld [vmem:[%s7203_s23 + $0x110] sm:$0xff] }
 0x8fb   : > { %v5013_v45 = vadd.f32 %v6389_v40, %v4829_v26 }
 0x8fc   : > { %v5012_v23 = vadd.f32 %v6390_v44, %v4824_v59  ;;  %v5942_v57 = vpop.f32.mrb[172].mxu0 }
 0x8fd   : > { %5067 = vst.msk [vmem:[%s10338_s24 + $0xa8] sm:$0xff] %vm677_vm0, %v5013_v45  ;;  %v4839_v58 = vadd.f32 %v5942_v57, %v10330_v37  ;;  %v4833_v17 = vpop.f32.mrb[173].mxu0  ;;  %v6405_v45 = vld [vmem:[%s7203_s23 + $0x128] sm:$0xff] }
 0x8fe   : > { %5066 = vst.msk [vmem:[%s10338_s24 + $0xa0] sm:$0xff] %vm677_vm0, %v5012_v23  ;;  %v4834_v12 = vadd.f32 %v10330_v37, %v4833_v17  ;;  %v6406_v23 = vld [vmem:[%s7203_s23 + $0x120] sm:$0xff] }
 0x8ff   : > { %v5015_v20 = vadd.f32 %v6391_v48, %v4839_v58 }
 0x900   : > { %v5014_v1 = vadd.f32 %v6392_v32, %v4834_v12  ;;  %v5945_v54 = vpop.f32.mrb[174].mxu0 }
 0x901   : > { %5069 = vst.msk [vmem:[%s10338_s24 + $0xb8] sm:$0xff] %vm677_vm0, %v5015_v20  ;;  %v4849_v2 = vadd.f32 %v5945_v54, %v10330_v37  ;;  %v4843_v21 = vpop.f32.mrb[175].mxu0  ;;  %v6407_v20 = vld [vmem:[%s7203_s23 + $0x138] sm:$0xff] }
 0x902   : > { %5068 = vst.msk [vmem:[%s10338_s24 + $0xb0] sm:$0xff] %vm677_vm0, %v5014_v1  ;;  %v4844_v39 = vadd.f32 %v10330_v37, %v4843_v21  ;;  %v6408_v1 = vld [vmem:[%s7203_s23 + $0x130] sm:$0xff] }
 0x903   : > { %v5017_v31 = vadd.f32 %v6393_v63, %v4849_v2 }
 0x904   : > { %v5016_v24 = vadd.f32 %v6394_v7, %v4844_v39  ;;  %v5948_v3 = vpop.f32.mrb[176].mxu0 }
 0x905   : > { %5071 = vst.msk [vmem:[%s10338_s24 + $0xc8] sm:$0xff] %vm677_vm0, %v5017_v31  ;;  %v4859_v22 = vadd.f32 %v5948_v3, %v10330_v37  ;;  %v4853_v25 = vpop.f32.mrb[177].mxu0  ;;  %v6409_v31 = vld [vmem:[%s7203_s23 + $0x148] sm:$0xff] }
 0x906   : > { %5070 = vst.msk [vmem:[%s10338_s24 + $0xc0] sm:$0xff] %vm677_vm0, %v5016_v24  ;;  %v4854_v38 = vadd.f32 %v10330_v37, %v4853_v25  ;;  %v6410_v24 = vld [vmem:[%s7203_s23 + $0x140] sm:$0xff] }
 0x907   : > { %v5019_v30 = vadd.f32 %v6395_v10, %v4859_v22 }
 0x908   : > { %v5018_v41 = vadd.f32 %v6396_v14, %v4854_v38  ;;  %v5951_v18 = vpop.f32.mrb[178].mxu0 }
 0x909   : > { %5073 = vst.msk [vmem:[%s10338_s24 + $0xd8] sm:$0xff] %vm677_vm0, %v5019_v30  ;;  %v4869_v47 = vadd.f32 %v5951_v18, %v10330_v37  ;;  %v4863_v9 = vpop.f32.mrb[179].mxu0  ;;  %v6411_v30 = vld [vmem:[%s7203_s23 + $0x158] sm:$0xff] }
 0x90a   : > { %5072 = vst.msk [vmem:[%s10338_s24 + $0xd0] sm:$0xff] %vm677_vm0, %v5018_v41  ;;  %v4864_v8 = vadd.f32 %v10330_v37, %v4863_v9  ;;  %v6412_v41 = vld [vmem:[%s7203_s23 + $0x150] sm:$0xff] }
 0x90b   : > { %v5021_v0 = vadd.f32 %v6397_v33, %v4869_v47 }
 0x90c   : > { %v5020_v16 = vadd.f32 %v6398_v51, %v4864_v8  ;;  %v5954_v4 = vpop.f32.mrb[180].mxu0 }
 0x90d   : > { %5075 = vst.msk [vmem:[%s10338_s24 + $0xe8] sm:$0xff] %vm677_vm0, %v5021_v0  ;;  %v4879_v27 = vadd.f32 %v5954_v4, %v10330_v37  ;;  %v4873_v50 = vpop.f32.mrb[181].mxu0  ;;  %v6413_v0 = vld [vmem:[%s7203_s23 + $0x168] sm:$0xff] }
 0x90e   : > { %5074 = vst.msk [vmem:[%s10338_s24 + $0xe0] sm:$0xff] %vm677_vm0, %v5020_v16  ;;  %v4874_v13 = vadd.f32 %v10330_v37, %v4873_v50  ;;  %v6414_v16 = vld [vmem:[%s7203_s23 + $0x160] sm:$0xff] }
 0x90f   : > { %v5023_v53 = vadd.f32 %v6399_v55, %v4879_v27 }
 0x910   : > { %v5022_v43 = vadd.f32 %v6400_v60, %v4874_v13  ;;  %v5957_v6 = vpop.f32.mrb[182].mxu0 }
 0x911   : > { %5077 = vst.msk [vmem:[%s10338_s24 + $0xf8] sm:$0xff] %vm677_vm0, %v5023_v53  ;;  %v4889_v61 = vadd.f32 %v5957_v6, %v10330_v37  ;;  %v4883_v29 = vpop.f32.mrb[183].mxu0  ;;  %v6415_v53 = vld [vmem:[%s7203_s23 + $0x178] sm:$0xff] }
 0x912   : > { %5076 = vst.msk [vmem:[%s10338_s24 + $0xf0] sm:$0xff] %vm677_vm0, %v5022_v43  ;;  %v4884_v11 = vadd.f32 %v10330_v37, %v4883_v29  ;;  %v6416_v43 = vld [vmem:[%s7203_s23 + $0x170] sm:$0xff] }
 0x913   : > { %v5025_v35 = vadd.f32 %v6401_v19, %v4889_v61 }
 0x914   : > { %v5024_v42 = vadd.f32 %v6402_v46, %v4884_v11  ;;  %v5960_v28 = vpop.f32.mrb[184].mxu0 }
 0x915   : > { %5079 = vst.msk [vmem:[%s10338_s24 + $0x108] sm:$0xff] %vm677_vm0, %v5025_v35  ;;  %v4899_v52 = vadd.f32 %v5960_v28, %v10330_v37  ;;  %v4893_v5 = vpop.f32.mrb[185].mxu0  ;;  %v6417_v35 = vld [vmem:[%s7203_s23 + $0x188] sm:$0xff] }
 0x916   : > { %5078 = vst.msk [vmem:[%s10338_s24 + $0x100] sm:$0xff] %vm677_vm0, %v5024_v42  ;;  %v4894_v15 = vadd.f32 %v10330_v37, %v4893_v5  ;;  %v6418_v42 = vld [vmem:[%s7203_s23 + $0x180] sm:$0xff] }
 0x917   : > { %v5027_v36 = vadd.f32 %v6403_v49, %v4899_v52 }
 0x918   : > { %v5026_v56 = vadd.f32 %v6404_v62, %v4894_v15  ;;  %v5963_v26 = vpop.f32.mrb[186].mxu0 }
 0x919   : > { %5081 = vst.msk [vmem:[%s10338_s24 + $0x118] sm:$0xff] %vm677_vm0, %v5027_v36  ;;  %v4909_v34 = vadd.f32 %v5963_v26, %v10330_v37  ;;  %v4903_v59 = vpop.f32.mrb[187].mxu0  ;;  %v6419_v36 = vld [vmem:[%s7203_s23 + $0x198] sm:$0xff] }
 0x91a   : > { %5080 = vst.msk [vmem:[%s10338_s24 + $0x110] sm:$0xff] %vm677_vm0, %v5026_v56  ;;  %v4904_v40 = vadd.f32 %v10330_v37, %v4903_v59  ;;  %v6420_v56 = vld [vmem:[%s7203_s23 + $0x190] sm:$0xff] }
 0x91b   : > { %v5029_v44 = vadd.f32 %v6405_v45, %v4909_v34 }
 0x91c   : > { %v5028_v57 = vadd.f32 %v6406_v23, %v4904_v40  ;;  %v5966_v58 = vpop.f32.mrb[188].mxu0 }
 0x91d   : > { %5083 = vst.msk [vmem:[%s10338_s24 + $0x128] sm:$0xff] %vm677_vm0, %v5029_v44  ;;  %v4919_v17 = vadd.f32 %v5966_v58, %v10330_v37  ;;  %v4913_v12 = vpop.f32.mrb[189].mxu0  ;;  %v6421_v44 = vld [vmem:[%s7203_s23 + $0x1a8] sm:$0x7f] }
 0x91e   : > { %5082 = vst.msk [vmem:[%s10338_s24 + $0x120] sm:$0xff] %vm677_vm0, %v5028_v57  ;;  %v4914_v48 = vadd.f32 %v10330_v37, %v4913_v12  ;;  %v6422_v57 = vld [vmem:[%s7203_s23 + $0x1a0] sm:$0xff] }
 0x91f   : > { %v5031_v32 = vadd.f32 %v6407_v20, %v4919_v17 }
 0x920   : > { %v5030_v54 = vadd.f32 %v6408_v1, %v4914_v48  ;;  %v5969_v2 = vpop.f32.mrb[190].mxu0 }
 0x921   : > { %5085 = vst.msk [vmem:[%s10338_s24 + $0x138] sm:$0xff] %vm677_vm0, %v5031_v32  ;;  %v4929_v21 = vadd.f32 %v5969_v2, %v10330_v37  ;;  %v4923_v39 = vpop.f32.mrb[191].mxu0 }
 0x922   : > { %5084 = vst.msk [vmem:[%s10338_s24 + $0x130] sm:$0xff] %vm677_vm0, %v5030_v54  ;;  %v4924_v63 = vadd.f32 %v10330_v37, %v4923_v39 }
 0x923   : > { %v5033_v7 = vadd.f32 %v6409_v31, %v4929_v21 }
 0x924   : > { %v5032_v3 = vadd.f32 %v6410_v24, %v4924_v63  ;;  %v5972_v22 = vpop.f32.mrb[192].mxu0 }
 0x925   : > { %5087 = vst.msk [vmem:[%s10338_s24 + $0x148] sm:$0xff] %vm677_vm0, %v5033_v7  ;;  %v4939_v25 = vadd.f32 %v5972_v22, %v10330_v37  ;;  %v4933_v38 = vpop.f32.mrb[193].mxu0 }
 0x926   : > { %5086 = vst.msk [vmem:[%s10338_s24 + $0x140] sm:$0xff] %vm677_vm0, %v5032_v3  ;;  %v4934_v10 = vadd.f32 %v10330_v37, %v4933_v38 }
 0x927   : > { %v5035_v14 = vadd.f32 %v6411_v30, %v4939_v25 }
 0x928   : > { %v5034_v18 = vadd.f32 %v6412_v41, %v4934_v10  ;;  %v5975_v47 = vpop.f32.mrb[194].mxu0 }
 0x929   : > { %5089 = vst.msk [vmem:[%s10338_s24 + $0x158] sm:$0xff] %vm677_vm0, %v5035_v14  ;;  %v4949_v9 = vadd.f32 %v5975_v47, %v10330_v37  ;;  %v4943_v8 = vpop.f32.mrb[195].mxu0 }
 0x92a   : > { %5088 = vst.msk [vmem:[%s10338_s24 + $0x150] sm:$0xff] %vm677_vm0, %v5034_v18  ;;  %v4944_v33 = vadd.f32 %v10330_v37, %v4943_v8 }
 0x92b   : > { %v5037_v51 = vadd.f32 %v6413_v0, %v4949_v9 }
 0x92c   : > { %v5036_v4 = vadd.f32 %v6414_v16, %v4944_v33  ;;  %v5978_v27 = vpop.f32.mrb[196].mxu0 }
 0x92d   : > { %5091 = vst.msk [vmem:[%s10338_s24 + $0x168] sm:$0xff] %vm677_vm0, %v5037_v51  ;;  %v4959_v50 = vadd.f32 %v5978_v27, %v10330_v37  ;;  %v4953_v13 = vpop.f32.mrb[197].mxu0 }
 0x92e   : > { %5090 = vst.msk [vmem:[%s10338_s24 + $0x160] sm:$0xff] %vm677_vm0, %v5036_v4  ;;  %v4954_v55 = vadd.f32 %v10330_v37, %v4953_v13 }
 0x92f   : > { %v5039_v60 = vadd.f32 %v6415_v53, %v4959_v50 }
 0x930   : > { %v5038_v6 = vadd.f32 %v6416_v43, %v4954_v55  ;;  %v5981_v61 = vpop.f32.mrb[198].mxu0 }
 0x931   : > { %5093 = vst.msk [vmem:[%s10338_s24 + $0x178] sm:$0xff] %vm677_vm0, %v5039_v60  ;;  %v4969_v29 = vadd.f32 %v5981_v61, %v10330_v37  ;;  %v4963_v11 = vpop.f32.mrb[199].mxu0 }
 0x932   : > { %5092 = vst.msk [vmem:[%s10338_s24 + $0x170] sm:$0xff] %vm677_vm0, %v5038_v6  ;;  %v4964_v19 = vadd.f32 %v10330_v37, %v4963_v11 }
 0x933   : > { %v5041_v46 = vadd.f32 %v6417_v35, %v4969_v29 }
 0x934   : > { %v5040_v28 = vadd.f32 %v6418_v42, %v4964_v19  ;;  %v5984_v52 = vpop.f32.mrb[200].mxu0 }
 0x935   : > { %5095 = vst.msk [vmem:[%s10338_s24 + $0x188] sm:$0xff] %vm677_vm0, %v5041_v46  ;;  %v4979_v5 = vadd.f32 %v5984_v52, %v10330_v37  ;;  %v4973_v15 = vpop.f32.mrb[201].mxu0 }
 0x936   : > { %5094 = vst.msk [vmem:[%s10338_s24 + $0x180] sm:$0xff] %vm677_vm0, %v5040_v28  ;;  %v4974_v49 = vadd.f32 %v10330_v37, %v4973_v15 }
 0x937   : > { %v5043_v62 = vadd.f32 %v6419_v36, %v4979_v5 }
 0x938   : > { %v5042_v26 = vadd.f32 %v6420_v56, %v4974_v49  ;;  %v5987_v34 = vpop.f32.mrb[202].mxu0 }
 0x939   : > { %5097 = vst.msk [vmem:[%s10338_s24 + $0x198] sm:$0xff] %vm677_vm0, %v5043_v62  ;;  %v4989_v59 = vadd.f32 %v5987_v34, %v10330_v37  ;;  %v4983_v40 = vpop.f32.mrb[203].mxu0 }
 0x93a   : > { %5096 = vst.msk [vmem:[%s10338_s24 + $0x190] sm:$0xff] %vm677_vm0, %v5042_v26  ;;  %v4984_v45 = vadd.f32 %v10330_v37, %v4983_v40 }
 0x93b   : > { %v5045_v23 = vadd.f32 %v6421_v44, %v4989_v59 }
 0x93c   : > { %v5044_v58 = vadd.f32 %v6422_v57, %v4984_v45 }
 0x93d   : > { %5099 = vst.msk [vmem:[%s10338_s24 + $0x1a8] sm:$0x7f] %vm783_vm1, %v5045_v23 }
 0x93e   : > { %5098 = vst.msk [vmem:[%s10338_s24 + $0x1a0] sm:$0xff] %vm677_vm0, %v5044_v58 }
 0x93f PF: > { %s10824_s16 = sld [smem:[#allocation28_spill]] }
 0x945   : > { %s31_s29 = sadd.s32 1, %s10824_s16  }
 0x946   : > { %p28_p7 = scmp.ge.s32.totalorder %s31_s29, 4  }
 0x948   :  { %30 = sbr.rel (!%p28_p7) target bundleno = 12 (0xc), region = 155 }
 0x94f   :  { %5121 = vsyncpa [#allocation3], 1 }
 0x950   :  { %5123 = vsyncpa [#allocation3 + $0x1], 1 }
 0x951   :  { %5124 = vsyncpa [#allocation5], 1 }
 0x952   :  { %5125 = vsyncpa [#allocation8], 1 }
 0x953   :  { %5126 = vsyncpa [#allocation11], 1 }
 0x954   :  { %5127 = vsyncpa [#allocation14], 1 }
 0x955   :  { %5128 = vsyncpa [#allocation17], 1 }
 0x956   :  { %5129 = vsyncpa [#allocation20], 1 }

</bundles_post_ra>
